<compile_context>
chip_gen: v5e
topology: v5e:2x2
jax: 0.10.0
libtpu: 0.0.40
codegen_flags: <defaults>
</compile_context>

<pallas_src>
import functools
import math

import jax
import jax.numpy as jnp
import numpy as np
from jax import lax
from jax.experimental import pallas as pl
from jax.experimental.pallas import tpu as pltpu


def _conv_kernel(x_ref, w_ref, b_ref, o_ref, slab_ref, *, KH, KW, stride, TR,
                 Wo, Cin, K, apply_relu):
    # x_ref:    (Hp, Wp, Cin)     bf16  whole padded NHWC image of batch b
    # w_ref:    (Cout_s, K_pad)   bf16  folded conv weights, k = (kh, kw, ci)
    # b_ref:    (Cout_s, 1)       f32   bias
    # o_ref:    (Cout_s, TR*Wo)   channel-major (NCHW-flat) output row tile
    # slab_ref: (TR*Wo, K_pad)    bf16  VMEM scratch: in-kernel im2col slab
    rt = pl.program_id(1)
    row0 = rt * (TR * stride)          # first input row of this output tile
    K_pad = slab_ref.shape[-1]

    # Keep the K-padding columns of the slab zero.  Done every grid step: the
    # scratch is per-core (megacore) and uninitialised VMEM may hold NaN bit
    # patterns that would not be masked by the zero weight rows.
    if K_pad > K:
        slab_ref[:, K:] = jnp.zeros((slab_ref.shape[0], K_pad - K),
                                    slab_ref.dtype)

    # In-kernel im2col: one shifted (TR*Wo, Cin) patch per (kh, kw) tap,
    # written into its K slot of the slab.  Never materialized in HBM.
    for kh in range(KH):
        for kw in range(KW):
            if stride == 1:
                rows = pl.ds(row0 + kh, TR)
                cols = pl.ds(kw, Wo)
            else:
                rows = pl.ds(row0 + kh, TR, stride=stride)
                cols = pl.ds(kw, Wo, stride=stride)
            patch = x_ref[rows, cols, :]                    # (TR, Wo, Cin)
            j = (kh * KW + kw) * Cin
            slab_ref[:, j:j + Cin] = patch.reshape(TR * Wo, Cin)

    # One lane-dense MXU matmul.  Contracting on K of both operands emits the
    # result directly channel-major (Cout_s sublanes x TR*Wo lanes), so the
    # store below is a full-lane, unmasked vst with no reshape / relayout.
    acc = lax.dot_general(w_ref[...], slab_ref[...],
                          dimension_numbers=(((1,), (1,)), ((), ())),
                          preferred_element_type=jnp.float32)  # (Cout_s, TR*Wo)
    acc = acc + b_ref[...]                                     # f32 bias
    if apply_relu:
        acc = jnp.maximum(acc, 0.0)
    o_ref[...] = acc.astype(o_ref.dtype)


def _round_up(x, m):
    return -(-x // m) * m


def layer_conv_forward(x_nchw, weight_hwio, bias, *, stride, padding, relu,
                       target_rows=1024):
    """Forward of LayerConv: y = ReLU?(Conv2d(x; W, b, stride, padding))."""
    B, Cin, H, W = x_nchw.shape
    KH, KW, Cin_w, Cout = weight_hwio.shape
    assert Cin == Cin_w
    Ho = (H + 2 * padding - KH) // stride + 1
    Wo = (W + 2 * padding - KW) // stride + 1

    LANES, SUBLANES = 128, 8

    # Row tile: ~target_rows flattened output rows per grid step, constrained
    # so TR*Wo (the lane-dense width of the output tile) is a multiple of 128.
    row_align = LANES // math.gcd(Wo, LANES)
    tr = max(1, target_rows // max(Wo, 1))
    TR = max(row_align, (tr // row_align) * row_align)
    TR = min(TR, _round_up(Ho, row_align))
    n_rt = -(-Ho // TR)
    Ho_pad = n_rt * TR

    # Folded contraction size (lane-dense) and sublane-aligned output channels.
    K = KH * KW * Cin
    K_pad = _round_up(K, LANES)
    Cout_s = _round_up(Cout, SUBLANES)
    # TODO(synk): on v6e/v7x with K_pad/Cout_s beyond 128, bump tiling to 256
    # multiples to fill the 2x256^2 MXU (keep 128 granularity on v5e).

    # NCHW -> NHWC bf16, spatial zero-pad (+ extra bottom rows so the last,
    # possibly padded, row tile never reads out of bounds).
    x = jnp.transpose(x_nchw, (0, 2, 3, 1)).astype(jnp.bfloat16)
    Hp_needed = (Ho_pad - 1) * stride + KH
    pad_bottom = padding + max(0, Hp_needed - (H + 2 * padding))
    x = jnp.pad(x, ((0, 0), (padding, pad_bottom), (padding, padding), (0, 0)))
    Hp, Wp = x.shape[1], x.shape[2]

    # Weights folded once to (Cout_s, K_pad), k = kh*KW*Cin + kw*Cin + ci
    # (matches the slab layout built in the kernel); bias (Cout_s, 1) in f32.
    w2 = jnp.transpose(weight_hwio, (3, 0, 1, 2)).reshape(Cout, K)
    w2 = jnp.pad(w2, ((0, Cout_s - Cout), (0, K_pad - K))).astype(jnp.bfloat16)
    b2 = jnp.pad(bias, (0, Cout_s - Cout)).astype(jnp.float32)
    b2 = b2.reshape(Cout_s, 1)

    try:
        phys_vmem = int(pltpu.get_tpu_info().vmem_capacity_bytes)
    except Exception:                       # pragma: no cover - conservative
        phys_vmem = 64 * 1024 * 1024        # v7x per-core fallback

    kernel = functools.partial(_conv_kernel, KH=KH, KW=KW, stride=stride,
                               TR=TR, Wo=Wo, Cin=Cin, K=K, apply_relu=relu)
    out_shape = jax.ShapeDtypeStruct((B, Cout_s, Ho_pad * Wo), x_nchw.dtype)

    def build(single_buffer_params):
        # Actual buffered VMEM footprint + ~25% headroom, capped at 85% of
        # this generation's per-core VMEM (no artificial 64 MiB ceiling).
        nbuf = 1 if single_buffer_params else 2
        needed = (2 * Hp * Wp * Cin * 2          # input image, double-buffered
                  + nbuf * Cout_s * K_pad * 2    # folded weights
                  + nbuf * Cout_s * 4            # bias
                  + 2 * Cout_s * TR * Wo * 4     # output tile, double-buffered
                  + TR * Wo * K_pad * 2          # im2col slab scratch
                  + Cout_s * TR * Wo * 4)        # f32 accumulator slack
        vmem_limit = int(min(max(needed * 1.25 + (2 << 20), 32 << 20),
                             0.85 * phys_vmem))

        pm = (dict(pipeline_mode=pl.Buffered(buffer_count=1))
              if single_buffer_params else {})
        return pl.pallas_call(
            kernel,
            out_shape=out_shape,
            grid_spec=pltpu.PrefetchScalarGridSpec(
                num_scalar_prefetch=0,
                grid=(B, n_rt),
                in_specs=[
                    # Whole padded image of batch b (re-DMA'd only when b
                    # changes).
                    # TODO(synk): for large H*W*Cin replace with a manually
                    # double-buffered halo row-slab pipeline
                    # (memory_space=pl.ANY + pltpu.make_async_copy) so the
                    # per-core footprint stays O(TR) on v7x's 64 MiB VMEM.
                    pl.BlockSpec((None, Hp, Wp, Cin),
                                 lambda b, r: (b, 0, 0, 0)),
                    # Resident conv weights / bias (constant index_map).
                    pl.BlockSpec((Cout_s, K_pad), lambda b, r: (0, 0), **pm),
                    pl.BlockSpec((Cout_s, 1), lambda b, r: (0, 0), **pm),
                ],
                out_specs=pl.BlockSpec((None, Cout_s, TR * Wo),
                                       lambda b, r: (b, 0, r)),
                scratch_shapes=[pltpu.VMEM((TR * Wo, K_pad), jnp.bfloat16)],
            ),
            compiler_params=pltpu.CompilerParams(
                dimension_semantics=("parallel", "parallel"),
                vmem_limit_bytes=vmem_limit),
        )

    def run(single_buffer_params):
        return jax.block_until_ready(build(single_buffer_params)(x, w2, b2))

    try:
        out = run(True)
    except Exception:
        # Older JAX may reject pipeline_mode=pl.Buffered(1); retry with the
        # default double-buffered params (identical semantics, bit more VMEM).
        out = run(False)

    # NCHW-flat output: just reshape + slice off row / channel padding.
    out = out.reshape(B, Cout_s, Ho_pad, Wo)
    return out[:, :Cout, :Ho, :]


if __name__ == "__main__":
    # LayerConv(in_planes=4, out_planes=8, kernel_size=3, stride=1, padding=1,
    #           relu=True) on x of shape (2, 4, 16, 16).
    B, Cin, H, W = 2, 4, 16, 16
    Cout, KH, KW = 8, 3, 3
    stride, padding, relu = 1, 1, True

    key = jax.random.PRNGKey(0)
    kx, kw, kb = jax.random.split(key, 3)
    x = jax.random.normal(kx, (B, Cin, H, W), dtype=jnp.float32)
    weight = 0.1 * jax.random.normal(kw, (KH, KW, Cin, Cout), dtype=jnp.float32)
    bias = 0.05 * jax.random.normal(kb, (Cout,), dtype=jnp.float32)

    y = layer_conv_forward(x, weight, bias, stride=stride, padding=padding,
                           relu=relu)
    y = jax.block_until_ready(y)

    # Pure-JAX reference (same NHWC/HWIO conventions).
    ref = lax.conv_general_dilated(
        jnp.transpose(x, (0, 2, 3, 1)), weight,
        window_strides=(stride, stride),
        padding=[(padding, padding), (padding, padding)],
        dimension_numbers=("NHWC", "HWIO", "NHWC"))
    ref = ref + bias
    if relu:
        ref = jnp.maximum(ref, 0.0)
    ref = jnp.transpose(ref, (0, 3, 1, 2))

    np.testing.assert_allclose(np.asarray(y), np.asarray(ref),
                               rtol=2e-2, atol=1e-2)
    assert y.shape == (B, Cout, H, W)
    print("KERNEL_OK")
</pallas_src>

<mosaic_0001>
module attributes {stable_mosaic.version = 11 : i64} {
  func.func @_conv_kernel(%arg0: i32, %arg1: i32, %arg2: memref<1x18x18x4xbf16, #tpu.memory_space<vmem>>, %arg3: memref<8x128xbf16, #tpu.memory_space<vmem>>, %arg4: memref<8x1xf32, #tpu.memory_space<vmem>>, %arg5: memref<1x8x256xf32, #tpu.memory_space<vmem>>, %arg6: memref<256x128xbf16, #tpu.memory_space<vmem>>) attributes {dimension_semantics = [#tpu.dimension_semantics<parallel>, #tpu.dimension_semantics<parallel>], iteration_bounds = array<i64: 2, 1>, scalar_prefetch = 0 : i64, scratch_operands = 1 : i64, tpu.core_type = #tpu.core_type<tc>, window_params = [{transform_indices = @transform_0, window_bounds = array<i64: 1, 18, 18, 4>}, {pipeline_mode = #tpu.pipeline_mode<synchronous>, transform_indices = @transform_1, window_bounds = array<i64: 8, 128>}, {pipeline_mode = #tpu.pipeline_mode<synchronous>, transform_indices = @transform_2, window_bounds = array<i64: 8, 1>}, {transform_indices = @transform_3, window_bounds = array<i64: 1, 8, 256>}]} {
    %c16_i32 = arith.constant 16 : i32
    %0 = arith.muli %arg1, %c16_i32 : i32
    %cst = arith.constant 0.000000e+00 : bf16
    %1 = vector.broadcast %cst : bf16 to vector<256x92xbf16>
    %c0 = arith.constant 0 : index
    %c36 = arith.constant 36 : index
    %2 = vector.load %arg6[%c0, %c36] : memref<256x128xbf16, #tpu.memory_space<vmem>>, vector<256x92xbf16>
    tpu.vector_store %arg6[%c0, %c36], %1 {strides = array<i32>} : memref<256x128xbf16, #tpu.memory_space<vmem>>, vector<256x92xbf16>,
    %c0_i32 = arith.constant 0 : i32
    %3 = arith.addi %0, %c0_i32 : i32
    %c0_0 = arith.constant 0 : index
    %4 = arith.index_cast %3 : i32 to index
    %c0_1 = arith.constant 0 : index
    %c0_2 = arith.constant 0 : index
    %5 = vector.load %arg2[%c0_0, %4, %c0_1, %c0_2] : memref<1x18x18x4xbf16, #tpu.memory_space<vmem>>, vector<1x16x16x4xbf16>
    %6 = vector.shape_cast %5 : vector<1x16x16x4xbf16> to vector<16x16x4xbf16>
    %7 = vector.shape_cast %6 : vector<16x16x4xbf16> to vector<256x4xbf16>
    %c0_3 = arith.constant 0 : index
    %c0_4 = arith.constant 0 : index
    %8 = vector.load %arg6[%c0_3, %c0_4] : memref<256x128xbf16, #tpu.memory_space<vmem>>, vector<256x4xbf16>
    tpu.vector_store %arg6[%c0_3, %c0_4], %7 {strides = array<i32>} : memref<256x128xbf16, #tpu.memory_space<vmem>>, vector<256x4xbf16>,
    %c0_i32_5 = arith.constant 0 : i32
    %9 = arith.addi %0, %c0_i32_5 : i32
    %c0_6 = arith.constant 0 : index
    %10 = arith.index_cast %9 : i32 to index
    %c1 = arith.constant 1 : index
    %c0_7 = arith.constant 0 : index
    %11 = vector.load %arg2[%c0_6, %10, %c1, %c0_7] : memref<1x18x18x4xbf16, #tpu.memory_space<vmem>>, vector<1x16x16x4xbf16>
    %12 = vector.shape_cast %11 : vector<1x16x16x4xbf16> to vector<16x16x4xbf16>
    %13 = vector.shape_cast %12 : vector<16x16x4xbf16> to vector<256x4xbf16>
    %c0_8 = arith.constant 0 : index
    %c4 = arith.constant 4 : index
    %14 = vector.load %arg6[%c0_8, %c4] : memref<256x128xbf16, #tpu.memory_space<vmem>>, vector<256x4xbf16>
    tpu.vector_store %arg6[%c0_8, %c4], %13 {strides = array<i32>} : memref<256x128xbf16, #tpu.memory_space<vmem>>, vector<256x4xbf16>,
    %c0_i32_9 = arith.constant 0 : i32
    %15 = arith.addi %0, %c0_i32_9 : i32
    %c0_10 = arith.constant 0 : index
    %16 = arith.index_cast %15 : i32 to index
    %c2 = arith.constant 2 : index
    %c0_11 = arith.constant 0 : index
    %17 = vector.load %arg2[%c0_10, %16, %c2, %c0_11] : memref<1x18x18x4xbf16, #tpu.memory_space<vmem>>, vector<1x16x16x4xbf16>
    %18 = vector.shape_cast %17 : vector<1x16x16x4xbf16> to vector<16x16x4xbf16>
    %19 = vector.shape_cast %18 : vector<16x16x4xbf16> to vector<256x4xbf16>
    %c0_12 = arith.constant 0 : index
    %c8 = arith.constant 8 : index
    %20 = vector.load %arg6[%c0_12, %c8] : memref<256x128xbf16, #tpu.memory_space<vmem>>, vector<256x4xbf16>
    tpu.vector_store %arg6[%c0_12, %c8], %19 {strides = array<i32>} : memref<256x128xbf16, #tpu.memory_space<vmem>>, vector<256x4xbf16>,
    %c1_i32 = arith.constant 1 : i32
    %21 = arith.addi %0, %c1_i32 : i32
    %c0_13 = arith.constant 0 : index
    %22 = arith.index_cast %21 : i32 to index
    %c0_14 = arith.constant 0 : index
    %c0_15 = arith.constant 0 : index
    %23 = vector.load %arg2[%c0_13, %22, %c0_14, %c0_15] : memref<1x18x18x4xbf16, #tpu.memory_space<vmem>>, vector<1x16x16x4xbf16>
    %24 = vector.shape_cast %23 : vector<1x16x16x4xbf16> to vector<16x16x4xbf16>
    %25 = vector.shape_cast %24 : vector<16x16x4xbf16> to vector<256x4xbf16>
    %c0_16 = arith.constant 0 : index
    %c12 = arith.constant 12 : index
    %26 = vector.load %arg6[%c0_16, %c12] : memref<256x128xbf16, #tpu.memory_space<vmem>>, vector<256x4xbf16>
    tpu.vector_store %arg6[%c0_16, %c12], %25 {strides = array<i32>} : memref<256x128xbf16, #tpu.memory_space<vmem>>, vector<256x4xbf16>,
    %c1_i32_17 = arith.constant 1 : i32
    %27 = arith.addi %0, %c1_i32_17 : i32
    %c0_18 = arith.constant 0 : index
    %28 = arith.index_cast %27 : i32 to index
    %c1_19 = arith.constant 1 : index
    %c0_20 = arith.constant 0 : index
    %29 = vector.load %arg2[%c0_18, %28, %c1_19, %c0_20] : memref<1x18x18x4xbf16, #tpu.memory_space<vmem>>, vector<1x16x16x4xbf16>
    %30 = vector.shape_cast %29 : vector<1x16x16x4xbf16> to vector<16x16x4xbf16>
    %31 = vector.shape_cast %30 : vector<16x16x4xbf16> to vector<256x4xbf16>
    %c0_21 = arith.constant 0 : index
    %c16 = arith.constant 16 : index
    %32 = vector.load %arg6[%c0_21, %c16] : memref<256x128xbf16, #tpu.memory_space<vmem>>, vector<256x4xbf16>
    tpu.vector_store %arg6[%c0_21, %c16], %31 {strides = array<i32>} : memref<256x128xbf16, #tpu.memory_space<vmem>>, vector<256x4xbf16>,
    %c1_i32_22 = arith.constant 1 : i32
    %33 = arith.addi %0, %c1_i32_22 : i32
    %c0_23 = arith.constant 0 : index
    %34 = arith.index_cast %33 : i32 to index
    %c2_24 = arith.constant 2 : index
    %c0_25 = arith.constant 0 : index
    %35 = vector.load %arg2[%c0_23, %34, %c2_24, %c0_25] : memref<1x18x18x4xbf16, #tpu.memory_space<vmem>>, vector<1x16x16x4xbf16>
    %36 = vector.shape_cast %35 : vector<1x16x16x4xbf16> to vector<16x16x4xbf16>
    %37 = vector.shape_cast %36 : vector<16x16x4xbf16> to vector<256x4xbf16>
    %c0_26 = arith.constant 0 : index
    %c20 = arith.constant 20 : index
    %38 = vector.load %arg6[%c0_26, %c20] : memref<256x128xbf16, #tpu.memory_space<vmem>>, vector<256x4xbf16>
    tpu.vector_store %arg6[%c0_26, %c20], %37 {strides = array<i32>} : memref<256x128xbf16, #tpu.memory_space<vmem>>, vector<256x4xbf16>,
    %c2_i32 = arith.constant 2 : i32
    %39 = arith.addi %0, %c2_i32 : i32
    %c0_27 = arith.constant 0 : index
    %40 = arith.index_cast %39 : i32 to index
    %c0_28 = arith.constant 0 : index
    %c0_29 = arith.constant 0 : index
    %41 = vector.load %arg2[%c0_27, %40, %c0_28, %c0_29] : memref<1x18x18x4xbf16, #tpu.memory_space<vmem>>, vector<1x16x16x4xbf16>
    %42 = vector.shape_cast %41 : vector<1x16x16x4xbf16> to vector<16x16x4xbf16>
    %43 = vector.shape_cast %42 : vector<16x16x4xbf16> to vector<256x4xbf16>
    %c0_30 = arith.constant 0 : index
    %c24 = arith.constant 24 : index
    %44 = vector.load %arg6[%c0_30, %c24] : memref<256x128xbf16, #tpu.memory_space<vmem>>, vector<256x4xbf16>
    tpu.vector_store %arg6[%c0_30, %c24], %43 {strides = array<i32>} : memref<256x128xbf16, #tpu.memory_space<vmem>>, vector<256x4xbf16>,
    %c2_i32_31 = arith.constant 2 : i32
    %45 = arith.addi %0, %c2_i32_31 : i32
    %c0_32 = arith.constant 0 : index
    %46 = arith.index_cast %45 : i32 to index
    %c1_33 = arith.constant 1 : index
    %c0_34 = arith.constant 0 : index
    %47 = vector.load %arg2[%c0_32, %46, %c1_33, %c0_34] : memref<1x18x18x4xbf16, #tpu.memory_space<vmem>>, vector<1x16x16x4xbf16>
    %48 = vector.shape_cast %47 : vector<1x16x16x4xbf16> to vector<16x16x4xbf16>
    %49 = vector.shape_cast %48 : vector<16x16x4xbf16> to vector<256x4xbf16>
    %c0_35 = arith.constant 0 : index
    %c28 = arith.constant 28 : index
    %50 = vector.load %arg6[%c0_35, %c28] : memref<256x128xbf16, #tpu.memory_space<vmem>>, vector<256x4xbf16>
    tpu.vector_store %arg6[%c0_35, %c28], %49 {strides = array<i32>} : memref<256x128xbf16, #tpu.memory_space<vmem>>, vector<256x4xbf16>,
    %c2_i32_36 = arith.constant 2 : i32
    %51 = arith.addi %0, %c2_i32_36 : i32
    %c0_37 = arith.constant 0 : index
    %52 = arith.index_cast %51 : i32 to index
    %c2_38 = arith.constant 2 : index
    %c0_39 = arith.constant 0 : index
    %53 = vector.load %arg2[%c0_37, %52, %c2_38, %c0_39] : memref<1x18x18x4xbf16, #tpu.memory_space<vmem>>, vector<1x16x16x4xbf16>
    %54 = vector.shape_cast %53 : vector<1x16x16x4xbf16> to vector<16x16x4xbf16>
    %55 = vector.shape_cast %54 : vector<16x16x4xbf16> to vector<256x4xbf16>
    %c0_40 = arith.constant 0 : index
    %c32 = arith.constant 32 : index
    %56 = vector.load %arg6[%c0_40, %c32] : memref<256x128xbf16, #tpu.memory_space<vmem>>, vector<256x4xbf16>
    tpu.vector_store %arg6[%c0_40, %c32], %55 {strides = array<i32>} : memref<256x128xbf16, #tpu.memory_space<vmem>>, vector<256x4xbf16>,
    %c0_41 = arith.constant 0 : index
    %c0_42 = arith.constant 0 : index
    %57 = vector.load %arg3[%c0_41, %c0_42] : memref<8x128xbf16, #tpu.memory_space<vmem>>, vector<8x128xbf16>
    %c0_43 = arith.constant 0 : index
    %c0_44 = arith.constant 0 : index
    %58 = vector.load %arg6[%c0_43, %c0_44] : memref<256x128xbf16, #tpu.memory_space<vmem>>, vector<256x128xbf16>
    %cst_45 = arith.constant dense<0.000000e+00> : vector<8x256xf32>
    %59 = tpu.matmul %57, %58, %cst_45 {dimension_numbers = #tpu.dot_dimension_numbers<[1], [1], [0], [0], [0, 0, 1, 0], [], []>} : vector<8x128xbf16>, vector<256x128xbf16>, vector<8x256xf32> -> vector<8x256xf32>
    %c0_46 = arith.constant 0 : index
    %c0_47 = arith.constant 0 : index
    %60 = vector.load %arg4[%c0_46, %c0_47] : memref<8x1xf32, #tpu.memory_space<vmem>>, vector<8x1xf32>
    %61 = vector.broadcast %60 : vector<8x1xf32> to vector<8x256xf32>
    %62 = arith.addf %59, %61 : vector<8x256xf32>
    %cst_48 = arith.constant 0.000000e+00 : f32
    %63 = vector.broadcast %cst_48 : f32 to vector<8x256xf32>
    %64 = arith.maximumf %62, %63 : vector<8x256xf32>
    %c0_49 = arith.constant 0 : index
    %c0_50 = arith.constant 0 : index
    %c0_51 = arith.constant 0 : index
    %65 = vector.load %arg5[%c0_49, %c0_50, %c0_51] : memref<1x8x256xf32, #tpu.memory_space<vmem>>, vector<1x8x256xf32>
    %66 = vector.shape_cast %65 : vector<1x8x256xf32> to vector<8x256xf32>
    %67 = vector.shape_cast %64 : vector<8x256xf32> to vector<1x8x256xf32>
    tpu.vector_store %arg5[%c0_49, %c0_50, %c0_51], %67 {strides = array<i32>} : memref<1x8x256xf32, #tpu.memory_space<vmem>>, vector<1x8x256xf32>,
    return
  }
  func.func @transform_0(%arg0: i32, %arg1: i32) -> (i32, i32, i32, i32) {
    %c0_i32 = arith.constant 0 : i32
    %c0_i32_0 = arith.constant 0 : i32
    %c0_i32_1 = arith.constant 0 : i32
    %c0_i32_2 = arith.constant 0 : i32
    return %arg0, %c0_i32, %c0_i32_0, %c0_i32_1 : i32, i32, i32, i32
  }
  func.func @transform_1(%arg0: i32, %arg1: i32) -> (i32, i32) {
    %c0_i32 = arith.constant 0 : i32
    %c0_i32_0 = arith.constant 0 : i32
    %c0_i32_1 = arith.constant 0 : i32
    return %c0_i32, %c0_i32_0 : i32, i32
  }
  func.func @transform_2(%arg0: i32, %arg1: i32) -> (i32, i32) {
    %c0_i32 = arith.constant 0 : i32
    %c0_i32_0 = arith.constant 0 : i32
    %c0_i32_1 = arith.constant 0 : i32
    return %c0_i32, %c0_i32_0 : i32, i32
  }
  func.func @transform_3(%arg0: i32, %arg1: i32) -> (i32, i32, i32) {
    %c0_i32 = arith.constant 0 : i32
    %c0_i32_0 = arith.constant 0 : i32
    return %arg0, %c0_i32, %arg1 : i32, i32, i32
  }
}

module attributes {stable_mosaic.version = 11 : i64} {
  func.func @_conv_kernel(%arg0: i32, %arg1: i32, %arg2: memref<1x18x18x4xbf16, #tpu.memory_space<vmem>>, %arg3: memref<8x128xbf16, #tpu.memory_space<vmem>>, %arg4: memref<8x1xf32, #tpu.memory_space<vmem>>, %arg5: memref<1x8x256xf32, #tpu.memory_space<vmem>>, %arg6: memref<256x128xbf16, #tpu.memory_space<vmem>>) attributes {dimension_semantics = [#tpu.dimension_semantics<parallel>, #tpu.dimension_semantics<parallel>], iteration_bounds = array<i64: 2, 1>, scalar_prefetch = 0 : i64, scratch_operands = 1 : i64, tpu.core_type = #tpu.core_type<tc>, window_params = [{transform_indices = @transform_0, window_bounds = array<i64: 1, 18, 18, 4>}, {pipeline_mode = #tpu.pipeline_mode<synchronous>, transform_indices = @transform_1, window_bounds = array<i64: 8, 128>}, {pipeline_mode = #tpu.pipeline_mode<synchronous>, transform_indices = @transform_2, window_bounds = array<i64: 8, 1>}, {transform_indices = @transform_3, window_bounds = array<i64: 1, 8, 256>}]} {
    %c16_i32 = arith.constant 16 : i32
    %0 = arith.muli %arg1, %c16_i32 : i32
    %cst = arith.constant 0.000000e+00 : bf16
    %1 = vector.broadcast %cst : bf16 to vector<256x92xbf16>
    %c0 = arith.constant 0 : index
    %c36 = arith.constant 36 : index
    %2 = vector.load %arg6[%c0, %c36] : memref<256x128xbf16, #tpu.memory_space<vmem>>, vector<256x92xbf16>
    tpu.vector_store %arg6[%c0, %c36], %1 {strides = array<i32>} : memref<256x128xbf16, #tpu.memory_space<vmem>>, vector<256x92xbf16>,
    %c0_i32 = arith.constant 0 : i32
    %3 = arith.addi %0, %c0_i32 : i32
    %c0_0 = arith.constant 0 : index
    %4 = arith.index_cast %3 : i32 to index
    %c0_1 = arith.constant 0 : index
    %c0_2 = arith.constant 0 : index
    %5 = vector.load %arg2[%c0_0, %4, %c0_1, %c0_2] : memref<1x18x18x4xbf16, #tpu.memory_space<vmem>>, vector<1x16x16x4xbf16>
    %6 = vector.shape_cast %5 : vector<1x16x16x4xbf16> to vector<16x16x4xbf16>
    %7 = vector.shape_cast %6 : vector<16x16x4xbf16> to vector<256x4xbf16>
    %c0_3 = arith.constant 0 : index
    %c0_4 = arith.constant 0 : index
    %8 = vector.load %arg6[%c0_3, %c0_4] : memref<256x128xbf16, #tpu.memory_space<vmem>>, vector<256x4xbf16>
    tpu.vector_store %arg6[%c0_3, %c0_4], %7 {strides = array<i32>} : memref<256x128xbf16, #tpu.memory_space<vmem>>, vector<256x4xbf16>,
    %c0_i32_5 = arith.constant 0 : i32
    %9 = arith.addi %0, %c0_i32_5 : i32
    %c0_6 = arith.constant 0 : index
    %10 = arith.index_cast %9 : i32 to index
    %c1 = arith.constant 1 : index
    %c0_7 = arith.constant 0 : index
    %11 = vector.load %arg2[%c0_6, %10, %c1, %c0_7] : memref<1x18x18x4xbf16, #tpu.memory_space<vmem>>, vector<1x16x16x4xbf16>
    %12 = vector.shape_cast %11 : vector<1x16x16x4xbf16> to vector<16x16x4xbf16>
    %13 = vector.shape_cast %12 : vector<16x16x4xbf16> to vector<256x4xbf16>
    %c0_8 = arith.constant 0 : index
    %c4 = arith.constant 4 : index
    %14 = vector.load %arg6[%c0_8, %c4] : memref<256x128xbf16, #tpu.memory_space<vmem>>, vector<256x4xbf16>
    tpu.vector_store %arg6[%c0_8, %c4], %13 {strides = array<i32>} : memref<256x128xbf16, #tpu.memory_space<vmem>>, vector<256x4xbf16>,
    %c0_i32_9 = arith.constant 0 : i32
    %15 = arith.addi %0, %c0_i32_9 : i32
    %c0_10 = arith.constant 0 : index
    %16 = arith.index_cast %15 : i32 to index
    %c2 = arith.constant 2 : index
    %c0_11 = arith.constant 0 : index
    %17 = vector.load %arg2[%c0_10, %16, %c2, %c0_11] : memref<1x18x18x4xbf16, #tpu.memory_space<vmem>>, vector<1x16x16x4xbf16>
    %18 = vector.shape_cast %17 : vector<1x16x16x4xbf16> to vector<16x16x4xbf16>
    %19 = vector.shape_cast %18 : vector<16x16x4xbf16> to vector<256x4xbf16>
    %c0_12 = arith.constant 0 : index
    %c8 = arith.constant 8 : index
    %20 = vector.load %arg6[%c0_12, %c8] : memref<256x128xbf16, #tpu.memory_space<vmem>>, vector<256x4xbf16>
    tpu.vector_store %arg6[%c0_12, %c8], %19 {strides = array<i32>} : memref<256x128xbf16, #tpu.memory_space<vmem>>, vector<256x4xbf16>,
    %c1_i32 = arith.constant 1 : i32
    %21 = arith.addi %0, %c1_i32 : i32
    %c0_13 = arith.constant 0 : index
    %22 = arith.index_cast %21 : i32 to index
    %c0_14 = arith.constant 0 : index
    %c0_15 = arith.constant 0 : index
    %23 = vector.load %arg2[%c0_13, %22, %c0_14, %c0_15] : memref<1x18x18x4xbf16, #tpu.memory_space<vmem>>, vector<1x16x16x4xbf16>
    %24 = vector.shape_cast %23 : vector<1x16x16x4xbf16> to vector<16x16x4xbf16>
    %25 = vector.shape_cast %24 : vector<16x16x4xbf16> to vector<256x4xbf16>
    %c0_16 = arith.constant 0 : index
    %c12 = arith.constant 12 : index
    %26 = vector.load %arg6[%c0_16, %c12] : memref<256x128xbf16, #tpu.memory_space<vmem>>, vector<256x4xbf16>
    tpu.vector_store %arg6[%c0_16, %c12], %25 {strides = array<i32>} : memref<256x128xbf16, #tpu.memory_space<vmem>>, vector<256x4xbf16>,
    %c1_i32_17 = arith.constant 1 : i32
    %27 = arith.addi %0, %c1_i32_17 : i32
    %c0_18 = arith.constant 0 : index
    %28 = arith.index_cast %27 : i32 to index
    %c1_19 = arith.constant 1 : index
    %c0_20 = arith.constant 0 : index
    %29 = vector.load %arg2[%c0_18, %28, %c1_19, %c0_20] : memref<1x18x18x4xbf16, #tpu.memory_space<vmem>>, vector<1x16x16x4xbf16>
    %30 = vector.shape_cast %29 : vector<1x16x16x4xbf16> to vector<16x16x4xbf16>
    %31 = vector.shape_cast %30 : vector<16x16x4xbf16> to vector<256x4xbf16>
    %c0_21 = arith.constant 0 : index
    %c16 = arith.constant 16 : index
    %32 = vector.load %arg6[%c0_21, %c16] : memref<256x128xbf16, #tpu.memory_space<vmem>>, vector<256x4xbf16>
    tpu.vector_store %arg6[%c0_21, %c16], %31 {strides = array<i32>} : memref<256x128xbf16, #tpu.memory_space<vmem>>, vector<256x4xbf16>,
    %c1_i32_22 = arith.constant 1 : i32
    %33 = arith.addi %0, %c1_i32_22 : i32
    %c0_23 = arith.constant 0 : index
    %34 = arith.index_cast %33 : i32 to index
    %c2_24 = arith.constant 2 : index
    %c0_25 = arith.constant 0 : index
    %35 = vector.load %arg2[%c0_23, %34, %c2_24, %c0_25] : memref<1x18x18x4xbf16, #tpu.memory_space<vmem>>, vector<1x16x16x4xbf16>
    %36 = vector.shape_cast %35 : vector<1x16x16x4xbf16> to vector<16x16x4xbf16>
    %37 = vector.shape_cast %36 : vector<16x16x4xbf16> to vector<256x4xbf16>
    %c0_26 = arith.constant 0 : index
    %c20 = arith.constant 20 : index
    %38 = vector.load %arg6[%c0_26, %c20] : memref<256x128xbf16, #tpu.memory_space<vmem>>, vector<256x4xbf16>
    tpu.vector_store %arg6[%c0_26, %c20], %37 {strides = array<i32>} : memref<256x128xbf16, #tpu.memory_space<vmem>>, vector<256x4xbf16>,
    %c2_i32 = arith.constant 2 : i32
    %39 = arith.addi %0, %c2_i32 : i32
    %c0_27 = arith.constant 0 : index
    %40 = arith.index_cast %39 : i32 to index
    %c0_28 = arith.constant 0 : index
    %c0_29 = arith.constant 0 : index
    %41 = vector.load %arg2[%c0_27, %40, %c0_28, %c0_29] : memref<1x18x18x4xbf16, #tpu.memory_space<vmem>>, vector<1x16x16x4xbf16>
    %42 = vector.shape_cast %41 : vector<1x16x16x4xbf16> to vector<16x16x4xbf16>
    %43 = vector.shape_cast %42 : vector<16x16x4xbf16> to vector<256x4xbf16>
    %c0_30 = arith.constant 0 : index
    %c24 = arith.constant 24 : index
    %44 = vector.load %arg6[%c0_30, %c24] : memref<256x128xbf16, #tpu.memory_space<vmem>>, vector<256x4xbf16>
    tpu.vector_store %arg6[%c0_30, %c24], %43 {strides = array<i32>} : memref<256x128xbf16, #tpu.memory_space<vmem>>, vector<256x4xbf16>,
    %c2_i32_31 = arith.constant 2 : i32
    %45 = arith.addi %0, %c2_i32_31 : i32
    %c0_32 = arith.constant 0 : index
    %46 = arith.index_cast %45 : i32 to index
    %c1_33 = arith.constant 1 : index
    %c0_34 = arith.constant 0 : index
    %47 = vector.load %arg2[%c0_32, %46, %c1_33, %c0_34] : memref<1x18x18x4xbf16, #tpu.memory_space<vmem>>, vector<1x16x16x4xbf16>
    %48 = vector.shape_cast %47 : vector<1x16x16x4xbf16> to vector<16x16x4xbf16>
    %49 = vector.shape_cast %48 : vector<16x16x4xbf16> to vector<256x4xbf16>
    %c0_35 = arith.constant 0 : index
    %c28 = arith.constant 28 : index
    %50 = vector.load %arg6[%c0_35, %c28] : memref<256x128xbf16, #tpu.memory_space<vmem>>, vector<256x4xbf16>
    tpu.vector_store %arg6[%c0_35, %c28], %49 {strides = array<i32>} : memref<256x128xbf16, #tpu.memory_space<vmem>>, vector<256x4xbf16>,
    %c2_i32_36 = arith.constant 2 : i32
    %51 = arith.addi %0, %c2_i32_36 : i32
    %c0_37 = arith.constant 0 : index
    %52 = arith.index_cast %51 : i32 to index
    %c2_38 = arith.constant 2 : index
    %c0_39 = arith.constant 0 : index
    %53 = vector.load %arg2[%c0_37, %52, %c2_38, %c0_39] : memref<1x18x18x4xbf16, #tpu.memory_space<vmem>>, vector<1x16x16x4xbf16>
    %54 = vector.shape_cast %53 : vector<1x16x16x4xbf16> to vector<16x16x4xbf16>
    %55 = vector.shape_cast %54 : vector<16x16x4xbf16> to vector<256x4xbf16>
    %c0_40 = arith.constant 0 : index
    %c32 = arith.constant 32 : index
    %56 = vector.load %arg6[%c0_40, %c32] : memref<256x128xbf16, #tpu.memory_space<vmem>>, vector<256x4xbf16>
    tpu.vector_store %arg6[%c0_40, %c32], %55 {strides = array<i32>} : memref<256x128xbf16, #tpu.memory_space<vmem>>, vector<256x4xbf16>,
    %c0_41 = arith.constant 0 : index
    %c0_42 = arith.constant 0 : index
    %57 = vector.load %arg3[%c0_41, %c0_42] : memref<8x128xbf16, #tpu.memory_space<vmem>>, vector<8x128xbf16>
    %c0_43 = arith.constant 0 : index
    %c0_44 = arith.constant 0 : index
    %58 = vector.load %arg6[%c0_43, %c0_44] : memref<256x128xbf16, #tpu.memory_space<vmem>>, vector<256x128xbf16>
    %cst_45 = arith.constant dense<0.000000e+00> : vector<8x256xf32>
    %59 = tpu.matmul %57, %58, %cst_45 {dimension_numbers = #tpu.dot_dimension_numbers<[1], [1], [0], [0], [0, 0, 1, 0], [], []>} : vector<8x128xbf16>, vector<256x128xbf16>, vector<8x256xf32> -> vector<8x256xf32>
    %c0_46 = arith.constant 0 : index
    %c0_47 = arith.constant 0 : index
    %60 = vector.load %arg4[%c0_46, %c0_47] : memref<8x1xf32, #tpu.memory_space<vmem>>, vector<8x1xf32>
    %61 = vector.broadcast %60 : vector<8x1xf32> to vector<8x256xf32>
    %62 = arith.addf %59, %61 : vector<8x256xf32>
    %cst_48 = arith.constant 0.000000e+00 : f32
    %63 = vector.broadcast %cst_48 : f32 to vector<8x256xf32>
    %64 = arith.maximumf %62, %63 : vector<8x256xf32>
    %c0_49 = arith.constant 0 : index
    %c0_50 = arith.constant 0 : index
    %c0_51 = arith.constant 0 : index
    %65 = vector.load %arg5[%c0_49, %c0_50, %c0_51] : memref<1x8x256xf32, #tpu.memory_space<vmem>>, vector<1x8x256xf32>
    %66 = vector.shape_cast %65 : vector<1x8x256xf32> to vector<8x256xf32>
    %67 = vector.shape_cast %64 : vector<8x256xf32> to vector<1x8x256xf32>
    tpu.vector_store %arg5[%c0_49, %c0_50, %c0_51], %67 {strides = array<i32>} : memref<1x8x256xf32, #tpu.memory_space<vmem>>, vector<1x8x256xf32>,
    return
  }
  func.func @transform_0(%arg0: i32, %arg1: i32) -> (i32, i32, i32, i32) {
    %c0_i32 = arith.constant 0 : i32
    %c0_i32_0 = arith.constant 0 : i32
    %c0_i32_1 = arith.constant 0 : i32
    %c0_i32_2 = arith.constant 0 : i32
    return %arg0, %c0_i32, %c0_i32_0, %c0_i32_1 : i32, i32, i32, i32
  }
  func.func @transform_1(%arg0: i32, %arg1: i32) -> (i32, i32) {
    %c0_i32 = arith.constant 0 : i32
    %c0_i32_0 = arith.constant 0 : i32
    %c0_i32_1 = arith.constant 0 : i32
    return %c0_i32, %c0_i32_0 : i32, i32
  }
  func.func @transform_2(%arg0: i32, %arg1: i32) -> (i32, i32) {
    %c0_i32 = arith.constant 0 : i32
    %c0_i32_0 = arith.constant 0 : i32
    %c0_i32_1 = arith.constant 0 : i32
    return %c0_i32, %c0_i32_0 : i32, i32
  }
  func.func @transform_3(%arg0: i32, %arg1: i32) -> (i32, i32, i32) {
    %c0_i32 = arith.constant 0 : i32
    %c0_i32_0 = arith.constant 0 : i32
    return %arg0, %c0_i32, %arg1 : i32, i32, i32
  }
}

</mosaic_0001>

<bundles_post_ra>
// kernel: tpu_custom_call.1
= control target key start
LH: loop header
LB: loop body
LE: loop exit
PB: predicated region body
PF: predicated region fallthrough
CT: control target
= control target key end

     0   :  { %8 = vsyncpa [#allocation4], 0  ;;  %s5879_s0 = inlined_call_operand.vmem [shape: bf16[2,18,18,4], index: 0, kind: input, shape index: {}]   ;;  %s5880_s1 = inlined_call_operand.vmem [shape: bf16[8,128], index: 1, kind: input, shape index: {}]   ;;  %s5881_s2 = inlined_call_operand.vmem [shape: f32[8,1], index: 2, kind: input, shape index: {}]   ;;  %s5882_s3 = inlined_call_operand.hbm [shape: f32[2,8,256], index: 3, kind: output, shape index: {}]  }
   0x1   :  { %10 = vsyncpa [#allocation4 + $0x1], 0  ;;  %s4218_s12 = smov 0   ;;  %s4220_s13 = smov 0  }
   0x2   :  { %s4222_s14 = smov 0   ;;  %s4224_s15 = smov 0  }
   0x3   :  { %s4226_s16 = smov 0   ;;  %s4228_s17 = smov 0  }
   0x4 LB: > { %s3645_s18 = sadd.s32 4294967295, %s4187_s17   ;;  %s3646_s19 = sadd.s32 4294967294, %s4187_s17   ;;  %s4187_s17 = sphi %s4228_s17, %s16_s17   ;;  %s4183_s16 = sphi %s4226_s16, %s5893_s16   ;;  %s4179_s15 = sphi %s4224_s15, %s5892_s15   ;;  %s4175_s14 = sphi %s4222_s14, %s5891_s14   ;;  %s4171_s13 = sphi %s4220_s13, %s5890_s13   ;;  %s4167_s12 = sphi %s4218_s12, %s5889_s12  }
   0x5   : > { %s28_s20 = sadd.s32 1, %s4183_s16  ;;  %s105_s21 = sadd.s32 1, %s4175_s14 }
   0x6   : > { %p30_p0 = scmp.ge.s32.totalorder %s28_s20, 2  ;;  %p115_p1 = scmp.ne.s32.totalorder %s4175_s14, %s4171_s13 }
   0x7   : > { %p116_p2 = scmp.eq.s32.totalorder %s3645_s18, 1  ;;  %p121_p3 = scmp.ne.s32.totalorder %s4171_s13, %s4167_s12 }
   0x8   : > { %s5895_s20 = smov (%p30_p0, %s28_s20), 0  ;;  %p122_p5 = scmp.eq.s32.totalorder %s3646_s19, 1 }
   0x9   : > { %p4258_p4 = por %p116_p2, %p115_p1  ;;  %s100_s23 = ssub.s32 %s4183_s16, %s5895_s20 }
   0xa   : > { %p3649_p6 = scmp.ge.s32.totalorder %s4187_s17, 1  ;;  %p103_p7 = scmp.eq.s32.totalorder %s100_s23, 0 }
   0xb   : > { %p4265_p8 = por %p122_p5, %p121_p3  ;;  %p154_p9 = scmp.lt.s32.totalorder %s4187_s17, 3 }
   0xc   : > { %s4271_s25 = scalar_select %p103_p7, %s4175_s14, %s105_s21  }
   0xd   : > { %p155_p10 = pnand %p3649_p6, %p154_p9 }
   0xe   : > { %p178_p11 = scmp.lt.s32.totalorder (!%p155_p10), %s4179_s15, 1  ;;  %s4189_s4 = smov (!%p155_p10), 4  }
   0xf   : > { %158 = sbr.rel (%p155_p10) target bundleno = 980 (0x3d4), region = 32  ;;  %s4191_s5 = smov (!%p155_p10), 8  }
  0x10   : > { %s4192_s6 = smov (!%p155_p10), 12   ;;  %s4193_s7 = smov (!%p155_p10), 16  }
  0x11   : > { %s4194_s8 = smov (!%p155_p10), 20   ;;  %s4195_s9 = smov (!%p155_p10), 24  }
  0x12   : > { %s4196_s10 = smov (!%p155_p10), 28   ;;  %s4197_s11 = smov (!%p155_p10), 32  }
  0x13   : > { %s4041_s28 = sshll.u32 (!%p155_p10), %s4179_s15, 4  ;;  %s4129_s18 = scalar_lea.hbm (!%p155_p10), %s5882_s3, 32 }
  0x14   : > { %s179_s26 = scalar_select %p178_p11, %s4179_s15, 1  ;;  %vm335_vm0 = vsmask.f32 3328  ;;  %vm336_vm1 = vsmask.f32 7440  ;;  %vm947_vm3 = vcmask 1042432  }
  0x15   : > { %vm4289_vm2 = vmor %vm335_vm0, %vm336_vm1  ;;  %vm948_vm4 = vcmask 1046532   ;;  %vm186_vm5 = vcmask 1043744   ;;  %vm254_vm7 = vcmask 27648   ;;  %vm818_vm8 = vcmask 60448  }
  0x16   : > { %s4042_s27 = smul.u32 216, %s179_s26  ;;  %vm4483_vm6 = vmor %vm947_vm3, %vm948_vm4  ;;  %vm1158_vm9 = vcmask 93248   ;;  %vm1355_vm10 = vcmask 126048   ;;  %vm1916_vm11 = vcmask 158848   ;;  %vm2253_vm12 = vcmask 191648   ;;  %s175_s26 = sand.u32 1, %s4171_s13  }
  0x17   : > { %vm2450_vm13 = vcmask 224448   ;;  %vm3011_vm14 = vcmask 257248   ;;  %vm3348_vm15 = vcmask 290048  }
  0x18   : > { %s4278_s30 = scalar_lea.vmem %s5879_s0, %s4042_s27  ;;  %s3650_s27 = sshll.u32 %s175_s26, 4 }
  0x19   : > { %v290_v0 = vld [vmem:[%s4278_s30 + $0xc] sm:$0xf]  ;;  %v291_v1 = vld [vmem:[%s4278_s30 + $0x10] sm:$0xf]  ;;  %v287_v2 = vld [vmem:[%s4278_s30] sm:$0xf] }
  0x1a   : > { %v363_v3 = vshrl.u32 %v290_v0, 16  ;;  %v366_v4 = vshll.u32 %v290_v0, 16  ;;  %v372_v5 = vshll.u32 %v291_v1, 16  ;;  %v376_v6 = vshrl.u32 %v291_v1, 16  ;;  %v288_v7 = vld [vmem:[%s4278_s30 + $0x4] sm:$0xf] }
  0x1b   : > { %v339_v8 = vshrl.u32 %v287_v2, 16  ;;  %v342_v9 = vshll.u32 %v287_v2, 16  ;;  %v348_v10 = vshll.u32 %v288_v7, 16  ;;  %v352_v11 = vshrl.u32 %v288_v7, 16  ;;  %v292_v16 = vld [vmem:[%s4278_s30 + $0x14] sm:$0x1] }
  0x1c   : > { %v365_v12 = vrot.slane %v363_v3, 4  ;;  %v368_v13 = vrot.slane %v366_v4, 5  ;;  %v374_v14 = vrot.slane %v372_v5, 5  ;;  %v378_v15 = vrot.slane %v376_v6, 4  ;;  %v297_v20 = vld [vmem:[%s4278_s30 + $0x28] sm:$0xf] }
  0x1d   : > { %v341_v17 = vrot.slane %v339_v8, 4  ;;  %v344_v18 = vrot.slane %v342_v9, 5  ;;  %v354_v19 = vrot.slane %v352_v11, 4  ;;  %v350_v22 = vrot.slane %v348_v10, 5  ;;  %v289_v24 = vld [vmem:[%s4278_s30 + $0x8] sm:$0x1] }
  0x1e   : > { %v369_v21 = vor.u32 %v368_v13, %v365_v12  ;;  %v379_v23 = vor.u32 %v378_v15, %v374_v14  ;;  %v382_v27 = vshll.u32 %v292_v16, 16  ;;  %v420_v28 = vshll.u32 %v297_v20, 16  ;;  %v296_v30 = vld [vmem:[%s4278_s30 + $0x24] sm:$0xf]  ;;  %v298_v42 = vld [vmem:[%s4278_s30 + $0x2c] sm:$0x1] }
  0x1f   : > { %v345_v26 = vor.u32 %v344_v18, %v341_v17  ;;  %v424_v29 = vshrl.u32 %v297_v20, 16  ;;  %v355_v33 = vor.u32 %v354_v19, %v350_v22  ;;  %v358_v34 = vshll.u32 %v289_v24, 16  ;;  %v302_v44 = vld [vmem:[%s4278_s30 + $0x3c] sm:$0xf]  ;;  %v300_v45 = vld [vmem:[%s4278_s30 + $0x34] sm:$0xf] }
  0x20   : > { %v370_v31 = vrot.slane %v369_v21, 4  ;;  %v4296_v36 = vrot.slane %v420_v28, 5  ;;  %v411_v38 = vshrl.u32 %v296_v30, 16  ;;  %v380_v40 = vrot.slane %v379_v23, 4  ;;  %v293_v50 = vld [vmem:[%s4278_s30 + $0x18] sm:$0xf] }
  0x21   : > { %v346_v32 = vrot.slane %v345_v26, 4  ;;  %v426_v37 = vrot.slane %v424_v29, 4  ;;  %v384_v41 = vrot.slane %v382_v27, 5  ;;  %v414_v43 = vshll.u32 %v296_v30, 16  ;;  %v294_v53 = vld [vmem:[%s4278_s30 + $0x1c] sm:$0xf] }
  0x22   : > { %v375_v35 = vsel %vm4289_vm2, %v370_v31, %v374_v14  ;;  %v356_v46 = vrot.slane %v355_v33, 4  ;;  %v360_v47 = vrot.slane %v358_v34, 5  ;;  %v413_v48 = vrot.slane %v411_v38, 4  ;;  %v4314_v4 = vld [vmem:[%s4278_s30 + $0x40] sm:$0xf]  ;;  %s177_s29 = scalar_lea.vmem [#allocation3], %s3650_s27 }
  0x23   : > { %726 = vrot.lane.b32.xlu1 %v375_v35, %s4189_s4  ;;  %v351_v39 = vsel %vm4289_vm2, %v346_v32, %v350_v22  ;;  %v416_v49 = vrot.slane %v414_v43, 5  ;;  %v427_v51 = vor.u32 %v426_v37, %v4296_v36  ;;  %v430_v52 = vshll.u32 %v298_v42, 16  ;;  %v301_v6 = vld [vmem:[%s4278_s30 + $0x38] sm:$0x1]  ;;  %v295_v12 = vld [vmem:[%s4278_s30 + $0x20] sm:$0x1] }
  0x24   : > { %722 = vrot.lane.b32.xlu0 %v351_v39, %s4189_s4  ;;  %v385_v54 = vsel %vm4289_vm2, %v380_v40, %v384_v41  ;;  %v459_v55 = vshrl.u32 %v302_v44, 16  ;;  %v462_v56 = vshll.u32 %v302_v44, 16  ;;  %v444_v57 = vshll.u32 %v300_v45, 16  ;;  %v306_v16 = vld [vmem:[%s4278_s30 + $0x4c] sm:$0xf] }
  0x25   : > { %v448_v58 = vshrl.u32 %v300_v45, 16  ;;  %v387_v59 = vshrl.u32 %v293_v50, 16  ;;  %v361_v60 = vsel %vm4289_vm2, %v356_v46, %v360_v47  ;;  %v417_v61 = vor.u32 %v416_v49, %v413_v48  ;;  %v305_v19 = vld [vmem:[%s4278_s30 + $0x48] sm:$0xf]  ;;  %v299_v33 = vld [vmem:[%s4278_s30 + $0x30] sm:$0xf] }
  0x26   : > { %v390_v62 = vshll.u32 %v293_v50, 16  ;;  %v396_v63 = vshll.u32 %v294_v53, 16  ;;  %v428_v0 = vrot.slane %v427_v51, 4  ;;  %v432_v1 = vrot.slane %v430_v52, 5  ;;  %v311_v39 = vld [vmem:[%s4278_s30 + $0x60] sm:$0xf] }
  0x27   : > { %v389_v2 = vrot.slane %v387_v59, 4  ;;  %v400_v3 = vshrl.u32 %v294_v53, 16  ;;  %v461_v5 = vrot.slane %v459_v55, 4  ;;  %v464_v8 = vrot.slane %v462_v56, 5  ;;  %v307_v43 = vld [vmem:[%s4278_s30 + $0x50] sm:$0x1] }
  0x28   : > { %v392_v7 = vrot.slane %v390_v62, 5  ;;  %v4318_v9 = vrot.slane %v444_v57, 5  ;;  %v450_v10 = vrot.slane %v448_v58, 4  ;;  %v418_v13 = vrot.slane %v417_v61, 4  ;;  %v309_v50 = vld [vmem:[%s4278_s30 + $0x58] sm:$0xf] }
  0x29   : > { %v402_v11 = vrot.slane %v400_v3, 4  ;;  %v398_v15 = vrot.slane %v396_v63, 5  ;;  %v433_v17 = vsel %vm4289_vm2, %v428_v0, %v432_v1  ;;  %v468_v18 = vshll.u32 %v4314_v4, 16  ;;  %v4355_v1 = vld [vmem:[%s4278_s30 + $0x64] sm:$0xf] }
  0x2a   : > { %v393_v14 = vor.u32 %v392_v7, %v389_v2  ;;  %v454_v20 = vshll.u32 %v301_v6, 16  ;;  %v406_v23 = vshll.u32 %v295_v12, 16  ;;  %v465_v24 = vor.u32 %v464_v8, %v461_v5  ;;  %v315_v6 = vld [vmem:[%s4278_s30 + $0x70] sm:$0xf]  ;;  %v304_v7 = vld [vmem:[%s4278_s30 + $0x44] sm:$0x1] }
  0x2b   : > { %728 = vrot.lane.b32.xlu1 %v385_v54, %s4189_s4  ;;  %v403_v22 = vor.u32 %v402_v11, %v398_v15  ;;  %v451_v26 = vor.u32 %v450_v10, %v4318_v9  ;;  %v492_v27 = vshll.u32 %v306_v16, 16  ;;  %v496_v28 = vshrl.u32 %v306_v16, 16  ;;  %v314_v12 = vld [vmem:[%s4278_s30 + $0x6c] sm:$0xf]  ;;  %v308_v16 = vld [vmem:[%s4278_s30 + $0x54] sm:$0xf] }
  0x2c   : > { %724 = vrot.lane.b32.xlu0 %v361_v60, %s4189_s4  ;;  %v394_v21 = vrot.slane %v393_v14, 4  ;;  %v423_v29 = vsel %vm4289_vm2, %v418_v13, %v4296_v36  ;;  %v483_v31 = vshrl.u32 %v305_v19, 16  ;;  %v486_v32 = vshll.u32 %v305_v19, 16 }
  0x2d   : > { %v4335_v34 = vrot.slane %v468_v18, 5  ;;  %v456_v35 = vrot.slane %v454_v20, 5  ;;  %v404_v37 = vrot.slane %v403_v22, 4  ;;  %v408_v38 = vrot.slane %v406_v23, 5 }
  0x2e   : > { %v399_v30 = vsel %vm4289_vm2, %v394_v21, %v398_v15  ;;  %v466_v36 = vrot.slane %v465_v24, 4  ;;  %v452_v40 = vrot.slane %v451_v26, 4  ;;  %v4339_v41 = vrot.slane %v492_v27, 5  ;;  %v310_v15 = vld [vmem:[%s4278_s30 + $0x5c] sm:$0x1] }
  0x2f   : > { %730 = vrot.lane.b32.xlu2 %v399_v30, %s4189_s4  ;;  %v498_v42 = vrot.slane %v496_v28, 4  ;;  %v485_v44 = vrot.slane %v483_v31, 4  ;;  %v488_v45 = vrot.slane %v486_v32, 5  ;;  %v435_v46 = vshrl.u32 %v299_v33, 16  ;;  %v316_v32 = vld [vmem:[%s4278_s30 + $0x74] sm:$0x1] }
  0x30   : > { %v438_v47 = vshll.u32 %v299_v33, 16  ;;  %v531_v48 = vshrl.u32 %v311_v39, 16  ;;  %v534_v49 = vshll.u32 %v311_v39, 16  ;;  %v472_v51 = vshrl.u32 %v4314_v4, 16 }
  0x31   : > { %v409_v52 = vsel %vm4289_vm2, %v404_v37, %v408_v38  ;;  %v437_v53 = vrot.slane %v435_v46, 4  ;;  %v471_v55 = vsel %vm4289_vm2, %v466_v36, %v4335_v34  ;;  %v457_v56 = vsel %vm4289_vm2, %v452_v40, %v456_v35 }
  0x32   : > { %v440_v54 = vrot.slane %v438_v47, 5  ;;  %v499_v57 = vor.u32 %v498_v42, %v4339_v41  ;;  %v502_v58 = vshll.u32 %v307_v43, 16  ;;  %v489_v59 = vor.u32 %v488_v45, %v485_v44  ;;  %v320_v43 = vld [vmem:[%s4278_s30 + $0x84] sm:$0xf]  ;;  %v318_v45 = vld [vmem:[%s4278_s30 + $0x7c] sm:$0xf] }
  0x33   : > { %736 = vrot.lane.b32.xlu1 %v433_v17, %s4189_s4  ;;  %v516_v60 = vshll.u32 %v309_v50, 16  ;;  %v520_v61 = vshrl.u32 %v309_v50, 16  ;;  %v533_v63 = vrot.slane %v531_v48, 4  ;;  %v536_v0 = vrot.slane %v534_v49, 5 }
  0x34   : > { %734 = vrot.lane.b32.xlu0 %v423_v29, %s4189_s4  ;;  %v441_v62 = vor.u32 %v440_v54, %v437_v53  ;;  %v474_v3 = vrot.slane %v472_v51, 4  ;;  %v500_v4 = vrot.slane %v499_v57, 4  ;;  %v504_v5 = vrot.slane %v502_v58, 5 }
  0x35   : > { %v490_v8 = vrot.slane %v489_v59, 4  ;;  %v4360_v10 = vrot.slane %v516_v60, 5  ;;  %v522_v11 = vrot.slane %v520_v61, 4  ;;  %v537_v13 = vor.u32 %v536_v0, %v533_v63  ;;  %v324_v59 = vld [vmem:[%s4278_s30 + $0x94] sm:$0xf] }
  0x36   : > { %v442_v2 = vrot.slane %v441_v62, 4  ;;  %v540_v14 = vshll.u32 %v4355_v1, 16  ;;  %v564_v18 = vshll.u32 %v315_v6, 16  ;;  %v475_v19 = vor.u32 %v474_v3, %v4335_v34  ;;  %v313_v60 = vld [vmem:[%s4278_s30 + $0x68] sm:$0x1] }
  0x37   : > { %732 = vrot.lane.b32.xlu2 %v409_v52, %s4189_s4  ;;  %v478_v20 = vshll.u32 %v304_v7, 16  ;;  %v505_v21 = vsel %vm4289_vm2, %v500_v4, %v504_v5  ;;  %v568_v22 = vshrl.u32 %v315_v6, 16  ;;  %v555_v23 = vshrl.u32 %v314_v12, 16  ;;  %v321_v3 = vld [vmem:[%s4278_s30 + $0x88] sm:$0xf] }
  0x38   : > { %v447_v17 = vsel %vm4289_vm2, %v442_v2, %v4318_v9  ;;  %v558_v24 = vshll.u32 %v314_v12, 16  ;;  %v495_v26 = vsel %vm4289_vm2, %v490_v8, %v4339_v41  ;;  %v523_v27 = vor.u32 %v522_v11, %v4360_v10  ;;  %v317_v2 = vld [vmem:[%s4278_s30 + $0x78] sm:$0xf]  ;;  %v319_v4 = vld [vmem:[%s4278_s30 + $0x80] sm:$0x1] }
  0x39   : > { %v526_v28 = vshll.u32 %v310_v15, 16  ;;  %v507_v29 = vshrl.u32 %v308_v16, 16  ;;  %v538_v9 = vrot.slane %v537_v13, 4  ;;  %v4376_v30 = vrot.slane %v540_v14, 5  ;;  %v323_v11 = vld [vmem:[%s4278_s30 + $0x90] sm:$0xf] }
  0x3a   : > { %v510_v31 = vshll.u32 %v308_v16, 16  ;;  %v4381_v33 = vrot.slane %v564_v18, 5  ;;  %v476_v34 = vrot.slane %v475_v19, 4  ;;  %v480_v35 = vrot.slane %v478_v20, 5 }
  0x3b   : > { %742 = vrot.lane.b32.xlu1 %v471_v55, %s4189_s4  ;;  %v509_v37 = vrot.slane %v507_v29, 4  ;;  %v570_v38 = vrot.slane %v568_v22, 4  ;;  %v557_v39 = vrot.slane %v555_v23, 4  ;;  %v560_v36 = vrot.slane %v558_v24, 5 }
  0x3c   : > { %740 = vrot.lane.b32.xlu0 %v457_v56, %s4189_s4  ;;  %v512_v40 = vrot.slane %v510_v31, 5  ;;  %v524_v41 = vrot.slane %v523_v27, 4  ;;  %v528_v42 = vrot.slane %v526_v28, 5  ;;  %v574_v44 = vshll.u32 %v316_v32, 16  ;;  %v325_v27 = vld [vmem:[%s4278_s30 + $0x98] sm:$0x1] }
  0x3d   : > { %v543_v46 = vsel %vm4289_vm2, %v538_v9, %v4376_v30  ;;  %v544_v47 = vshrl.u32 %v4355_v1, 16  ;;  %v481_v48 = vsel %vm4289_vm2, %v476_v34, %v480_v35  ;;  %v571_v50 = vor.u32 %v570_v38, %v4381_v33  ;;  %v329_v38 = vld [vmem:[%s4278_s30 + $0xa8] sm:$0xf] }
  0x3e   : > { %v513_v49 = vor.u32 %v512_v40, %v509_v37  ;;  %v561_v51 = vor.u32 %v560_v36, %v557_v39  ;;  %v603_v52 = vshrl.u32 %v320_v43, 16  ;;  %v606_v53 = vshll.u32 %v320_v43, 16  ;;  %v327_v40 = vld [vmem:[%s4278_s30 + $0xa0] sm:$0xf] }
  0x3f   : > { %738 = vrot.lane.b32.xlu2 %v447_v17, %s4189_s4  ;;  %v529_v54 = vsel %vm4289_vm2, %v524_v41, %v528_v42  ;;  %v588_v55 = vshll.u32 %v318_v45, 16  ;;  %v592_v56 = vshrl.u32 %v318_v45, 16  ;;  %v576_v57 = vrot.slane %v574_v44, 5 }
  0x40   : > { %v514_v58 = vrot.slane %v513_v49, 4  ;;  %v546_v61 = vrot.slane %v544_v47, 4  ;;  %v572_v62 = vrot.slane %v571_v50, 4  ;;  %v562_v63 = vrot.slane %v561_v51, 4 }
  0x41   : > { %v605_v0 = vrot.slane %v603_v52, 4  ;;  %v608_v1 = vrot.slane %v606_v53, 5  ;;  %v4403_v5 = vrot.slane %v588_v55, 5  ;;  %v594_v6 = vrot.slane %v592_v56, 4  ;;  %v330_v53 = vld [vmem:[%s4278_s30 + $0xac] sm:$0xf] }
  0x42   : > { %v636_v7 = vshll.u32 %v324_v59, 16  ;;  %v640_v8 = vshrl.u32 %v324_v59, 16  ;;  %v550_v12 = vshll.u32 %v313_v60, 16  ;;  %v519_v13 = vsel %vm4289_vm2, %v514_v58, %v4360_v10  ;;  %v322_v55 = vld [vmem:[%s4278_s30 + $0x8c] sm:$0x1] }
  0x43   : > { %748 = vrot.lane.b32.xlu1 %v505_v21, %s4189_s4  ;;  %v547_v14 = vor.u32 %v546_v61, %v4376_v30  ;;  %v579_v15 = vshrl.u32 %v317_v2, 16  ;;  %v582_v16 = vshll.u32 %v317_v2, 16  ;;  %v577_v17 = vsel %vm4289_vm2, %v572_v62, %v576_v57  ;;  %v328_v59 = vld [vmem:[%s4278_s30 + $0xa4] sm:$0x1]  ;;  %v326_v60 = vld [vmem:[%s4278_s30 + $0x9c] sm:$0xf] }
  0x44   : > { %746 = vrot.lane.b32.xlu0 %v495_v26, %s4189_s4  ;;  %v567_v18 = vsel %vm4289_vm2, %v562_v63, %v4381_v33  ;;  %v609_v19 = vor.u32 %v608_v1, %v605_v0  ;;  %v612_v20 = vshll.u32 %v321_v3, 16  ;;  %v595_v21 = vor.u32 %v594_v6, %v4403_v5  ;;  %v333_v0 = vld [vmem:[%s4278_s30 + $0xb8] sm:$0xf] }
  0x45   : > { %v598_v22 = vshll.u32 %v319_v4, 16  ;;  %v627_v23 = vshrl.u32 %v323_v11, 16  ;;  %v630_v24 = vshll.u32 %v323_v11, 16  ;;  %v4417_v10 = vrot.slane %v636_v7, 5 }
  0x46   : > { %v642_v26 = vrot.slane %v640_v8, 4  ;;  %v548_v28 = vrot.slane %v547_v14, 4  ;;  %v552_v29 = vrot.slane %v550_v12, 5  ;;  %v581_v9 = vrot.slane %v579_v15, 4 }
  0x47   : > { %744 = vrot.lane.b32.xlu2 %v481_v48, %s4189_s4  ;;  %v584_v30 = vrot.slane %v582_v16, 5  ;;  %v610_v31 = vrot.slane %v609_v19, 4  ;;  %v614_v32 = vrot.slane %v612_v20, 5  ;;  %v596_v33 = vrot.slane %v595_v21, 4 }
  0x48   : > { %v600_v34 = vrot.slane %v598_v22, 5  ;;  %v629_v35 = vrot.slane %v627_v23, 4  ;;  %v632_v37 = vrot.slane %v630_v24, 5  ;;  %v643_v39 = vor.u32 %v642_v26, %v4417_v10 }
  0x49   : > { %v646_v36 = vshll.u32 %v325_v27, 16  ;;  %v616_v41 = vshrl.u32 %v321_v3, 16  ;;  %v553_v42 = vsel %vm4289_vm2, %v548_v28, %v552_v29  ;;  %v585_v43 = vor.u32 %v584_v30, %v581_v9  ;;  %v332_v3 = vld [vmem:[%s4278_s30 + $0xb4] sm:$0xf]  ;;  %v334_v29 = vld [vmem:[%s4278_s30 + $0xbc] sm:$0x1] }
  0x4a   : > { %v615_v44 = vsel %vm4289_vm2, %v610_v31, %v614_v32  ;;  %v675_v45 = vshrl.u32 %v329_v38, 16  ;;  %v601_v47 = vsel %vm4289_vm2, %v596_v33, %v600_v34  ;;  %v633_v48 = vor.u32 %v632_v37, %v629_v35 }
  0x4b   : > { %754 = vrot.lane.b32.xlu1 %v543_v46, %s4189_s4  ;;  %v678_v46 = vshll.u32 %v329_v38, 16  ;;  %v660_v49 = vshll.u32 %v327_v40, 16  ;;  %v664_v50 = vshrl.u32 %v327_v40, 16  ;;  %v644_v51 = vrot.slane %v643_v39, 4 }
  0x4c   : > { %752 = vrot.lane.b32.xlu0 %v529_v54, %s4189_s4  ;;  %v648_v52 = vrot.slane %v646_v36, 5  ;;  %v586_v54 = vrot.slane %v585_v43, 4  ;;  %v618_v56 = vrot.slane %v616_v41, 4  ;;  %v677_v57 = vrot.slane %v675_v45, 4  ;;  %v331_v43 = vld [vmem:[%s4278_s30 + $0xb0] sm:$0x1] }
  0x4d   : > { %v680_v58 = vrot.slane %v678_v46, 5  ;;  %v634_v61 = vrot.slane %v633_v48, 4  ;;  %v4438_v62 = vrot.slane %v660_v49, 5  ;;  %v666_v63 = vrot.slane %v664_v50, 4  ;;  %v852_v45 = vld [vmem:[%s4278_s30 + $0x4] sm:$0xf] }
  0x4e   : > { %v649_v1 = vsel %vm4289_vm2, %v644_v51, %v648_v52  ;;  %v684_v2 = vshll.u32 %v330_v53, 16  ;;  %v622_v4 = vshll.u32 %v322_v55, 16  ;;  %v591_v6 = vsel %vm4289_vm2, %v586_v54, %v4403_v5  ;;  %v854_v50 = vld [vmem:[%s4278_s30 + $0xc] sm:$0xe]  ;;  %v4475_v52 = vld [vmem:[%s4278_s30 + $0x10] sm:$0xf] }
  0x4f   : > { %750 = vrot.lane.b32.xlu2 %v519_v13, %s4189_s4  ;;  %v619_v7 = vor.u32 %v618_v56, %v614_v32  ;;  %v651_v8 = vshrl.u32 %v326_v60, 16  ;;  %v654_v11 = vshll.u32 %v326_v60, 16  ;;  %v681_v12 = vor.u32 %v680_v58, %v677_v57  ;;  %v858_v60 = vld [vmem:[%s4278_s30 + $0x1c] sm:$0xf] }
  0x50   : > { %v670_v13 = vshll.u32 %v328_v59, 16  ;;  %v708_v14 = vshll.u32 %v333_v0, 16  ;;  %v712_v15 = vshrl.u32 %v333_v0, 16  ;;  %v639_v16 = vsel %vm4289_vm2, %v634_v61, %v4417_v10  ;;  %v224_v0 = vld [vmem:[%s4278_s30 + $0xc] sm:$0xf] }
  0x51   : > { %v702_v19 = vshll.u32 %v332_v3, 16  ;;  %v620_v5 = vrot.slane %v619_v7, 4  ;;  %v624_v20 = vrot.slane %v622_v4, 5  ;;  %v653_v21 = vrot.slane %v651_v8, 4  ;;  %v851_v4 = vld [vmem:[%s4278_s30] sm:$0xe] }
  0x52   : > { %v656_v22 = vrot.slane %v654_v11, 5  ;;  %v682_v23 = vrot.slane %v681_v12, 4  ;;  %v686_v24 = vrot.slane %v684_v2, 5  ;;  %v710_v26 = vrot.slane %v708_v14, 5  ;;  %v859_v7 = vld [vmem:[%s4278_s30 + $0x20] sm:$0x1] }
  0x53   : > { %760 = vrot.lane.b32.xlu1 %v577_v17, %s4189_s4  ;;  %v667_v17 = vor.u32 %v666_v63, %v4438_v62  ;;  %v714_v27 = vrot.slane %v712_v15, 4  ;;  %v672_v28 = vrot.slane %v670_v13, 5  ;;  %v704_v30 = vrot.slane %v702_v19, 5  ;;  %v857_v8 = vld [vmem:[%s4278_s30 + $0x18] sm:$0xe] }
  0x54   : > { %758 = vrot.lane.b32.xlu0 %v567_v18, %s4189_s4  ;;  %v699_v18 = vshrl.u32 %v332_v3, 16  ;;  %v688_v31 = vshrl.u32 %v330_v53, 16  ;;  %v625_v32 = vsel %vm4289_vm2, %v620_v5, %v624_v20  ;;  %v657_v33 = vor.u32 %v656_v22, %v653_v21  ;;  %v853_v53 = vld [vmem:[%s4278_s30 + $0x8] sm:$0x1]  ;;  %v856_v19 = vld [vmem:[%s4278_s30 + $0x14] sm:$0x1] }
  0x55   : > { %v668_v10 = vrot.slane %v667_v17, 4  ;;  %v687_v34 = vsel %vm4289_vm2, %v682_v23, %v686_v24  ;;  %v715_v35 = vor.u32 %v714_v27, %v710_v26  ;;  %v718_v37 = vshll.u32 %v334_v29, 16  ;;  %v861_v15 = vld [vmem:[%s4278_s30 + $0x28] sm:$0xf]  ;;  %v864_v20 = vld [vmem:[%s4278_s30 + $0x34] sm:$0xf] }
  0x56   : > { %v701_v9 = vrot.slane %v699_v18, 4  ;;  %v658_v36 = vrot.slane %v657_v33, 4  ;;  %v690_v40 = vrot.slane %v688_v31, 4  ;;  %v694_v48 = vshll.u32 %v331_v43, 16  ;;  %v863_v18 = vld [vmem:[%s4278_s30 + $0x30] sm:$0xe] }
  0x57   : > { %756 = vrot.lane.b32.xlu2 %v553_v42, %s4189_s4  ;;  %v673_v38 = vsel %vm4289_vm2, %v668_v10, %v672_v28  ;;  %v716_v41 = vrot.slane %v715_v35, 4  ;;  %v720_v42 = vrot.slane %v718_v37, 5  ;;  %v952_v54 = vrot.slane %v852_v45, 5  ;;  %v862_v22 = vld [vmem:[%s4278_s30 + $0x2c] sm:$0x1] }
  0x58   : > { %v705_v39 = vor.u32 %v704_v30, %v701_v9  ;;  %v663_v46 = vsel %vm4289_vm2, %v658_v36, %v4438_v62  ;;  %v3653_v55 = vrot.slane %v854_v50, 9  ;;  %v696_v57 = vrot.slane %v694_v48, 5  ;;  %v867_v29 = vld [vmem:[%s4278_s30 + $0x40] sm:$0xf]  ;;  %v866_v35 = vld [vmem:[%s4278_s30 + $0x3c] sm:$0xe] }
  0x59   : > { %v721_v49 = vsel %vm4289_vm2, %v716_v41, %v720_v42  ;;  %v959_v58 = vrot.slane %v4475_v52, 5  ;;  %v955_v59 = vrot.slane %v853_v53, 5  ;;  %v954_v62 = vrot.slane %v952_v54, 4  ;;  %v4579_v41 = vld [vmem:[%s4278_s30 + $0x4c] sm:$0xf] }
  0x5a   : > { %v4190_v63 = vmov 0   ;;  %v966_v3 = vrot.slane %v858_v60, 5  ;;  %v3652_v11 = vrot.slane %v851_v4, 9  ;;  %v969_v13 = vrot.slane %v859_v7, 5  ;;  %v865_v45 = vld [vmem:[%s4278_s30 + $0x38] sm:$0x1] }
  0x5b   : > { %766 = vrot.lane.b32.xlu1 %v615_v44, %s4189_s4  ;;  %v706_v44 = vrot.slane %v705_v39, 4  ;;  %189 = vst.msk [vmem:[#allocation2 + $0x8] sm:$0xf] %vm186_vm5, %v4190_v63  ;;  %4108 = vset.pattern.permute.xlu0 %v4190_v63  ;;  %v960_v2 = vsel %vm4483_vm6, %v3653_v55, %v959_v58  ;;  %v3654_v14 = vrot.slane %v857_v8, 9  ;;  %v973_v21 = vrot.slane %v861_v15, 5 }
  0x5c   : > { %764 = vrot.lane.b32.xlu0 %v601_v47, %s4189_s4  ;;  %v691_v47 = vor.u32 %v690_v40, %v686_v24  ;;  %4107 = vset.pattern.permute.xlu1 %v4190_v63  ;;  %257 = vst.msk [vmem:[#allocation2 + $0x8] sm:$0xf] %vm254_vm7, %v224_v0  ;;  %v968_v12 = vrot.slane %v966_v3, 4  ;;  %v961_v23 = vrot.slane %v959_v58, 4  ;;  %v962_v24 = vrot.slane %v856_v19, 5 }
  0x5d   : > { %v711_v51 = vsel %vm4289_vm2, %v706_v44, %v710_v26  ;;  %187 = vst.msk [vmem:[#allocation2] sm:$0xf] %vm186_vm5, %v4190_v63  ;;  %v967_v5 = vsel %vm4483_vm6, %v3654_v14, %v966_v3  ;;  %v3656_v26 = vrot.slane %v863_v18, 9  ;;  %v980_v27 = vrot.slane %v864_v20, 5  ;;  %v4599_v48 = vld [vmem:[%s4278_s30 + $0x58] sm:$0xf] }
  0x5e   : > { %v692_v56 = vrot.slane %v691_v47, 4  ;;  %188 = vst.msk [vmem:[#allocation2 + $0x4] sm:$0xf] %vm186_vm5, %v4190_v63  ;;  %v970_v17 = vsel %vm4483_vm6, %v968_v12, %v969_v13  ;;  %v975_v10 = vrot.slane %v973_v21, 4  ;;  %v976_v28 = vrot.slane %v862_v22, 5 }
  0x5f   : > { %762 = vrot.lane.b32.xlu2 %v591_v6, %s4189_s4  ;;  %v956_v6 = vsel %vm4483_vm6, %v954_v62, %v955_v59  ;;  %190 = vst.msk [vmem:[#allocation2 + $0xc] sm:$0xf] %vm186_vm5, %v4190_v63  ;;  %v963_v9 = vsel %vm4483_vm6, %v961_v23, %v962_v24  ;;  %v981_v30 = vsel %vm4483_vm6, %v3656_v26, %v980_v27  ;;  %v987_v31 = vrot.slane %v867_v29, 5  ;;  %v872_v47 = vld [vmem:[%s4278_s30 + $0x54] sm:$0xe] }
  0x60   : > { %191 = vst.msk [vmem:[#allocation2 + $0x10] sm:$0xf] %vm186_vm5, %v4190_v63  ;;  %v977_v33 = vsel %vm4483_vm6, %v975_v10, %v976_v28  ;;  %v3657_v40 = vrot.slane %v866_v35, 9  ;;  %v994_v44 = vrot.slane %v4579_v41, 5  ;;  %v982_v50 = vrot.slane %v980_v27, 4 }
  0x61   : > { %192 = vst.msk [vmem:[#allocation2 + $0x14] sm:$0xf] %vm186_vm5, %v4190_v63  ;;  %v222_v52 = vld [vmem:[%s4278_s30] sm:$0xf]  ;;  %v3659_v53 = vrot.slane %v872_v47, 9 }
  0x62   : > { %193 = vst.msk [vmem:[#allocation2 + $0x18] sm:$0xf] %vm186_vm5, %v4190_v63  ;;  %v876_v59 = vld [vmem:[%s4278_s30 + $0x64] sm:$0xf]  ;;  %v226_v62 = vld [vmem:[%s4278_s30 + $0x18] sm:$0xf] }
  0x63   : > { %772 = vrot.lane.b32.xlu1 %v649_v1, %s4189_s4  ;;  %v697_v1 = vsel %vm4289_vm2, %v692_v56, %v696_v57  ;;  %194 = vst.msk [vmem:[#allocation2 + $0x1c] sm:$0xf] %vm186_vm5, %v4190_v63  ;;  %v996_v57 = vrot.slane %v994_v44, 4  ;;  %v225_v0 = vld [vmem:[%s4278_s30 + $0x10] sm:$0xf] }
  0x64   : > { %770 = vrot.lane.b32.xlu0 %v639_v16, %s4189_s4  ;;  %195 = vst.msk [vmem:[#allocation2 + $0x20] sm:$0xf] %vm186_vm5, %v4190_v63  ;;  %v953_v16 = vsel %vm4483_vm6, %v3652_v11, %v952_v54  ;;  %v1001_v54 = vrot.slane %v4599_v48, 5  ;;  %v869_v3 = vld [vmem:[%s4278_s30 + $0x48] sm:$0xe] }
  0x65   : > { %196 = vst.msk [vmem:[#allocation2 + $0x24] sm:$0xf] %vm186_vm5, %v4190_v63  ;;  %v877_v7 = vld [vmem:[%s4278_s30 + $0x68] sm:$0x1]  ;;  %v875_v8 = vld [vmem:[%s4278_s30 + $0x60] sm:$0xe] }
  0x66   : > { %197 = vst.msk [vmem:[#allocation2 + $0x28] sm:$0xf] %vm186_vm5, %v4190_v63  ;;  %v227_v11 = vld [vmem:[%s4278_s30 + $0x1c] sm:$0xf]  ;;  %v3658_v12 = vrot.slane %v869_v3, 9  ;;  %v1011_v14 = vrot.slane %v877_v7, 5 }
  0x67   : > { %768 = vrot.lane.b32.xlu2 %v625_v32, %s4189_s4  ;;  %198 = vst.msk [vmem:[#allocation2 + $0x2c] sm:$0xf] %vm186_vm5, %v4190_v63  ;;  %v860_v32 = vld [vmem:[%s4278_s30 + $0x24] sm:$0xe]  ;;  %v229_v19 = vld [vmem:[%s4278_s30 + $0x28] sm:$0xf] }
  0x68   : > { %199 = vst.msk [vmem:[#allocation2 + $0x30] sm:$0xf] %vm186_vm5, %v4190_v63  ;;  %v3655_v37 = vrot.slane %v860_v32, 9  ;;  %v228_v20 = vld [vmem:[%s4278_s30 + $0x24] sm:$0xf]  ;;  %v995_v22 = vsel %vm4483_vm6, %v3658_v12, %v994_v44 }
  0x69   : > { %200 = vst.msk [vmem:[#allocation2 + $0x34] sm:$0xf] %vm186_vm5, %v4190_v63  ;;  %v230_v24 = vld [vmem:[%s4278_s30 + $0x30] sm:$0xf]  ;;  %v874_v26 = vld [vmem:[%s4278_s30 + $0x5c] sm:$0x1] }
  0x6a   : > { %201 = vst.msk [vmem:[#allocation2 + $0x38] sm:$0xf] %vm186_vm5, %v4190_v63  ;;  %v974_v42 = vsel %vm4483_vm6, %v3655_v37, %v973_v21  ;;  %v881_v21 = vld [vmem:[%s4278_s30 + $0x78] sm:$0xe]  ;;  %v4659_v10 = vld [vmem:[%s4278_s30 + $0x7c] sm:$0xf] }
  0x6b   : > { %778 = vrot.lane.b32.xlu1 %v687_v34, %s4189_s4  ;;  %202 = vst.msk [vmem:[#allocation2 + $0x3c] sm:$0xf] %vm186_vm5, %v4190_v63  ;;  %v868_v34 = vld [vmem:[%s4278_s30 + $0x44] sm:$0x1]  ;;  %v880_v29 = vld [vmem:[%s4278_s30 + $0x74] sm:$0x1] }
  0x6c   : > { %776 = vrot.lane.b32.xlu0 %v673_v38, %s4189_s4  ;;  %203 = vst.msk [vmem:[#allocation2 + $0x40] sm:$0xf] %vm186_vm5, %v4190_v63  ;;  %v989_v38 = vrot.slane %v987_v31, 4  ;;  %v990_v39 = vrot.slane %v868_v34, 5  ;;  %v3662_v32 = vrot.slane %v881_v21, 9 }
  0x6d   : > { %204 = vst.msk [vmem:[#allocation2 + $0x44] sm:$0xf] %vm186_vm5, %v4190_v63  ;;  %v885_v34 = vld [vmem:[%s4278_s30 + $0x88] sm:$0xf]  ;;  %v233_v41 = vld [vmem:[%s4278_s30 + $0x40] sm:$0xf] }
  0x6e   : > { %205 = vst.msk [vmem:[#allocation2 + $0x48] sm:$0xf] %vm186_vm5, %v4190_v63  ;;  %v991_v43 = vsel %vm4483_vm6, %v989_v38, %v990_v39  ;;  %v1018_v39 = vrot.slane %v880_v29, 5  ;;  %v886_v48 = vld [vmem:[%s4278_s30 + $0x8c] sm:$0x1] }
  0x6f   : > { %774 = vrot.lane.b32.xlu2 %v663_v46, %s4189_s4  ;;  %206 = vst.msk [vmem:[#allocation2 + $0x4c] sm:$0xf] %vm186_vm5, %v4190_v63  ;;  %v988_v46 = vsel %vm4483_vm6, %v3657_v40, %v987_v31  ;;  %v1004_v31 = vrot.slane %v874_v26, 5  ;;  %v239_v3 = vld [vmem:[%s4278_s30 + $0x64] sm:$0xf] }
  0x70   : > { %207 = vst.msk [vmem:[#allocation2 + $0x50] sm:$0xf] %vm186_vm5, %v4190_v63  ;;  %v244_v26 = vld [vmem:[%s4278_s30 + $0x84] sm:$0xf] }
  0x71   : > { %208 = vst.msk [vmem:[#allocation2 + $0x54] sm:$0xf] %vm186_vm5, %v4190_v63 }
  0x72   : > { %209 = vst.msk [vmem:[#allocation2 + $0x58] sm:$0xf] %vm186_vm5, %v4190_v63 }
  0x73   : > { %784 = vrot.lane.b32.xlu1 %v721_v49, %s4189_s4  ;;  %210 = vst.msk [vmem:[#allocation2 + $0x5c] sm:$0xf] %vm186_vm5, %v4190_v63  ;;  %v871_v49 = vld [vmem:[%s4278_s30 + $0x50] sm:$0x1] }
  0x74   : > { %782 = vrot.lane.b32.xlu0 %v711_v51, %s4189_s4  ;;  %211 = vst.msk [vmem:[#allocation2 + $0x60] sm:$0xf] %vm186_vm5, %v4190_v63  ;;  %v983_v51 = vrot.slane %v865_v45, 5  ;;  %v997_v58 = vrot.slane %v871_v49, 5  ;;  %v235_v45 = vld [vmem:[%s4278_s30 + $0x4c] sm:$0xf] }
  0x75   : > { %212 = vst.msk [vmem:[#allocation2 + $0x64] sm:$0xf] %vm186_vm5, %v4190_v63  ;;  %v234_v49 = vld [vmem:[%s4278_s30 + $0x48] sm:$0xf] }
  0x76   : > { %213 = vst.msk [vmem:[#allocation2 + $0x68] sm:$0xf] %vm186_vm5, %v4190_v63  ;;  %v998_v4 = vsel %vm4483_vm6, %v996_v57, %v997_v58 }
  0x77   : > { %780 = vrot.lane.b32.xlu2 %v697_v1, %s4189_s4  ;;  %214 = vst.msk [vmem:[#allocation2 + $0x6c] sm:$0xf] %vm186_vm5, %v4190_v63  ;;  %v984_v1 = vsel %vm4483_vm6, %v982_v50, %v983_v51  ;;  %v884_v50 = vld [vmem:[%s4278_s30 + $0x84] sm:$0xe]  ;;  %v236_v51 = vld [vmem:[%s4278_s30 + $0x54] sm:$0xf] }
  0x78   : > { %215 = vst.msk [vmem:[#allocation2 + $0x70] sm:$0xf] %vm186_vm5, %v4190_v63  ;;  %v3663_v57 = vrot.slane %v884_v50, 9  ;;  %v898_v50 = vld [vmem:[%s4278_s30 + $0xbc] sm:$0x1] }
  0x79   : > { %216 = vst.msk [vmem:[#allocation2 + $0x74] sm:$0xf] %vm186_vm5, %v4190_v63 }
  0x7a   : > { %217 = vst.msk [vmem:[#allocation2 + $0x78] sm:$0xf] %vm186_vm5, %v4190_v63 }
  0x7b   : > { %1066 = vrot.lane.b32.xlu1 %v960_v2, %s4191_s5  ;;  %218 = vst.msk [vmem:[#allocation2 + $0x7c] sm:$0xf] %vm186_vm5, %v4190_v63  ;;  %v1002_v63 = vsel %vm4483_vm6, %v3659_v53, %v1001_v54  ;;  %v1008_v2 = vrot.slane %v876_v59, 5  ;;  %v4700_v59 = vld [vmem:[%s4278_s30 + $0x94] sm:$0xf] }
  0x7c   : > { %1064 = vrot.lane.b32.xlu0 %v956_v6, %s4191_s5  ;;  %255 = vst.msk [vmem:[#allocation2] sm:$0xf] %vm254_vm7, %v222_v52  ;;  %v223_v6 = vld [vmem:[%s4278_s30 + $0x4] sm:$0xf]  ;;  %v1036_v7 = vrot.slane %v4700_v59, 5 }
  0x7d   : > { %259 = vst.msk [vmem:[#allocation2 + $0x10] sm:$0xf] %vm254_vm7, %v226_v62  ;;  %v1010_v13 = vrot.slane %v1008_v2, 4  ;;  %v890_v62 = vld [vmem:[%s4278_s30 + $0x9c] sm:$0xe] }
  0x7e   : > { %258 = vst.msk [vmem:[#allocation2 + $0xc] sm:$0xf] %vm254_vm7, %v225_v0  ;;  %v4706_v0 = vld [vmem:[%s4278_s30 + $0xa0] sm:$0xf]  ;;  %v253_v59 = vld [vmem:[%s4278_s30 + $0xb8] sm:$0xf] }
  0x7f   : > { %1062 = vrot.lane.b32.xlu2 %v953_v16, %s4191_s5  ;;  %256 = vst.msk [vmem:[#allocation2 + $0x4] sm:$0xf] %vm254_vm7, %v223_v6  ;;  %v1012_v23 = vsel %vm4483_vm6, %v1010_v13, %v1011_v14  ;;  %v3665_v14 = vrot.slane %v890_v62, 9  ;;  %v252_v62 = vld [vmem:[%s4278_s30 + $0xb4] sm:$0xf] }
  0x80   : > { %260 = vst.msk [vmem:[#allocation2 + $0x14] sm:$0xf] %vm254_vm7, %v227_v11  ;;  %v889_v11 = vld [vmem:[%s4278_s30 + $0x98] sm:$0x1] }
  0x81   : > { %262 = vst.msk [vmem:[#allocation2 + $0x1c] sm:$0xf] %vm254_vm7, %v229_v19  ;;  %v1038_v19 = vrot.slane %v1036_v7, 4 }
  0x82   : > { %261 = vst.msk [vmem:[#allocation2 + $0x18] sm:$0xf] %vm254_vm7, %v228_v20  ;;  %v240_v20 = vld [vmem:[%s4278_s30 + $0x6c] sm:$0xf] }
  0x83   : > { %1072 = vrot.lane.b32.xlu1 %v970_v17, %s4191_s5  ;;  %v3660_v17 = vrot.slane %v875_v8, 9  ;;  %263 = vst.msk [vmem:[#allocation2 + $0x20] sm:$0xf] %vm254_vm7, %v230_v24  ;;  %v241_v8 = vld [vmem:[%s4278_s30 + $0x70] sm:$0xf] }
  0x84   : > { %1070 = vrot.lane.b32.xlu0 %v967_v5, %s4191_s5  ;;  %v4643_v5 = vld [vmem:[%s4278_s30 + $0x70] sm:$0xf]  ;;  %266 = vst.msk [vmem:[#allocation2 + $0x2c] sm:$0xf] %vm254_vm7, %v233_v41 }
  0x85   : > { %v1009_v27 = vsel %vm4483_vm6, %v3660_v17, %v1008_v2  ;;  %v1015_v28 = vrot.slane %v4643_v5, 5  ;;  %268 = vst.msk [vmem:[#allocation2 + $0x34] sm:$0xf] %vm254_vm7, %v235_v45  ;;  %v1039_v5 = vrot.slane %v889_v11, 5  ;;  %v246_v41 = vld [vmem:[%s4278_s30 + $0x90] sm:$0xf] }
  0x86   : > { %267 = vst.msk [vmem:[#allocation2 + $0x30] sm:$0xf] %vm254_vm7, %v234_v49  ;;  %v892_v45 = vld [vmem:[%s4278_s30 + $0xa4] sm:$0x1]  ;;  %v249_v49 = vld [vmem:[%s4278_s30 + $0xa0] sm:$0xf] }
  0x87   : > { %1068 = vrot.lane.b32.xlu2 %v963_v9, %s4191_s5  ;;  %v232_v9 = vld [vmem:[%s4278_s30 + $0x3c] sm:$0xf]  ;;  %v1017_v38 = vrot.slane %v1015_v28, 4  ;;  %269 = vst.msk [vmem:[#allocation2 + $0x38] sm:$0xf] %vm254_vm7, %v236_v51  ;;  %v1040_v29 = vsel %vm4483_vm6, %v1038_v19, %v1039_v5 }
  0x88   : > { %265 = vst.msk [vmem:[#allocation2 + $0x28] sm:$0xf] %vm254_vm7, %v232_v9  ;;  %v895_v9 = vld [vmem:[%s4278_s30 + $0xb0] sm:$0x1]  ;;  %v3670_v11 = vld [vmem:[%s4278_s30 + $0x18] sm:$0xf] }
  0x89   : > { %v731_v36 = vpop.permute.xlu2 %730  ;;  %v1019_v47 = vsel %vm4483_vm6, %v1017_v38, %v1018_v39  ;;  %272 = vst.msk [vmem:[#allocation2 + $0x44] sm:$0xf] %vm254_vm7, %v239_v3  ;;  %v247_v39 = vld [vmem:[%s4278_s30 + $0x94] sm:$0xf] }
  0x8a   : > { %823 = vst.msk [vmem:[#allocation2 + $0x10] sm:$0xf] %vm818_vm8, %v731_v36  ;;  %v231_v36 = vld [vmem:[%s4278_s30 + $0x34] sm:$0xf] }
  0x8b   : > { %1078 = vrot.lane.b32.xlu1 %v981_v30, %s4191_s5  ;;  %v1003_v30 = vrot.slane %v1001_v54, 4  ;;  %264 = vst.msk [vmem:[#allocation2 + $0x24] sm:$0xf] %vm254_vm7, %v231_v36  ;;  %v1032_v54 = vrot.slane %v886_v48, 5 }
  0x8c   : > { %1076 = vrot.lane.b32.xlu0 %v977_v33, %s4191_s5  ;;  %v1022_v33 = vrot.slane %v4659_v10, 5  ;;  %274 = vst.msk [vmem:[#allocation2 + $0x4c] sm:$0xf] %vm254_vm7, %v241_v8  ;;  %v243_v10 = vld [vmem:[%s4278_s30 + $0x7c] sm:$0xf] }
  0x8d   : > { %273 = vst.msk [vmem:[#allocation2 + $0x48] sm:$0xf] %vm254_vm7, %v240_v20  ;;  %v3671_v8 = vld [vmem:[%s4278_s30 + $0x1c] sm:$0xf]  ;;  %v3672_v20 = vld [vmem:[%s4278_s30 + $0x24] sm:$0xf] }
  0x8e   : > { %v1023_v44 = vsel %vm4483_vm6, %v3662_v32, %v1022_v33  ;;  %v1024_v12 = vrot.slane %v1022_v33, 4  ;;  %277 = vst.msk [vmem:[#allocation2 + $0x58] sm:$0xf] %vm254_vm7, %v244_v26 }
  0x8f   : > { %1074 = vrot.lane.b32.xlu2 %v974_v42, %s4191_s5  ;;  %v1029_v42 = vrot.slane %v885_v34, 5  ;;  %276 = vst.msk [vmem:[#allocation2 + $0x54] sm:$0xf] %vm254_vm7, %v243_v10  ;;  %v1053_v34 = vrot.slane %v895_v9, 5  ;;  %v3680_v10 = vld [vmem:[%s4278_s30 + $0x54] sm:$0xf] }
  0x90   : > { %280 = vst.msk [vmem:[#allocation2 + $0x64] sm:$0xf] %vm254_vm7, %v247_v39  ;;  %v3686_v39 = vld [vmem:[%s4278_s30 + $0x78] sm:$0xf] }
  0x91   : > { %v733_v55 = vpop.permute.xlu2 %732  ;;  %v1031_v53 = vrot.slane %v1029_v42, 4  ;;  %v1030_v6 = vsel %vm4483_vm6, %v3663_v57, %v1029_v42  ;;  %279 = vst.msk [vmem:[#allocation2 + $0x60] sm:$0xf] %vm254_vm7, %v246_v41  ;;  %v251_v57 = vld [vmem:[%s4278_s30 + $0xac] sm:$0xf] }
  0x92   : > { %824 = vst.msk [vmem:[#allocation2 + $0x14] sm:$0xf] %vm818_vm8, %v733_v55 }
  0x93   : > { %1084 = vrot.lane.b32.xlu1 %v991_v43, %s4191_s5  ;;  %v1005_v43 = vsel %vm4483_vm6, %v1003_v30, %v1004_v31  ;;  %v1033_v2 = vsel %vm4483_vm6, %v1031_v53, %v1032_v54  ;;  %v245_v30 = vld [vmem:[%s4278_s30 + $0x88] sm:$0xf]  ;;  %282 = vst.msk [vmem:[#allocation2 + $0x6c] sm:$0xf] %vm254_vm7, %v249_v49  ;;  %v3687_v49 = vld [vmem:[%s4278_s30 + $0x7c] sm:$0xf] }
  0x94   : > { %1082 = vrot.lane.b32.xlu0 %v988_v46, %s4191_s5  ;;  %v878_v46 = vld [vmem:[%s4278_s30 + $0x6c] sm:$0xe]  ;;  %v893_v31 = vld [vmem:[%s4278_s30 + $0xa8] sm:$0xe]  ;;  %278 = vst.msk [vmem:[#allocation2 + $0x5c] sm:$0xf] %vm254_vm7, %v245_v30 }
  0x95   : > { %v727_v56 = vpop.permute.xlu1 %726  ;;  %v3661_v52 = vrot.slane %v878_v46, 9  ;;  %v3666_v38 = vrot.slane %v893_v31, 9  ;;  %v250_v46 = vld [vmem:[%s4278_s30 + $0xa8] sm:$0xf]  ;;  %284 = vst.msk [vmem:[#allocation2 + $0x74] sm:$0xf] %vm254_vm7, %v251_v57 }
  0x96   : > { %821 = vst.msk [vmem:[#allocation2 + $0x8] sm:$0xf] %vm818_vm8, %v727_v56  ;;  %v723_v60 = vpop.permute.xlu0 %722  ;;  %v3678_v31 = vld [vmem:[%s4278_s30 + $0x48] sm:$0xf] }
  0x97   : > { %819 = vst.msk [vmem:[#allocation2] sm:$0xf] %vm818_vm8, %v723_v60  ;;  %1080 = vrot.lane.b32.xlu2 %v984_v1, %s4191_s5  ;;  %v238_v60 = vld [vmem:[%s4278_s30 + $0x60] sm:$0xf]  ;;  %v237_v1 = vld [vmem:[%s4278_s30 + $0x58] sm:$0xf] }
  0x98   : > { %271 = vst.msk [vmem:[#allocation2 + $0x40] sm:$0xf] %vm254_vm7, %v238_v60 }
  0x99   : > { %v739_v15 = vpop.permute.xlu2 %738  ;;  %270 = vst.msk [vmem:[#allocation2 + $0x3c] sm:$0xf] %vm254_vm7, %v237_v1  ;;  %v896_v1 = vld [vmem:[%s4278_s30 + $0xb4] sm:$0xe] }
  0x9a   : > { %827 = vst.msk [vmem:[#allocation2 + $0x20] sm:$0xf] %vm818_vm8, %v739_v15  ;;  %v1043_v15 = vrot.slane %v4706_v0, 5  ;;  %v3668_v0 = vld [vmem:[%s4278_s30 + $0xc] sm:$0xf] }
  0x9b   : > { %1090 = vrot.lane.b32.xlu1 %v1002_v63, %s4191_s5  ;;  %v1016_v63 = vsel %vm4483_vm6, %v3661_v52, %v1015_v28  ;;  %v887_v28 = vld [vmem:[%s4278_s30 + $0x90] sm:$0xe]  ;;  %v1046_v52 = vrot.slane %v892_v45, 5  ;;  %283 = vst.msk [vmem:[#allocation2 + $0x70] sm:$0xf] %vm254_vm7, %v250_v46 }
  0x9c   : > { %1088 = vrot.lane.b32.xlu0 %v998_v4, %s4191_s5  ;;  %v883_v4 = vld [vmem:[%s4278_s30 + $0x80] sm:$0x1]  ;;  %v3664_v32 = vrot.slane %v887_v28, 9  ;;  %v1045_v51 = vrot.slane %v1043_v15, 4  ;;  %286 = vst.msk [vmem:[#allocation2 + $0x7c] sm:$0xf] %vm254_vm7, %v253_v59 }
  0x9d   : > { %v729_v16 = vpop.permute.xlu1 %728  ;;  %v1025_v13 = vrot.slane %v883_v4, 5  ;;  %285 = vst.msk [vmem:[#allocation2 + $0x78] sm:$0xf] %vm254_vm7, %v252_v62  ;;  %v3679_v28 = vld [vmem:[%s4278_s30 + $0x4c] sm:$0xf] }
  0x9e   : > { %822 = vst.msk [vmem:[#allocation2 + $0xc] sm:$0xf] %vm818_vm8, %v729_v16  ;;  %v725_v18 = vpop.permute.xlu0 %724  ;;  %v894_v16 = vld [vmem:[%s4278_s30 + $0xac] sm:$0xf]  ;;  %v1037_v42 = vsel %vm4483_vm6, %v3664_v32, %v1036_v7  ;;  %v1047_v60 = vsel %vm4483_vm6, %v1045_v51, %v1046_v52  ;;  %v3683_v32 = vld [vmem:[%s4278_s30 + $0x64] sm:$0xf] }
  0x9f   : > { %820 = vst.msk [vmem:[#allocation2 + $0x4] sm:$0xf] %vm818_vm8, %v725_v18  ;;  %1086 = vrot.lane.b32.xlu2 %v995_v22, %s4191_s5  ;;  %v242_v22 = vld [vmem:[%s4278_s30 + $0x78] sm:$0xf]  ;;  %v1026_v24 = vsel %vm4483_vm6, %v1024_v12, %v1025_v13  ;;  %v3688_v45 = vld [vmem:[%s4278_s30 + $0x84] sm:$0xf] }
  0xa0   : > { %275 = vst.msk [vmem:[#allocation2 + $0x50] sm:$0xf] %vm254_vm7, %v242_v22  ;;  %v3676_v22 = vld [vmem:[%s4278_s30 + $0x3c] sm:$0xf]  ;;  %v3691_v51 = vld [vmem:[%s4278_s30 + $0x94] sm:$0xf] }
  0xa1   : > { %v745_v35 = vpop.permute.xlu2 %744  ;;  %v3701_v52 = vld [vmem:[%s4278_s30 + $0x10] sm:$0xf] }
  0xa2   : > { %830 = vst.msk [vmem:[#allocation2 + $0x2c] sm:$0xf] %vm818_vm8, %v745_v35  ;;  %v1446_v57 = vshll.u32 %v3701_v52, 16  ;;  %v3690_v59 = vld [vmem:[%s4278_s30 + $0x90] sm:$0xf] }
  0xa3   : > { %1096 = vrot.lane.b32.xlu1 %v1012_v23, %s4191_s5  ;;  %v1050_v23 = vrot.slane %v894_v16, 5  ;;  %v3674_v16 = vld [vmem:[%s4278_s30 + $0x30] sm:$0xf] }
  0xa4   : > { %1094 = vrot.lane.b32.xlu0 %v1009_v27, %s4191_s5  ;;  %v1044_v27 = vsel %vm4483_vm6, %v3665_v14, %v1043_v15  ;;  %v3669_v15 = vld [vmem:[%s4278_s30 + $0x10] sm:$0xf] }
  0xa5   : > { %v737_v37 = vpop.permute.xlu1 %736  ;;  %v1052_v33 = vrot.slane %v1050_v23, 4 }
  0xa6   : > { %826 = vst.msk [vmem:[#allocation2 + $0x1c] sm:$0xf] %vm818_vm8, %v737_v37  ;;  %v735_v40 = vpop.permute.xlu0 %734 }
  0xa7   : > { %825 = vst.msk [vmem:[#allocation2 + $0x18] sm:$0xf] %vm818_vm8, %v735_v40  ;;  %1092 = vrot.lane.b32.xlu2 %v1005_v43, %s4191_s5  ;;  %v897_v40 = vld [vmem:[%s4278_s30 + $0xb8] sm:$0xf]  ;;  %v248_v43 = vld [vmem:[%s4278_s30 + $0x9c] sm:$0xf] }
  0xa8   : > { %v1057_v48 = vrot.slane %v897_v40, 5  ;;  %281 = vst.msk [vmem:[#allocation2 + $0x68] sm:$0xf] %vm254_vm7, %v248_v43  ;;  %v3684_v43 = vld [vmem:[%s4278_s30 + $0x6c] sm:$0xf] }
  0xa9   : > { %v751_v55 = vpop.permute.xlu2 %750 }
  0xaa   : > { %833 = vst.msk [vmem:[#allocation2 + $0x38] sm:$0xf] %vm818_vm8, %v751_v55  ;;  %v1059_v55 = vrot.slane %v1057_v48, 4 }
  0xab   : > { %1102 = vrot.lane.b32.xlu1 %v1023_v44, %s4191_s5  ;;  %v1054_v44 = vsel %vm4483_vm6, %v1052_v33, %v1053_v34  ;;  %v3682_v33 = vld [vmem:[%s4278_s30 + $0x60] sm:$0xf] }
  0xac   : > { %1100 = vrot.lane.b32.xlu0 %v1019_v47, %s4191_s5  ;;  %v1051_v47 = vsel %vm4483_vm6, %v3666_v38, %v1050_v23  ;;  %v3681_v38 = vld [vmem:[%s4278_s30 + $0x58] sm:$0xf] }
  0xad   : > { %v743_v56 = vpop.permute.xlu1 %742 }
  0xae   : > { %829 = vst.msk [vmem:[#allocation2 + $0x28] sm:$0xf] %vm818_vm8, %v743_v56  ;;  %v741_v58 = vpop.permute.xlu0 %740  ;;  %v1060_v56 = vrot.slane %v898_v50, 5  ;;  %v3692_v50 = vld [vmem:[%s4278_s30 + $0x9c] sm:$0xf] }
  0xaf   : > { %828 = vst.msk [vmem:[#allocation2 + $0x24] sm:$0xf] %vm818_vm8, %v741_v58  ;;  %1098 = vrot.lane.b32.xlu2 %v1016_v63, %s4191_s5 }
  0xb0   : > { %v1061_v63 = vsel %vm4483_vm6, %v1059_v55, %v1060_v56 }
  0xb1   : > { %v757_v17 = vpop.permute.xlu2 %756 }
  0xb2   : > { %836 = vst.msk [vmem:[#allocation2 + $0x44] sm:$0xf] %vm818_vm8, %v757_v17  ;;  %v3673_v17 = vld [vmem:[%s4278_s30 + $0x28] sm:$0xf] }
  0xb3   : > { %1108 = vrot.lane.b32.xlu1 %v1033_v2, %s4191_s5  ;;  %v3667_v2 = vrot.slane %v896_v1, 9  ;;  %v3694_v1 = vld [vmem:[%s4278_s30 + $0xa8] sm:$0xf] }
  0xb4   : > { %1106 = vrot.lane.b32.xlu0 %v1030_v6, %s4191_s5 }
  0xb5   : > { %v749_v18 = vpop.permute.xlu1 %748  ;;  %v1058_v7 = vsel %vm4483_vm6, %v3667_v2, %v1057_v48 }
  0xb6   : > { %832 = vst.msk [vmem:[#allocation2 + $0x34] sm:$0xf] %vm818_vm8, %v749_v18  ;;  %v747_v21 = vpop.permute.xlu0 %746 }
  0xb7   : > { %831 = vst.msk [vmem:[#allocation2 + $0x30] sm:$0xf] %vm818_vm8, %v747_v21  ;;  %1104 = vrot.lane.b32.xlu2 %v1026_v24, %s4191_s5  ;;  %v3677_v21 = vld [vmem:[%s4278_s30 + $0x40] sm:$0xf] }
  0xb9   : > { %v763_v35 = vpop.permute.xlu2 %762 }
  0xba   : > { %839 = vst.msk [vmem:[#allocation2 + $0x50] sm:$0xf] %vm818_vm8, %v763_v35 }
  0xbb   : > { %1114 = vrot.lane.b32.xlu1 %v1044_v27, %s4191_s5  ;;  %v3675_v27 = vld [vmem:[%s4278_s30 + $0x34] sm:$0xf] }
  0xbc   : > { %1112 = vrot.lane.b32.xlu0 %v1040_v29, %s4191_s5 }
  0xbd   : > { %v755_v37 = vpop.permute.xlu1 %754 }
  0xbe   : > { %835 = vst.msk [vmem:[#allocation2 + $0x40] sm:$0xf] %vm818_vm8, %v755_v37  ;;  %v753_v36 = vpop.permute.xlu0 %752 }
  0xbf   : > { %834 = vst.msk [vmem:[#allocation2 + $0x3c] sm:$0xf] %vm818_vm8, %v753_v36  ;;  %1110 = vrot.lane.b32.xlu2 %v1037_v42, %s4191_s5  ;;  %v3685_v36 = vld [vmem:[%s4278_s30 + $0x70] sm:$0xf] }
  0xc1   : > { %v769_v53 = vpop.permute.xlu2 %768 }
  0xc2   : > { %842 = vst.msk [vmem:[#allocation2 + $0x5c] sm:$0xf] %vm818_vm8, %v769_v53 }
  0xc3   : > { %1120 = vrot.lane.b32.xlu1 %v1054_v44, %s4191_s5  ;;  %v3689_v44 = vld [vmem:[%s4278_s30 + $0x88] sm:$0xf] }
  0xc4   : > { %1118 = vrot.lane.b32.xlu0 %v1051_v47, %s4191_s5 }
  0xc5   : > { %v761_v54 = vpop.permute.xlu1 %760 }
  0xc6   : > { %838 = vst.msk [vmem:[#allocation2 + $0x4c] sm:$0xf] %vm818_vm8, %v761_v54  ;;  %v759_v58 = vpop.permute.xlu0 %758  ;;  %v3700_v54 = vld [vmem:[%s4278_s30 + $0xc] sm:$0xf] }
  0xc7   : > { %837 = vst.msk [vmem:[#allocation2 + $0x48] sm:$0xf] %vm818_vm8, %v759_v58  ;;  %1116 = vrot.lane.b32.xlu2 %v1047_v60, %s4191_s5  ;;  %v1450_v58 = vshrl.u32 %v3701_v52, 16  ;;  %v1437_v60 = vshrl.u32 %v3700_v54, 16  ;;  %v1440_v62 = vshll.u32 %v3700_v54, 16 }
  0xc9   : > { %v775_v3 = vpop.permute.xlu2 %774  ;;  %v1452_v2 = vrot.slane %v1450_v58, 4 }
  0xca   : > { %845 = vst.msk [vmem:[#allocation2 + $0x68] sm:$0xf] %vm818_vm8, %v775_v3  ;;  %v1439_v3 = vrot.slane %v1437_v60, 4 }
  0xcb   : > { %1259 = vrot.lane.b32.xlu1 %v3668_v0, %s4192_s6  ;;  %v3695_v0 = vld [vmem:[%s4278_s30 + $0xac] sm:$0xf] }
  0xcc   : > { %1124 = vrot.lane.b32.xlu0 %v1061_v63, %s4191_s5  ;;  %v4881_v63 = vrot.slane %v1446_v57, 5 }
  0xcd   : > { %v767_v4 = vpop.permute.xlu1 %766 }
  0xce   : > { %841 = vst.msk [vmem:[#allocation2 + $0x58] sm:$0xf] %vm818_vm8, %v767_v4  ;;  %v765_v6 = vpop.permute.xlu0 %764  ;;  %v1442_v4 = vrot.slane %v1440_v62, 5 }
  0xcf   : > { %840 = vst.msk [vmem:[#allocation2 + $0x54] sm:$0xf] %vm818_vm8, %v765_v6  ;;  %1122 = vrot.lane.b32.xlu2 %v1058_v7, %s4191_s5  ;;  %v3702_v6 = vld [vmem:[%s4278_s30 + $0x14] sm:$0x1]  ;;  %s3560_s5 = scalar_lea.hbm %s5882_s3, %s4041_s28 }
  0xd1   : > { %v781_v12 = vpop.permute.xlu2 %780 }
  0xd2   : > { %848 = vst.msk [vmem:[#allocation2 + $0x74] sm:$0xf] %vm818_vm8, %v781_v12 }
  0xd3   : > { %1265 = vrot.lane.b32.xlu1 %v3671_v8, %s4192_s6 }
  0xd4   : > { %1263 = vrot.lane.b32.xlu0 %v3670_v11, %s4192_s6  ;;  %v3706_v11 = vld [vmem:[%s4278_s30 + $0x24] sm:$0xf] }
  0xd5   : > { %v773_v13 = vpop.permute.xlu1 %772 }
  0xd6   : > { %844 = vst.msk [vmem:[#allocation2 + $0x64] sm:$0xf] %vm818_vm8, %v773_v13  ;;  %v771_v14 = vpop.permute.xlu0 %770  ;;  %v3704_v13 = vld [vmem:[%s4278_s30 + $0x1c] sm:$0xf] }
  0xd7   : > { %843 = vst.msk [vmem:[#allocation2 + $0x60] sm:$0xf] %vm818_vm8, %v771_v14  ;;  %1261 = vrot.lane.b32.xlu2 %v3669_v15, %s4192_s6  ;;  %v1453_v14 = vor.u32 %v1452_v2, %v4881_v63  ;;  %v1456_v15 = vshll.u32 %v3702_v6, 16 }
  0xd9   : > { %v1063_v18 = vpop.permute.xlu2 %1062 }
  0xda   : > { %1159 = vst.msk [vmem:[#allocation2] sm:$0xf] %vm1158_vm9, %v1063_v18  ;;  %v3698_v18 = vld [vmem:[%s4278_s30 + $0xc0] sm:$0xf] }
  0xdb   : > { %1271 = vrot.lane.b32.xlu1 %v3674_v16, %s4192_s6  ;;  %v1443_v16 = vor.u32 %v1442_v4, %v1439_v3 }
  0xdc   : > { %1269 = vrot.lane.b32.xlu0 %v3673_v17, %s4192_s6  ;;  %v3693_v17 = vld [vmem:[%s4278_s30 + $0xa0] sm:$0xf] }
  0xdd   : > { %v779_v19 = vpop.permute.xlu1 %778 }
  0xde   : > { %847 = vst.msk [vmem:[#allocation2 + $0x70] sm:$0xf] %vm818_vm8, %v779_v19  ;;  %v777_v5 = vpop.permute.xlu0 %776  ;;  %v1485_v19 = vshrl.u32 %v3706_v11, 16 }
  0xdf   : > { %846 = vst.msk [vmem:[#allocation2 + $0x6c] sm:$0xf] %vm818_vm8, %v777_v5  ;;  %1267 = vrot.lane.b32.xlu2 %v3672_v20, %s4192_s6  ;;  %v1488_v5 = vshll.u32 %v3706_v11, 16  ;;  %v3697_v20 = vld [vmem:[%s4278_s30 + $0xb8] sm:$0xf] }
  0xe0   : > { %v3699_v11 = vld [vmem:[%s4278_s30 + $0xc4] sm:$0xf] }
  0xe1   : > { %v1069_v23 = vpop.permute.xlu2 %1068 }
  0xe2   : > { %1162 = vst.msk [vmem:[#allocation2 + $0xc] sm:$0xf] %vm1158_vm9, %v1069_v23  ;;  %v1454_v23 = vrot.slane %v1453_v14, 4 }
  0xe3   : > { %1277 = vrot.lane.b32.xlu1 %v3677_v21, %s4192_s6  ;;  %v1470_v21 = vshll.u32 %v3704_v13, 16 }
  0xe4   : > { %1275 = vrot.lane.b32.xlu0 %v3676_v22, %s4192_s6  ;;  %v1474_v22 = vshrl.u32 %v3704_v13, 16 }
  0xe5   : > { %v785_v24 = vpop.permute.xlu1 %784 }
  0xe6   : > { %850 = vst.msk [vmem:[#allocation2 + $0x7c] sm:$0xf] %vm818_vm8, %v785_v24  ;;  %v783_v26 = vpop.permute.xlu0 %782  ;;  %v1458_v24 = vrot.slane %v1456_v15, 5 }
  0xe7   : > { %849 = vst.msk [vmem:[#allocation2 + $0x78] sm:$0xf] %vm818_vm8, %v783_v26  ;;  %1273 = vrot.lane.b32.xlu2 %v3675_v27, %s4192_s6  ;;  %v1444_v26 = vrot.slane %v1443_v16, 4  ;;  %v3710_v27 = vld [vmem:[%s4278_s30 + $0x34] sm:$0xf] }
  0xe9   : > { %v1075_v29 = vpop.permute.xlu2 %1074 }
  0xea   : > { %1165 = vst.msk [vmem:[#allocation2 + $0x18] sm:$0xf] %vm1158_vm9, %v1075_v29  ;;  %v1490_v29 = vrot.slane %v1488_v5, 5 }
  0xeb   : > { %1283 = vrot.lane.b32.xlu1 %v3680_v10, %s4192_s6  ;;  %v4899_v10 = vld [vmem:[%s4278_s30 + $0x28] sm:$0xf] }
  0xec   : > { %1281 = vrot.lane.b32.xlu0 %v3679_v28, %s4192_s6  ;;  %v1487_v28 = vrot.slane %v1485_v19, 4 }
  0xed   : > { %v1067_v9 = vpop.permute.xlu1 %1066 }
  0xee   : > { %1161 = vst.msk [vmem:[#allocation2 + $0x8] sm:$0xf] %vm1158_vm9, %v1067_v9  ;;  %v1065_v30 = vpop.permute.xlu0 %1064 }
  0xef   : > { %1160 = vst.msk [vmem:[#allocation2 + $0x4] sm:$0xf] %vm1158_vm9, %v1065_v30  ;;  %1279 = vrot.lane.b32.xlu2 %v3678_v31, %s4192_s6  ;;  %v3703_v30 = vld [vmem:[%s4278_s30 + $0x18] sm:$0xf] }
  0xf1   : > { %v1081_v34 = vpop.permute.xlu2 %1080 }
  0xf2   : > { %1168 = vst.msk [vmem:[#allocation2 + $0x24] sm:$0xf] %vm1158_vm9, %v1081_v34  ;;  %v1476_v34 = vrot.slane %v1474_v22, 4 }
  0xf3   : > { %1289 = vrot.lane.b32.xlu1 %v3683_v32, %s4192_s6  ;;  %v3705_v32 = vld [vmem:[%s4278_s30 + $0x20] sm:$0x1] }
  0xf4   : > { %1287 = vrot.lane.b32.xlu0 %v3682_v33, %s4192_s6  ;;  %v4903_v33 = vrot.slane %v1470_v21, 5  ;;  %v3719_v21 = vld [vmem:[%s4278_s30 + $0x58] sm:$0xf] }
  0xf5   : > { %v1073_v35 = vpop.permute.xlu1 %1072 }
  0xf6   : > { %1164 = vst.msk [vmem:[#allocation2 + $0x14] sm:$0xf] %vm1158_vm9, %v1073_v35  ;;  %v1071_v37 = vpop.permute.xlu0 %1070 }
  0xf7   : > { %1163 = vst.msk [vmem:[#allocation2 + $0x10] sm:$0xf] %vm1158_vm9, %v1071_v37  ;;  %1285 = vrot.lane.b32.xlu2 %v3681_v38, %s4192_s6  ;;  %v1518_v37 = vshll.u32 %v3710_v27, 16  ;;  %v1522_v38 = vshrl.u32 %v3710_v27, 16  ;;  %v4945_v27 = vld [vmem:[%s4278_s30 + $0x4c] sm:$0xf] }
  0xf9   : > { %v1087_v40 = vpop.permute.xlu2 %1086  ;;  %v1524_v52 = vrot.slane %v1522_v38, 4 }
  0xfa   : > { %1171 = vst.msk [vmem:[#allocation2 + $0x30] sm:$0xf] %vm1158_vm9, %v1087_v40  ;;  %v1461_v40 = vshrl.u32 %v3703_v30, 16 }
  0xfb   : > { %1295 = vrot.lane.b32.xlu1 %v3686_v39, %s4192_s6  ;;  %v3709_v39 = vld [vmem:[%s4278_s30 + $0x30] sm:$0xf] }
  0xfc   : > { %1293 = vrot.lane.b32.xlu0 %v3685_v36, %s4192_s6  ;;  %v3696_v36 = vld [vmem:[%s4278_s30 + $0xb4] sm:$0xf]  ;;  %v1463_v54 = vrot.slane %v1461_v40, 4 }
  0xfd   : > { %v1079_v41 = vpop.permute.xlu1 %1078 }
  0xfe   : > { %1167 = vst.msk [vmem:[#allocation2 + $0x20] sm:$0xf] %vm1158_vm9, %v1079_v41  ;;  %v1077_v42 = vpop.permute.xlu0 %1076  ;;  %v1464_v41 = vshll.u32 %v3703_v30, 16 }
  0xff   : > { %1166 = vst.msk [vmem:[#allocation2 + $0x1c] sm:$0xf] %vm1158_vm9, %v1077_v42  ;;  %1291 = vrot.lane.b32.xlu2 %v3684_v43, %s4192_s6  ;;  %v1459_v42 = vsel %vm4289_vm2, %v1454_v23, %v1458_v24  ;;  %v1491_v43 = vor.u32 %v1490_v29, %v1487_v28  ;;  %v3718_v23 = vld [vmem:[%s4278_s30 + $0x54] sm:$0xf]  ;;  %v3708_v29 = vld [vmem:[%s4278_s30 + $0x2c] sm:$0x1] }
 0x100   : > { %v1581_v38 = vshrl.u32 %v3718_v23, 16 }
 0x101   : > { %v1093_v46 = vpop.permute.xlu2 %1092 }
 0x102   : > { %1174 = vst.msk [vmem:[#allocation2 + $0x3c] sm:$0xf] %vm1158_vm9, %v1093_v46  ;;  %v1449_v46 = vsel %vm4289_vm2, %v1444_v26, %v4881_v63  ;;  %v3712_v26 = vld [vmem:[%s4278_s30 + $0x3c] sm:$0xf] }
 0x103   : > { %1301 = vrot.lane.b32.xlu1 %v3689_v44, %s4192_s6  ;;  %v1494_v44 = vshll.u32 %v4899_v10, 16 }
 0x104   : > { %1299 = vrot.lane.b32.xlu0 %v3688_v45, %s4192_s6  ;;  %v1480_v45 = vshll.u32 %v3705_v32, 16 }
 0x105   : > { %v1085_v47 = vpop.permute.xlu1 %1084  ;;  %v4924_v57 = vrot.slane %v1494_v44, 5 }
 0x106   : > { %1170 = vst.msk [vmem:[#allocation2 + $0x2c] sm:$0xf] %vm1158_vm9, %v1085_v47  ;;  %v1083_v48 = vpop.permute.xlu0 %1082  ;;  %v1477_v47 = vor.u32 %v1476_v34, %v4903_v33  ;;  %v1482_v58 = vrot.slane %v1480_v45, 5  ;;  %v1590_v34 = vshll.u32 %v3719_v21, 16 }
 0x107   : > { %1169 = vst.msk [vmem:[#allocation2 + $0x28] sm:$0xf] %vm1158_vm9, %v1083_v48  ;;  %1297 = vrot.lane.b32.xlu2 %v3687_v49, %s4192_s6  ;;  %v1509_v48 = vshrl.u32 %v3709_v39, 16  ;;  %v1512_v49 = vshll.u32 %v3709_v39, 16  ;;  %v1533_v39 = vshrl.u32 %v3712_v26, 16 }
 0x108   : > { %v1478_v62 = vrot.slane %v1477_v47, 4 }
 0x109   : > { %v1099_v53 = vpop.permute.xlu2 %1098  ;;  %v1514_v63 = vrot.slane %v1512_v49, 5 }
 0x10a   : > { %1177 = vst.msk [vmem:[#allocation2 + $0x48] sm:$0xf] %vm1158_vm9, %v1099_v53  ;;  %v3715_v53 = vld [vmem:[%s4278_s30 + $0x48] sm:$0xf]  ;;  %v1483_v14 = vsel %vm4289_vm2, %v1478_v62, %v1482_v58  ;;  %v3724_v62 = vld [vmem:[%s4278_s30 + $0x6c] sm:$0xf] }
 0x10b   : > { %1307 = vrot.lane.b32.xlu1 %v3692_v50, %s4192_s6  ;;  %v3711_v50 = vld [vmem:[%s4278_s30 + $0x38] sm:$0x1]  ;;  %v1557_v4 = vshrl.u32 %v3715_v53, 16  ;;  %v1560_v6 = vshll.u32 %v3715_v53, 16 }
 0x10c   : > { %1305 = vrot.lane.b32.xlu0 %v3691_v51, %s4192_s6  ;;  %v4919_v51 = vrot.slane %v1518_v37, 5  ;;  %v1594_v37 = vshrl.u32 %v3719_v21, 16 }
 0x10d   : > { %v1091_v55 = vpop.permute.xlu1 %1090  ;;  %v1559_v5 = vrot.slane %v1557_v4, 4 }
 0x10e   : > { %1173 = vst.msk [vmem:[#allocation2 + $0x38] sm:$0xf] %vm1158_vm9, %v1091_v55  ;;  %v1089_v56 = vpop.permute.xlu0 %1088  ;;  %v1466_v55 = vrot.slane %v1464_v41, 5  ;;  %v1525_v3 = vor.u32 %v1524_v52, %v4919_v51  ;;  %v1584_v41 = vshll.u32 %v3718_v23, 16  ;;  %v1535_v52 = vrot.slane %v1533_v39, 4 }
 0x10f   : > { %1172 = vst.msk [vmem:[#allocation2 + $0x34] sm:$0xf] %vm1158_vm9, %v1089_v56  ;;  %1303 = vrot.lane.b32.xlu2 %v3690_v59, %s4192_s6  ;;  %v1492_v56 = vrot.slane %v1491_v43, 4  ;;  %v1504_v43 = vshll.u32 %v3708_v29, 16  ;;  %v3721_v29 = vld [vmem:[%s4278_s30 + $0x60] sm:$0xf] }
 0x111   : > { %v1105_v7 = vpop.permute.xlu2 %1104  ;;  %v1497_v13 = vsel %vm4289_vm2, %v1492_v56, %v4924_v57  ;;  %v1586_v56 = vrot.slane %v1584_v41, 5 }
 0x112   : > { %1180 = vst.msk [vmem:[#allocation2 + $0x54] sm:$0xf] %vm1158_vm9, %v1105_v7  ;;  %v3713_v7 = vld [vmem:[%s4278_s30 + $0x40] sm:$0xf] }
 0x113   : > { %1313 = vrot.lane.b32.xlu1 %v3695_v0, %s4192_s6  ;;  %v1528_v0 = vshll.u32 %v3711_v50, 16  ;;  %v1542_v16 = vshll.u32 %v3713_v7, 16  ;;  %v1596_v50 = vrot.slane %v1594_v37, 4 }
 0x114   : > { %1311 = vrot.lane.b32.xlu0 %v3694_v1, %s4192_s6  ;;  %v1511_v1 = vrot.slane %v1509_v48, 4 }
 0x115   : > { %v1097_v8 = vpop.permute.xlu1 %1096  ;;  %v1530_v19 = vrot.slane %v1528_v0, 5 }
 0x116   : > { %1176 = vst.msk [vmem:[#allocation2 + $0x44] sm:$0xf] %vm1158_vm9, %v1097_v8  ;;  %v1095_v12 = vpop.permute.xlu0 %1094  ;;  %v1498_v8 = vshrl.u32 %v4899_v10, 16  ;;  %v1515_v15 = vor.u32 %v1514_v63, %v1511_v1  ;;  %v3714_v10 = vld [vmem:[%s4278_s30 + $0x44] sm:$0x1] }
 0x117   : > { %1175 = vst.msk [vmem:[#allocation2 + $0x40] sm:$0xf] %vm1158_vm9, %v1095_v12  ;;  %1309 = vrot.lane.b32.xlu2 %v3693_v17, %s4192_s6  ;;  %v1467_v12 = vor.u32 %v1466_v55, %v1463_v54  ;;  %v1546_v17 = vshrl.u32 %v3713_v7, 16  ;;  %v1552_v49 = vshll.u32 %v3714_v10, 16  ;;  %v3720_v54 = vld [vmem:[%s4278_s30 + $0x5c] sm:$0x1] }
 0x118   : > { %v1500_v24 = vrot.slane %v1498_v8, 4  ;;  %v1516_v30 = vrot.slane %v1515_v15, 4  ;;  %v1583_v55 = vrot.slane %v1581_v38, 4  ;;  %v3722_v7 = vld [vmem:[%s4278_s30 + $0x64] sm:$0xf] }
 0x119   : > { %v1111_v9 = vpop.permute.xlu2 %1110  ;;  %v1468_v22 = vrot.slane %v1467_v12, 4  ;;  %v1548_v32 = vrot.slane %v1546_v17, 4  ;;  %v1554_v63 = vrot.slane %v1552_v49, 5  ;;  %v1614_v17 = vshll.u32 %v3722_v7, 16 }
 0x11a   : > { %1183 = vst.msk [vmem:[#allocation2 + $0x60] sm:$0xf] %vm1158_vm9, %v1111_v9  ;;  %v1521_v47 = vsel %vm4289_vm2, %v1516_v30, %v4919_v51  ;;  %v1506_v51 = vrot.slane %v1504_v43, 5  ;;  %v3723_v30 = vld [vmem:[%s4278_s30 + $0x68] sm:$0x1]  ;;  %v1608_v43 = vshll.u32 %v3721_v29, 16 }
 0x11b   : > { %1319 = vrot.lane.b32.xlu1 %v3698_v18, %s4192_s6  ;;  %v1526_v18 = vrot.slane %v1525_v3, 4  ;;  %v1473_v40 = vsel %vm4289_vm2, %v1468_v22, %v4903_v33  ;;  %v4966_v33 = vrot.slane %v1590_v34, 5  ;;  %v1570_v3 = vshrl.u32 %v4945_v27, 16 }
 0x11c   : > { %1317 = vrot.lane.b32.xlu0 %v3697_v20, %s4192_s6  ;;  %v1562_v20 = vrot.slane %v1560_v6, 5  ;;  %v1600_v6 = vshll.u32 %v3720_v54, 16 }
 0x11d   : > { %v1103_v31 = vpop.permute.xlu1 %1102  ;;  %v1531_v44 = vsel %vm4289_vm2, %v1526_v18, %v1530_v19  ;;  %v1597_v4 = vor.u32 %v1596_v50, %v4966_v33  ;;  %v1618_v18 = vshrl.u32 %v3722_v7, 16 }
 0x11e   : > { %1179 = vst.msk [vmem:[#allocation2 + $0x50] sm:$0xf] %vm1158_vm9, %v1103_v31  ;;  %v1101_v35 = vpop.permute.xlu0 %1100  ;;  %v4949_v31 = vrot.slane %v1542_v16, 5  ;;  %v1563_v45 = vor.u32 %v1562_v20, %v1559_v5  ;;  %v1602_v5 = vrot.slane %v1600_v6, 5 }
 0x11f   : > { %1178 = vst.msk [vmem:[#allocation2 + $0x4c] sm:$0xf] %vm1158_vm9, %v1101_v35  ;;  %1315 = vrot.lane.b32.xlu2 %v3696_v36, %s4192_s6  ;;  %v1536_v36 = vshll.u32 %v3712_v26, 16  ;;  %v1598_v19 = vrot.slane %v1597_v4, 4  ;;  %v1572_v26 = vrot.slane %v1570_v3, 4  ;;  %v1620_v34 = vrot.slane %v1618_v18, 4 }
 0x120   : > { %v1549_v48 = vor.u32 %v1548_v32, %v4949_v31  ;;  %v1564_v58 = vrot.slane %v1563_v45, 4  ;;  %v4997_v32 = vrot.slane %v1614_v17, 5 }
 0x121   : > { %v1117_v59 = vpop.permute.xlu2 %1116  ;;  %v1538_v53 = vrot.slane %v1536_v36, 5  ;;  %v3727_v36 = vld [vmem:[%s4278_s30 + $0x78] sm:$0xf] }
 0x122   : > { %1186 = vst.msk [vmem:[#allocation2 + $0x6c] sm:$0xf] %vm1158_vm9, %v1117_v59  ;;  %v1550_v1 = vrot.slane %v1549_v48, 4  ;;  %v1621_v48 = vor.u32 %v1620_v34, %v4997_v32  ;;  %v1653_v49 = vshrl.u32 %v3727_v36, 16  ;;  %v1656_v50 = vshll.u32 %v3727_v36, 16 }
 0x123   : > { %1822 = vrot.lane.b32.xlu1 %v1459_v42, %s4193_s7  ;;  %v1501_v42 = vor.u32 %v1500_v24, %v4924_v57  ;;  %v1539_v8 = vor.u32 %v1538_v53, %v1535_v52  ;;  %v3728_v24 = vld [vmem:[%s4278_s30 + $0x7c] sm:$0xf]  ;;  %v3729_v52 = vld [vmem:[%s4278_s30 + $0x80] sm:$0x1] }
 0x124   : > { %1820 = vrot.lane.b32.xlu0 %v1449_v46, %s4193_s7  ;;  %v1566_v46 = vshll.u32 %v4945_v27, 16  ;;  %v1555_v16 = vsel %vm4289_vm2, %v1550_v1, %v1554_v63  ;;  %v4992_v27 = vld [vmem:[%s4278_s30 + $0x70] sm:$0xf]  ;;  %v1662_v38 = vshll.u32 %v3728_v24, 16  ;;  %v1666_v39 = vshrl.u32 %v3728_v24, 16 }
 0x125   : > { %v1109_v60 = vpop.permute.xlu1 %1108  ;;  %v1502_v57 = vrot.slane %v1501_v42, 4  ;;  %v1540_v20 = vrot.slane %v1539_v8, 4  ;;  %v1605_v42 = vshrl.u32 %v3721_v29, 16  ;;  %v1622_v1 = vrot.slane %v1621_v48, 4  ;;  %v3732_v29 = vld [vmem:[%s4278_s30 + $0x8c] sm:$0x1] }
 0x126   : > { %1182 = vst.msk [vmem:[#allocation2 + $0x5c] sm:$0xf] %vm1158_vm9, %v1109_v60  ;;  %v1107_v2 = vpop.permute.xlu0 %1106  ;;  %v4971_v59 = vrot.slane %v1566_v46, 5  ;;  %v1638_v46 = vshll.u32 %v4992_v27, 16  ;;  %v5016_v53 = vrot.slane %v1662_v38, 5  ;;  %v1668_v54 = vrot.slane %v1666_v39, 4 }
 0x127   : > { %1181 = vst.msk [vmem:[#allocation2 + $0x58] sm:$0xf] %vm1158_vm9, %v1107_v2  ;;  %1321 = vrot.lane.b32.xlu2 %v3699_v11, %s4192_s6  ;;  %v1587_v11 = vor.u32 %v1586_v56, %v1583_v55  ;;  %v1507_v12 = vsel %vm4289_vm2, %v1502_v57, %v1506_v51  ;;  %v1545_v37 = vsel %vm4289_vm2, %v1540_v20, %v4949_v31  ;;  %v3733_v57 = vld [vmem:[%s4278_s30 + $0x90] sm:$0xf]  ;;  %v1607_v51 = vrot.slane %v1605_v42, 4  ;;  %s3562_s6 = sshll.u32 %s177_s29, 4  ;;  %s3563_s6 = int_to_ptr.vmem [resolvable:$true] %s3562_s6 }
 0x128   : > { %v1569_v15 = vsel %vm4289_vm2, %v1564_v58, %v4971_v59  ;;  %v1610_v58 = vrot.slane %v1608_v43, 5  ;;  %v1672_v63 = vshll.u32 %v3729_v52, 16  ;;  %v1658_v3 = vrot.slane %v1656_v50, 5 }
 0x129   : > { %v1123_v28 = vpop.permute.xlu2 %1122  ;;  %v1588_v21 = vrot.slane %v1587_v11, 4  ;;  %v1669_v6 = vor.u32 %v1668_v54, %v5016_v53  ;;  %v1701_v7 = vshrl.u32 %v3733_v57, 16  ;;  %v1704_v8 = vshll.u32 %v3733_v57, 16  ;;  %v3731_v11 = vld [vmem:[%s4278_s30 + $0x88] sm:$0xf] }
 0x12a   : > { %1189 = vst.msk [vmem:[#allocation2 + $0x78] sm:$0xf] %vm1158_vm9, %v1123_v28  ;;  %v3717_v28 = vld [vmem:[%s4278_s30 + $0x50] sm:$0x1]  ;;  %v1686_v18 = vshll.u32 %v3731_v11, 16  ;;  %v1674_v20 = vrot.slane %v1672_v63, 5 }
 0x12b   : > { %1828 = vrot.lane.b32.xlu1 %v1497_v13, %s4193_s7  ;;  %v1629_v13 = vshrl.u32 %v3724_v62, 16  ;;  %v1576_v41 = vshll.u32 %v3717_v28, 16  ;;  %v1593_v31 = vsel %vm4289_vm2, %v1588_v21, %v4966_v33  ;;  %v1703_v21 = vrot.slane %v1701_v7, 4  ;;  %v5043_v28 = vld [vmem:[%s4278_s30 + $0x94] sm:$0xf] }
 0x12c   : > { %1826 = vrot.lane.b32.xlu0 %v1483_v14, %s4193_s7  ;;  %v1632_v14 = vshll.u32 %v3724_v62, 16  ;;  %v1696_v50 = vshll.u32 %v3732_v29, 16 }
 0x12d   : > { %v1115_v9 = vpop.permute.xlu1 %1114  ;;  %v1631_v22 = vrot.slane %v1629_v13, 4  ;;  %v1578_v56 = vrot.slane %v1576_v41, 5 }
 0x12e   : > { %1185 = vst.msk [vmem:[#allocation2 + $0x68] sm:$0xf] %vm1158_vm9, %v1115_v9  ;;  %v1113_v35 = vpop.permute.xlu0 %1112  ;;  %v1634_v23 = vrot.slane %v1632_v14, 5  ;;  %v1611_v14 = vor.u32 %v1610_v58, %v1607_v51 }
 0x12f   : > { %1184 = vst.msk [vmem:[#allocation2 + $0x64] sm:$0xf] %vm1158_vm9, %v1113_v35  ;;  %1824 = vrot.lane.b32.xlu2 %v1473_v40, %s4193_s7  ;;  %v1573_v40 = vor.u32 %v1572_v26, %v4971_v59  ;;  %v5021_v59 = vrot.slane %v1638_v46, 5  ;;  %v3736_v26 = vld [vmem:[%s4278_s30 + $0x9c] sm:$0xf] }
 0x130   : > { %v1635_v45 = vor.u32 %v1634_v23, %v1631_v22  ;;  %v1706_v22 = vrot.slane %v1704_v8, 5  ;;  %v3737_v23 = vld [vmem:[%s4278_s30 + $0xa0] sm:$0xf]  ;;  %v1612_v24 = vrot.slane %v1611_v14, 4  ;;  %v1725_v41 = vshrl.u32 %v3736_v26, 16 }
 0x131   : > { %v1262_v60 = vpop.permute.xlu2 %1261  ;;  %v1574_v55 = vrot.slane %v1573_v40, 4  ;;  %v1734_v39 = vshll.u32 %v3737_v23, 16  ;;  %v1738_v40 = vshrl.u32 %v3737_v23, 16  ;;  %v1714_v14 = vshrl.u32 %v5043_v28, 16 }
 0x132   : > { %1357 = vst.msk [vmem:[#allocation2 + $0x4] sm:$0xf] %vm1355_vm10, %v1262_v60  ;;  %v1636_v33 = vrot.slane %v1635_v45, 4  ;;  %v1728_v45 = vshll.u32 %v3736_v26, 16  ;;  %v1707_v48 = vor.u32 %v1706_v22, %v1703_v21  ;;  %v1727_v58 = vrot.slane %v1725_v41, 4 }
 0x133   : > { %1834 = vrot.lane.b32.xlu1 %v1531_v44, %s4193_s7  ;;  %v1603_v44 = vsel %vm4289_vm2, %v1598_v19, %v1602_v5  ;;  %v1579_v13 = vsel %vm4289_vm2, %v1574_v55, %v1578_v56  ;;  %v1690_v19 = vshrl.u32 %v3731_v11, 16  ;;  %v1670_v5 = vrot.slane %v1669_v6, 4  ;;  %v3740_v6 = vld [vmem:[%s4278_s30 + $0xac] sm:$0xf] }
 0x134   : > { %1832 = vrot.lane.b32.xlu0 %v1521_v47, %s4193_s7  ;;  %v1624_v47 = vshll.u32 %v3723_v30, 16  ;;  %v3726_v30 = vld [vmem:[%s4278_s30 + $0x74] sm:$0x1]  ;;  %v5065_v55 = vrot.slane %v1734_v39, 5  ;;  %v1740_v56 = vrot.slane %v1738_v40, 4 }
 0x135   : > { %v1121_v0 = vpop.permute.xlu1 %1120  ;;  %v1692_v38 = vrot.slane %v1690_v19, 4  ;;  %v1762_v19 = vshrl.u32 %v3740_v6, 16  ;;  %v3746_v39 = vld [vmem:[%s4278_s30 + $0xc4] sm:$0xf] }
 0x136   : > { %1188 = vst.msk [vmem:[#allocation2 + $0x74] sm:$0xf] %vm1158_vm9, %v1121_v0  ;;  %v1119_v2 = vpop.permute.xlu0 %1118  ;;  %v1626_v60 = vrot.slane %v1624_v47, 5  ;;  %v1648_v47 = vshll.u32 %v3726_v30, 16  ;;  %v1741_v8 = vor.u32 %v1740_v56, %v5065_v55  ;;  %v3735_v30 = vld [vmem:[%s4278_s30 + $0x98] sm:$0x1] }
 0x137   : > { %1187 = vst.msk [vmem:[#allocation2 + $0x70] sm:$0xf] %vm1158_vm9, %v1119_v2  ;;  %1830 = vrot.lane.b32.xlu2 %v1507_v12, %s4193_s7  ;;  %v1655_v2 = vrot.slane %v1653_v49, 4  ;;  %v1642_v12 = vshrl.u32 %v4992_v27, 16  ;;  %v1710_v49 = vshll.u32 %v5043_v28, 16  ;;  %v1764_v29 = vrot.slane %v1762_v19, 4 }
 0x138   : > { %v1742_v21 = vrot.slane %v1741_v8, 4 }
 0x139   : > { %v1268_v10 = vpop.permute.xlu2 %1267  ;;  %v1659_v17 = vor.u32 %v1658_v3, %v1655_v2  ;;  %v1644_v27 = vrot.slane %v1642_v12, 4 }
 0x13a   : > { %1360 = vst.msk [vmem:[#allocation2 + $0x10] sm:$0xf] %vm1355_vm10, %v1268_v10  ;;  %v3730_v10 = vld [vmem:[%s4278_s30 + $0x84] sm:$0xf] }
 0x13b   : > { %1840 = vrot.lane.b32.xlu1 %v1569_v15, %s4193_s7  ;;  %v1641_v15 = vsel %vm4289_vm2, %v1636_v33, %v5021_v59  ;;  %v1677_v42 = vshrl.u32 %v3730_v10, 16  ;;  %v1680_v43 = vshll.u32 %v3730_v10, 16  ;;  %v1645_v46 = vor.u32 %v1644_v27, %v5021_v59  ;;  %v5088_v27 = vld [vmem:[%s4278_s30 + $0xb8] sm:$0xf] }
 0x13c   : > { %1838 = vrot.lane.b32.xlu0 %v1555_v16, %s4193_s7  ;;  %v1627_v16 = vsel %vm4289_vm2, %v1622_v1, %v1626_v60  ;;  %v1730_v33 = vrot.slane %v1728_v45, 5  ;;  %v1650_v60 = vrot.slane %v1648_v47, 5  ;;  %v1698_v1 = vrot.slane %v1696_v50, 5 }
 0x13d   : > { %v1260_v9 = vpop.permute.xlu1 %1259  ;;  %v1679_v57 = vrot.slane %v1677_v42, 4  ;;  %v1682_v51 = vrot.slane %v1680_v43, 5  ;;  %v1646_v59 = vrot.slane %v1645_v46, 4  ;;  %v1716_v10 = vrot.slane %v1714_v14, 4 }
 0x13e   : > { %1356 = vst.msk [vmem:[#allocation2] sm:$0xf] %vm1355_vm10, %v1260_v9  ;;  %v1125_v35 = vpop.permute.xlu0 %1124  ;;  %v1782_v42 = vshll.u32 %v5088_v27, 16  ;;  %v1720_v46 = vshll.u32 %v3735_v30, 16  ;;  %v1806_v50 = vshll.u32 %v3746_v39, 16 }
 0x13f   : > { %1190 = vst.msk [vmem:[#allocation2 + $0x7c] sm:$0xf] %vm1158_vm9, %v1125_v35  ;;  %1836 = vrot.lane.b32.xlu2 %v1545_v37, %s4193_s7  ;;  %v1660_v35 = vrot.slane %v1659_v17, 4  ;;  %v5047_v37 = vrot.slane %v1686_v18, 5  ;;  %v1758_v18 = vshll.u32 %v3740_v6, 16  ;;  %v1786_v6 = vshrl.u32 %v5088_v27, 16 }
 0x140   : > { %v3751_v30 = vld [vmem:[%s4278_s30 + $0x18] sm:$0xe] }
 0x141   : > { %v1274_v62 = vpop.permute.xlu2 %1273  ;;  %v1665_v52 = vsel %vm4289_vm2, %v1660_v35, %v5016_v53  ;;  %v1693_v54 = vor.u32 %v1692_v38, %v5047_v37  ;;  %v1708_v53 = vrot.slane %v1707_v48, 4  ;;  %v5091_v28 = vrot.slane %v1758_v18, 5  ;;  %v3741_v38 = vld [vmem:[%s4278_s30 + $0xb0] sm:$0x1] }
 0x142   : > { %1363 = vst.msk [vmem:[#allocation2 + $0x1c] sm:$0xf] %vm1355_vm10, %v1274_v62  ;;  %v3742_v62 = vld [vmem:[%s4278_s30 + $0xb4] sm:$0xf] }
 0x143   : > { %1846 = vrot.lane.b32.xlu1 %v1603_v44, %s4193_s7  ;;  %v1617_v44 = vsel %vm4289_vm2, %v1612_v24, %v4997_v32  ;;  %v3738_v32 = vld [vmem:[%s4278_s30 + $0xa4] sm:$0x1]  ;;  %v1694_v3 = vrot.slane %v1693_v54, 4  ;;  %v1773_v11 = vshrl.u32 %v3742_v62, 16  ;;  %v1776_v12 = vshll.u32 %v3742_v62, 16 }
 0x144   : > { %1844 = vrot.lane.b32.xlu0 %v1593_v31, %s4193_s7  ;;  %v1675_v31 = vsel %vm4289_vm2, %v1670_v5, %v1674_v20  ;;  %v1765_v48 = vor.u32 %v1764_v29, %v5091_v28 }
 0x145   : > { %v1266_v0 = vpop.permute.xlu1 %1265  ;;  %v1699_v5 = vsel %vm4289_vm2, %v1694_v3, %v1698_v1  ;;  %v1775_v22 = vrot.slane %v1773_v11, 4  ;;  %v1778_v23 = vrot.slane %v1776_v12, 5 }
 0x146   : > { %1359 = vst.msk [vmem:[#allocation2 + $0xc] sm:$0xf] %vm1355_vm10, %v1266_v0  ;;  %v1264_v4 = vpop.permute.xlu0 %1263  ;;  %v5070_v0 = vrot.slane %v1710_v49, 5  ;;  %v1768_v49 = vshll.u32 %v3741_v38, 16  ;;  %v3750_v38 = vld [vmem:[%s4278_s30 + $0x14] sm:$0x1] }
 0x147   : > { %1358 = vst.msk [vmem:[#allocation2 + $0x8] sm:$0xf] %vm1355_vm10, %v1264_v4  ;;  %1842 = vrot.lane.b32.xlu2 %v1579_v13, %s4193_s7  ;;  %v1744_v4 = vshll.u32 %v3738_v32, 16  ;;  %v1683_v13 = vor.u32 %v1682_v51, %v1679_v57  ;;  %v1779_v41 = vor.u32 %v1778_v23, %v1775_v22  ;;  %v1784_v57 = vrot.slane %v1782_v42, 5 }
 0x148   : > { %v1713_v17 = vsel %vm4289_vm2, %v1708_v53, %v5070_v0  ;;  %v1717_v45 = vor.u32 %v1716_v10, %v5070_v0  ;;  %v1770_v62 = vrot.slane %v1768_v49, 5  ;;  %v1808_v53 = vrot.slane %v1806_v50, 5  ;;  %v3748_v49 = vld [vmem:[%s4278_s30 + $0xc] sm:$0xe] }
 0x149   : > { %v1280_v9 = vpop.permute.xlu2 %1279  ;;  %v1746_v20 = vrot.slane %v1744_v4, 5  ;;  %v1684_v24 = vrot.slane %v1683_v13, 4 }
 0x14a   : > { %1366 = vst.msk [vmem:[#allocation2 + $0x28] sm:$0xf] %vm1355_vm10, %v1280_v9  ;;  %v1718_v51 = vrot.slane %v1717_v45, 4  ;;  %v3755_v45 = vld [vmem:[%s4278_s30 + $0x28] sm:$0xf] }
 0x14b   : > { %1852 = vrot.lane.b32.xlu1 %v1641_v15, %s4193_s7  ;;  %v1731_v15 = vor.u32 %v1730_v33, %v1727_v58  ;;  %v1747_v40 = vsel %vm4289_vm2, %v1742_v21, %v1746_v20  ;;  %v1689_v43 = vsel %vm4289_vm2, %v1684_v24, %v5047_v37  ;;  %v1780_v37 = vrot.slane %v1779_v41, 4  ;;  %v3744_v20 = vld [vmem:[%s4278_s30 + $0xbc] sm:$0x1]  ;;  %v3749_v24 = vld [vmem:[%s4278_s30 + $0x10] sm:$0xf] }
 0x14c   : > { %1850 = vrot.lane.b32.xlu0 %v1627_v16, %s4193_s7  ;;  %v1651_v16 = vsel %vm4289_vm2, %v1646_v59, %v1650_v60  ;;  %v1722_v58 = vrot.slane %v1720_v46, 5  ;;  %v1766_v60 = vrot.slane %v1765_v48, 4  ;;  %v1792_v10 = vshll.u32 %v3744_v20, 16  ;;  %v3765_v20 = vld [vmem:[%s4278_s30 + $0x50] sm:$0x1] }
 0x14d   : > { %v1272_v34 = vpop.permute.xlu1 %1271  ;;  %v1732_v26 = vrot.slane %v1731_v15, 4  ;;  %v1785_v11 = vsel %vm4289_vm2, %v1780_v37, %v1784_v57  ;;  %v2061_v48 = vrot.slane %v3755_v45, 5 }
 0x14e   : > { %1362 = vst.msk [vmem:[#allocation2 + $0x18] sm:$0xf] %vm1355_vm10, %v1272_v34  ;;  %v1270_v36 = vpop.permute.xlu0 %1269  ;;  %v3739_v34 = vld [vmem:[%s4278_s30 + $0xa8] sm:$0xf]  ;;  %v1771_v14 = vsel %vm4289_vm2, %v1766_v60, %v1770_v62 }
 0x14f   : > { %1361 = vst.msk [vmem:[#allocation2 + $0x14] sm:$0xf] %vm1355_vm10, %v1270_v36  ;;  %1848 = vrot.lane.b32.xlu2 %v1617_v44, %s4193_s7  ;;  %v3745_v44 = vld [vmem:[%s4278_s30 + $0xc0] sm:$0xf]  ;;  %v1749_v47 = vshrl.u32 %v3739_v34, 16  ;;  %v1737_v54 = vsel %vm4289_vm2, %v1732_v26, %v5065_v55 }
 0x150   : > { %v1797_v32 = vshrl.u32 %v3745_v44, 16  ;;  %v1800_v56 = vshll.u32 %v3745_v44, 16  ;;  %v2050_v44 = vrot.slane %v3750_v38, 5 }
 0x151   : > { %v1286_v63 = vpop.permute.xlu2 %1285  ;;  %v1751_v33 = vrot.slane %v1749_v47, 4 }
 0x152   : > { %1369 = vst.msk [vmem:[#allocation2 + $0x34] sm:$0xf] %vm1355_vm10, %v1286_v63  ;;  %v3747_v63 = vld [vmem:[%s4278_s30 + $0xc8] sm:$0x1]  ;;  %v1802_v3 = vrot.slane %v1800_v56, 5  ;;  %v2063_v56 = vrot.slane %v2061_v48, 4 }
 0x153   : > { %1858 = vrot.lane.b32.xlu1 %v1675_v31, %s4193_s7  ;;  %v1752_v31 = vshll.u32 %v3739_v34, 16  ;;  %v1816_v13 = vshll.u32 %v3747_v63, 16  ;;  %v3752_v34 = vld [vmem:[%s4278_s30 + $0x1c] sm:$0xf] }
 0x154   : > { %1856 = vrot.lane.b32.xlu0 %v1665_v52, %s4193_s7  ;;  %v1810_v52 = vshrl.u32 %v3746_v39, 16 }
 0x155   : > { %v1278_v2 = vpop.permute.xlu1 %1277  ;;  %v1754_v59 = vrot.slane %v1752_v31, 5  ;;  %v1818_v19 = vrot.slane %v1816_v13, 5 }
 0x156   : > { %1365 = vst.msk [vmem:[#allocation2 + $0x24] sm:$0xf] %vm1355_vm10, %v1278_v2  ;;  %v1276_v7 = vpop.permute.xlu0 %1275  ;;  %v1812_v0 = vrot.slane %v1810_v52, 4  ;;  %v1799_v2 = vrot.slane %v1797_v32, 4  ;;  %v3756_v52 = vld [vmem:[%s4278_s30 + $0x2c] sm:$0x1] }
 0x157   : > { %1364 = vst.msk [vmem:[#allocation2 + $0x20] sm:$0xf] %vm1355_vm10, %v1276_v7  ;;  %1854 = vrot.lane.b32.xlu2 %v1651_v16, %s4193_s7  ;;  %v1723_v7 = vsel %vm4289_vm2, %v1718_v51, %v1722_v58  ;;  %v1755_v8 = vor.u32 %v1754_v59, %v1751_v33  ;;  %v3796_v32 = vrot.slane %v3748_v49, 9  ;;  %v2064_v37 = vrot.slane %v3756_v52, 5  ;;  %v3758_v59 = vld [vmem:[%s4278_s30 + $0x34] sm:$0xf] }
 0x158   : > { %v1813_v12 = vor.u32 %v1812_v0, %v1808_v53  ;;  %v1803_v15 = vor.u32 %v1802_v3, %v1799_v2  ;;  %v2068_v63 = vrot.slane %v3758_v59, 5  ;;  %v3759_v2 = vld [vmem:[%s4278_s30 + $0x38] sm:$0x1] }
 0x159   : > { %v1292_v9 = vpop.permute.xlu2 %1291  ;;  %v1756_v16 = vrot.slane %v1755_v8, 4  ;;  %v2065_v62 = vsel %vm4483_vm6, %v2063_v56, %v2064_v37  ;;  %v2071_v13 = vrot.slane %v3759_v2, 5  ;;  %v3774_v37 = vld [vmem:[%s4278_s30 + $0x74] sm:$0x1] }
 0x15a   : > { %1372 = vst.msk [vmem:[#allocation2 + $0x40] sm:$0xf] %vm1355_vm10, %v1292_v9  ;;  %v1814_v18 = vrot.slane %v1813_v12, 4  ;;  %v1804_v22 = vrot.slane %v1803_v15, 4  ;;  %v2070_v12 = vrot.slane %v2068_v63, 4 }
 0x15b   : > { %1864 = vrot.lane.b32.xlu1 %v1713_v17, %s4193_s7  ;;  %v1788_v17 = vrot.slane %v1786_v6, 4  ;;  %v1761_v26 = vsel %vm4289_vm2, %v1756_v16, %v5091_v28  ;;  %v3797_v28 = vrot.slane %v3751_v30, 9 }
 0x15c   : > { %1862 = vrot.lane.b32.xlu0 %v1699_v5, %s4193_s7  ;;  %v1819_v29 = vsel %vm4289_vm2, %v1814_v18, %v1818_v19  ;;  %v1809_v9 = vsel %vm4289_vm2, %v1804_v22, %v1808_v53  ;;  %v3753_v53 = vld [vmem:[%s4278_s30 + $0x20] sm:$0x1]  ;;  %v3757_v19 = vld [vmem:[%s4278_s30 + $0x30] sm:$0xe] }
 0x15d   : > { %v1284_v35 = vpop.permute.xlu1 %1283  ;;  %v1789_v27 = vor.u32 %v1788_v17, %v1784_v57  ;;  %v3799_v22 = vrot.slane %v3757_v19, 9 }
 0x15e   : > { %1368 = vst.msk [vmem:[#allocation2 + $0x30] sm:$0xf] %vm1355_vm10, %v1284_v35  ;;  %v1282_v36 = vpop.permute.xlu0 %1281  ;;  %v2047_v35 = vrot.slane %v3749_v24, 5  ;;  %v2085_v24 = vrot.slane %v3765_v20, 5 }
 0x15f   : > { %1367 = vst.msk [vmem:[#allocation2 + $0x2c] sm:$0xf] %vm1355_vm10, %v1282_v36  ;;  %1860 = vrot.lane.b32.xlu2 %v1689_v43, %s4193_s7  ;;  %v1790_v39 = vrot.slane %v1789_v27, 4  ;;  %v1794_v36 = vrot.slane %v1792_v10, 5  ;;  %v2069_v30 = vsel %vm4483_vm6, %v3799_v22, %v2068_v63  ;;  %v3771_v63 = vld [vmem:[%s4278_s30 + $0x68] sm:$0x1] }
 0x160   : > { %v2049_v43 = vrot.slane %v2047_v35, 4  ;;  %v2048_v60 = vsel %vm4483_vm6, %v3796_v32, %v2047_v35  ;;  %v3762_v35 = vld [vmem:[%s4278_s30 + $0x44] sm:$0x1]  ;;  %v3766_v32 = vld [vmem:[%s4278_s30 + $0x54] sm:$0xe] }
 0x161   : > { %v1298_v55 = vpop.permute.xlu2 %1297  ;;  %v1795_v47 = vsel %vm4289_vm2, %v1790_v39, %v1794_v36  ;;  %v3769_v39 = vld [vmem:[%s4278_s30 + $0x60] sm:$0xe]  ;;  %v3770_v36 = vld [vmem:[%s4278_s30 + $0x64] sm:$0xf]  ;;  %v3775_v22 = vld [vmem:[%s4278_s30 + $0x78] sm:$0xe] }
 0x162   : > { %1375 = vst.msk [vmem:[#allocation2 + $0x4c] sm:$0xf] %vm1355_vm10, %v1298_v55  ;;  %v2051_v50 = vsel %vm4483_vm6, %v2049_v43, %v2050_v44  ;;  %v3760_v55 = vld [vmem:[%s4278_s30 + $0x3c] sm:$0xe]  ;;  %v3803_v43 = vrot.slane %v3769_v39, 9  ;;  %v2096_v44 = vrot.slane %v3770_v36, 5 }
 0x163   : > { %1870 = vrot.lane.b32.xlu1 %v1747_v40, %s4193_s7  ;;  %v2054_v40 = vrot.slane %v3752_v34, 5  ;;  %v3800_v6 = vrot.slane %v3760_v55, 9 }
 0x164   : > { %1868 = vrot.lane.b32.xlu0 %v1737_v54, %s4193_s7  ;;  %v3754_v54 = vld [vmem:[%s4278_s30 + $0x24] sm:$0xe]  ;;  %v2097_v52 = vsel %vm4483_vm6, %v3803_v43, %v2096_v44 }
 0x165   : > { %v1290_v1 = vpop.permute.xlu1 %1289  ;;  %v2055_v31 = vsel %vm4483_vm6, %v3797_v28, %v2054_v40  ;;  %v3798_v58 = vrot.slane %v3754_v54, 9  ;;  %v2056_v3 = vrot.slane %v2054_v40, 4  ;;  %v3768_v40 = vld [vmem:[%s4278_s30 + $0x5c] sm:$0x1] }
 0x166   : > { %1371 = vst.msk [vmem:[#allocation2 + $0x3c] sm:$0xf] %vm1355_vm10, %v1290_v1  ;;  %v1288_v4 = vpop.permute.xlu0 %1287  ;;  %v3761_v1 = vld [vmem:[%s4278_s30 + $0x40] sm:$0xf] }
 0x167   : > { %1370 = vst.msk [vmem:[#allocation2 + $0x38] sm:$0xf] %vm1355_vm10, %v1288_v4  ;;  %1866 = vrot.lane.b32.xlu2 %v1723_v7, %s4193_s7  ;;  %v2062_v0 = vsel %vm4483_vm6, %v3798_v58, %v2061_v48  ;;  %v2057_v4 = vrot.slane %v3753_v53, 5  ;;  %v2075_v7 = vrot.slane %v3761_v1, 5  ;;  %v3773_v48 = vld [vmem:[%s4278_s30 + $0x70] sm:$0xf] }
 0x168   : > { %v2103_v54 = vrot.slane %v3773_v48, 5 }
 0x169   : > { %v1304_v5 = vpop.permute.xlu2 %1303  ;;  %v2058_v16 = vsel %vm4483_vm6, %v2056_v3, %v2057_v4  ;;  %v2076_v17 = vsel %vm4483_vm6, %v3800_v6, %v2075_v7  ;;  %v3778_v3 = vld [vmem:[%s4278_s30 + $0x84] sm:$0xe]  ;;  %v3779_v4 = vld [vmem:[%s4278_s30 + $0x88] sm:$0xf] }
 0x16a   : > { %1378 = vst.msk [vmem:[#allocation2 + $0x58] sm:$0xf] %vm1355_vm10, %v1304_v5  ;;  %v2072_v5 = vsel %vm4483_vm6, %v2070_v12, %v2071_v13  ;;  %v2105_v58 = vrot.slane %v2103_v54, 4  ;;  %v3806_v12 = vrot.slane %v3778_v3, 9  ;;  %v2117_v13 = vrot.slane %v3779_v4, 5 }
 0x16b   : > { %1876 = vrot.lane.b32.xlu1 %v1785_v11, %s4193_s7 }
 0x16c   : > { %1874 = vrot.lane.b32.xlu0 %v1771_v14, %s4193_s7  ;;  %v3764_v14 = vld [vmem:[%s4278_s30 + $0x4c] sm:$0xf]  ;;  %v2118_v20 = vsel %vm4483_vm6, %v3806_v12, %v2117_v13 }
 0x16d   : > { %v1296_v21 = vpop.permute.xlu1 %1295  ;;  %v2082_v18 = vrot.slane %v3764_v14, 5 }
 0x16e   : > { %1374 = vst.msk [vmem:[#allocation2 + $0x48] sm:$0xf] %vm1355_vm10, %v1296_v21  ;;  %v1294_v23 = vpop.permute.xlu0 %1293  ;;  %v3763_v21 = vld [vmem:[%s4278_s30 + $0x48] sm:$0xe] }
 0x16f   : > { %1373 = vst.msk [vmem:[#allocation2 + $0x44] sm:$0xf] %vm1355_vm10, %v1294_v23  ;;  %1872 = vrot.lane.b32.xlu2 %v1761_v26, %s4193_s7  ;;  %v2084_v23 = vrot.slane %v2082_v18, 4  ;;  %v3801_v10 = vrot.slane %v3763_v21, 9 }
 0x171   : > { %v1310_v41 = vpop.permute.xlu2 %1309  ;;  %v2086_v34 = vsel %vm4483_vm6, %v2084_v23, %v2085_v24  ;;  %v2083_v38 = vsel %vm4483_vm6, %v3801_v10, %v2082_v18  ;;  %v3782_v18 = vld [vmem:[%s4278_s30 + $0x94] sm:$0xf]  ;;  %v3783_v24 = vld [vmem:[%s4278_s30 + $0x98] sm:$0x1] }
 0x172   : > { %1381 = vst.msk [vmem:[#allocation2 + $0x64] sm:$0xf] %vm1355_vm10, %v1310_v41  ;;  %v2077_v41 = vrot.slane %v2075_v7, 4  ;;  %v3777_v7 = vld [vmem:[%s4278_s30 + $0x80] sm:$0x1]  ;;  %v2124_v21 = vrot.slane %v3782_v18, 5 }
 0x173   : > { %1882 = vrot.lane.b32.xlu1 %v1819_v29, %s4193_s7 }
 0x174   : > { %1880 = vrot.lane.b32.xlu0 %v1809_v9, %s4193_s7  ;;  %v3767_v9 = vld [vmem:[%s4278_s30 + $0x58] sm:$0xf]  ;;  %v2126_v10 = vrot.slane %v2124_v21, 4 }
 0x175   : > { %v1302_v42 = vpop.permute.xlu1 %1301  ;;  %v2089_v28 = vrot.slane %v3767_v9, 5 }
 0x176   : > { %1377 = vst.msk [vmem:[#allocation2 + $0x54] sm:$0xf] %vm1355_vm10, %v1302_v42  ;;  %v1300_v46 = vpop.permute.xlu0 %1299  ;;  %v2078_v42 = vrot.slane %v3762_v35, 5 }
 0x177   : > { %1376 = vst.msk [vmem:[#allocation2 + $0x50] sm:$0xf] %vm1355_vm10, %v1300_v46  ;;  %1878 = vrot.lane.b32.xlu2 %v1795_v47, %s4193_s7  ;;  %v2091_v47 = vrot.slane %v2089_v28, 4  ;;  %s3564_s7 = sshll.u32 %s3560_s5, 4  ;;  %s3565_s7 = int_to_ptr.hbm [resolvable:$true] %s3564_s7 }
 0x179   : > { %v1316_v57 = vpop.permute.xlu2 %1315 }
 0x17a   : > { %1384 = vst.msk [vmem:[#allocation2 + $0x70] sm:$0xf] %vm1355_vm10, %v1316_v57  ;;  %v3772_v57 = vld [vmem:[%s4278_s30 + $0x6c] sm:$0xe] }
 0x17b   : > { %2161 = vrot.lane.b32.xlu1 %v2055_v31, %s4194_s8  ;;  %v2092_v31 = vrot.slane %v3768_v40, 5 }
 0x17c   : > { %2159 = vrot.lane.b32.xlu0 %v2051_v50, %s4194_s8  ;;  %v2079_v50 = vsel %vm4483_vm6, %v2077_v41, %v2078_v42  ;;  %v3787_v41 = vld [vmem:[%s4278_s30 + $0xa8] sm:$0xe]  ;;  %v3788_v42 = vld [vmem:[%s4278_s30 + $0xac] sm:$0xf] }
 0x17d   : > { %v1308_v51 = vpop.permute.xlu1 %1307  ;;  %v2093_v56 = vsel %vm4483_vm6, %v2091_v47, %v2092_v31  ;;  %v3809_v47 = vrot.slane %v3787_v41, 9  ;;  %v2138_v31 = vrot.slane %v3788_v42, 5  ;;  %v3816_v41 = vld [vmem:[%s4278_s30 + $0x30] sm:$0xf]  ;;  %v3821_v42 = vld [vmem:[%s4278_s30 + $0x4c] sm:$0xf] }
 0x17e   : > { %1380 = vst.msk [vmem:[#allocation2 + $0x60] sm:$0xf] %vm1355_vm10, %v1308_v51  ;;  %v1306_v33 = vpop.permute.xlu0 %1305  ;;  %v3802_v51 = vrot.slane %v3766_v32, 9 }
 0x17f   : > { %1379 = vst.msk [vmem:[#allocation2 + $0x5c] sm:$0xf] %vm1355_vm10, %v1306_v33  ;;  %2157 = vrot.lane.b32.xlu2 %v2048_v60, %s4194_s8  ;;  %v2106_v33 = vrot.slane %v3774_v37, 5  ;;  %v2139_v37 = vsel %vm4483_vm6, %v3809_v47, %v2138_v31  ;;  %v2140_v12 = vrot.slane %v2138_v31, 4  ;;  %v3819_v31 = vld [vmem:[%s4278_s30 + $0x40] sm:$0xf] }
 0x180   : > { %v2090_v55 = vsel %vm4483_vm6, %v3802_v51, %v2089_v28  ;;  %v3780_v28 = vld [vmem:[%s4278_s30 + $0x8c] sm:$0x1]  ;;  %v3784_v51 = vld [vmem:[%s4278_s30 + $0x9c] sm:$0xe] }
 0x181   : > { %v1322_v8 = vpop.permute.xlu2 %1321  ;;  %v2107_v1 = vsel %vm4483_vm6, %v2105_v58, %v2106_v33  ;;  %v3792_v33 = vld [vmem:[%s4278_s30 + $0xbc] sm:$0x1] }
 0x182   : > { %1387 = vst.msk [vmem:[#allocation2 + $0x7c] sm:$0xf] %vm1355_vm10, %v1322_v8  ;;  %v2098_v8 = vrot.slane %v2096_v44, 4  ;;  %v3786_v44 = vld [vmem:[%s4278_s30 + $0xa4] sm:$0x1] }
 0x183   : > { %2167 = vrot.lane.b32.xlu1 %v2065_v62, %s4194_s8  ;;  %v3804_v62 = vrot.slane %v3772_v57, 9 }
 0x184   : > { %2165 = vrot.lane.b32.xlu0 %v2062_v0, %s4194_s8  ;;  %v3776_v0 = vld [vmem:[%s4278_s30 + $0x7c] sm:$0xf] }
 0x185   : > { %v1314_v11 = vpop.permute.xlu1 %1313  ;;  %v2104_v2 = vsel %vm4483_vm6, %v3804_v62, %v2103_v54  ;;  %v2110_v6 = vrot.slane %v3776_v0, 5  ;;  %v3791_v54 = vld [vmem:[%s4278_s30 + $0xb8] sm:$0xf] }
 0x186   : > { %1383 = vst.msk [vmem:[#allocation2 + $0x6c] sm:$0xf] %vm1355_vm10, %v1314_v11  ;;  %v1312_v15 = vpop.permute.xlu0 %1311  ;;  %v2099_v11 = vrot.slane %v3771_v63, 5  ;;  %v2145_v57 = vrot.slane %v3791_v54, 5 }
 0x187   : > { %1382 = vst.msk [vmem:[#allocation2 + $0x68] sm:$0xf] %vm1355_vm10, %v1312_v15  ;;  %2163 = vrot.lane.b32.xlu2 %v2058_v16, %s4194_s8  ;;  %v2112_v16 = vrot.slane %v2110_v6, 4 }
 0x188   : > { %v2147_v62 = vrot.slane %v2145_v57, 4 }
 0x189   : > { %v1825_v26 = vpop.permute.xlu2 %1824 }
 0x18a   : > { %1919 = vst.msk [vmem:[#allocation2 + $0x8] sm:$0xf] %vm1916_vm11, %v1825_v26  ;;  %v3781_v26 = vld [vmem:[%s4278_s30 + $0x90] sm:$0xe] }
 0x18b   : > { %2173 = vrot.lane.b32.xlu1 %v2076_v17, %s4194_s8  ;;  %v2113_v17 = vrot.slane %v3777_v7, 5 }
 0x18c   : > { %2171 = vrot.lane.b32.xlu0 %v2072_v5, %s4194_s8  ;;  %v2100_v5 = vsel %vm4483_vm6, %v2098_v8, %v2099_v11  ;;  %v3795_v11 = vld [vmem:[%s4278_s30 + $0xc8] sm:$0x1] }
 0x18d   : > { %v1320_v27 = vpop.permute.xlu1 %1319  ;;  %v2114_v23 = vsel %vm4483_vm6, %v2112_v16, %v2113_v17  ;;  %v2155_v17 = vrot.slane %v3795_v11, 5 }
 0x18e   : > { %1386 = vst.msk [vmem:[#allocation2 + $0x78] sm:$0xf] %vm1355_vm10, %v1320_v27  ;;  %v1318_v29 = vpop.permute.xlu0 %1317  ;;  %v3805_v27 = vrot.slane %v3775_v22, 9 }
 0x18f   : > { %1385 = vst.msk [vmem:[#allocation2 + $0x74] sm:$0xf] %vm1355_vm10, %v1318_v29  ;;  %2169 = vrot.lane.b32.xlu2 %v2069_v30, %s4194_s8  ;;  %v2127_v29 = vrot.slane %v3783_v24, 5 }
 0x190   : > { %v2111_v39 = vsel %vm4483_vm6, %v3805_v27, %v2110_v6  ;;  %v3789_v6 = vld [vmem:[%s4278_s30 + $0xb0] sm:$0x1] }
 0x191   : > { %v1831_v45 = vpop.permute.xlu2 %1830  ;;  %v2128_v36 = vsel %vm4483_vm6, %v2126_v10, %v2127_v29  ;;  %v3815_v10 = vld [vmem:[%s4278_s30 + $0x28] sm:$0xf]  ;;  %v3814_v29 = vld [vmem:[%s4278_s30 + $0x24] sm:$0xf] }
 0x192   : > { %1922 = vst.msk [vmem:[#allocation2 + $0x14] sm:$0xf] %vm1916_vm11, %v1831_v45  ;;  %v2119_v45 = vrot.slane %v2117_v13, 4  ;;  %v2141_v13 = vrot.slane %v3789_v6, 5 }
 0x193   : > { %2179 = vrot.lane.b32.xlu1 %v2086_v34, %s4194_s8  ;;  %v3807_v34 = vrot.slane %v3781_v26, 9 }
 0x194   : > { %2177 = vrot.lane.b32.xlu0 %v2083_v38, %s4194_s8  ;;  %v3785_v38 = vld [vmem:[%s4278_s30 + $0xa0] sm:$0xf] }
 0x195   : > { %v1823_v46 = vpop.permute.xlu1 %1822  ;;  %v2125_v40 = vsel %vm4483_vm6, %v3807_v34, %v2124_v21  ;;  %v2131_v43 = vrot.slane %v3785_v38, 5  ;;  %v3818_v38 = vld [vmem:[%s4278_s30 + $0x3c] sm:$0xf] }
 0x196   : > { %1918 = vst.msk [vmem:[#allocation2 + $0x4] sm:$0xf] %vm1916_vm11, %v1823_v46  ;;  %v1821_v49 = vpop.permute.xlu0 %1820  ;;  %v2120_v46 = vrot.slane %v3780_v28, 5 }
 0x197   : > { %1917 = vst.msk [vmem:[#allocation2] sm:$0xf] %vm1916_vm11, %v1821_v49  ;;  %2175 = vrot.lane.b32.xlu2 %v2079_v50, %s4194_s8  ;;  %v2133_v50 = vrot.slane %v2131_v43, 4 }
 0x199   : > { %v1837_v59 = vpop.permute.xlu2 %1836 }
 0x19a   : > { %1925 = vst.msk [vmem:[#allocation2 + $0x20] sm:$0xf] %vm1916_vm11, %v1837_v59  ;;  %v3790_v59 = vld [vmem:[%s4278_s30 + $0xb4] sm:$0xe] }
 0x19b   : > { %2185 = vrot.lane.b32.xlu1 %v2097_v52, %s4194_s8  ;;  %v2134_v52 = vrot.slane %v3786_v44, 5 }
 0x19c   : > { %2183 = vrot.lane.b32.xlu0 %v2093_v56, %s4194_s8  ;;  %v2121_v56 = vsel %vm4483_vm6, %v2119_v45, %v2120_v46  ;;  %v3865_v46 = vld [vmem:[%s4278_s30 + $0x6c] sm:$0xf] }
 0x19d   : > { %v1829_v60 = vpop.permute.xlu1 %1828  ;;  %v2135_v58 = vsel %vm4483_vm6, %v2133_v50, %v2134_v52  ;;  %v2703_v50 = vshll.u32 %v3865_v46, 16  ;;  %v3823_v52 = vld [vmem:[%s4278_s30 + $0x58] sm:$0xf] }
 0x19e   : > { %1921 = vst.msk [vmem:[#allocation2 + $0x10] sm:$0xf] %vm1916_vm11, %v1829_v60  ;;  %v1827_v53 = vpop.permute.xlu0 %1826  ;;  %v3808_v60 = vrot.slane %v3784_v51, 9  ;;  %v3890_v51 = vld [vmem:[%s4278_s30 + $0xd0] sm:$0xf] }
 0x19f   : > { %1920 = vst.msk [vmem:[#allocation2 + $0xc] sm:$0xf] %vm1916_vm11, %v1827_v53  ;;  %2181 = vrot.lane.b32.xlu2 %v2090_v55, %s4194_s8  ;;  %v2148_v53 = vrot.slane %v3792_v33, 5  ;;  %v3889_v33 = vld [vmem:[%s4278_s30 + $0xcc] sm:$0xf] }
 0x1a0   : > { %v2132_v3 = vsel %vm4483_vm6, %v3808_v60, %v2131_v43  ;;  %v3820_v43 = vld [vmem:[%s4278_s30 + $0x48] sm:$0xf]  ;;  %v3827_v60 = vld [vmem:[%s4278_s30 + $0x70] sm:$0xf] }
 0x1a1   : > { %v1843_v14 = vpop.permute.xlu2 %1842  ;;  %v2149_v4 = vsel %vm4483_vm6, %v2147_v62, %v2148_v53 }
 0x1a2   : > { %1928 = vst.msk [vmem:[#allocation2 + $0x2c] sm:$0xf] %vm1916_vm11, %v1843_v14 }
 0x1a3   : > { %2191 = vrot.lane.b32.xlu1 %v2107_v1, %s4194_s8  ;;  %v3810_v1 = vrot.slane %v3790_v59, 9  ;;  %v3822_v59 = vld [vmem:[%s4278_s30 + $0x54] sm:$0xf] }
 0x1a4   : > { %2189 = vrot.lane.b32.xlu0 %v2104_v2, %s4194_s8  ;;  %v3794_v2 = vld [vmem:[%s4278_s30 + $0xc4] sm:$0xf] }
 0x1a5   : > { %v1835_v15 = vpop.permute.xlu1 %1834  ;;  %v2146_v7 = vsel %vm4483_vm6, %v3810_v1, %v2145_v57  ;;  %v2152_v8 = vrot.slane %v3794_v2, 5  ;;  %v3866_v57 = vld [vmem:[%s4278_s30 + $0x70] sm:$0xf]  ;;  %v3826_v1 = vld [vmem:[%s4278_s30 + $0x6c] sm:$0xf]  ;;  %v2895_v2 = vshll.u32 %v3889_v33, 16 }
 0x1a6   : > { %1924 = vst.msk [vmem:[#allocation2 + $0x1c] sm:$0xf] %vm1916_vm11, %v1835_v15  ;;  %v1833_v19 = vpop.permute.xlu0 %1832  ;;  %v2709_v53 = vshll.u32 %v3866_v57, 16 }
 0x1a7   : > { %1923 = vst.msk [vmem:[#allocation2 + $0x18] sm:$0xf] %vm1916_vm11, %v1833_v19  ;;  %2187 = vrot.lane.b32.xlu2 %v2100_v5, %s4194_s8  ;;  %v2154_v16 = vrot.slane %v2152_v8, 4  ;;  %v2142_v19 = vsel %vm4483_vm6, %v2140_v12, %v2141_v13  ;;  %v3812_v5 = vld [vmem:[%s4278_s30 + $0x18] sm:$0xf] }
 0x1a8   : > { %v3891_v12 = vld [vmem:[%s4278_s30 + $0xd4] sm:$0x1] }
 0x1a9   : > { %v1849_v9 = vpop.permute.xlu2 %1848  ;;  %v2156_v21 = vsel %vm4483_vm6, %v2154_v16, %v2155_v17  ;;  %v2713_v16 = vshrl.u32 %v3866_v57, 16  ;;  %v3825_v17 = vld [vmem:[%s4278_s30 + $0x64] sm:$0xf] }
 0x1aa   : > { %1931 = vst.msk [vmem:[#allocation2 + $0x38] sm:$0xf] %vm1916_vm11, %v1849_v9 }
 0x1ab   : > { %2197 = vrot.lane.b32.xlu1 %v2118_v20, %s4194_s8  ;;  %v3793_v20 = vld [vmem:[%s4278_s30 + $0xc0] sm:$0xe] }
 0x1ac   : > { %2195 = vrot.lane.b32.xlu0 %v2114_v23, %s4194_s8  ;;  %v3811_v22 = vrot.slane %v3793_v20, 9  ;;  %v3843_v20 = vld [vmem:[%s4278_s30 + $0xd0] sm:$0xf] }
 0x1ad   : > { %v1841_v30 = vpop.permute.xlu1 %1840 }
 0x1ae   : > { %1927 = vst.msk [vmem:[#allocation2 + $0x28] sm:$0xf] %vm1916_vm11, %v1841_v30  ;;  %v1839_v35 = vpop.permute.xlu0 %1838  ;;  %v2153_v27 = vsel %vm4483_vm6, %v3811_v22, %v2152_v8  ;;  %v2715_v22 = vrot.slane %v2713_v16, 4  ;;  %v3840_v16 = vld [vmem:[%s4278_s30 + $0xc0] sm:$0xf] }
 0x1af   : > { %1926 = vst.msk [vmem:[#allocation2 + $0x24] sm:$0xf] %vm1916_vm11, %v1839_v35  ;;  %2193 = vrot.lane.b32.xlu2 %v2111_v39, %s4194_s8  ;;  %v3813_v35 = vld [vmem:[%s4278_s30 + $0x1c] sm:$0xf]  ;;  %v3817_v39 = vld [vmem:[%s4278_s30 + $0x34] sm:$0xf] }
 0x1b1   : > { %v1855_v48 = vpop.permute.xlu2 %1854 }
 0x1b2   : > { %1934 = vst.msk [vmem:[#allocation2 + $0x44] sm:$0xf] %vm1916_vm11, %v1855_v48  ;;  %v3824_v48 = vld [vmem:[%s4278_s30 + $0x60] sm:$0xf] }
 0x1b3   : > { %2203 = vrot.lane.b32.xlu1 %v2128_v36, %s4194_s8 }
 0x1b4   : > { %2201 = vrot.lane.b32.xlu0 %v2125_v40, %s4194_s8 }
 0x1b5   : > { %v1847_v49 = vpop.permute.xlu1 %1846 }
 0x1b6   : > { %1930 = vst.msk [vmem:[#allocation2 + $0x34] sm:$0xf] %vm1916_vm11, %v1847_v49  ;;  %v1845_v32 = vpop.permute.xlu0 %1844  ;;  %v2700_v49 = vshrl.u32 %v3865_v46, 16 }
 0x1b7   : > { %1929 = vst.msk [vmem:[#allocation2 + $0x30] sm:$0xf] %vm1916_vm11, %v1845_v32  ;;  %2199 = vrot.lane.b32.xlu2 %v2121_v56, %s4194_s8  ;;  %v2705_v32 = vrot.slane %v2703_v50, 5  ;;  %v3886_v50 = vld [vmem:[%s4278_s30 + $0xc0] sm:$0xf] }
 0x1b8   : > { %v2702_v54 = vrot.slane %v2700_v49, 4  ;;  %v2871_v57 = vshll.u32 %v3886_v50, 16 }
 0x1b9   : > { %v1861_v0 = vpop.permute.xlu2 %1860 }
 0x1ba   : > { %1937 = vst.msk [vmem:[#allocation2 + $0x50] sm:$0xf] %vm1916_vm11, %v1861_v0  ;;  %v2706_v62 = vor.u32 %v2705_v32, %v2702_v54  ;;  %v2901_v0 = vshll.u32 %v3890_v51, 16  ;;  %v3863_v54 = vld [vmem:[%s4278_s30 + $0x64] sm:$0xf] }
 0x1bb   : > { %2209 = vrot.lane.b32.xlu1 %v2139_v37, %s4194_s8 }
 0x1bc   : > { %2207 = vrot.lane.b32.xlu0 %v2135_v58, %s4194_s8  ;;  %v2903_v6 = vrot.slane %v2901_v0, 5 }
 0x1bd   : > { %v1853_v55 = vpop.permute.xlu1 %1852 }
 0x1be   : > { %1933 = vst.msk [vmem:[#allocation2 + $0x40] sm:$0xf] %vm1916_vm11, %v1853_v55  ;;  %v1851_v63 = vpop.permute.xlu0 %1850  ;;  %v2905_v55 = vshrl.u32 %v3890_v51, 16  ;;  %v3913_v51 = vld [vmem:[%s4278_s30 + $0x6c] sm:$0xe] }
 0x1bf   : > { %1932 = vst.msk [vmem:[#allocation2 + $0x3c] sm:$0xf] %vm1916_vm11, %v1851_v63  ;;  %2205 = vrot.lane.b32.xlu2 %v2132_v3, %s4194_s8  ;;  %v2892_v63 = vshrl.u32 %v3889_v33, 16  ;;  %v2707_v3 = vrot.slane %v2706_v62, 4  ;;  %v2685_v33 = vshll.u32 %v3863_v54, 16 }
 0x1c1   : > { %v1867_v14 = vpop.permute.xlu2 %1866  ;;  %v2894_v13 = vrot.slane %v2892_v63, 4  ;;  %v3887_v63 = vld [vmem:[%s4278_s30 + $0xc4] sm:$0xf] }
 0x1c2   : > { %1940 = vst.msk [vmem:[#allocation2 + $0x5c] sm:$0xf] %vm1916_vm11, %v1867_v14  ;;  %v2897_v14 = vrot.slane %v2895_v2, 5  ;;  %v5416_v2 = vrot.slane %v2685_v33, 5 }
 0x1c3   : > { %2215 = vrot.lane.b32.xlu1 %v2149_v4, %s4194_s8  ;;  %v2711_v4 = vrot.slane %v2709_v53, 5  ;;  %v2873_v53 = vrot.slane %v2871_v57, 5 }
 0x1c4   : > { %2213 = vrot.lane.b32.xlu0 %v2146_v7, %s4194_s8  ;;  %v2907_v7 = vrot.slane %v2905_v55, 4  ;;  %v3862_v55 = vld [vmem:[%s4278_s30 + $0x60] sm:$0xf] }
 0x1c5   : > { %v1859_v15 = vpop.permute.xlu1 %1858 }
 0x1c6   : > { %1936 = vst.msk [vmem:[#allocation2 + $0x4c] sm:$0xf] %vm1916_vm11, %v1859_v15  ;;  %v1857_v18 = vpop.permute.xlu0 %1856 }
 0x1c7   : > { %1935 = vst.msk [vmem:[#allocation2 + $0x48] sm:$0xf] %vm1916_vm11, %v1857_v18  ;;  %2211 = vrot.lane.b32.xlu2 %v2142_v19, %s4194_s8  ;;  %v2712_v18 = vsel %vm4289_vm2, %v2707_v3, %v2711_v4  ;;  %v2908_v19 = vor.u32 %v2907_v7, %v2903_v6 }
 0x1c9   : > { %v1873_v23 = vpop.permute.xlu2 %1872 }
 0x1ca   : > { %1943 = vst.msk [vmem:[#allocation2 + $0x68] sm:$0xf] %vm1916_vm11, %v1873_v23  ;;  %v2909_v23 = vrot.slane %v2908_v19, 4 }
 0x1cb   : > { %2354 = vrot.lane.b32.xlu1 %v3812_v5, %s4195_s9  ;;  %v2911_v5 = vshll.u32 %v3891_v12, 16  ;;  %v3841_v12 = vld [vmem:[%s4278_s30 + $0xc4] sm:$0xf] }
 0x1cc   : > { %2219 = vrot.lane.b32.xlu0 %v2156_v21, %s4194_s8  ;;  %v2898_v21 = vor.u32 %v2897_v14, %v2894_v13  ;;  %v2877_v14 = vshll.u32 %v3887_v63, 16 }
 0x1cd   : > { %v1865_v24 = vpop.permute.xlu1 %1864 }
 0x1ce   : > { %1939 = vst.msk [vmem:[#allocation2 + $0x58] sm:$0xf] %vm1916_vm11, %v1865_v24  ;;  %v1863_v26 = vpop.permute.xlu0 %1862  ;;  %v2913_v24 = vrot.slane %v2911_v5, 5 }
 0x1cf   : > { %1938 = vst.msk [vmem:[#allocation2 + $0x54] sm:$0xf] %vm1916_vm11, %v1863_v26  ;;  %2217 = vrot.lane.b32.xlu2 %v2153_v27, %s4194_s8  ;;  %v3867_v27 = vld [vmem:[%s4278_s30 + $0x74] sm:$0x1]  ;;  %s3547_s8 = scalar_lea.sflag [#allocation4], %s175_s26 }
 0x1d1   : > { %v1879_v9 = vpop.permute.xlu2 %1878 }
 0x1d2   : > { %1946 = vst.msk [vmem:[#allocation2 + $0x74] sm:$0xf] %vm1916_vm11, %v1879_v9 }
 0x1d3   : > { %2360 = vrot.lane.b32.xlu1 %v3815_v10, %s4195_s9 }
 0x1d4   : > { %2358 = vrot.lane.b32.xlu0 %v3814_v29, %s4195_s9  ;;  %v2899_v29 = vrot.slane %v2898_v21, 4 }
 0x1d5   : > { %v1871_v30 = vpop.permute.xlu1 %1870 }
 0x1d6   : > { %1942 = vst.msk [vmem:[#allocation2 + $0x64] sm:$0xf] %vm1916_vm11, %v1871_v30  ;;  %v1869_v34 = vpop.permute.xlu0 %1868  ;;  %v3914_v30 = vld [vmem:[%s4278_s30 + $0x70] sm:$0xf] }
 0x1d7   : > { %1941 = vst.msk [vmem:[#allocation2 + $0x60] sm:$0xf] %vm1916_vm11, %v1869_v34  ;;  %2356 = vrot.lane.b32.xlu2 %v3813_v35, %s4195_s9  ;;  %v3842_v34 = vld [vmem:[%s4278_s30 + $0xcc] sm:$0xf]  ;;  %v2716_v35 = vor.u32 %v2715_v22, %v2711_v4 }
 0x1d9   : > { %v2158_v36 = vpop.permute.xlu2 %2157 }
 0x1da   : > { %2254 = vst.msk [vmem:[#allocation2] sm:$0xf] %vm2253_vm12, %v2158_v36  ;;  %v2904_v36 = vsel %vm4289_vm2, %v2899_v29, %v2903_v6  ;;  %v3864_v6 = vld [vmem:[%s4278_s30 + $0x68] sm:$0x1]  ;;  %v3911_v29 = vld [vmem:[%s4278_s30 + $0x64] sm:$0xf] }
 0x1db   : > { %2366 = vrot.lane.b32.xlu1 %v3818_v38, %s4195_s9  ;;  %v2719_v38 = vshll.u32 %v3867_v27, 16 }
 0x1dc   : > { %2364 = vrot.lane.b32.xlu0 %v3817_v39, %s4195_s9  ;;  %v2914_v39 = vsel %vm4289_vm2, %v2909_v23, %v2913_v24  ;;  %v2879_v23 = vrot.slane %v2877_v14, 5  ;;  %v3838_v14 = vld [vmem:[%s4278_s30 + $0xb4] sm:$0xf] }
 0x1dd   : > { %v1877_v28 = vpop.permute.xlu1 %1876 }
 0x1de   : > { %1945 = vst.msk [vmem:[#allocation2 + $0x70] sm:$0xf] %vm1916_vm11, %v1877_v28  ;;  %v1875_v40 = vpop.permute.xlu0 %1874  ;;  %v3937_v28 = vld [vmem:[%s4278_s30 + $0xcc] sm:$0xe] }
 0x1df   : > { %1944 = vst.msk [vmem:[#allocation2 + $0x6c] sm:$0xf] %vm1916_vm11, %v1875_v40  ;;  %2362 = vrot.lane.b32.xlu2 %v3816_v41, %s4195_s9  ;;  %v3938_v40 = vld [vmem:[%s4278_s30 + $0xd0] sm:$0xf]  ;;  %v3191_v41 = vrot.slane %v3914_v30, 5  ;;  %v2881_v30 = vshrl.u32 %v3887_v63, 16 }
 0x1e0   : > { %v3247_v46 = vrot.slane %v3938_v40, 5  ;;  %v3910_v40 = vld [vmem:[%s4278_s30 + $0x60] sm:$0xe] }
 0x1e1   : > { %v2164_v44 = vpop.permute.xlu2 %2163 }
 0x1e2   : > { %2257 = vst.msk [vmem:[#allocation2 + $0xc] sm:$0xf] %vm2253_vm12, %v2164_v44  ;;  %v2721_v44 = vrot.slane %v2719_v38, 5  ;;  %v3249_v19 = vrot.slane %v3247_v46, 4 }
 0x1e3   : > { %2372 = vrot.lane.b32.xlu1 %v3821_v42, %s4195_s9  ;;  %v3915_v42 = vld [vmem:[%s4278_s30 + $0x74] sm:$0x1] }
 0x1e4   : > { %2370 = vrot.lane.b32.xlu0 %v3820_v43, %s4195_s9  ;;  %v2717_v43 = vrot.slane %v2716_v35, 4  ;;  %v3194_v49 = vrot.slane %v3915_v42, 5  ;;  %v2883_v42 = vrot.slane %v2881_v30, 4 }
 0x1e5   : > { %v1883_v45 = vpop.permute.xlu1 %1882 }
 0x1e6   : > { %1948 = vst.msk [vmem:[#allocation2 + $0x7c] sm:$0xf] %vm1916_vm11, %v1883_v45  ;;  %v1881_v47 = vpop.permute.xlu0 %1880  ;;  %v3955_v45 = vrot.slane %v3937_v28, 9  ;;  %v2722_v32 = vsel %vm4289_vm2, %v2717_v43, %v2721_v44  ;;  %v3912_v28 = vld [vmem:[%s4278_s30 + $0x68] sm:$0x1] }
 0x1e7   : > { %1947 = vst.msk [vmem:[#allocation2 + $0x78] sm:$0xf] %vm1916_vm11, %v1881_v47  ;;  %2368 = vrot.lane.b32.xlu2 %v3819_v31, %s4195_s9  ;;  %v3187_v44 = vrot.slane %v3912_v28, 5 }
 0x1e9   : > { %v2170_v56 = vpop.permute.xlu2 %2169 }
 0x1ea   : > { %2260 = vst.msk [vmem:[#allocation2 + $0x18] sm:$0xf] %vm2253_vm12, %v2170_v56  ;;  %v3248_v56 = vsel %vm4483_vm6, %v3955_v45, %v3247_v46  ;;  %v3946_v45 = vrot.slane %v3910_v40, 9  ;;  %v3907_v40 = vld [vmem:[%s4278_s30 + $0x54] sm:$0xe] }
 0x1eb   : > { %2378 = vrot.lane.b32.xlu1 %v3824_v48, %s4195_s9  ;;  %v3193_v48 = vrot.slane %v3191_v41, 4 }
 0x1ec   : > { %2376 = vrot.lane.b32.xlu0 %v3823_v52, %s4195_s9 }
 0x1ed   : > { %v2162_v37 = vpop.permute.xlu1 %2161 }
 0x1ee   : > { %2256 = vst.msk [vmem:[#allocation2 + $0x8] sm:$0xf] %vm2253_vm12, %v2162_v37  ;;  %v2160_v58 = vpop.permute.xlu0 %2159  ;;  %v2868_v37 = vshrl.u32 %v3886_v50, 16 }
 0x1ef   : > { %2255 = vst.msk [vmem:[#allocation2 + $0x4] sm:$0xf] %vm2253_vm12, %v2160_v58  ;;  %2374 = vrot.lane.b32.xlu2 %v3822_v59, %s4195_s9  ;;  %v3195_v58 = vsel %vm4483_vm6, %v3193_v48, %v3194_v49  ;;  %v2689_v59 = vshrl.u32 %v3863_v54, 16  ;;  %v5448_v48 = vld [vmem:[%s4278_s30 + $0xc4] sm:$0xf] }
 0x1f0   : > { %v2870_v62 = vrot.slane %v2868_v37, 4  ;;  %v3860_v49 = vld [vmem:[%s4278_s30 + $0x58] sm:$0xf]  ;;  %v3240_v57 = vrot.slane %v5448_v48, 5 }
 0x1f1   : > { %v2176_v8 = vpop.permute.xlu2 %2175  ;;  %v2691_v3 = vrot.slane %v2689_v59, 4  ;;  %v3936_v59 = vld [vmem:[%s4278_s30 + $0xc8] sm:$0x1] }
 0x1f2   : > { %2263 = vst.msk [vmem:[#allocation2 + $0x24] sm:$0xf] %vm2253_vm12, %v2176_v8  ;;  %v2676_v8 = vshrl.u32 %v3862_v55, 16  ;;  %v2874_v13 = vor.u32 %v2873_v53, %v2870_v62 }
 0x1f3   : > { %2384 = vrot.lane.b32.xlu1 %v3827_v60, %s4195_s9  ;;  %v3947_v60 = vrot.slane %v3913_v51, 9  ;;  %v2661_v51 = vshll.u32 %v3860_v49, 16 }
 0x1f4   : > { %2382 = vrot.lane.b32.xlu0 %v3826_v1, %s4195_s9  ;;  %v2875_v22 = vrot.slane %v2874_v13, 4 }
 0x1f5   : > { %v2168_v11 = vpop.permute.xlu1 %2167  ;;  %v3192_v7 = vsel %vm4483_vm6, %v3947_v60, %v3191_v41  ;;  %v2663_v63 = vrot.slane %v2661_v51, 5 }
 0x1f6   : > { %2259 = vst.msk [vmem:[#allocation2 + $0x14] sm:$0xf] %vm2253_vm12, %v2168_v11  ;;  %v2166_v15 = vpop.permute.xlu0 %2165  ;;  %v2679_v11 = vshll.u32 %v3862_v55, 16  ;;  %v2880_v38 = vsel %vm4289_vm2, %v2875_v22, %v2879_v23  ;;  %v3242_v55 = vrot.slane %v3240_v57, 4 }
 0x1f7   : > { %2258 = vst.msk [vmem:[#allocation2 + $0x10] sm:$0xf] %vm2253_vm12, %v2166_v15  ;;  %2380 = vrot.lane.b32.xlu2 %v3825_v17, %s4195_s9  ;;  %v3939_v15 = vld [vmem:[%s4278_s30 + $0xd4] sm:$0x1]  ;;  %v2692_v17 = vor.u32 %v2691_v3, %v5416_v2 }
 0x1f8   : > { %v3250_v5 = vrot.slane %v3939_v15, 5  ;;  %v2681_v21 = vrot.slane %v2679_v11, 5 }
 0x1f9   : > { %v2182_v26 = vpop.permute.xlu2 %2181  ;;  %v2693_v27 = vrot.slane %v2692_v17, 4  ;;  %v3934_v17 = vld [vmem:[%s4278_s30 + $0xc0] sm:$0xe] }
 0x1fa   : > { %2266 = vst.msk [vmem:[#allocation2 + $0x30] sm:$0xf] %vm2253_vm12, %v2182_v26 }
 0x1fb   : > { %2943 = vrot.lane.b32.xlu1 %v2712_v18, %s4196_s10  ;;  %v2695_v18 = vshll.u32 %v3864_v6, 16  ;;  %v3861_v6 = vld [vmem:[%s4278_s30 + $0x5c] sm:$0x1] }
 0x1fc   : > { %2416 = vrot.lane.b32.xlu0 %v3843_v20, %s4195_s9  ;;  %v2678_v20 = vrot.slane %v2676_v8, 4 }
 0x1fd   : > { %v2174_v10 = vpop.permute.xlu1 %2173 }
 0x1fe   : > { %2262 = vst.msk [vmem:[#allocation2 + $0x20] sm:$0xf] %vm2253_vm12, %v2174_v10  ;;  %v2172_v9 = vpop.permute.xlu0 %2171  ;;  %v2697_v10 = vrot.slane %v2695_v18, 5  ;;  %v2682_v35 = vor.u32 %v2681_v21, %v2678_v20  ;;  %v3954_v21 = vrot.slane %v3934_v17, 9 }
 0x1ff   : > { %2261 = vst.msk [vmem:[#allocation2 + $0x1c] sm:$0xf] %vm2253_vm12, %v2172_v9  ;;  %2414 = vrot.lane.b32.xlu2 %v3842_v34, %s4195_s9  ;;  %v3251_v34 = vsel %vm4483_vm6, %v3249_v19, %v3250_v5 }
 0x200   : > { %v2683_v41 = vrot.slane %v2682_v35, 4  ;;  %v3241_v35 = vsel %vm4483_vm6, %v3954_v21, %v3240_v57 }
 0x201   : > { %v2188_v47 = vpop.permute.xlu2 %2187 }
 0x202   : > { %2269 = vst.msk [vmem:[#allocation2 + $0x3c] sm:$0xf] %vm2253_vm12, %v2188_v47  ;;  %v3888_v47 = vld [vmem:[%s4278_s30 + $0xc8] sm:$0x1]  ;;  %v2688_v54 = vsel %vm4289_vm2, %v2683_v41, %v5416_v2  ;;  %v3908_v41 = vld [vmem:[%s4278_s30 + $0x58] sm:$0xf] }
 0x203   : > { %2977 = vrot.lane.b32.xlu1 %v2914_v39, %s4196_s10  ;;  %v3184_v39 = vrot.slane %v3911_v29, 5 }
 0x204   : > { %2975 = vrot.lane.b32.xlu0 %v2904_v36, %s4196_s10  ;;  %v2698_v36 = vsel %vm4289_vm2, %v2693_v27, %v2697_v10 }
 0x205   : > { %v2180_v31 = vpop.permute.xlu1 %2179  ;;  %v3186_v43 = vrot.slane %v3184_v39, 4  ;;  %v3185_v33 = vsel %vm4483_vm6, %v3946_v45, %v3184_v39 }
 0x206   : > { %2265 = vst.msk [vmem:[#allocation2 + $0x2c] sm:$0xf] %vm2253_vm12, %v2180_v31  ;;  %v2178_v52 = vpop.permute.xlu0 %2177 }
 0x207   : > { %2264 = vst.msk [vmem:[#allocation2 + $0x28] sm:$0xf] %vm2253_vm12, %v2178_v52  ;;  %2945 = vrot.lane.b32.xlu2 %v2722_v32, %s4196_s10  ;;  %v3859_v52 = vld [vmem:[%s4278_s30 + $0x54] sm:$0xf]  ;;  %v2884_v32 = vor.u32 %v2883_v42, %v2879_v23  ;;  %v3188_v37 = vsel %vm4483_vm6, %v3186_v43, %v3187_v44 }
 0x208   : > { %v2652_v60 = vshrl.u32 %v3859_v52, 16  ;;  %v2655_v62 = vshll.u32 %v3859_v52, 16 }
 0x209   : > { %v2194_v0 = vpop.permute.xlu2 %2193  ;;  %v2885_v53 = vrot.slane %v2884_v32, 4 }
 0x20a   : > { %2272 = vst.msk [vmem:[#allocation2 + $0x48] sm:$0xf] %vm2253_vm12, %v2194_v0  ;;  %v2657_v8 = vrot.slane %v2655_v62, 5  ;;  %v3931_v62 = vld [vmem:[%s4278_s30 + $0xb4] sm:$0xe] }
 0x20b   : > { %3312 = vrot.lane.b32.xlu1 %v3248_v56, %s4197_s11  ;;  %v2887_v56 = vshll.u32 %v3888_v47, 16  ;;  %v3177_v47 = vrot.slane %v3908_v41, 5  ;;  %v3837_v41 = vld [vmem:[%s4278_s30 + $0xac] sm:$0xf] }
 0x20c   : > { %3282 = vrot.lane.b32.xlu0 %v3195_v58, %s4197_s11  ;;  %v2665_v58 = vshrl.u32 %v3860_v49, 16 }
 0x20d   : > { %v2186_v1 = vpop.permute.xlu1 %2185  ;;  %v2889_v0 = vrot.slane %v2887_v56, 5  ;;  %v3179_v21 = vrot.slane %v3177_v47, 4 }
 0x20e   : > { %2268 = vst.msk [vmem:[#allocation2 + $0x38] sm:$0xf] %vm2253_vm12, %v2186_v1  ;;  %v2184_v4 = vpop.permute.xlu0 %2183  ;;  %v3243_v1 = vrot.slane %v3936_v59, 5  ;;  %v2667_v2 = vrot.slane %v2665_v58, 4  ;;  %v3933_v58 = vld [vmem:[%s4278_s30 + $0xbc] sm:$0x1] }
 0x20f   : > { %2267 = vst.msk [vmem:[#allocation2 + $0x34] sm:$0xf] %vm2253_vm12, %v2184_v4  ;;  %3280 = vrot.lane.b32.xlu2 %v3192_v7, %s4197_s11  ;;  %v2654_v7 = vrot.slane %v2652_v60, 4  ;;  %v2890_v13 = vsel %vm4289_vm2, %v2885_v53, %v2889_v0  ;;  %v3236_v0 = vrot.slane %v3933_v58, 5 }
 0x210   : > { %v2668_v15 = vor.u32 %v2667_v2, %v2663_v63  ;;  %v3244_v18 = vsel %vm4483_vm6, %v3242_v55, %v3243_v1  ;;  %v3953_v1 = vrot.slane %v3931_v62, 9 }
 0x211   : > { %v2200_v24 = vpop.permute.xlu2 %2199  ;;  %v2658_v19 = vor.u32 %v2657_v8, %v2654_v7  ;;  %v3881_v7 = vld [vmem:[%s4278_s30 + $0xac] sm:$0xf] }
 0x212   : > { %2275 = vst.msk [vmem:[#allocation2 + $0x54] sm:$0xf] %vm2253_vm12, %v2200_v24  ;;  %v2669_v22 = vrot.slane %v2668_v15, 4  ;;  %v2833_v17 = vshrl.u32 %v3881_v7, 16 }
 0x213   : > { %2412 = vrot.lane.b32.xlu1 %v3841_v12, %s4195_s9  ;;  %v3884_v12 = vld [vmem:[%s4278_s30 + $0xb8] sm:$0xf]  ;;  %v2659_v10 = vrot.slane %v2658_v19, 4 }
 0x214   : > { %2410 = vrot.lane.b32.xlu0 %v3840_v16, %s4195_s9  ;;  %v2671_v16 = vshll.u32 %v3861_v6, 16  ;;  %v2853_v5 = vshll.u32 %v3884_v12, 16  ;;  %v2857_v20 = vshrl.u32 %v3884_v12, 16  ;;  %v3857_v6 = vld [vmem:[%s4278_s30 + $0x4c] sm:$0xf] }
 0x215   : > { %v2192_v26 = vpop.permute.xlu1 %2191  ;;  %v2664_v28 = vsel %vm4289_vm2, %v2659_v10, %v2663_v63  ;;  %v2637_v15 = vshll.u32 %v3857_v6, 16 }
 0x216   : > { %2271 = vst.msk [vmem:[#allocation2 + $0x44] sm:$0xf] %vm2253_vm12, %v2192_v26  ;;  %v2190_v9 = vpop.permute.xlu0 %2189  ;;  %v2673_v23 = vrot.slane %v2671_v16, 5  ;;  %v3883_v26 = vld [vmem:[%s4278_s30 + $0xb4] sm:$0xf]  ;;  %v5482_v29 = vrot.slane %v2853_v5, 5 }
 0x217   : > { %2270 = vst.msk [vmem:[#allocation2 + $0x40] sm:$0xf] %vm2253_vm12, %v2190_v9  ;;  %3314 = vrot.lane.b32.xlu2 %v3251_v34, %s4197_s11  ;;  %v2859_v9 = vrot.slane %v2857_v20, 4  ;;  %v3885_v34 = vld [vmem:[%s4278_s30 + $0xbc] sm:$0x1]  ;;  %v2847_v39 = vshll.u32 %v3883_v26, 16 }
 0x218   : > { %v2863_v43 = vshll.u32 %v3885_v34, 16  ;;  %v2829_v16 = vshll.u32 %v3881_v7, 16 }
 0x219   : > { %v2206_v46 = vpop.permute.xlu2 %2205  ;;  %v2860_v42 = vor.u32 %v2859_v9, %v5482_v29  ;;  %v2849_v45 = vrot.slane %v2847_v39, 5  ;;  %v3882_v9 = vld [vmem:[%s4278_s30 + $0xb0] sm:$0x1] }
 0x21a   : > { %2278 = vst.msk [vmem:[#allocation2 + $0x60] sm:$0xf] %vm2253_vm12, %v2206_v46  ;;  %v3945_v46 = vrot.slane %v3907_v40, 9  ;;  %v2865_v52 = vrot.slane %v2863_v43, 5  ;;  %v2839_v40 = vshll.u32 %v3882_v9, 16 }
 0x21b   : > { %2971 = vrot.lane.b32.xlu1 %v2880_v38, %s4196_s10  ;;  %v2844_v38 = vshrl.u32 %v3883_v26, 16  ;;  %v2831_v26 = vrot.slane %v2829_v16, 5  ;;  %v3835_v9 = vld [vmem:[%s4278_s30 + $0xa0] sm:$0xf] }
 0x21c   : > { %2941 = vrot.lane.b32.xlu0 %v2698_v36, %s4196_s10  ;;  %v2674_v36 = vsel %vm4289_vm2, %v2669_v22, %v2673_v23  ;;  %v3178_v51 = vsel %vm4483_vm6, %v3945_v46, %v3177_v47  ;;  %v3858_v47 = vld [vmem:[%s4278_s30 + $0x50] sm:$0x1] }
 0x21d   : > { %v2198_v31 = vpop.permute.xlu1 %2197  ;;  %v2846_v44 = vrot.slane %v2844_v38, 4  ;;  %v2641_v38 = vshrl.u32 %v3857_v6, 16 }
 0x21e   : > { %2274 = vst.msk [vmem:[#allocation2 + $0x50] sm:$0xf] %vm2253_vm12, %v2198_v31  ;;  %v2196_v50 = vpop.permute.xlu0 %2195  ;;  %v3932_v31 = vld [vmem:[%s4278_s30 + $0xb8] sm:$0xf] }
 0x21f   : > { %2273 = vst.msk [vmem:[#allocation2 + $0x4c] sm:$0xf] %vm2253_vm12, %v2196_v50  ;;  %2939 = vrot.lane.b32.xlu2 %v2688_v54, %s4196_s10  ;;  %v2861_v50 = vrot.slane %v2860_v42, 4  ;;  %v3856_v54 = vld [vmem:[%s4278_s30 + $0x48] sm:$0xf]  ;;  %v3233_v56 = vrot.slane %v3932_v31, 5  ;;  %v2850_v57 = vor.u32 %v2849_v45, %v2846_v44 }
 0x220   : > { %v2631_v59 = vshll.u32 %v3856_v54, 16  ;;  %v2643_v43 = vrot.slane %v2641_v38, 4  ;;  %v2841_v45 = vrot.slane %v2839_v40, 5  ;;  %v3834_v38 = vld [vmem:[%s4278_s30 + $0x9c] sm:$0xf] }
 0x221   : > { %v2212_v3 = vpop.permute.xlu2 %2211  ;;  %v2866_v60 = vsel %vm4289_vm2, %v2861_v50, %v2865_v52  ;;  %v3235_v53 = vrot.slane %v3233_v56, 4  ;;  %v2851_v55 = vrot.slane %v2850_v57, 4  ;;  %v3234_v19 = vsel %vm4483_vm6, %v3953_v1, %v3233_v56  ;;  %v3905_v50 = vld [vmem:[%s4278_s30 + $0x4c] sm:$0xf]  ;;  %v3836_v52 = vld [vmem:[%s4278_s30 + $0xa8] sm:$0xf] }
 0x222   : > { %2281 = vst.msk [vmem:[#allocation2 + $0x6c] sm:$0xf] %vm2253_vm12, %v2212_v3  ;;  %v2633_v2 = vrot.slane %v2631_v59, 5  ;;  %v3928_v57 = vld [vmem:[%s4278_s30 + $0xa8] sm:$0xe]  ;;  %v3170_v58 = vrot.slane %v3905_v50, 5 }
 0x223   : > { %3278 = vrot.lane.b32.xlu1 %v3188_v37, %s4197_s11  ;;  %v3839_v37 = vld [vmem:[%s4278_s30 + $0xb8] sm:$0xf]  ;;  %v3237_v12 = vsel %vm4483_vm6, %v3235_v53, %v3236_v0  ;;  %v3952_v62 = vrot.slane %v3928_v57, 9  ;;  %v3903_v57 = vld [vmem:[%s4278_s30 + $0x44] sm:$0x1] }
 0x224   : > { %3276 = vrot.lane.b32.xlu0 %v3185_v33, %s4197_s11  ;;  %v2628_v33 = vshrl.u32 %v3856_v54, 16  ;;  %v3172_v1 = vrot.slane %v3170_v58, 4 }
 0x225   : > { %v2204_v4 = vpop.permute.xlu1 %2203 }
 0x226   : > { %2277 = vst.msk [vmem:[#allocation2 + $0x5c] sm:$0xf] %vm2253_vm12, %v2204_v4  ;;  %v2202_v11 = vpop.permute.xlu0 %2201  ;;  %v2630_v63 = vrot.slane %v2628_v33, 4  ;;  %v3906_v33 = vld [vmem:[%s4278_s30 + $0x50] sm:$0x1] }
 0x227   : > { %2276 = vst.msk [vmem:[#allocation2 + $0x58] sm:$0xf] %vm2253_vm12, %v2202_v11  ;;  %2973 = vrot.lane.b32.xlu2 %v2890_v13, %s4196_s10  ;;  %v3880_v11 = vld [vmem:[%s4278_s30 + $0xa8] sm:$0xf]  ;;  %v2856_v13 = vsel %vm4289_vm2, %v2851_v55, %v5482_v29 }
 0x228   : > { %v2820_v5 = vshrl.u32 %v3880_v11, 16  ;;  %v2823_v20 = vshll.u32 %v3880_v11, 16 }
 0x229   : > { %v2218_v24 = vpop.permute.xlu2 %2217 }
 0x22a   : > { %2284 = vst.msk [vmem:[#allocation2 + $0x78] sm:$0xf] %vm2253_vm12, %v2218_v24  ;;  %v2639_v24 = vrot.slane %v2637_v15, 5  ;;  %v2825_v34 = vrot.slane %v2823_v20, 5 }
 0x22b   : > { %2406 = vrot.lane.b32.xlu1 %v3838_v14, %s4195_s9  ;;  %v2634_v14 = vor.u32 %v2633_v2, %v2630_v63  ;;  %v3173_v63 = vrot.slane %v3906_v33, 5  ;;  %v3877_v2 = vld [vmem:[%s4278_s30 + $0x9c] sm:$0xf] }
 0x22c   : > { %3310 = vrot.lane.b32.xlu0 %v3244_v18, %s4197_s11  ;;  %v3909_v18 = vld [vmem:[%s4278_s30 + $0x5c] sm:$0x1]  ;;  %v2644_v54 = vor.u32 %v2643_v43, %v2639_v24  ;;  %v2799_v11 = vshll.u32 %v3877_v2, 16 }
 0x22d   : > { %v2210_v27 = vpop.permute.xlu1 %2209  ;;  %v3180_v22 = vrot.slane %v3909_v18, 5  ;;  %v2635_v23 = vrot.slane %v2634_v14, 4 }
 0x22e   : > { %2280 = vst.msk [vmem:[#allocation2 + $0x68] sm:$0xf] %vm2253_vm12, %v2210_v27  ;;  %v2208_v30 = vpop.permute.xlu0 %2207  ;;  %v2835_v27 = vrot.slane %v2833_v17, 4  ;;  %v2645_v59 = vrot.slane %v2644_v54, 4  ;;  %v2801_v18 = vrot.slane %v2799_v11, 5 }
 0x22f   : > { %2279 = vst.msk [vmem:[#allocation2 + $0x64] sm:$0xf] %vm2253_vm12, %v2208_v30  ;;  %3308 = vrot.lane.b32.xlu2 %v3241_v35, %s4197_s11  ;;  %v2822_v30 = vrot.slane %v2820_v5, 4  ;;  %v3181_v39 = vsel %vm4483_vm6, %v3179_v21, %v3180_v22  ;;  %v3853_v5 = vld [vmem:[%s4278_s30 + $0x3c] sm:$0xf] }
 0x230   : > { %v3878_v21 = vld [vmem:[%s4278_s30 + $0xa0] sm:$0xf] }
 0x231   : > { %v2357_v48 = vpop.permute.xlu2 %2356  ;;  %v2826_v42 = vor.u32 %v2825_v34, %v2822_v30  ;;  %v2805_v34 = vshll.u32 %v3878_v21, 16  ;;  %v2809_v50 = vshrl.u32 %v3878_v21, 16 }
 0x232   : > { %2452 = vst.msk [vmem:[#allocation2 + $0x4] sm:$0xf] %vm2450_vm13, %v2357_v48 }
 0x233   : > { %2937 = vrot.lane.b32.xlu1 %v2674_v36, %s4196_s10  ;;  %v2640_v36 = vsel %vm4289_vm2, %v2635_v23, %v2639_v24  ;;  %v2827_v48 = vrot.slane %v2826_v42, 4  ;;  %v2811_v33 = vrot.slane %v2809_v50, 4 }
 0x234   : > { %2935 = vrot.lane.b32.xlu0 %v2664_v28, %s4196_s10  ;;  %v2836_v28 = vor.u32 %v2835_v27, %v2831_v26 }
 0x235   : > { %v2216_v49 = vpop.permute.xlu1 %2215 }
 0x236   : > { %2283 = vst.msk [vmem:[#allocation2 + $0x74] sm:$0xf] %vm2253_vm12, %v2216_v49  ;;  %v2214_v32 = vpop.permute.xlu0 %2213  ;;  %v2837_v44 = vrot.slane %v2836_v28, 4 }
 0x237   : > { %2282 = vst.msk [vmem:[#allocation2 + $0x70] sm:$0xf] %vm2253_vm12, %v2214_v32  ;;  %2408 = vrot.lane.b32.xlu2 %v3839_v37, %s4195_s9  ;;  %v2647_v32 = vshll.u32 %v3858_v47, 16  ;;  %v2832_v37 = vsel %vm4289_vm2, %v2827_v48, %v2831_v26  ;;  %v3855_v26 = vld [vmem:[%s4278_s30 + $0x44] sm:$0x1] }
 0x238   : > { %v2842_v56 = vsel %vm4289_vm2, %v2837_v44, %v2841_v45  ;;  %v2807_v44 = vrot.slane %v2805_v34, 5  ;;  %v3902_v48 = vld [vmem:[%s4278_s30 + $0x40] sm:$0xf] }
 0x239   : > { %v2363_v3 = vpop.permute.xlu2 %2362 }
 0x23a   : > { %2455 = vst.msk [vmem:[#allocation2 + $0x10] sm:$0xf] %vm2450_vm13, %v2363_v3 }
 0x23b   : > { %3272 = vrot.lane.b32.xlu1 %v3178_v51, %s4197_s11  ;;  %v3929_v51 = vld [vmem:[%s4278_s30 + $0xac] sm:$0xf] }
 0x23c   : > { %2969 = vrot.lane.b32.xlu0 %v2866_v60, %s4196_s10  ;;  %v2649_v60 = vrot.slane %v2647_v32, 5  ;;  %v3226_v53 = vrot.slane %v3929_v51, 5  ;;  %v3901_v51 = vld [vmem:[%s4278_s30 + $0x3c] sm:$0xe] }
 0x23d   : > { %v2355_v4 = vpop.permute.xlu1 %2354 }
 0x23e   : > { %2451 = vst.msk [vmem:[#allocation2] sm:$0xf] %vm2450_vm13, %v2355_v4  ;;  %v2220_v8 = vpop.permute.xlu0 %2219  ;;  %v3854_v4 = vld [vmem:[%s4278_s30 + $0x40] sm:$0xf]  ;;  %v2650_v6 = vsel %vm4289_vm2, %v2645_v59, %v2649_v60  ;;  %v3227_v7 = vsel %vm4483_vm6, %v3952_v62, %v3226_v53  ;;  %v3228_v28 = vrot.slane %v3226_v53, 4  ;;  %v3166_v60 = vrot.slane %v3903_v57, 5 }
 0x23f   : > { %2285 = vst.msk [vmem:[#allocation2 + $0x7c] sm:$0xf] %vm2253_vm12, %v2220_v8  ;;  %2967 = vrot.lane.b32.xlu2 %v2856_v13, %s4196_s10  ;;  %v2796_v8 = vshrl.u32 %v3877_v2, 16  ;;  %v3174_v13 = vsel %vm4483_vm6, %v3172_v1, %v3173_v63  ;;  %v2613_v14 = vshll.u32 %v3854_v4, 16  ;;  %v2617_v15 = vshrl.u32 %v3854_v4, 16 }
 0x240   : > { %v3879_v53 = vld [vmem:[%s4278_s30 + $0xa4] sm:$0x1]  ;;  %v3851_v1 = vld [vmem:[%s4278_s30 + $0x34] sm:$0xf]  ;;  %v3926_v2 = vld [vmem:[%s4278_s30 + $0xa0] sm:$0xf] }
 0x241   : > { %v2369_v10 = vpop.permute.xlu2 %2368  ;;  %v2798_v17 = vrot.slane %v2796_v8, 4  ;;  %v5577_v22 = vrot.slane %v2613_v14, 5  ;;  %v2619_v23 = vrot.slane %v2617_v15, 4  ;;  %v2589_v11 = vshll.u32 %v3851_v1, 16 }
 0x242   : > { %2458 = vst.msk [vmem:[#allocation2 + $0x1c] sm:$0xf] %vm2450_vm13, %v2369_v10  ;;  %v2604_v10 = vshrl.u32 %v3853_v5, 16  ;;  %v3219_v14 = vrot.slane %v3926_v2, 5 }
 0x243   : > { %3306 = vrot.lane.b32.xlu1 %v3237_v12, %s4197_s11  ;;  %v3904_v12 = vld [vmem:[%s4278_s30 + $0x48] sm:$0xe]  ;;  %v2802_v30 = vor.u32 %v2801_v18, %v2798_v17  ;;  %v3927_v17 = vld [vmem:[%s4278_s30 + $0xa4] sm:$0x1] }
 0x244   : > { %3304 = vrot.lane.b32.xlu0 %v3234_v19, %s4197_s11  ;;  %v3944_v16 = vrot.slane %v3904_v12, 9  ;;  %v2593_v12 = vshrl.u32 %v3851_v1, 16 }
 0x245   : > { %v2361_v29 = vpop.permute.xlu1 %2360  ;;  %v2803_v43 = vrot.slane %v2802_v30, 4  ;;  %v3832_v30 = vld [vmem:[%s4278_s30 + $0x90] sm:$0xf] }
 0x246   : > { %2454 = vst.msk [vmem:[#allocation2 + $0xc] sm:$0xf] %vm2450_vm13, %v2361_v29  ;;  %v2359_v35 = vpop.permute.xlu0 %2358  ;;  %v3171_v27 = vsel %vm4483_vm6, %v3944_v16, %v3170_v58  ;;  %v2607_v29 = vshll.u32 %v3853_v5, 16  ;;  %v3852_v5 = vld [vmem:[%s4278_s30 + $0x38] sm:$0x1]  ;;  %v2595_v21 = vrot.slane %v2593_v12, 4 }
 0x247   : > { %2453 = vst.msk [vmem:[#allocation2 + $0x8] sm:$0xf] %vm2450_vm13, %v2359_v35  ;;  %3274 = vrot.lane.b32.xlu2 %v3181_v39, %s4197_s11  ;;  %v3930_v35 = vld [vmem:[%s4278_s30 + $0xb0] sm:$0x1]  ;;  %v2620_v39 = vor.u32 %v2619_v23, %v5577_v22  ;;  %v2808_v32 = vsel %vm4289_vm2, %v2803_v43, %v2807_v44  ;;  %v2599_v34 = vshll.u32 %v3852_v5, 16 }
 0x248   : > { %v3229_v40 = vrot.slane %v3930_v35, 5  ;;  %v2609_v42 = vrot.slane %v2607_v29, 5  ;;  %v3875_v29 = vld [vmem:[%s4278_s30 + $0x94] sm:$0xf] }
 0x249   : > { %v2375_v46 = vpop.permute.xlu2 %2374  ;;  %v2621_v47 = vrot.slane %v2620_v39, 4  ;;  %v2781_v39 = vshll.u32 %v3875_v29, 16 }
 0x24a   : > { %2461 = vst.msk [vmem:[#allocation2 + $0x28] sm:$0xf] %vm2450_vm13, %v2375_v46 }
 0x24b   : > { %2931 = vrot.lane.b32.xlu1 %v2640_v36, %s4196_s10  ;;  %v2623_v36 = vshll.u32 %v3855_v26, 16  ;;  %v3222_v26 = vrot.slane %v3927_v17, 5 }
 0x24c   : > { %2404 = vrot.lane.b32.xlu0 %v3837_v41, %s4195_s9  ;;  %v2606_v41 = vrot.slane %v2604_v10, 4 }
 0x24d   : > { %v2367_v31 = vpop.permute.xlu1 %2366 }
 0x24e   : > { %2457 = vst.msk [vmem:[#allocation2 + $0x18] sm:$0xf] %vm2450_vm13, %v2367_v31  ;;  %v2365_v49 = vpop.permute.xlu0 %2364  ;;  %v2625_v31 = vrot.slane %v2623_v36, 5  ;;  %v2610_v54 = vor.u32 %v2609_v42, %v2606_v41  ;;  %v2785_v36 = vshrl.u32 %v3875_v29, 16  ;;  %v3872_v29 = vld [vmem:[%s4278_s30 + $0x88] sm:$0xf] }
 0x24f   : > { %2456 = vst.msk [vmem:[#allocation2 + $0x14] sm:$0xf] %vm2450_vm13, %v2365_v49  ;;  %2402 = vrot.lane.b32.xlu2 %v3836_v52, %s4195_s9  ;;  %v3230_v52 = vsel %vm4483_vm6, %v3228_v28, %v3229_v40  ;;  %v3925_v28 = vld [vmem:[%s4278_s30 + $0x9c] sm:$0xe] }
 0x250   : > { %v2611_v58 = vrot.slane %v2610_v54, 4  ;;  %v3951_v42 = vrot.slane %v3925_v28, 9  ;;  %v2761_v28 = vshrl.u32 %v3872_v29, 16 }
 0x251   : > { %v2381_v0 = vpop.permute.xlu2 %2380 }
 0x252   : > { %2464 = vst.msk [vmem:[#allocation2 + $0x34] sm:$0xf] %vm2450_vm13, %v2381_v0  ;;  %v2616_v4 = vsel %vm4289_vm2, %v2611_v58, %v5577_v22  ;;  %v3220_v54 = vsel %vm4483_vm6, %v3951_v42, %v3219_v14  ;;  %v3898_v58 = vld [vmem:[%s4278_s30 + $0x30] sm:$0xe] }
 0x253   : > { %2965 = vrot.lane.b32.xlu1 %v2842_v56, %s4196_s10  ;;  %v3163_v56 = vrot.slane %v3902_v48, 5 }
 0x254   : > { %2963 = vrot.lane.b32.xlu0 %v2832_v37, %s4196_s10  ;;  %v2626_v37 = vsel %vm4289_vm2, %v2621_v47, %v2625_v31  ;;  %v3874_v31 = vld [vmem:[%s4278_s30 + $0x90] sm:$0xf] }
 0x255   : > { %v2373_v55 = vpop.permute.xlu1 %2372  ;;  %v3165_v59 = vrot.slane %v3163_v56, 4 }
 0x256   : > { %2460 = vst.msk [vmem:[#allocation2 + $0x24] sm:$0xf] %vm2450_vm13, %v2373_v55  ;;  %v2371_v3 = vpop.permute.xlu0 %2370  ;;  %v3943_v55 = vrot.slane %v3901_v51, 9 }
 0x257   : > { %2459 = vst.msk [vmem:[#allocation2 + $0x20] sm:$0xf] %vm2450_vm13, %v2371_v3  ;;  %2933 = vrot.lane.b32.xlu2 %v2650_v6, %s4196_s10  ;;  %v3850_v3 = vld [vmem:[%s4278_s30 + $0x30] sm:$0xf]  ;;  %v2812_v6 = vor.u32 %v2811_v33, %v2807_v44  ;;  %v3167_v8 = vsel %vm4483_vm6, %v3165_v59, %v3166_v60  ;;  %v2601_v44 = vrot.slane %v2599_v34, 5 }
 0x258   : > { %v2580_v15 = vshrl.u32 %v3850_v3, 16  ;;  %v2583_v16 = vshll.u32 %v3850_v3, 16  ;;  %v3899_v33 = vld [vmem:[%s4278_s30 + $0x34] sm:$0xf] }
 0x259   : > { %v2415_v19 = vpop.permute.xlu2 %2414  ;;  %v2813_v18 = vrot.slane %v2812_v6, 4  ;;  %v3847_v6 = vld [vmem:[%s4278_s30 + $0x24] sm:$0xf] }
 0x25a   : > { %2481 = vst.msk [vmem:[#allocation2 + $0x78] sm:$0xf] %vm2450_vm13, %v2415_v19  ;;  %v2585_v10 = vrot.slane %v2583_v16, 5  ;;  %v2559_v16 = vshll.u32 %v3847_v6, 16 }
 0x25b   : > { %3300 = vrot.lane.b32.xlu1 %v3227_v7, %s4197_s11  ;;  %v2815_v7 = vshll.u32 %v3879_v53, 16  ;;  %v3942_v53 = vrot.slane %v3898_v58, 9 }
 0x25c   : > { %3270 = vrot.lane.b32.xlu0 %v3174_v13, %s4197_s11  ;;  %v3164_v13 = vsel %vm4483_vm6, %v3943_v55, %v3163_v56  ;;  %v2775_v56 = vshll.u32 %v3874_v31, 16 }
 0x25d   : > { %v2379_v20 = vpop.permute.xlu1 %2378  ;;  %v2817_v19 = vrot.slane %v2815_v7, 5 }
 0x25e   : > { %2463 = vst.msk [vmem:[#allocation2 + $0x30] sm:$0xf] %vm2450_vm13, %v2379_v20  ;;  %v2377_v24 = vpop.permute.xlu0 %2376  ;;  %v2591_v20 = vrot.slane %v2589_v11, 5  ;;  %v3833_v11 = vld [vmem:[%s4278_s30 + $0x94] sm:$0xf] }
 0x25f   : > { %2462 = vst.msk [vmem:[#allocation2 + $0x2c] sm:$0xf] %vm2450_vm13, %v2377_v24  ;;  %3268 = vrot.lane.b32.xlu2 %v3171_v27, %s4197_s11  ;;  %v3221_v24 = vrot.slane %v3219_v14, 4  ;;  %v2582_v27 = vrot.slane %v2580_v15, 4  ;;  %v2818_v35 = vsel %vm4289_vm2, %v2813_v18, %v2817_v19  ;;  %v2556_v15 = vshrl.u32 %v3847_v6, 16 }
 0x260   : > { %v3924_v18 = vld [vmem:[%s4278_s30 + $0x98] sm:$0x1]  ;;  %v3922_v19 = vld [vmem:[%s4278_s30 + $0x90] sm:$0xe]  ;;  %v3896_v6 = vld [vmem:[%s4278_s30 + $0x28] sm:$0xf] }
 0x261   : > { %v2946_v45 = vpop.permute.xlu2 %2945  ;;  %v3223_v40 = vsel %vm4483_vm6, %v3221_v24, %v3222_v26  ;;  %v2586_v41 = vor.u32 %v2585_v10, %v2582_v27  ;;  %v2561_v24 = vrot.slane %v2559_v16, 5  ;;  %v3950_v10 = vrot.slane %v3922_v19, 9 }
 0x262   : > { %v3149_v16 = vrot.slane %v3896_v6, 5  ;;  %v3893_v6 = vld [vmem:[%s4278_s30 + $0x1c] sm:$0xf] }
 0x263   : > { %2400 = vrot.lane.b32.xlu1 %v3835_v9, %s4195_s9 }
 0x264   : > { %2398 = vrot.lane.b32.xlu0 %v3834_v38, %s4195_s9  ;;  %v2596_v38 = vor.u32 %v2595_v21, %v2591_v20  ;;  %v3215_v21 = vrot.slane %v3924_v18, 5 }
 0x265   : > { %v2385_v46 = vpop.permute.xlu1 %2384 }
 0x266   : > { %2466 = vst.msk [vmem:[#allocation2 + $0x3c] sm:$0xf] %vm2450_vm13, %v2385_v46  ;;  %v2383_v49 = vpop.permute.xlu0 %2382  ;;  %v2597_v43 = vrot.slane %v2596_v38, 4  ;;  %v2787_v46 = vrot.slane %v2785_v36, 4  ;;  %v2757_v36 = vshll.u32 %v3872_v29, 16 }
 0x267   : > { %2465 = vst.msk [vmem:[#allocation2 + $0x38] sm:$0xf] %vm2450_vm13, %v2383_v49  ;;  %3302 = vrot.lane.b32.xlu2 %v3230_v52, %s4197_s11  ;;  %v2587_v49 = vrot.slane %v2586_v41, 4  ;;  %v3876_v52 = vld [vmem:[%s4278_s30 + $0x98] sm:$0x1] }
 0x268   : > { %3027 = vst.msk [vmem:[#allocation2 + $0x3c] sm:$0xf] %vm3011_vm14, %v2946_v45  ;;  %v5639_v45 = vrot.slane %v2781_v39, 5  ;;  %v2791_v59 = vshll.u32 %v3876_v52, 16  ;;  %v3873_v52 = vld [vmem:[%s4278_s30 + $0x8c] sm:$0x1] }
 0x269   : > { %v3281_v62 = vpop.permute.xlu2 %3280  ;;  %v2592_v51 = vsel %vm4289_vm2, %v2587_v49, %v2591_v20  ;;  %v3845_v29 = vld [vmem:[%s4278_s30 + $0x1c] sm:$0xf] }
 0x26a   : > { %v2788_v57 = vor.u32 %v2787_v46, %v5639_v45  ;;  %v2793_v2 = vrot.slane %v2791_v59, 5  ;;  %v3831_v59 = vld [vmem:[%s4278_s30 + $0x88] sm:$0xf] }
 0x26b   : > { %2959 = vrot.lane.b32.xlu1 %v2808_v32, %s4196_s10  ;;  %v2772_v32 = vshrl.u32 %v3874_v31, 16  ;;  %v2759_v31 = vrot.slane %v2757_v36, 5  ;;  %v2541_v36 = vshll.u32 %v3845_v29, 16 }
 0x26c   : > { %2929 = vrot.lane.b32.xlu0 %v2626_v37, %s4196_s10  ;;  %v2602_v37 = vsel %vm4289_vm2, %v2597_v43, %v2601_v44  ;;  %v2789_v55 = vrot.slane %v2788_v57, 4 }
 0x26d   : > { %v2944_v0 = vpop.permute.xlu1 %2943  ;;  %v2774_v60 = vrot.slane %v2772_v32, 4 }
 0x26e   : > { %3026 = vst.msk [vmem:[#allocation2 + $0x38] sm:$0xf] %vm3011_vm14, %v2944_v0  ;;  %v2417_v63 = vpop.permute.xlu0 %2416  ;;  %v3156_v0 = vrot.slane %v3899_v33, 5  ;;  %v2794_v17 = vsel %vm4289_vm2, %v2789_v55, %v2793_v2  ;;  %v2767_v33 = vshll.u32 %v3873_v52, 16 }
 0x26f   : > { %2482 = vst.msk [vmem:[#allocation2 + $0x7c] sm:$0xf] %vm2450_vm13, %v2417_v63  ;;  %2927 = vrot.lane.b32.xlu2 %v2616_v4, %s4196_s10  ;;  %v3923_v4 = vld [vmem:[%s4278_s30 + $0x94] sm:$0xf] }
 0x270   : > { %3363 = vst.msk [vmem:[#allocation2 + $0x38] sm:$0xf] %vm3348_vm15, %v3281_v62  ;;  %v2777_v62 = vrot.slane %v2775_v56, 5  ;;  %v3212_v14 = vrot.slane %v3923_v4, 5  ;;  %v3158_v44 = vrot.slane %v3156_v0, 4 }
 0x271   : > { %v3315_v22 = vpop.permute.xlu2 %3314 }
 0x272   : > { %v2778_v12 = vor.u32 %v2777_v62, %v2774_v60  ;;  %v3214_v20 = vrot.slane %v3212_v14, 4  ;;  %v3213_v41 = vsel %vm4483_vm6, %v3950_v10, %v3212_v14  ;;  %v3919_v14 = vld [vmem:[%s4278_s30 + $0x84] sm:$0xe] }
 0x273   : > { %3266 = vrot.lane.b32.xlu1 %v3167_v8, %s4197_s11 }
 0x274   : > { %3264 = vrot.lane.b32.xlu0 %v3164_v13, %s4197_s11  ;;  %v3157_v13 = vsel %vm4483_vm6, %v3942_v53, %v3156_v0  ;;  %v2779_v5 = vrot.slane %v2778_v12, 4  ;;  %v3216_v38 = vsel %vm4483_vm6, %v3214_v20, %v3215_v21  ;;  %v2769_v0 = vrot.slane %v2767_v33, 5 }
 0x275   : > { %v2978_v23 = vpop.permute.xlu1 %2977 }
 0x276   : > { %3043 = vst.msk [vmem:[#allocation2 + $0x7c] sm:$0xf] %vm3011_vm14, %v2978_v23  ;;  %v2976_v9 = vpop.permute.xlu0 %2975  ;;  %v2558_v23 = vrot.slane %v2556_v15, 4  ;;  %v3920_v15 = vld [vmem:[%s4278_s30 + $0x88] sm:$0xf] }
 0x277   : > { %3042 = vst.msk [vmem:[#allocation2 + $0x78] sm:$0xf] %vm3011_vm14, %v2976_v9  ;;  %2961 = vrot.lane.b32.xlu2 %v2818_v35, %s4196_s10  ;;  %v2784_v35 = vsel %vm4289_vm2, %v2779_v5, %v5639_v45  ;;  %v3949_v5 = vrot.slane %v3919_v14, 9  ;;  %v3205_v20 = vrot.slane %v3920_v15, 5  ;;  %v3142_v14 = vrot.slane %v3893_v6, 5 }
 0x278   : > { %3380 = vst.msk [vmem:[#allocation2 + $0x7c] sm:$0xf] %vm3348_vm15, %v3315_v22  ;;  %v3848_v22 = vld [vmem:[%s4278_s30 + $0x28] sm:$0xf]  ;;  %v2562_v39 = vor.u32 %v2561_v24, %v2558_v23  ;;  %v3151_v23 = vrot.slane %v3149_v16, 4 }
 0x279   : > { %v2940_v47 = vpop.permute.xlu2 %2939  ;;  %v2565_v34 = vshll.u32 %v3848_v22, 16 }
 0x27a   : > { %3024 = vst.msk [vmem:[#allocation2 + $0x30] sm:$0xf] %vm3011_vm14, %v2940_v47  ;;  %v2563_v46 = vrot.slane %v2562_v39, 4 }
 0x27b   : > { %2394 = vrot.lane.b32.xlu1 %v3832_v30, %s4195_s9  ;;  %v3871_v30 = vld [vmem:[%s4278_s30 + $0x84] sm:$0xf]  ;;  %v2567_v47 = vrot.slane %v2565_v34, 5 }
 0x27c   : > { %3298 = vrot.lane.b32.xlu0 %v3223_v40, %s4197_s11  ;;  %v3900_v40 = vld [vmem:[%s4278_s30 + $0x38] sm:$0x1]  ;;  %v2748_v42 = vshrl.u32 %v3871_v30, 16  ;;  %v2751_v43 = vshll.u32 %v3871_v30, 16  ;;  %v3206_v30 = vsel %vm4483_vm6, %v3949_v5, %v3205_v20  ;;  %v3144_v5 = vrot.slane %v3142_v14, 4 }
 0x27d   : > { %v3313_v48 = vpop.permute.xlu1 %3312  ;;  %v3159_v45 = vrot.slane %v3900_v40, 5 }
 0x27e   : > { %3379 = vst.msk [vmem:[#allocation2 + $0x78] sm:$0xf] %vm3348_vm15, %v3313_v48  ;;  %v3283_v50 = vpop.permute.xlu0 %3282  ;;  %v2763_v48 = vrot.slane %v2761_v28, 4  ;;  %v2753_v32 = vrot.slane %v2751_v43, 5  ;;  %v2545_v28 = vshrl.u32 %v3845_v29, 16 }
 0x27f   : > { %3364 = vst.msk [vmem:[#allocation2 + $0x3c] sm:$0xf] %vm3348_vm15, %v3283_v50  ;;  %3296 = vrot.lane.b32.xlu2 %v3220_v54, %s4197_s11  ;;  %v2750_v54 = vrot.slane %v2748_v42, 4  ;;  %v3160_v57 = vsel %vm4483_vm6, %v3158_v44, %v3159_v45  ;;  %v3844_v45 = vld [vmem:[%s4278_s30 + $0x18] sm:$0xf] }
 0x280   : > { %v2764_v58 = vor.u32 %v2763_v48, %v2759_v31  ;;  %v2547_v48 = vrot.slane %v2545_v28, 4  ;;  %v2532_v52 = vshrl.u32 %v3844_v45, 16 }
 0x281   : > { %v2974_v1 = vpop.permute.xlu2 %2973  ;;  %v2754_v60 = vor.u32 %v2753_v32, %v2750_v54  ;;  %v2535_v54 = vshll.u32 %v3844_v45, 16  ;;  %v3829_v32 = vld [vmem:[%s4278_s30 + $0x7c] sm:$0xf] }
 0x282   : > { %v2765_v53 = vrot.slane %v2764_v58, 4  ;;  %v3828_v58 = vld [vmem:[%s4278_s30 + $0x78] sm:$0xf] }
 0x283   : > { %2925 = vrot.lane.b32.xlu1 %v2602_v37, %s4196_s10  ;;  %v2569_v37 = vshrl.u32 %v3848_v22, 16  ;;  %v2755_v2 = vrot.slane %v2754_v60, 4 }
 0x284   : > { %2923 = vrot.lane.b32.xlu0 %v2592_v51, %s4196_s10  ;;  %v2568_v51 = vsel %vm4289_vm2, %v2563_v46, %v2567_v47  ;;  %v2770_v12 = vsel %vm4289_vm2, %v2765_v53, %v2769_v0  ;;  %v2537_v53 = vrot.slane %v2535_v54, 5 }
 0x285   : > { %v2413_v63 = vpop.permute.xlu1 %2412  ;;  %v4040_v3 = vld [vmem:[#allocation2 + $0x78] sm:$0xff]  ;;  %v2571_v62 = vrot.slane %v2569_v37, 4 }
 0x286   : > { %2480 = vst.msk [vmem:[#allocation2 + $0x74] sm:$0xf] %vm2450_vm13, %v2413_v63  ;;  %v2411_v7 = vpop.permute.xlu0 %2410  ;;  %v4032_v8 = vld [vmem:[#allocation2 + $0x38] sm:$0xff]  ;;  %3529 = vmatpush.bf16.xpose.msra.mxu1 %v4040_v3 }
 0x287   : > { %2479 = vst.msk [vmem:[#allocation2 + $0x70] sm:$0xf] %vm2450_vm13, %v2411_v7  ;;  %3516 = vmatpush.bf16.xpose.msra.mxu0 %v4032_v8  ;;  %2396 = vrot.lane.b32.xlu2 %v3833_v11, %s4195_s9  ;;  %v3830_v7 = vld [vmem:[%s4278_s30 + $0x84] sm:$0xf]  ;;  %v2572_v8 = vor.u32 %v2571_v62, %v2567_v47  ;;  %v3846_v47 = vld [vmem:[%s4278_s30 + $0x20] sm:$0x1] }
 0x288   : > { %3041 = vst.msk [vmem:[#allocation2 + $0x74] sm:$0xf] %vm3011_vm14, %v2974_v1  ;;  %v3849_v1 = vld [vmem:[%s4278_s30 + $0x2c] sm:$0x1]  ;;  %v2534_v62 = vrot.slane %v2532_v52, 4 }
 0x289   : > { %v3309_v26 = vpop.permute.xlu2 %3308  ;;  %v2575_v11 = vshll.u32 %v3849_v1, 16  ;;  %v2573_v18 = vrot.slane %v2572_v8, 4 }
 0x28b   : > { %3260 = vrot.lane.b32.xlu1 %v3157_v13, %s4197_s11  ;;  %v2760_v13 = vsel %vm4289_vm2, %v2755_v2, %v2759_v31  ;;  %v2577_v19 = vrot.slane %v2575_v11, 5  ;;  %v5736_v31 = vrot.slane %v2541_v36, 5 }
 0x28c   : > { %2957 = vrot.lane.b32.xlu0 %v2794_v17, %s4196_s10  ;;  %v3897_v17 = vld [vmem:[%s4278_s30 + $0x2c] sm:$0x1] }
 0x28d   : > { %v2972_v27 = vpop.permute.xlu1 %2971  ;;  %v3152_v24 = vrot.slane %v3897_v17, 5  ;;  %v2548_v33 = vor.u32 %v2547_v48, %v5736_v31  ;;  %v3892_v17 = vld [vmem:[%s4278_s30 + $0x18] sm:$0xe] }
 0x28e   : > { %3040 = vst.msk [vmem:[#allocation2 + $0x70] sm:$0xf] %vm3011_vm14, %v2972_v27  ;;  %v2942_v9 = vpop.permute.xlu0 %2941 }
 0x28f   : > { %3025 = vst.msk [vmem:[#allocation2 + $0x34] sm:$0xf] %vm3011_vm14, %v2942_v9  ;;  %2955 = vrot.lane.b32.xlu2 %v2784_v35, %s4196_s10  ;;  %v2578_v9 = vsel %vm4289_vm2, %v2573_v18, %v2577_v19  ;;  %v3153_v39 = vsel %vm4483_vm6, %v3151_v23, %v3152_v24  ;;  %v3940_v24 = vrot.slane %v3892_v17, 9 }
 0x290   : > { %3377 = vst.msk [vmem:[#allocation2 + $0x70] sm:$0xf] %vm3348_vm15, %v3309_v26  ;;  %v3868_v26 = vld [vmem:[%s4278_s30 + $0x78] sm:$0xf] }
 0x291   : > { %v2409_v49 = vpop.permute.xlu2 %2408  ;;  %v2724_v34 = vshrl.u32 %v3868_v26, 16  ;;  %v2727_v35 = vshll.u32 %v3868_v26, 16 }
 0x292   : > { %2478 = vst.msk [vmem:[#allocation2 + $0x6c] sm:$0xf] %vm2450_vm13, %v2409_v49 }
 0x293   : > { %3294 = vrot.lane.b32.xlu1 %v3216_v38, %s4197_s11  ;;  %v3895_v38 = vld [vmem:[%s4278_s30 + $0x24] sm:$0xe]  ;;  %v2726_v42 = vrot.slane %v2724_v34, 4  ;;  %v2729_v43 = vrot.slane %v2727_v35, 5  ;;  %v3143_v35 = vsel %vm4483_vm6, %v3940_v24, %v3142_v14 }
 0x294   : > { %3292 = vrot.lane.b32.xlu0 %v3213_v41, %s4197_s11  ;;  %v3941_v40 = vrot.slane %v3895_v38, 9  ;;  %v3869_v41 = vld [vmem:[%s4278_s30 + $0x7c] sm:$0xf] }
 0x295   : > { %v3279_v50 = vpop.permute.xlu1 %3278  ;;  %v2733_v37 = vshll.u32 %v3869_v41, 16  ;;  %v2737_v8 = vshrl.u32 %v3869_v41, 16 }
 0x296   : > { %3362 = vst.msk [vmem:[#allocation2 + $0x34] sm:$0xf] %vm3348_vm15, %v3279_v50  ;;  %v3277_v56 = vpop.permute.xlu0 %3276  ;;  %v3150_v50 = vsel %vm4483_vm6, %v3941_v40, %v3149_v16  ;;  %v3894_v16 = vld [vmem:[%s4278_s30 + $0x20] sm:$0x1] }
 0x297   : > { %3361 = vst.msk [vmem:[#allocation2 + $0x30] sm:$0xf] %vm3348_vm15, %v3277_v56  ;;  %3262 = vrot.lane.b32.xlu2 %v3160_v57, %s4197_s11  ;;  %v2730_v56 = vor.u32 %v2729_v43, %v2726_v42  ;;  %v2551_v57 = vshll.u32 %v3846_v47, 16  ;;  %v2739_v19 = vrot.slane %v2737_v8, 4 }
 0x299   : > { %v2968_v55 = vpop.permute.xlu2 %2967  ;;  %v2731_v0 = vrot.slane %v2730_v56, 4  ;;  %v2553_v1 = vrot.slane %v2551_v57, 5 }
 0x29b   : > { %2919 = vrot.lane.b32.xlu1 %v2568_v51, %s4196_s10  ;;  %v3921_v51 = vld [vmem:[%s4278_s30 + $0x8c] sm:$0x1] }
 0x29c   : > { %2392 = vrot.lane.b32.xlu0 %v3831_v59, %s4195_s9  ;;  %v3207_v59 = vrot.slane %v3205_v20, 4  ;;  %v3208_v60 = vrot.slane %v3921_v51, 5  ;;  %v3145_v20 = vrot.slane %v3894_v16, 5 }
 0x29d   : > { %v2407_v63 = vpop.permute.xlu1 %2406 }
 0x29e   : > { %2477 = vst.msk [vmem:[#allocation2 + $0x68] sm:$0xf] %vm2450_vm13, %v2407_v63  ;;  %v3311_v3 = vpop.permute.xlu0 %3310  ;;  %v4031_v4 = vld [vmem:[#allocation2 + $0x30] sm:$0xff]  ;;  %v3209_v11 = vsel %vm4483_vm6, %v3207_v59, %v3208_v60  ;;  %v3146_v34 = vsel %vm4483_vm6, %v3144_v5, %v3145_v20 }
 0x29f   : > { %3378 = vst.msk [vmem:[#allocation2 + $0x74] sm:$0xf] %vm3348_vm15, %v3311_v3  ;;  %3517 = vmatpush.bf16.xpose.msra.mxu0 %v4031_v4  ;;  %2390 = vrot.lane.b32.xlu2 %v3830_v7, %s4195_s9  ;;  %v2549_v3 = vrot.slane %v2548_v33, 4 }
 0x2a0   : > { %3038 = vst.msk [vmem:[#allocation2 + $0x68] sm:$0xf] %vm3011_vm14, %v2968_v55  ;;  %v2735_v55 = vrot.slane %v2733_v37, 5 }
 0x2a1   : > { %v3275_v21 = vpop.permute.xlu2 %3274  ;;  %v2554_v15 = vsel %vm4289_vm2, %v2549_v3, %v2553_v1 }
 0x2a3   : > { %2953 = vrot.lane.b32.xlu1 %v2770_v12, %s4196_s10  ;;  %v2538_v12 = vor.u32 %v2537_v53, %v2534_v62 }
 0x2a4   : > { %2951 = vrot.lane.b32.xlu0 %v2760_v13, %s4196_s10  ;;  %v2736_v13 = vsel %vm4289_vm2, %v2731_v0, %v2735_v55 }
 0x2a5   : > { %v2938_v22 = vpop.permute.xlu1 %2937  ;;  %v2539_v18 = vrot.slane %v2538_v12, 4 }
 0x2a6   : > { %3023 = vst.msk [vmem:[#allocation2 + $0x2c] sm:$0xf] %vm3011_vm14, %v2938_v22  ;;  %v2936_v27 = vpop.permute.xlu0 %2935  ;;  %v4039_v10 = vld [vmem:[#allocation2 + $0x70] sm:$0xff]  ;;  %v3870_v22 = vld [vmem:[%s4278_s30 + $0x80] sm:$0x1] }
 0x2a7   : > { %3022 = vst.msk [vmem:[#allocation2 + $0x28] sm:$0xf] %vm3011_vm14, %v2936_v27  ;;  %3530 = vmatpush.bf16.xpose.msra.mxu1 %v4039_v10  ;;  %2921 = vrot.lane.b32.xlu2 %v2578_v9, %s4196_s10  ;;  %v3917_v10 = vld [vmem:[%s4278_s30 + $0x7c] sm:$0xf]  ;;  %v2544_v29 = vsel %vm4289_vm2, %v2539_v18, %v5736_v31  ;;  %v2740_v9 = vor.u32 %v2739_v19, %v2735_v55 }
 0x2a8   : > { %3360 = vst.msk [vmem:[#allocation2 + $0x2c] sm:$0xf] %vm3348_vm15, %v3275_v21  ;;  %v3198_v38 = vrot.slane %v3917_v10, 5 }
 0x2a9   : > { %v2403_v44 = vpop.permute.xlu2 %2402  ;;  %v2741_v36 = vrot.slane %v2740_v9, 4 }
 0x2aa   : > { %2475 = vst.msk [vmem:[#allocation2 + $0x60] sm:$0xf] %vm2450_vm13, %v2403_v44  ;;  %v3200_v42 = vrot.slane %v3198_v38, 4 }
 0x2ab   : > { %3288 = vrot.lane.b32.xlu1 %v3206_v30, %s4197_s11  ;;  %v2743_v30 = vshll.u32 %v3870_v22, 16 }
 0x2ac   : > { %3258 = vrot.lane.b32.xlu0 %v3153_v39, %s4197_s11  ;;  %v3918_v39 = vld [vmem:[%s4278_s30 + $0x80] sm:$0x1] }
 0x2ad   : > { %v3273_v46 = vpop.permute.xlu1 %3272  ;;  %v2745_v28 = vrot.slane %v2743_v30, 5  ;;  %v3201_v43 = vrot.slane %v3918_v39, 5  ;;  %v3414_v30 = vld [vmem:[%s5881_s2] sm:$0xff] }
 0x2ae   : > { %3359 = vst.msk [vmem:[#allocation2 + $0x28] sm:$0xf] %vm3348_vm15, %v3273_v46  ;;  %v2970_v49 = vpop.permute.xlu0 %2969  ;;  %v3916_v46 = vld [vmem:[%s4278_s30 + $0x78] sm:$0xe] }
 0x2af   : > { %3039 = vst.msk [vmem:[#allocation2 + $0x6c] sm:$0xf] %vm3011_vm14, %v2970_v49  ;;  %3256 = vrot.lane.b32.xlu2 %v3150_v50, %s4197_s11  ;;  %v2746_v45 = vsel %vm4289_vm2, %v2741_v36, %v2745_v28  ;;  %v3202_v47 = vsel %vm4483_vm6, %v3200_v42, %v3201_v43  ;;  %v3948_v31 = vrot.slane %v3916_v46, 9  ;;  %v3381_v36 = vld [vmem:[%s5880_s1] sm:$0xf] }
 0x2b1   : > { %v2934_v63 = vpop.permute.xlu2 %2933  ;;  %v3199_v25 = vsel %vm4483_vm6, %v3948_v31, %v3198_v38 }
 0x2b2   : > { %3021 = vst.msk [vmem:[#allocation2 + $0x24] sm:$0xf] %vm3011_vm14, %v2934_v63 }
 0x2b3   : > { %2388 = vrot.lane.b32.xlu1 %v3829_v32, %s4195_s9 }
 0x2b4   : > { %2386 = vrot.lane.b32.xlu0 %v3828_v58, %s4195_s9  ;;  %s4123_s9 = sshra.s32 %s3565_s7, 4  ;;  %s4124_s9 = int_to_ptr.hbm [resolvable:$true] %s4123_s9 }
 0x2b5   : > { %v3307_v2 = vpop.permute.xlu1 %3306  ;;  %v4030_v4 = vld [vmem:[#allocation2 + $0x28] sm:$0xff]  ;;  %s4125_s15 = scalar_lea.hbm %s4124_s9, 16  ;;  %p4130_p1 = scmp.lt.s32.totalorder %s4124_s9, %s5882_s3 }
 0x2b6   : > { %3376 = vst.msk [vmem:[#allocation2 + $0x6c] sm:$0xf] %vm3348_vm15, %v3307_v2  ;;  %v3305_v7 = vpop.permute.xlu0 %3304  ;;  %3518 = vmatpush.bf16.xpose.msra.mxu0 %v4030_v4  ;;  %p4126_p12 = scmp.ne.s32.totalorder %s4124_s9, %s4125_s15  ;;  %p4131_p2 = scmp.lt.s32.totalorder %s4129_s18, %s4125_s15 }
 0x2b7   : > { %3375 = vst.msk [vmem:[#allocation2 + $0x68] sm:$0xf] %vm3348_vm15, %v3305_v7  ;;  %3290 = vrot.lane.b32.xlu2 %v3209_v11, %s4197_s11 }
 0x2b8   : > { %p4127_p13 = pnand %p4126_p12, %p4258_p4  ;;  %p4132_p3 = por %p4131_p2, %p4130_p1 }
 0x2b9   : > { %v3269_v21 = vpop.permute.xlu2 %3268 }
 0x2ba   : > { %p4128_p0 = pneg %p4127_p13 }
 0x2bb   : > { %2947 = vrot.lane.b32.xlu1 %v2736_v13, %s4196_s10 }
 0x2bc   : > { %2917 = vrot.lane.b32.xlu0 %v2554_v15, %s4196_s10  ;;  %p4133_p5 = pnand %p4132_p3, %p4128_p0 }
 0x2bd   : > { %v2932_v23 = vpop.permute.xlu1 %2931 }
 0x2be   : > { %3020 = vst.msk [vmem:[#allocation2 + $0x20] sm:$0xf] %vm3011_vm14, %v2932_v23  ;;  %v2405_v26 = vpop.permute.xlu0 %2404  ;;  %v4038_v27 = vld [vmem:[#allocation2 + $0x68] sm:$0xff] }
 0x2bf   : > { %2476 = vst.msk [vmem:[#allocation2 + $0x64] sm:$0xf] %vm2450_vm13, %v2405_v26  ;;  %3531 = vmatpush.bf16.xpose.msra.mxu1 %v4038_v27  ;;  %2915 = vrot.lane.b32.xlu2 %v2544_v29, %s4196_s10 }
 0x2c0   : > { %3357 = vst.msk [vmem:[#allocation2 + $0x20] sm:$0xf] %vm3348_vm15, %v3269_v21 }
 0x2c1   : > { %v3303_v40 = vpop.permute.xlu2 %3302 }
 0x2c3   : > { %3254 = vrot.lane.b32.xlu1 %v3146_v34, %s4197_s11 }
 0x2c4   : > { %3252 = vrot.lane.b32.xlu0 %v3143_v35, %s4197_s11 }
 0x2c5   : > { %v2966_v41 = vpop.permute.xlu1 %2965 }
 0x2c6   : > { %3037 = vst.msk [vmem:[#allocation2 + $0x64] sm:$0xf] %vm3011_vm14, %v2966_v41  ;;  %v2964_v44 = vpop.permute.xlu0 %2963 }
 0x2c7   : > { %3036 = vst.msk [vmem:[#allocation2 + $0x60] sm:$0xf] %vm3011_vm14, %v2964_v44  ;;  %2949 = vrot.lane.b32.xlu2 %v2746_v45, %s4196_s10 }
 0x2c8   : > { %3374 = vst.msk [vmem:[#allocation2 + $0x64] sm:$0xf] %vm3348_vm15, %v3303_v40 }
 0x2c9   : > { %v2928_v48 = vpop.permute.xlu2 %2927 }
 0x2ca   : > { %3018 = vst.msk [vmem:[#allocation2 + $0x18] sm:$0xf] %vm3011_vm14, %v2928_v48 }
 0x2cb   : > { %3417 = vperm.xlu1 %4107, %v3414_v30  }
 0x2cc   : > { %3286 = vrot.lane.b32.xlu0 %v3202_v47, %s4197_s11 }
 0x2cd   : > { %v3301_v49 = vpop.permute.xlu1 %3300 }
 0x2ce   : > { %3373 = vst.msk [vmem:[#allocation2 + $0x60] sm:$0xf] %vm3348_vm15, %v3301_v49  ;;  %v3271_v50 = vpop.permute.xlu0 %3270 }
 0x2cf   : > { %3358 = vst.msk [vmem:[#allocation2 + $0x24] sm:$0xf] %vm3348_vm15, %v3271_v50  ;;  %3284 = vrot.lane.b32.xlu2 %v3199_v25, %s4197_s11 }
 0x2d1   : > { %v2962_v52 = vpop.permute.xlu2 %2961 }
 0x2d5   : > { %v2401_v54 = vpop.permute.xlu1 %2400  ;;  %v4037_v32 = vld [vmem:[#allocation2 + $0x60] sm:$0xff] }
 0x2d6   : > { %2474 = vst.msk [vmem:[#allocation2 + $0x5c] sm:$0xf] %vm2450_vm13, %v2401_v54  ;;  %v2399_v56 = vpop.permute.xlu0 %2398  ;;  %v4029_v37 = vld [vmem:[#allocation2 + $0x20] sm:$0xff]  ;;  %3532 = vmatpush.bf16.xpose.msra.mxu1 %v4037_v32 }
 0x2d7   : > { %2473 = vst.msk [vmem:[#allocation2 + $0x58] sm:$0xf] %vm2450_vm13, %v2399_v56  ;;  %3519 = vmatpush.bf16.xpose.msra.mxu0 %v4029_v37 }
 0x2d8   : > { %3035 = vst.msk [vmem:[#allocation2 + $0x5c] sm:$0xf] %vm3011_vm14, %v2962_v52 }
 0x2d9   : > { %v3297_v57 = vpop.permute.xlu2 %3296 }
 0x2dd   : > { %v2960_v51 = vpop.permute.xlu1 %2959 }
 0x2de   : > { %3034 = vst.msk [vmem:[#allocation2 + $0x58] sm:$0xf] %vm3011_vm14, %v2960_v51  ;;  %v2930_v61 = vpop.permute.xlu0 %2929 }
 0x2df   : > { %3019 = vst.msk [vmem:[#allocation2 + $0x1c] sm:$0xf] %vm3011_vm14, %v2930_v61 }
 0x2e0   : > { %3371 = vst.msk [vmem:[#allocation2 + $0x58] sm:$0xf] %vm3348_vm15, %v3297_v57 }
 0x2e1   : > { %v2397_v58 = vpop.permute.xlu2 %2396 }
 0x2e2   : > { %2472 = vst.msk [vmem:[#allocation2 + $0x54] sm:$0xf] %vm2450_vm13, %v2397_v58 }
 0x2e5   : > { %v3267_v33 = vpop.permute.xlu1 %3266 }
 0x2e6   : > { %3356 = vst.msk [vmem:[#allocation2 + $0x1c] sm:$0xf] %vm3348_vm15, %v3267_v33  ;;  %v3265_v59 = vpop.permute.xlu0 %3264 }
 0x2e7   : > { %3355 = vst.msk [vmem:[#allocation2 + $0x18] sm:$0xf] %vm3348_vm15, %v3265_v59 }
 0x2e9   : > { %v2956_v60 = vpop.permute.xlu2 %2955 }
 0x2ed   : > { %v2395_v62 = vpop.permute.xlu1 %2394 }
 0x2ee   : > { %2471 = vst.msk [vmem:[#allocation2 + $0x50] sm:$0xf] %vm2450_vm13, %v2395_v62  ;;  %v3299_v53 = vpop.permute.xlu0 %3298  ;;  %v4028_v0 = vld [vmem:[#allocation2 + $0x18] sm:$0xff] }
 0x2ef   : > { %3372 = vst.msk [vmem:[#allocation2 + $0x5c] sm:$0xf] %vm3348_vm15, %v3299_v53  ;;  %3520 = vmatpush.bf16.xpose.msra.mxu0 %v4028_v0 }
 0x2f0   : > { %3032 = vst.msk [vmem:[#allocation2 + $0x50] sm:$0xf] %vm3011_vm14, %v2956_v60 }
 0x2f1   : > { %v3263_v55 = vpop.permute.xlu2 %3262 }
 0x2f5   : > { %v2926_v1 = vpop.permute.xlu1 %2925 }
 0x2f6   : > { %3017 = vst.msk [vmem:[#allocation2 + $0x14] sm:$0xf] %vm3011_vm14, %v2926_v1  ;;  %v2924_v63 = vpop.permute.xlu0 %2923  ;;  %v4036_v2 = vld [vmem:[#allocation2 + $0x58] sm:$0xff] }
 0x2f7   : > { %3016 = vst.msk [vmem:[#allocation2 + $0x10] sm:$0xf] %vm3011_vm14, %v2924_v63  ;;  %3533 = vmatpush.bf16.xpose.msra.mxu1 %v4036_v2 }
 0x2f8   : > { %3354 = vst.msk [vmem:[#allocation2 + $0x14] sm:$0xf] %vm3348_vm15, %v3263_v55 }
 0x2f9   : > { %v2391_v3 = vpop.permute.xlu2 %2390 }
 0x2fa   : > { %2469 = vst.msk [vmem:[#allocation2 + $0x48] sm:$0xf] %vm2450_vm13, %v2391_v3 }
 0x2fd   : > { %v3261_v4 = vpop.permute.xlu1 %3260 }
 0x2fe   : > { %3353 = vst.msk [vmem:[#allocation2 + $0x10] sm:$0xf] %vm3348_vm15, %v3261_v4  ;;  %v2958_v6 = vpop.permute.xlu0 %2957 }
 0x2ff   : > { %3033 = vst.msk [vmem:[#allocation2 + $0x54] sm:$0xf] %vm3011_vm14, %v2958_v6 }
 0x301   : > { %v2922_v7 = vpop.permute.xlu2 %2921 }
 0x302   : > { %3015 = vst.msk [vmem:[#allocation2 + $0xc] sm:$0xf] %vm3011_vm14, %v2922_v7 }
 0x305   : > { %v3295_v8 = vpop.permute.xlu1 %3294  ;;  %v4027_v11 = vld [vmem:[#allocation2 + $0x10] sm:$0xff] }
 0x306   : > { %3370 = vst.msk [vmem:[#allocation2 + $0x54] sm:$0xf] %vm3348_vm15, %v3295_v8  ;;  %v3293_v12 = vpop.permute.xlu0 %3292  ;;  %3521 = vmatpush.bf16.xpose.msra.mxu0 %v4027_v11 }
 0x307   : > { %3369 = vst.msk [vmem:[#allocation2 + $0x50] sm:$0xf] %vm3348_vm15, %v3293_v12 }
 0x309   : > { %v3257_v13 = vpop.permute.xlu2 %3256 }
 0x30d   : > { %v2920_v14 = vpop.permute.xlu1 %2919 }
 0x30e   : > { %3014 = vst.msk [vmem:[#allocation2 + $0x8] sm:$0xf] %vm3011_vm14, %v2920_v14  ;;  %v2393_v15 = vpop.permute.xlu0 %2392  ;;  %v4035_v16 = vld [vmem:[#allocation2 + $0x50] sm:$0xff] }
 0x30f   : > { %2470 = vst.msk [vmem:[#allocation2 + $0x4c] sm:$0xf] %vm2450_vm13, %v2393_v15  ;;  %3534 = vmatpush.bf16.xpose.msra.mxu1 %v4035_v16 }
 0x310   : > { %3351 = vst.msk [vmem:[#allocation2 + $0x8] sm:$0xf] %vm3348_vm15, %v3257_v13 }
 0x311   : > { %v3291_v17 = vpop.permute.xlu2 %3290 }
 0x315   : > { %v2954_v18 = vpop.permute.xlu1 %2953 }
 0x316   : > { %3031 = vst.msk [vmem:[#allocation2 + $0x4c] sm:$0xf] %vm3011_vm14, %v2954_v18  ;;  %v2952_v19 = vpop.permute.xlu0 %2951 }
 0x317   : > { %3030 = vst.msk [vmem:[#allocation2 + $0x48] sm:$0xf] %vm3011_vm14, %v2952_v19 }
 0x318   : > { %3368 = vst.msk [vmem:[#allocation2 + $0x4c] sm:$0xf] %vm3348_vm15, %v3291_v17 }
 0x319   : > { %v2916_v5 = vpop.permute.xlu2 %2915 }
 0x31a   : > { %3012 = vst.msk [vmem:[#allocation2] sm:$0xf] %vm3011_vm14, %v2916_v5 }
 0x31d   : > { %v3289_v20 = vpop.permute.xlu1 %3288 }
 0x31e   : > { %3367 = vst.msk [vmem:[#allocation2 + $0x48] sm:$0xf] %vm3348_vm15, %v3289_v20  ;;  %v3259_v21 = vpop.permute.xlu0 %3258 }
 0x31f   : > { %3352 = vst.msk [vmem:[#allocation2 + $0xc] sm:$0xf] %vm3348_vm15, %v3259_v21 }
 0x321   : > { %v2950_v22 = vpop.permute.xlu2 %2949 }
 0x325   : > { %v2389_v23 = vpop.permute.xlu1 %2388  ;;  %v4034_v24 = vld [vmem:[#allocation2 + $0x48] sm:$0xff] }
 0x326   : > { %2468 = vst.msk [vmem:[#allocation2 + $0x44] sm:$0xf] %vm2450_vm13, %v2389_v23  ;;  %v2387_v26 = vpop.permute.xlu0 %2386  ;;  %v4026_v27 = vld [vmem:[#allocation2 + $0x8] sm:$0xff]  ;;  %3535 = vmatpush.bf16.xpose.msra.mxu1 %v4034_v24 }
 0x327   : > { %2467 = vst.msk [vmem:[#allocation2 + $0x40] sm:$0xf] %vm2450_vm13, %v2387_v26  ;;  %3522 = vmatpush.bf16.xpose.msra.mxu0 %v4026_v27 }
 0x328   : > { %3029 = vst.msk [vmem:[#allocation2 + $0x44] sm:$0xf] %vm3011_vm14, %v2950_v22 }
 0x329   : > { %v3285_v29 = vpop.permute.xlu2 %3284 }
 0x32d   : > { %v2948_v10 = vpop.permute.xlu1 %2947 }
 0x32e   : > { %3028 = vst.msk [vmem:[#allocation2 + $0x40] sm:$0xf] %vm3011_vm14, %v2948_v10  ;;  %v2918_v9 = vpop.permute.xlu0 %2917 }
 0x32f   : > { %3013 = vst.msk [vmem:[#allocation2 + $0x4] sm:$0xf] %vm3011_vm14, %v2918_v9 }
 0x330   : > { %3365 = vst.msk [vmem:[#allocation2 + $0x40] sm:$0xf] %vm3348_vm15, %v3285_v29 }
 0x335   : > { %v3255_v34 = vpop.permute.xlu1 %3254 }
 0x336   : > { %3350 = vst.msk [vmem:[#allocation2 + $0x4] sm:$0xf] %vm3348_vm15, %v3255_v34  ;;  %v3253_v35 = vpop.permute.xlu0 %3252 }
 0x337   : > { %3349 = vst.msk [vmem:[#allocation2] sm:$0xf] %vm3348_vm15, %v3253_v35 }
 0x33d   : > { %v3418_v40 = vpop.permute.xlu1 %3417 }
 0x33e   : > { %v3287_v38 = vpop.permute.xlu0 %3286  ;;  %v4025_v39 = vld [vmem:[#allocation2] sm:$0xff] }
 0x33f   : > { %3366 = vst.msk [vmem:[#allocation2 + $0x44] sm:$0xf] %vm3348_vm15, %v3287_v38  ;;  %3523 = vmatpush.bf16.xpose.msra.mxu0 %v4025_v39 }
 0x346   : > { %v4033_v28 = vld [vmem:[#allocation2 + $0x40] sm:$0xff]  ;;  %3524 = vmatmul.bf16.vlgmr.msra.gmra.mxu0 %v3381_v36 }
 0x347   : > { %3536 = vmatpush.bf16.xpose.msra.mxu1 %v4033_v28 }
 0x34e   : > { %3537 = vmatmul.bf16.vlgmr.msra.gmra.mxu1 %v3381_v36 }
 0x3c3   : > { %v3525_v41 = vpop.f32.mrf.mxu0 }
 0x3c4   : > { %v3526_v42 = vadd.f32 %v3525_v41, %v3418_v40 }
 0x3c6   : > { %v3542_v43 = vmax.f32 %v3526_v42, 0.0 }
 0x3c8   : > { %3544 = vst [vmem:[%s177_s29] sm:$0xff] %v3542_v43 }
 0x3cb   : > { %v3527_v44 = vpop.f32.mrf.mxu0  ;;  %v3538_v45 = vpop.f32.mrf.mxu1 }
 0x3cc   : > { %v3539_v46 = vadd.f32 %v3538_v45, %v3418_v40 }
 0x3ce   : > { %v3543_v47 = vmax.f32 %v3539_v46, 0.0 }
 0x3d0   : > { %3545 = vst [vmem:[%s177_s29 + $0x8] sm:$0xff] %v3543_v47 }
 0x3d1   : > { %4136 = shalt.err (!%p4133_p5)
}
 0x3d2   : > { %4043 = dma.vmem_to_hbm [thread:$0]  (%p4258_p4), %s3563_s6, 256, %s3565_s7, %s3547_s8  }
 0x3d3   : > { %v3540_v31 = vpop.f32.mrf.mxu1 }
 0x3d4 PF: > { %p4049_p6 = scmp.ge.s32.totalorder %s4187_s17, 2  ;;  %s3576_s23 = sand.u32 1, %s4167_s12  }
 0x3d5   : > { %s3577_s26 = scalar_lea.sflag [#allocation4], %s3576_s23 }
 0x3d6   : > { %p4046_p7 = pnand %p4049_p6, %p4265_p8 }
 0x3d8   : > { %p4047_p9 = pneg %p4046_p7 }
 0x3da   : > { %4162 = dma.done.wait (%p4047_p9), %s3577_s26, 256  }
 0x3db   : > { %4164 = vsyncadd (%p4047_p9), %s3577_s26, 4294967040  ;;  %s16_s17 = sadd.s32 1, %s4187_s17   ;;  %s5889_s12 = smov %s4171_s13 }
 0x3dc   : > { %p13_p10 = scmp.ge.s32.totalorder %s16_s17, 4   ;;  %s5890_s13 = smov %s4175_s14 }
 0x3dd   : > { %s5891_s14 = smov %s4271_s25  ;;  %s5892_s15 = smov %s4183_s16 }
 0x3de   : > { %s5893_s16 = smov %s5895_s20  ;;  %15 = sbr.rel (!%p13_p10) target bundleno = 4 (0x4), region = 70 }
 0x3e3   :  { %3583 = vsyncpa [#allocation4], 1 }
 0x3e4   :  { %3585 = vsyncpa [#allocation4 + $0x1], 1 }

// kernel: tpu_custom_call.1
= control target key start
LH: loop header
LB: loop body
LE: loop exit
PB: predicated region body
PF: predicated region fallthrough
CT: control target
= control target key end

     0   :  { %8 = vsyncpa [#allocation4], 0  ;;  %s5879_s0 = inlined_call_operand.vmem [shape: bf16[2,18,18,4], index: 0, kind: input, shape index: {}]   ;;  %s5880_s1 = inlined_call_operand.vmem [shape: bf16[8,128], index: 1, kind: input, shape index: {}]   ;;  %s5881_s2 = inlined_call_operand.vmem [shape: f32[8,1], index: 2, kind: input, shape index: {}]   ;;  %s5882_s3 = inlined_call_operand.hbm [shape: f32[2,8,256], index: 3, kind: output, shape index: {}]  }
   0x1   :  { %10 = vsyncpa [#allocation4 + $0x1], 0  ;;  %s4218_s12 = smov 0   ;;  %s4220_s13 = smov 0  }
   0x2   :  { %s4222_s14 = smov 0   ;;  %s4224_s15 = smov 0  }
   0x3   :  { %s4226_s16 = smov 0   ;;  %s4228_s17 = smov 0  }
   0x4 LB: > { %s3645_s18 = sadd.s32 4294967295, %s4187_s17   ;;  %s3646_s19 = sadd.s32 4294967294, %s4187_s17   ;;  %s4187_s17 = sphi %s4228_s17, %s16_s17   ;;  %s4183_s16 = sphi %s4226_s16, %s5893_s16   ;;  %s4179_s15 = sphi %s4224_s15, %s5892_s15   ;;  %s4175_s14 = sphi %s4222_s14, %s5891_s14   ;;  %s4171_s13 = sphi %s4220_s13, %s5890_s13   ;;  %s4167_s12 = sphi %s4218_s12, %s5889_s12  }
   0x5   : > { %s28_s20 = sadd.s32 1, %s4183_s16  ;;  %s105_s21 = sadd.s32 1, %s4175_s14 }
   0x6   : > { %p30_p0 = scmp.ge.s32.totalorder %s28_s20, 2  ;;  %p115_p1 = scmp.ne.s32.totalorder %s4175_s14, %s4171_s13 }
   0x7   : > { %p116_p2 = scmp.eq.s32.totalorder %s3645_s18, 1  ;;  %p121_p3 = scmp.ne.s32.totalorder %s4171_s13, %s4167_s12 }
   0x8   : > { %s5895_s20 = smov (%p30_p0, %s28_s20), 0  ;;  %p122_p5 = scmp.eq.s32.totalorder %s3646_s19, 1 }
   0x9   : > { %p4258_p4 = por %p116_p2, %p115_p1  ;;  %s100_s23 = ssub.s32 %s4183_s16, %s5895_s20 }
   0xa   : > { %p3649_p6 = scmp.ge.s32.totalorder %s4187_s17, 1  ;;  %p103_p7 = scmp.eq.s32.totalorder %s100_s23, 0 }
   0xb   : > { %p4265_p8 = por %p122_p5, %p121_p3  ;;  %p154_p9 = scmp.lt.s32.totalorder %s4187_s17, 3 }
   0xc   : > { %s4271_s25 = scalar_select %p103_p7, %s4175_s14, %s105_s21  }
   0xd   : > { %p155_p10 = pnand %p3649_p6, %p154_p9 }
   0xe   : > { %p178_p11 = scmp.lt.s32.totalorder (!%p155_p10), %s4179_s15, 1  ;;  %s4189_s4 = smov (!%p155_p10), 4  }
   0xf   : > { %158 = sbr.rel (%p155_p10) target bundleno = 980 (0x3d4), region = 32  ;;  %s4191_s5 = smov (!%p155_p10), 8  }
  0x10   : > { %s4192_s6 = smov (!%p155_p10), 12   ;;  %s4193_s7 = smov (!%p155_p10), 16  }
  0x11   : > { %s4194_s8 = smov (!%p155_p10), 20   ;;  %s4195_s9 = smov (!%p155_p10), 24  }
  0x12   : > { %s4196_s10 = smov (!%p155_p10), 28   ;;  %s4197_s11 = smov (!%p155_p10), 32  }
  0x13   : > { %s4041_s28 = sshll.u32 (!%p155_p10), %s4179_s15, 4  ;;  %s4129_s18 = scalar_lea.hbm (!%p155_p10), %s5882_s3, 32 }
  0x14   : > { %s179_s26 = scalar_select %p178_p11, %s4179_s15, 1  ;;  %vm335_vm0 = vsmask.f32 3328  ;;  %vm336_vm1 = vsmask.f32 7440  ;;  %vm947_vm3 = vcmask 1042432  }
  0x15   : > { %vm4289_vm2 = vmor %vm335_vm0, %vm336_vm1  ;;  %vm948_vm4 = vcmask 1046532   ;;  %vm186_vm5 = vcmask 1043744   ;;  %vm254_vm7 = vcmask 27648   ;;  %vm818_vm8 = vcmask 60448  }
  0x16   : > { %s4042_s27 = smul.u32 216, %s179_s26  ;;  %vm4483_vm6 = vmor %vm947_vm3, %vm948_vm4  ;;  %vm1158_vm9 = vcmask 93248   ;;  %vm1355_vm10 = vcmask 126048   ;;  %vm1916_vm11 = vcmask 158848   ;;  %vm2253_vm12 = vcmask 191648   ;;  %s175_s26 = sand.u32 1, %s4171_s13  }
  0x17   : > { %vm2450_vm13 = vcmask 224448   ;;  %vm3011_vm14 = vcmask 257248   ;;  %vm3348_vm15 = vcmask 290048  }
  0x18   : > { %s4278_s30 = scalar_lea.vmem %s5879_s0, %s4042_s27  ;;  %s3650_s27 = sshll.u32 %s175_s26, 4 }
  0x19   : > { %v290_v0 = vld [vmem:[%s4278_s30 + $0xc] sm:$0xf]  ;;  %v291_v1 = vld [vmem:[%s4278_s30 + $0x10] sm:$0xf]  ;;  %v287_v2 = vld [vmem:[%s4278_s30] sm:$0xf] }
  0x1a   : > { %v363_v3 = vshrl.u32 %v290_v0, 16  ;;  %v366_v4 = vshll.u32 %v290_v0, 16  ;;  %v372_v5 = vshll.u32 %v291_v1, 16  ;;  %v376_v6 = vshrl.u32 %v291_v1, 16  ;;  %v288_v7 = vld [vmem:[%s4278_s30 + $0x4] sm:$0xf] }
  0x1b   : > { %v339_v8 = vshrl.u32 %v287_v2, 16  ;;  %v342_v9 = vshll.u32 %v287_v2, 16  ;;  %v348_v10 = vshll.u32 %v288_v7, 16  ;;  %v352_v11 = vshrl.u32 %v288_v7, 16  ;;  %v292_v16 = vld [vmem:[%s4278_s30 + $0x14] sm:$0x1] }
  0x1c   : > { %v365_v12 = vrot.slane %v363_v3, 4  ;;  %v368_v13 = vrot.slane %v366_v4, 5  ;;  %v374_v14 = vrot.slane %v372_v5, 5  ;;  %v378_v15 = vrot.slane %v376_v6, 4  ;;  %v297_v20 = vld [vmem:[%s4278_s30 + $0x28] sm:$0xf] }
  0x1d   : > { %v341_v17 = vrot.slane %v339_v8, 4  ;;  %v344_v18 = vrot.slane %v342_v9, 5  ;;  %v354_v19 = vrot.slane %v352_v11, 4  ;;  %v350_v22 = vrot.slane %v348_v10, 5  ;;  %v289_v24 = vld [vmem:[%s4278_s30 + $0x8] sm:$0x1] }
  0x1e   : > { %v369_v21 = vor.u32 %v368_v13, %v365_v12  ;;  %v379_v23 = vor.u32 %v378_v15, %v374_v14  ;;  %v382_v27 = vshll.u32 %v292_v16, 16  ;;  %v420_v28 = vshll.u32 %v297_v20, 16  ;;  %v296_v30 = vld [vmem:[%s4278_s30 + $0x24] sm:$0xf]  ;;  %v298_v42 = vld [vmem:[%s4278_s30 + $0x2c] sm:$0x1] }
  0x1f   : > { %v345_v26 = vor.u32 %v344_v18, %v341_v17  ;;  %v424_v29 = vshrl.u32 %v297_v20, 16  ;;  %v355_v33 = vor.u32 %v354_v19, %v350_v22  ;;  %v358_v34 = vshll.u32 %v289_v24, 16  ;;  %v302_v44 = vld [vmem:[%s4278_s30 + $0x3c] sm:$0xf]  ;;  %v300_v45 = vld [vmem:[%s4278_s30 + $0x34] sm:$0xf] }
  0x20   : > { %v370_v31 = vrot.slane %v369_v21, 4  ;;  %v4296_v36 = vrot.slane %v420_v28, 5  ;;  %v411_v38 = vshrl.u32 %v296_v30, 16  ;;  %v380_v40 = vrot.slane %v379_v23, 4  ;;  %v293_v50 = vld [vmem:[%s4278_s30 + $0x18] sm:$0xf] }
  0x21   : > { %v346_v32 = vrot.slane %v345_v26, 4  ;;  %v426_v37 = vrot.slane %v424_v29, 4  ;;  %v384_v41 = vrot.slane %v382_v27, 5  ;;  %v414_v43 = vshll.u32 %v296_v30, 16  ;;  %v294_v53 = vld [vmem:[%s4278_s30 + $0x1c] sm:$0xf] }
  0x22   : > { %v375_v35 = vsel %vm4289_vm2, %v370_v31, %v374_v14  ;;  %v356_v46 = vrot.slane %v355_v33, 4  ;;  %v360_v47 = vrot.slane %v358_v34, 5  ;;  %v413_v48 = vrot.slane %v411_v38, 4  ;;  %v4314_v4 = vld [vmem:[%s4278_s30 + $0x40] sm:$0xf]  ;;  %s177_s29 = scalar_lea.vmem [#allocation3], %s3650_s27 }
  0x23   : > { %726 = vrot.lane.b32.xlu1 %v375_v35, %s4189_s4  ;;  %v351_v39 = vsel %vm4289_vm2, %v346_v32, %v350_v22  ;;  %v416_v49 = vrot.slane %v414_v43, 5  ;;  %v427_v51 = vor.u32 %v426_v37, %v4296_v36  ;;  %v430_v52 = vshll.u32 %v298_v42, 16  ;;  %v301_v6 = vld [vmem:[%s4278_s30 + $0x38] sm:$0x1]  ;;  %v295_v12 = vld [vmem:[%s4278_s30 + $0x20] sm:$0x1] }
  0x24   : > { %722 = vrot.lane.b32.xlu0 %v351_v39, %s4189_s4  ;;  %v385_v54 = vsel %vm4289_vm2, %v380_v40, %v384_v41  ;;  %v459_v55 = vshrl.u32 %v302_v44, 16  ;;  %v462_v56 = vshll.u32 %v302_v44, 16  ;;  %v444_v57 = vshll.u32 %v300_v45, 16  ;;  %v306_v16 = vld [vmem:[%s4278_s30 + $0x4c] sm:$0xf] }
  0x25   : > { %v448_v58 = vshrl.u32 %v300_v45, 16  ;;  %v387_v59 = vshrl.u32 %v293_v50, 16  ;;  %v361_v60 = vsel %vm4289_vm2, %v356_v46, %v360_v47  ;;  %v417_v61 = vor.u32 %v416_v49, %v413_v48  ;;  %v305_v19 = vld [vmem:[%s4278_s30 + $0x48] sm:$0xf]  ;;  %v299_v33 = vld [vmem:[%s4278_s30 + $0x30] sm:$0xf] }
  0x26   : > { %v390_v62 = vshll.u32 %v293_v50, 16  ;;  %v396_v63 = vshll.u32 %v294_v53, 16  ;;  %v428_v0 = vrot.slane %v427_v51, 4  ;;  %v432_v1 = vrot.slane %v430_v52, 5  ;;  %v311_v39 = vld [vmem:[%s4278_s30 + $0x60] sm:$0xf] }
  0x27   : > { %v389_v2 = vrot.slane %v387_v59, 4  ;;  %v400_v3 = vshrl.u32 %v294_v53, 16  ;;  %v461_v5 = vrot.slane %v459_v55, 4  ;;  %v464_v8 = vrot.slane %v462_v56, 5  ;;  %v307_v43 = vld [vmem:[%s4278_s30 + $0x50] sm:$0x1] }
  0x28   : > { %v392_v7 = vrot.slane %v390_v62, 5  ;;  %v4318_v9 = vrot.slane %v444_v57, 5  ;;  %v450_v10 = vrot.slane %v448_v58, 4  ;;  %v418_v13 = vrot.slane %v417_v61, 4  ;;  %v309_v50 = vld [vmem:[%s4278_s30 + $0x58] sm:$0xf] }
  0x29   : > { %v402_v11 = vrot.slane %v400_v3, 4  ;;  %v398_v15 = vrot.slane %v396_v63, 5  ;;  %v433_v17 = vsel %vm4289_vm2, %v428_v0, %v432_v1  ;;  %v468_v18 = vshll.u32 %v4314_v4, 16  ;;  %v4355_v1 = vld [vmem:[%s4278_s30 + $0x64] sm:$0xf] }
  0x2a   : > { %v393_v14 = vor.u32 %v392_v7, %v389_v2  ;;  %v454_v20 = vshll.u32 %v301_v6, 16  ;;  %v406_v23 = vshll.u32 %v295_v12, 16  ;;  %v465_v24 = vor.u32 %v464_v8, %v461_v5  ;;  %v315_v6 = vld [vmem:[%s4278_s30 + $0x70] sm:$0xf]  ;;  %v304_v7 = vld [vmem:[%s4278_s30 + $0x44] sm:$0x1] }
  0x2b   : > { %728 = vrot.lane.b32.xlu1 %v385_v54, %s4189_s4  ;;  %v403_v22 = vor.u32 %v402_v11, %v398_v15  ;;  %v451_v26 = vor.u32 %v450_v10, %v4318_v9  ;;  %v492_v27 = vshll.u32 %v306_v16, 16  ;;  %v496_v28 = vshrl.u32 %v306_v16, 16  ;;  %v314_v12 = vld [vmem:[%s4278_s30 + $0x6c] sm:$0xf]  ;;  %v308_v16 = vld [vmem:[%s4278_s30 + $0x54] sm:$0xf] }
  0x2c   : > { %724 = vrot.lane.b32.xlu0 %v361_v60, %s4189_s4  ;;  %v394_v21 = vrot.slane %v393_v14, 4  ;;  %v423_v29 = vsel %vm4289_vm2, %v418_v13, %v4296_v36  ;;  %v483_v31 = vshrl.u32 %v305_v19, 16  ;;  %v486_v32 = vshll.u32 %v305_v19, 16 }
  0x2d   : > { %v4335_v34 = vrot.slane %v468_v18, 5  ;;  %v456_v35 = vrot.slane %v454_v20, 5  ;;  %v404_v37 = vrot.slane %v403_v22, 4  ;;  %v408_v38 = vrot.slane %v406_v23, 5 }
  0x2e   : > { %v399_v30 = vsel %vm4289_vm2, %v394_v21, %v398_v15  ;;  %v466_v36 = vrot.slane %v465_v24, 4  ;;  %v452_v40 = vrot.slane %v451_v26, 4  ;;  %v4339_v41 = vrot.slane %v492_v27, 5  ;;  %v310_v15 = vld [vmem:[%s4278_s30 + $0x5c] sm:$0x1] }
  0x2f   : > { %730 = vrot.lane.b32.xlu2 %v399_v30, %s4189_s4  ;;  %v498_v42 = vrot.slane %v496_v28, 4  ;;  %v485_v44 = vrot.slane %v483_v31, 4  ;;  %v488_v45 = vrot.slane %v486_v32, 5  ;;  %v435_v46 = vshrl.u32 %v299_v33, 16  ;;  %v316_v32 = vld [vmem:[%s4278_s30 + $0x74] sm:$0x1] }
  0x30   : > { %v438_v47 = vshll.u32 %v299_v33, 16  ;;  %v531_v48 = vshrl.u32 %v311_v39, 16  ;;  %v534_v49 = vshll.u32 %v311_v39, 16  ;;  %v472_v51 = vshrl.u32 %v4314_v4, 16 }
  0x31   : > { %v409_v52 = vsel %vm4289_vm2, %v404_v37, %v408_v38  ;;  %v437_v53 = vrot.slane %v435_v46, 4  ;;  %v471_v55 = vsel %vm4289_vm2, %v466_v36, %v4335_v34  ;;  %v457_v56 = vsel %vm4289_vm2, %v452_v40, %v456_v35 }
  0x32   : > { %v440_v54 = vrot.slane %v438_v47, 5  ;;  %v499_v57 = vor.u32 %v498_v42, %v4339_v41  ;;  %v502_v58 = vshll.u32 %v307_v43, 16  ;;  %v489_v59 = vor.u32 %v488_v45, %v485_v44  ;;  %v320_v43 = vld [vmem:[%s4278_s30 + $0x84] sm:$0xf]  ;;  %v318_v45 = vld [vmem:[%s4278_s30 + $0x7c] sm:$0xf] }
  0x33   : > { %736 = vrot.lane.b32.xlu1 %v433_v17, %s4189_s4  ;;  %v516_v60 = vshll.u32 %v309_v50, 16  ;;  %v520_v61 = vshrl.u32 %v309_v50, 16  ;;  %v533_v63 = vrot.slane %v531_v48, 4  ;;  %v536_v0 = vrot.slane %v534_v49, 5 }
  0x34   : > { %734 = vrot.lane.b32.xlu0 %v423_v29, %s4189_s4  ;;  %v441_v62 = vor.u32 %v440_v54, %v437_v53  ;;  %v474_v3 = vrot.slane %v472_v51, 4  ;;  %v500_v4 = vrot.slane %v499_v57, 4  ;;  %v504_v5 = vrot.slane %v502_v58, 5 }
  0x35   : > { %v490_v8 = vrot.slane %v489_v59, 4  ;;  %v4360_v10 = vrot.slane %v516_v60, 5  ;;  %v522_v11 = vrot.slane %v520_v61, 4  ;;  %v537_v13 = vor.u32 %v536_v0, %v533_v63  ;;  %v324_v59 = vld [vmem:[%s4278_s30 + $0x94] sm:$0xf] }
  0x36   : > { %v442_v2 = vrot.slane %v441_v62, 4  ;;  %v540_v14 = vshll.u32 %v4355_v1, 16  ;;  %v564_v18 = vshll.u32 %v315_v6, 16  ;;  %v475_v19 = vor.u32 %v474_v3, %v4335_v34  ;;  %v313_v60 = vld [vmem:[%s4278_s30 + $0x68] sm:$0x1] }
  0x37   : > { %732 = vrot.lane.b32.xlu2 %v409_v52, %s4189_s4  ;;  %v478_v20 = vshll.u32 %v304_v7, 16  ;;  %v505_v21 = vsel %vm4289_vm2, %v500_v4, %v504_v5  ;;  %v568_v22 = vshrl.u32 %v315_v6, 16  ;;  %v555_v23 = vshrl.u32 %v314_v12, 16  ;;  %v321_v3 = vld [vmem:[%s4278_s30 + $0x88] sm:$0xf] }
  0x38   : > { %v447_v17 = vsel %vm4289_vm2, %v442_v2, %v4318_v9  ;;  %v558_v24 = vshll.u32 %v314_v12, 16  ;;  %v495_v26 = vsel %vm4289_vm2, %v490_v8, %v4339_v41  ;;  %v523_v27 = vor.u32 %v522_v11, %v4360_v10  ;;  %v317_v2 = vld [vmem:[%s4278_s30 + $0x78] sm:$0xf]  ;;  %v319_v4 = vld [vmem:[%s4278_s30 + $0x80] sm:$0x1] }
  0x39   : > { %v526_v28 = vshll.u32 %v310_v15, 16  ;;  %v507_v29 = vshrl.u32 %v308_v16, 16  ;;  %v538_v9 = vrot.slane %v537_v13, 4  ;;  %v4376_v30 = vrot.slane %v540_v14, 5  ;;  %v323_v11 = vld [vmem:[%s4278_s30 + $0x90] sm:$0xf] }
  0x3a   : > { %v510_v31 = vshll.u32 %v308_v16, 16  ;;  %v4381_v33 = vrot.slane %v564_v18, 5  ;;  %v476_v34 = vrot.slane %v475_v19, 4  ;;  %v480_v35 = vrot.slane %v478_v20, 5 }
  0x3b   : > { %742 = vrot.lane.b32.xlu1 %v471_v55, %s4189_s4  ;;  %v509_v37 = vrot.slane %v507_v29, 4  ;;  %v570_v38 = vrot.slane %v568_v22, 4  ;;  %v557_v39 = vrot.slane %v555_v23, 4  ;;  %v560_v36 = vrot.slane %v558_v24, 5 }
  0x3c   : > { %740 = vrot.lane.b32.xlu0 %v457_v56, %s4189_s4  ;;  %v512_v40 = vrot.slane %v510_v31, 5  ;;  %v524_v41 = vrot.slane %v523_v27, 4  ;;  %v528_v42 = vrot.slane %v526_v28, 5  ;;  %v574_v44 = vshll.u32 %v316_v32, 16  ;;  %v325_v27 = vld [vmem:[%s4278_s30 + $0x98] sm:$0x1] }
  0x3d   : > { %v543_v46 = vsel %vm4289_vm2, %v538_v9, %v4376_v30  ;;  %v544_v47 = vshrl.u32 %v4355_v1, 16  ;;  %v481_v48 = vsel %vm4289_vm2, %v476_v34, %v480_v35  ;;  %v571_v50 = vor.u32 %v570_v38, %v4381_v33  ;;  %v329_v38 = vld [vmem:[%s4278_s30 + $0xa8] sm:$0xf] }
  0x3e   : > { %v513_v49 = vor.u32 %v512_v40, %v509_v37  ;;  %v561_v51 = vor.u32 %v560_v36, %v557_v39  ;;  %v603_v52 = vshrl.u32 %v320_v43, 16  ;;  %v606_v53 = vshll.u32 %v320_v43, 16  ;;  %v327_v40 = vld [vmem:[%s4278_s30 + $0xa0] sm:$0xf] }
  0x3f   : > { %738 = vrot.lane.b32.xlu2 %v447_v17, %s4189_s4  ;;  %v529_v54 = vsel %vm4289_vm2, %v524_v41, %v528_v42  ;;  %v588_v55 = vshll.u32 %v318_v45, 16  ;;  %v592_v56 = vshrl.u32 %v318_v45, 16  ;;  %v576_v57 = vrot.slane %v574_v44, 5 }
  0x40   : > { %v514_v58 = vrot.slane %v513_v49, 4  ;;  %v546_v61 = vrot.slane %v544_v47, 4  ;;  %v572_v62 = vrot.slane %v571_v50, 4  ;;  %v562_v63 = vrot.slane %v561_v51, 4 }
  0x41   : > { %v605_v0 = vrot.slane %v603_v52, 4  ;;  %v608_v1 = vrot.slane %v606_v53, 5  ;;  %v4403_v5 = vrot.slane %v588_v55, 5  ;;  %v594_v6 = vrot.slane %v592_v56, 4  ;;  %v330_v53 = vld [vmem:[%s4278_s30 + $0xac] sm:$0xf] }
  0x42   : > { %v636_v7 = vshll.u32 %v324_v59, 16  ;;  %v640_v8 = vshrl.u32 %v324_v59, 16  ;;  %v550_v12 = vshll.u32 %v313_v60, 16  ;;  %v519_v13 = vsel %vm4289_vm2, %v514_v58, %v4360_v10  ;;  %v322_v55 = vld [vmem:[%s4278_s30 + $0x8c] sm:$0x1] }
  0x43   : > { %748 = vrot.lane.b32.xlu1 %v505_v21, %s4189_s4  ;;  %v547_v14 = vor.u32 %v546_v61, %v4376_v30  ;;  %v579_v15 = vshrl.u32 %v317_v2, 16  ;;  %v582_v16 = vshll.u32 %v317_v2, 16  ;;  %v577_v17 = vsel %vm4289_vm2, %v572_v62, %v576_v57  ;;  %v328_v59 = vld [vmem:[%s4278_s30 + $0xa4] sm:$0x1]  ;;  %v326_v60 = vld [vmem:[%s4278_s30 + $0x9c] sm:$0xf] }
  0x44   : > { %746 = vrot.lane.b32.xlu0 %v495_v26, %s4189_s4  ;;  %v567_v18 = vsel %vm4289_vm2, %v562_v63, %v4381_v33  ;;  %v609_v19 = vor.u32 %v608_v1, %v605_v0  ;;  %v612_v20 = vshll.u32 %v321_v3, 16  ;;  %v595_v21 = vor.u32 %v594_v6, %v4403_v5  ;;  %v333_v0 = vld [vmem:[%s4278_s30 + $0xb8] sm:$0xf] }
  0x45   : > { %v598_v22 = vshll.u32 %v319_v4, 16  ;;  %v627_v23 = vshrl.u32 %v323_v11, 16  ;;  %v630_v24 = vshll.u32 %v323_v11, 16  ;;  %v4417_v10 = vrot.slane %v636_v7, 5 }
  0x46   : > { %v642_v26 = vrot.slane %v640_v8, 4  ;;  %v548_v28 = vrot.slane %v547_v14, 4  ;;  %v552_v29 = vrot.slane %v550_v12, 5  ;;  %v581_v9 = vrot.slane %v579_v15, 4 }
  0x47   : > { %744 = vrot.lane.b32.xlu2 %v481_v48, %s4189_s4  ;;  %v584_v30 = vrot.slane %v582_v16, 5  ;;  %v610_v31 = vrot.slane %v609_v19, 4  ;;  %v614_v32 = vrot.slane %v612_v20, 5  ;;  %v596_v33 = vrot.slane %v595_v21, 4 }
  0x48   : > { %v600_v34 = vrot.slane %v598_v22, 5  ;;  %v629_v35 = vrot.slane %v627_v23, 4  ;;  %v632_v37 = vrot.slane %v630_v24, 5  ;;  %v643_v39 = vor.u32 %v642_v26, %v4417_v10 }
  0x49   : > { %v646_v36 = vshll.u32 %v325_v27, 16  ;;  %v616_v41 = vshrl.u32 %v321_v3, 16  ;;  %v553_v42 = vsel %vm4289_vm2, %v548_v28, %v552_v29  ;;  %v585_v43 = vor.u32 %v584_v30, %v581_v9  ;;  %v332_v3 = vld [vmem:[%s4278_s30 + $0xb4] sm:$0xf]  ;;  %v334_v29 = vld [vmem:[%s4278_s30 + $0xbc] sm:$0x1] }
  0x4a   : > { %v615_v44 = vsel %vm4289_vm2, %v610_v31, %v614_v32  ;;  %v675_v45 = vshrl.u32 %v329_v38, 16  ;;  %v601_v47 = vsel %vm4289_vm2, %v596_v33, %v600_v34  ;;  %v633_v48 = vor.u32 %v632_v37, %v629_v35 }
  0x4b   : > { %754 = vrot.lane.b32.xlu1 %v543_v46, %s4189_s4  ;;  %v678_v46 = vshll.u32 %v329_v38, 16  ;;  %v660_v49 = vshll.u32 %v327_v40, 16  ;;  %v664_v50 = vshrl.u32 %v327_v40, 16  ;;  %v644_v51 = vrot.slane %v643_v39, 4 }
  0x4c   : > { %752 = vrot.lane.b32.xlu0 %v529_v54, %s4189_s4  ;;  %v648_v52 = vrot.slane %v646_v36, 5  ;;  %v586_v54 = vrot.slane %v585_v43, 4  ;;  %v618_v56 = vrot.slane %v616_v41, 4  ;;  %v677_v57 = vrot.slane %v675_v45, 4  ;;  %v331_v43 = vld [vmem:[%s4278_s30 + $0xb0] sm:$0x1] }
  0x4d   : > { %v680_v58 = vrot.slane %v678_v46, 5  ;;  %v634_v61 = vrot.slane %v633_v48, 4  ;;  %v4438_v62 = vrot.slane %v660_v49, 5  ;;  %v666_v63 = vrot.slane %v664_v50, 4  ;;  %v852_v45 = vld [vmem:[%s4278_s30 + $0x4] sm:$0xf] }
  0x4e   : > { %v649_v1 = vsel %vm4289_vm2, %v644_v51, %v648_v52  ;;  %v684_v2 = vshll.u32 %v330_v53, 16  ;;  %v622_v4 = vshll.u32 %v322_v55, 16  ;;  %v591_v6 = vsel %vm4289_vm2, %v586_v54, %v4403_v5  ;;  %v854_v50 = vld [vmem:[%s4278_s30 + $0xc] sm:$0xe]  ;;  %v4475_v52 = vld [vmem:[%s4278_s30 + $0x10] sm:$0xf] }
  0x4f   : > { %750 = vrot.lane.b32.xlu2 %v519_v13, %s4189_s4  ;;  %v619_v7 = vor.u32 %v618_v56, %v614_v32  ;;  %v651_v8 = vshrl.u32 %v326_v60, 16  ;;  %v654_v11 = vshll.u32 %v326_v60, 16  ;;  %v681_v12 = vor.u32 %v680_v58, %v677_v57  ;;  %v858_v60 = vld [vmem:[%s4278_s30 + $0x1c] sm:$0xf] }
  0x50   : > { %v670_v13 = vshll.u32 %v328_v59, 16  ;;  %v708_v14 = vshll.u32 %v333_v0, 16  ;;  %v712_v15 = vshrl.u32 %v333_v0, 16  ;;  %v639_v16 = vsel %vm4289_vm2, %v634_v61, %v4417_v10  ;;  %v224_v0 = vld [vmem:[%s4278_s30 + $0xc] sm:$0xf] }
  0x51   : > { %v702_v19 = vshll.u32 %v332_v3, 16  ;;  %v620_v5 = vrot.slane %v619_v7, 4  ;;  %v624_v20 = vrot.slane %v622_v4, 5  ;;  %v653_v21 = vrot.slane %v651_v8, 4  ;;  %v851_v4 = vld [vmem:[%s4278_s30] sm:$0xe] }
  0x52   : > { %v656_v22 = vrot.slane %v654_v11, 5  ;;  %v682_v23 = vrot.slane %v681_v12, 4  ;;  %v686_v24 = vrot.slane %v684_v2, 5  ;;  %v710_v26 = vrot.slane %v708_v14, 5  ;;  %v859_v7 = vld [vmem:[%s4278_s30 + $0x20] sm:$0x1] }
  0x53   : > { %760 = vrot.lane.b32.xlu1 %v577_v17, %s4189_s4  ;;  %v667_v17 = vor.u32 %v666_v63, %v4438_v62  ;;  %v714_v27 = vrot.slane %v712_v15, 4  ;;  %v672_v28 = vrot.slane %v670_v13, 5  ;;  %v704_v30 = vrot.slane %v702_v19, 5  ;;  %v857_v8 = vld [vmem:[%s4278_s30 + $0x18] sm:$0xe] }
  0x54   : > { %758 = vrot.lane.b32.xlu0 %v567_v18, %s4189_s4  ;;  %v699_v18 = vshrl.u32 %v332_v3, 16  ;;  %v688_v31 = vshrl.u32 %v330_v53, 16  ;;  %v625_v32 = vsel %vm4289_vm2, %v620_v5, %v624_v20  ;;  %v657_v33 = vor.u32 %v656_v22, %v653_v21  ;;  %v853_v53 = vld [vmem:[%s4278_s30 + $0x8] sm:$0x1]  ;;  %v856_v19 = vld [vmem:[%s4278_s30 + $0x14] sm:$0x1] }
  0x55   : > { %v668_v10 = vrot.slane %v667_v17, 4  ;;  %v687_v34 = vsel %vm4289_vm2, %v682_v23, %v686_v24  ;;  %v715_v35 = vor.u32 %v714_v27, %v710_v26  ;;  %v718_v37 = vshll.u32 %v334_v29, 16  ;;  %v861_v15 = vld [vmem:[%s4278_s30 + $0x28] sm:$0xf]  ;;  %v864_v20 = vld [vmem:[%s4278_s30 + $0x34] sm:$0xf] }
  0x56   : > { %v701_v9 = vrot.slane %v699_v18, 4  ;;  %v658_v36 = vrot.slane %v657_v33, 4  ;;  %v690_v40 = vrot.slane %v688_v31, 4  ;;  %v694_v48 = vshll.u32 %v331_v43, 16  ;;  %v863_v18 = vld [vmem:[%s4278_s30 + $0x30] sm:$0xe] }
  0x57   : > { %756 = vrot.lane.b32.xlu2 %v553_v42, %s4189_s4  ;;  %v673_v38 = vsel %vm4289_vm2, %v668_v10, %v672_v28  ;;  %v716_v41 = vrot.slane %v715_v35, 4  ;;  %v720_v42 = vrot.slane %v718_v37, 5  ;;  %v952_v54 = vrot.slane %v852_v45, 5  ;;  %v862_v22 = vld [vmem:[%s4278_s30 + $0x2c] sm:$0x1] }
  0x58   : > { %v705_v39 = vor.u32 %v704_v30, %v701_v9  ;;  %v663_v46 = vsel %vm4289_vm2, %v658_v36, %v4438_v62  ;;  %v3653_v55 = vrot.slane %v854_v50, 9  ;;  %v696_v57 = vrot.slane %v694_v48, 5  ;;  %v867_v29 = vld [vmem:[%s4278_s30 + $0x40] sm:$0xf]  ;;  %v866_v35 = vld [vmem:[%s4278_s30 + $0x3c] sm:$0xe] }
  0x59   : > { %v721_v49 = vsel %vm4289_vm2, %v716_v41, %v720_v42  ;;  %v959_v58 = vrot.slane %v4475_v52, 5  ;;  %v955_v59 = vrot.slane %v853_v53, 5  ;;  %v954_v62 = vrot.slane %v952_v54, 4  ;;  %v4579_v41 = vld [vmem:[%s4278_s30 + $0x4c] sm:$0xf] }
  0x5a   : > { %v4190_v63 = vmov 0   ;;  %v966_v3 = vrot.slane %v858_v60, 5  ;;  %v3652_v11 = vrot.slane %v851_v4, 9  ;;  %v969_v13 = vrot.slane %v859_v7, 5  ;;  %v865_v45 = vld [vmem:[%s4278_s30 + $0x38] sm:$0x1] }
  0x5b   : > { %766 = vrot.lane.b32.xlu1 %v615_v44, %s4189_s4  ;;  %v706_v44 = vrot.slane %v705_v39, 4  ;;  %189 = vst.msk [vmem:[#allocation2 + $0x8] sm:$0xf] %vm186_vm5, %v4190_v63  ;;  %4108 = vset.pattern.permute.xlu0 %v4190_v63  ;;  %v960_v2 = vsel %vm4483_vm6, %v3653_v55, %v959_v58  ;;  %v3654_v14 = vrot.slane %v857_v8, 9  ;;  %v973_v21 = vrot.slane %v861_v15, 5 }
  0x5c   : > { %764 = vrot.lane.b32.xlu0 %v601_v47, %s4189_s4  ;;  %v691_v47 = vor.u32 %v690_v40, %v686_v24  ;;  %4107 = vset.pattern.permute.xlu1 %v4190_v63  ;;  %257 = vst.msk [vmem:[#allocation2 + $0x8] sm:$0xf] %vm254_vm7, %v224_v0  ;;  %v968_v12 = vrot.slane %v966_v3, 4  ;;  %v961_v23 = vrot.slane %v959_v58, 4  ;;  %v962_v24 = vrot.slane %v856_v19, 5 }
  0x5d   : > { %v711_v51 = vsel %vm4289_vm2, %v706_v44, %v710_v26  ;;  %187 = vst.msk [vmem:[#allocation2] sm:$0xf] %vm186_vm5, %v4190_v63  ;;  %v967_v5 = vsel %vm4483_vm6, %v3654_v14, %v966_v3  ;;  %v3656_v26 = vrot.slane %v863_v18, 9  ;;  %v980_v27 = vrot.slane %v864_v20, 5  ;;  %v4599_v48 = vld [vmem:[%s4278_s30 + $0x58] sm:$0xf] }
  0x5e   : > { %v692_v56 = vrot.slane %v691_v47, 4  ;;  %188 = vst.msk [vmem:[#allocation2 + $0x4] sm:$0xf] %vm186_vm5, %v4190_v63  ;;  %v970_v17 = vsel %vm4483_vm6, %v968_v12, %v969_v13  ;;  %v975_v10 = vrot.slane %v973_v21, 4  ;;  %v976_v28 = vrot.slane %v862_v22, 5 }
  0x5f   : > { %762 = vrot.lane.b32.xlu2 %v591_v6, %s4189_s4  ;;  %v956_v6 = vsel %vm4483_vm6, %v954_v62, %v955_v59  ;;  %190 = vst.msk [vmem:[#allocation2 + $0xc] sm:$0xf] %vm186_vm5, %v4190_v63  ;;  %v963_v9 = vsel %vm4483_vm6, %v961_v23, %v962_v24  ;;  %v981_v30 = vsel %vm4483_vm6, %v3656_v26, %v980_v27  ;;  %v987_v31 = vrot.slane %v867_v29, 5  ;;  %v872_v47 = vld [vmem:[%s4278_s30 + $0x54] sm:$0xe] }
  0x60   : > { %191 = vst.msk [vmem:[#allocation2 + $0x10] sm:$0xf] %vm186_vm5, %v4190_v63  ;;  %v977_v33 = vsel %vm4483_vm6, %v975_v10, %v976_v28  ;;  %v3657_v40 = vrot.slane %v866_v35, 9  ;;  %v994_v44 = vrot.slane %v4579_v41, 5  ;;  %v982_v50 = vrot.slane %v980_v27, 4 }
  0x61   : > { %192 = vst.msk [vmem:[#allocation2 + $0x14] sm:$0xf] %vm186_vm5, %v4190_v63  ;;  %v222_v52 = vld [vmem:[%s4278_s30] sm:$0xf]  ;;  %v3659_v53 = vrot.slane %v872_v47, 9 }
  0x62   : > { %193 = vst.msk [vmem:[#allocation2 + $0x18] sm:$0xf] %vm186_vm5, %v4190_v63  ;;  %v876_v59 = vld [vmem:[%s4278_s30 + $0x64] sm:$0xf]  ;;  %v226_v62 = vld [vmem:[%s4278_s30 + $0x18] sm:$0xf] }
  0x63   : > { %772 = vrot.lane.b32.xlu1 %v649_v1, %s4189_s4  ;;  %v697_v1 = vsel %vm4289_vm2, %v692_v56, %v696_v57  ;;  %194 = vst.msk [vmem:[#allocation2 + $0x1c] sm:$0xf] %vm186_vm5, %v4190_v63  ;;  %v996_v57 = vrot.slane %v994_v44, 4  ;;  %v225_v0 = vld [vmem:[%s4278_s30 + $0x10] sm:$0xf] }
  0x64   : > { %770 = vrot.lane.b32.xlu0 %v639_v16, %s4189_s4  ;;  %195 = vst.msk [vmem:[#allocation2 + $0x20] sm:$0xf] %vm186_vm5, %v4190_v63  ;;  %v953_v16 = vsel %vm4483_vm6, %v3652_v11, %v952_v54  ;;  %v1001_v54 = vrot.slane %v4599_v48, 5  ;;  %v869_v3 = vld [vmem:[%s4278_s30 + $0x48] sm:$0xe] }
  0x65   : > { %196 = vst.msk [vmem:[#allocation2 + $0x24] sm:$0xf] %vm186_vm5, %v4190_v63  ;;  %v877_v7 = vld [vmem:[%s4278_s30 + $0x68] sm:$0x1]  ;;  %v875_v8 = vld [vmem:[%s4278_s30 + $0x60] sm:$0xe] }
  0x66   : > { %197 = vst.msk [vmem:[#allocation2 + $0x28] sm:$0xf] %vm186_vm5, %v4190_v63  ;;  %v227_v11 = vld [vmem:[%s4278_s30 + $0x1c] sm:$0xf]  ;;  %v3658_v12 = vrot.slane %v869_v3, 9  ;;  %v1011_v14 = vrot.slane %v877_v7, 5 }
  0x67   : > { %768 = vrot.lane.b32.xlu2 %v625_v32, %s4189_s4  ;;  %198 = vst.msk [vmem:[#allocation2 + $0x2c] sm:$0xf] %vm186_vm5, %v4190_v63  ;;  %v860_v32 = vld [vmem:[%s4278_s30 + $0x24] sm:$0xe]  ;;  %v229_v19 = vld [vmem:[%s4278_s30 + $0x28] sm:$0xf] }
  0x68   : > { %199 = vst.msk [vmem:[#allocation2 + $0x30] sm:$0xf] %vm186_vm5, %v4190_v63  ;;  %v3655_v37 = vrot.slane %v860_v32, 9  ;;  %v228_v20 = vld [vmem:[%s4278_s30 + $0x24] sm:$0xf]  ;;  %v995_v22 = vsel %vm4483_vm6, %v3658_v12, %v994_v44 }
  0x69   : > { %200 = vst.msk [vmem:[#allocation2 + $0x34] sm:$0xf] %vm186_vm5, %v4190_v63  ;;  %v230_v24 = vld [vmem:[%s4278_s30 + $0x30] sm:$0xf]  ;;  %v874_v26 = vld [vmem:[%s4278_s30 + $0x5c] sm:$0x1] }
  0x6a   : > { %201 = vst.msk [vmem:[#allocation2 + $0x38] sm:$0xf] %vm186_vm5, %v4190_v63  ;;  %v974_v42 = vsel %vm4483_vm6, %v3655_v37, %v973_v21  ;;  %v881_v21 = vld [vmem:[%s4278_s30 + $0x78] sm:$0xe]  ;;  %v4659_v10 = vld [vmem:[%s4278_s30 + $0x7c] sm:$0xf] }
  0x6b   : > { %778 = vrot.lane.b32.xlu1 %v687_v34, %s4189_s4  ;;  %202 = vst.msk [vmem:[#allocation2 + $0x3c] sm:$0xf] %vm186_vm5, %v4190_v63  ;;  %v868_v34 = vld [vmem:[%s4278_s30 + $0x44] sm:$0x1]  ;;  %v880_v29 = vld [vmem:[%s4278_s30 + $0x74] sm:$0x1] }
  0x6c   : > { %776 = vrot.lane.b32.xlu0 %v673_v38, %s4189_s4  ;;  %203 = vst.msk [vmem:[#allocation2 + $0x40] sm:$0xf] %vm186_vm5, %v4190_v63  ;;  %v989_v38 = vrot.slane %v987_v31, 4  ;;  %v990_v39 = vrot.slane %v868_v34, 5  ;;  %v3662_v32 = vrot.slane %v881_v21, 9 }
  0x6d   : > { %204 = vst.msk [vmem:[#allocation2 + $0x44] sm:$0xf] %vm186_vm5, %v4190_v63  ;;  %v885_v34 = vld [vmem:[%s4278_s30 + $0x88] sm:$0xf]  ;;  %v233_v41 = vld [vmem:[%s4278_s30 + $0x40] sm:$0xf] }
  0x6e   : > { %205 = vst.msk [vmem:[#allocation2 + $0x48] sm:$0xf] %vm186_vm5, %v4190_v63  ;;  %v991_v43 = vsel %vm4483_vm6, %v989_v38, %v990_v39  ;;  %v1018_v39 = vrot.slane %v880_v29, 5  ;;  %v886_v48 = vld [vmem:[%s4278_s30 + $0x8c] sm:$0x1] }
  0x6f   : > { %774 = vrot.lane.b32.xlu2 %v663_v46, %s4189_s4  ;;  %206 = vst.msk [vmem:[#allocation2 + $0x4c] sm:$0xf] %vm186_vm5, %v4190_v63  ;;  %v988_v46 = vsel %vm4483_vm6, %v3657_v40, %v987_v31  ;;  %v1004_v31 = vrot.slane %v874_v26, 5  ;;  %v239_v3 = vld [vmem:[%s4278_s30 + $0x64] sm:$0xf] }
  0x70   : > { %207 = vst.msk [vmem:[#allocation2 + $0x50] sm:$0xf] %vm186_vm5, %v4190_v63  ;;  %v244_v26 = vld [vmem:[%s4278_s30 + $0x84] sm:$0xf] }
  0x71   : > { %208 = vst.msk [vmem:[#allocation2 + $0x54] sm:$0xf] %vm186_vm5, %v4190_v63 }
  0x72   : > { %209 = vst.msk [vmem:[#allocation2 + $0x58] sm:$0xf] %vm186_vm5, %v4190_v63 }
  0x73   : > { %784 = vrot.lane.b32.xlu1 %v721_v49, %s4189_s4  ;;  %210 = vst.msk [vmem:[#allocation2 + $0x5c] sm:$0xf] %vm186_vm5, %v4190_v63  ;;  %v871_v49 = vld [vmem:[%s4278_s30 + $0x50] sm:$0x1] }
  0x74   : > { %782 = vrot.lane.b32.xlu0 %v711_v51, %s4189_s4  ;;  %211 = vst.msk [vmem:[#allocation2 + $0x60] sm:$0xf] %vm186_vm5, %v4190_v63  ;;  %v983_v51 = vrot.slane %v865_v45, 5  ;;  %v997_v58 = vrot.slane %v871_v49, 5  ;;  %v235_v45 = vld [vmem:[%s4278_s30 + $0x4c] sm:$0xf] }
  0x75   : > { %212 = vst.msk [vmem:[#allocation2 + $0x64] sm:$0xf] %vm186_vm5, %v4190_v63  ;;  %v234_v49 = vld [vmem:[%s4278_s30 + $0x48] sm:$0xf] }
  0x76   : > { %213 = vst.msk [vmem:[#allocation2 + $0x68] sm:$0xf] %vm186_vm5, %v4190_v63  ;;  %v998_v4 = vsel %vm4483_vm6, %v996_v57, %v997_v58 }
  0x77   : > { %780 = vrot.lane.b32.xlu2 %v697_v1, %s4189_s4  ;;  %214 = vst.msk [vmem:[#allocation2 + $0x6c] sm:$0xf] %vm186_vm5, %v4190_v63  ;;  %v984_v1 = vsel %vm4483_vm6, %v982_v50, %v983_v51  ;;  %v884_v50 = vld [vmem:[%s4278_s30 + $0x84] sm:$0xe]  ;;  %v236_v51 = vld [vmem:[%s4278_s30 + $0x54] sm:$0xf] }
  0x78   : > { %215 = vst.msk [vmem:[#allocation2 + $0x70] sm:$0xf] %vm186_vm5, %v4190_v63  ;;  %v3663_v57 = vrot.slane %v884_v50, 9  ;;  %v898_v50 = vld [vmem:[%s4278_s30 + $0xbc] sm:$0x1] }
  0x79   : > { %216 = vst.msk [vmem:[#allocation2 + $0x74] sm:$0xf] %vm186_vm5, %v4190_v63 }
  0x7a   : > { %217 = vst.msk [vmem:[#allocation2 + $0x78] sm:$0xf] %vm186_vm5, %v4190_v63 }
  0x7b   : > { %1066 = vrot.lane.b32.xlu1 %v960_v2, %s4191_s5  ;;  %218 = vst.msk [vmem:[#allocation2 + $0x7c] sm:$0xf] %vm186_vm5, %v4190_v63  ;;  %v1002_v63 = vsel %vm4483_vm6, %v3659_v53, %v1001_v54  ;;  %v1008_v2 = vrot.slane %v876_v59, 5  ;;  %v4700_v59 = vld [vmem:[%s4278_s30 + $0x94] sm:$0xf] }
  0x7c   : > { %1064 = vrot.lane.b32.xlu0 %v956_v6, %s4191_s5  ;;  %255 = vst.msk [vmem:[#allocation2] sm:$0xf] %vm254_vm7, %v222_v52  ;;  %v223_v6 = vld [vmem:[%s4278_s30 + $0x4] sm:$0xf]  ;;  %v1036_v7 = vrot.slane %v4700_v59, 5 }
  0x7d   : > { %259 = vst.msk [vmem:[#allocation2 + $0x10] sm:$0xf] %vm254_vm7, %v226_v62  ;;  %v1010_v13 = vrot.slane %v1008_v2, 4  ;;  %v890_v62 = vld [vmem:[%s4278_s30 + $0x9c] sm:$0xe] }
  0x7e   : > { %258 = vst.msk [vmem:[#allocation2 + $0xc] sm:$0xf] %vm254_vm7, %v225_v0  ;;  %v4706_v0 = vld [vmem:[%s4278_s30 + $0xa0] sm:$0xf]  ;;  %v253_v59 = vld [vmem:[%s4278_s30 + $0xb8] sm:$0xf] }
  0x7f   : > { %1062 = vrot.lane.b32.xlu2 %v953_v16, %s4191_s5  ;;  %256 = vst.msk [vmem:[#allocation2 + $0x4] sm:$0xf] %vm254_vm7, %v223_v6  ;;  %v1012_v23 = vsel %vm4483_vm6, %v1010_v13, %v1011_v14  ;;  %v3665_v14 = vrot.slane %v890_v62, 9  ;;  %v252_v62 = vld [vmem:[%s4278_s30 + $0xb4] sm:$0xf] }
  0x80   : > { %260 = vst.msk [vmem:[#allocation2 + $0x14] sm:$0xf] %vm254_vm7, %v227_v11  ;;  %v889_v11 = vld [vmem:[%s4278_s30 + $0x98] sm:$0x1] }
  0x81   : > { %262 = vst.msk [vmem:[#allocation2 + $0x1c] sm:$0xf] %vm254_vm7, %v229_v19  ;;  %v1038_v19 = vrot.slane %v1036_v7, 4 }
  0x82   : > { %261 = vst.msk [vmem:[#allocation2 + $0x18] sm:$0xf] %vm254_vm7, %v228_v20  ;;  %v240_v20 = vld [vmem:[%s4278_s30 + $0x6c] sm:$0xf] }
  0x83   : > { %1072 = vrot.lane.b32.xlu1 %v970_v17, %s4191_s5  ;;  %v3660_v17 = vrot.slane %v875_v8, 9  ;;  %263 = vst.msk [vmem:[#allocation2 + $0x20] sm:$0xf] %vm254_vm7, %v230_v24  ;;  %v241_v8 = vld [vmem:[%s4278_s30 + $0x70] sm:$0xf] }
  0x84   : > { %1070 = vrot.lane.b32.xlu0 %v967_v5, %s4191_s5  ;;  %v4643_v5 = vld [vmem:[%s4278_s30 + $0x70] sm:$0xf]  ;;  %266 = vst.msk [vmem:[#allocation2 + $0x2c] sm:$0xf] %vm254_vm7, %v233_v41 }
  0x85   : > { %v1009_v27 = vsel %vm4483_vm6, %v3660_v17, %v1008_v2  ;;  %v1015_v28 = vrot.slane %v4643_v5, 5  ;;  %268 = vst.msk [vmem:[#allocation2 + $0x34] sm:$0xf] %vm254_vm7, %v235_v45  ;;  %v1039_v5 = vrot.slane %v889_v11, 5  ;;  %v246_v41 = vld [vmem:[%s4278_s30 + $0x90] sm:$0xf] }
  0x86   : > { %267 = vst.msk [vmem:[#allocation2 + $0x30] sm:$0xf] %vm254_vm7, %v234_v49  ;;  %v892_v45 = vld [vmem:[%s4278_s30 + $0xa4] sm:$0x1]  ;;  %v249_v49 = vld [vmem:[%s4278_s30 + $0xa0] sm:$0xf] }
  0x87   : > { %1068 = vrot.lane.b32.xlu2 %v963_v9, %s4191_s5  ;;  %v232_v9 = vld [vmem:[%s4278_s30 + $0x3c] sm:$0xf]  ;;  %v1017_v38 = vrot.slane %v1015_v28, 4  ;;  %269 = vst.msk [vmem:[#allocation2 + $0x38] sm:$0xf] %vm254_vm7, %v236_v51  ;;  %v1040_v29 = vsel %vm4483_vm6, %v1038_v19, %v1039_v5 }
  0x88   : > { %265 = vst.msk [vmem:[#allocation2 + $0x28] sm:$0xf] %vm254_vm7, %v232_v9  ;;  %v895_v9 = vld [vmem:[%s4278_s30 + $0xb0] sm:$0x1]  ;;  %v3670_v11 = vld [vmem:[%s4278_s30 + $0x18] sm:$0xf] }
  0x89   : > { %v731_v36 = vpop.permute.xlu2 %730  ;;  %v1019_v47 = vsel %vm4483_vm6, %v1017_v38, %v1018_v39  ;;  %272 = vst.msk [vmem:[#allocation2 + $0x44] sm:$0xf] %vm254_vm7, %v239_v3  ;;  %v247_v39 = vld [vmem:[%s4278_s30 + $0x94] sm:$0xf] }
  0x8a   : > { %823 = vst.msk [vmem:[#allocation2 + $0x10] sm:$0xf] %vm818_vm8, %v731_v36  ;;  %v231_v36 = vld [vmem:[%s4278_s30 + $0x34] sm:$0xf] }
  0x8b   : > { %1078 = vrot.lane.b32.xlu1 %v981_v30, %s4191_s5  ;;  %v1003_v30 = vrot.slane %v1001_v54, 4  ;;  %264 = vst.msk [vmem:[#allocation2 + $0x24] sm:$0xf] %vm254_vm7, %v231_v36  ;;  %v1032_v54 = vrot.slane %v886_v48, 5 }
  0x8c   : > { %1076 = vrot.lane.b32.xlu0 %v977_v33, %s4191_s5  ;;  %v1022_v33 = vrot.slane %v4659_v10, 5  ;;  %274 = vst.msk [vmem:[#allocation2 + $0x4c] sm:$0xf] %vm254_vm7, %v241_v8  ;;  %v243_v10 = vld [vmem:[%s4278_s30 + $0x7c] sm:$0xf] }
  0x8d   : > { %273 = vst.msk [vmem:[#allocation2 + $0x48] sm:$0xf] %vm254_vm7, %v240_v20  ;;  %v3671_v8 = vld [vmem:[%s4278_s30 + $0x1c] sm:$0xf]  ;;  %v3672_v20 = vld [vmem:[%s4278_s30 + $0x24] sm:$0xf] }
  0x8e   : > { %v1023_v44 = vsel %vm4483_vm6, %v3662_v32, %v1022_v33  ;;  %v1024_v12 = vrot.slane %v1022_v33, 4  ;;  %277 = vst.msk [vmem:[#allocation2 + $0x58] sm:$0xf] %vm254_vm7, %v244_v26 }
  0x8f   : > { %1074 = vrot.lane.b32.xlu2 %v974_v42, %s4191_s5  ;;  %v1029_v42 = vrot.slane %v885_v34, 5  ;;  %276 = vst.msk [vmem:[#allocation2 + $0x54] sm:$0xf] %vm254_vm7, %v243_v10  ;;  %v1053_v34 = vrot.slane %v895_v9, 5  ;;  %v3680_v10 = vld [vmem:[%s4278_s30 + $0x54] sm:$0xf] }
  0x90   : > { %280 = vst.msk [vmem:[#allocation2 + $0x64] sm:$0xf] %vm254_vm7, %v247_v39  ;;  %v3686_v39 = vld [vmem:[%s4278_s30 + $0x78] sm:$0xf] }
  0x91   : > { %v733_v55 = vpop.permute.xlu2 %732  ;;  %v1031_v53 = vrot.slane %v1029_v42, 4  ;;  %v1030_v6 = vsel %vm4483_vm6, %v3663_v57, %v1029_v42  ;;  %279 = vst.msk [vmem:[#allocation2 + $0x60] sm:$0xf] %vm254_vm7, %v246_v41  ;;  %v251_v57 = vld [vmem:[%s4278_s30 + $0xac] sm:$0xf] }
  0x92   : > { %824 = vst.msk [vmem:[#allocation2 + $0x14] sm:$0xf] %vm818_vm8, %v733_v55 }
  0x93   : > { %1084 = vrot.lane.b32.xlu1 %v991_v43, %s4191_s5  ;;  %v1005_v43 = vsel %vm4483_vm6, %v1003_v30, %v1004_v31  ;;  %v1033_v2 = vsel %vm4483_vm6, %v1031_v53, %v1032_v54  ;;  %v245_v30 = vld [vmem:[%s4278_s30 + $0x88] sm:$0xf]  ;;  %282 = vst.msk [vmem:[#allocation2 + $0x6c] sm:$0xf] %vm254_vm7, %v249_v49  ;;  %v3687_v49 = vld [vmem:[%s4278_s30 + $0x7c] sm:$0xf] }
  0x94   : > { %1082 = vrot.lane.b32.xlu0 %v988_v46, %s4191_s5  ;;  %v878_v46 = vld [vmem:[%s4278_s30 + $0x6c] sm:$0xe]  ;;  %v893_v31 = vld [vmem:[%s4278_s30 + $0xa8] sm:$0xe]  ;;  %278 = vst.msk [vmem:[#allocation2 + $0x5c] sm:$0xf] %vm254_vm7, %v245_v30 }
  0x95   : > { %v727_v56 = vpop.permute.xlu1 %726  ;;  %v3661_v52 = vrot.slane %v878_v46, 9  ;;  %v3666_v38 = vrot.slane %v893_v31, 9  ;;  %v250_v46 = vld [vmem:[%s4278_s30 + $0xa8] sm:$0xf]  ;;  %284 = vst.msk [vmem:[#allocation2 + $0x74] sm:$0xf] %vm254_vm7, %v251_v57 }
  0x96   : > { %821 = vst.msk [vmem:[#allocation2 + $0x8] sm:$0xf] %vm818_vm8, %v727_v56  ;;  %v723_v60 = vpop.permute.xlu0 %722  ;;  %v3678_v31 = vld [vmem:[%s4278_s30 + $0x48] sm:$0xf] }
  0x97   : > { %819 = vst.msk [vmem:[#allocation2] sm:$0xf] %vm818_vm8, %v723_v60  ;;  %1080 = vrot.lane.b32.xlu2 %v984_v1, %s4191_s5  ;;  %v238_v60 = vld [vmem:[%s4278_s30 + $0x60] sm:$0xf]  ;;  %v237_v1 = vld [vmem:[%s4278_s30 + $0x58] sm:$0xf] }
  0x98   : > { %271 = vst.msk [vmem:[#allocation2 + $0x40] sm:$0xf] %vm254_vm7, %v238_v60 }
  0x99   : > { %v739_v15 = vpop.permute.xlu2 %738  ;;  %270 = vst.msk [vmem:[#allocation2 + $0x3c] sm:$0xf] %vm254_vm7, %v237_v1  ;;  %v896_v1 = vld [vmem:[%s4278_s30 + $0xb4] sm:$0xe] }
  0x9a   : > { %827 = vst.msk [vmem:[#allocation2 + $0x20] sm:$0xf] %vm818_vm8, %v739_v15  ;;  %v1043_v15 = vrot.slane %v4706_v0, 5  ;;  %v3668_v0 = vld [vmem:[%s4278_s30 + $0xc] sm:$0xf] }
  0x9b   : > { %1090 = vrot.lane.b32.xlu1 %v1002_v63, %s4191_s5  ;;  %v1016_v63 = vsel %vm4483_vm6, %v3661_v52, %v1015_v28  ;;  %v887_v28 = vld [vmem:[%s4278_s30 + $0x90] sm:$0xe]  ;;  %v1046_v52 = vrot.slane %v892_v45, 5  ;;  %283 = vst.msk [vmem:[#allocation2 + $0x70] sm:$0xf] %vm254_vm7, %v250_v46 }
  0x9c   : > { %1088 = vrot.lane.b32.xlu0 %v998_v4, %s4191_s5  ;;  %v883_v4 = vld [vmem:[%s4278_s30 + $0x80] sm:$0x1]  ;;  %v3664_v32 = vrot.slane %v887_v28, 9  ;;  %v1045_v51 = vrot.slane %v1043_v15, 4  ;;  %286 = vst.msk [vmem:[#allocation2 + $0x7c] sm:$0xf] %vm254_vm7, %v253_v59 }
  0x9d   : > { %v729_v16 = vpop.permute.xlu1 %728  ;;  %v1025_v13 = vrot.slane %v883_v4, 5  ;;  %285 = vst.msk [vmem:[#allocation2 + $0x78] sm:$0xf] %vm254_vm7, %v252_v62  ;;  %v3679_v28 = vld [vmem:[%s4278_s30 + $0x4c] sm:$0xf] }
  0x9e   : > { %822 = vst.msk [vmem:[#allocation2 + $0xc] sm:$0xf] %vm818_vm8, %v729_v16  ;;  %v725_v18 = vpop.permute.xlu0 %724  ;;  %v894_v16 = vld [vmem:[%s4278_s30 + $0xac] sm:$0xf]  ;;  %v1037_v42 = vsel %vm4483_vm6, %v3664_v32, %v1036_v7  ;;  %v1047_v60 = vsel %vm4483_vm6, %v1045_v51, %v1046_v52  ;;  %v3683_v32 = vld [vmem:[%s4278_s30 + $0x64] sm:$0xf] }
  0x9f   : > { %820 = vst.msk [vmem:[#allocation2 + $0x4] sm:$0xf] %vm818_vm8, %v725_v18  ;;  %1086 = vrot.lane.b32.xlu2 %v995_v22, %s4191_s5  ;;  %v242_v22 = vld [vmem:[%s4278_s30 + $0x78] sm:$0xf]  ;;  %v1026_v24 = vsel %vm4483_vm6, %v1024_v12, %v1025_v13  ;;  %v3688_v45 = vld [vmem:[%s4278_s30 + $0x84] sm:$0xf] }
  0xa0   : > { %275 = vst.msk [vmem:[#allocation2 + $0x50] sm:$0xf] %vm254_vm7, %v242_v22  ;;  %v3676_v22 = vld [vmem:[%s4278_s30 + $0x3c] sm:$0xf]  ;;  %v3691_v51 = vld [vmem:[%s4278_s30 + $0x94] sm:$0xf] }
  0xa1   : > { %v745_v35 = vpop.permute.xlu2 %744  ;;  %v3701_v52 = vld [vmem:[%s4278_s30 + $0x10] sm:$0xf] }
  0xa2   : > { %830 = vst.msk [vmem:[#allocation2 + $0x2c] sm:$0xf] %vm818_vm8, %v745_v35  ;;  %v1446_v57 = vshll.u32 %v3701_v52, 16  ;;  %v3690_v59 = vld [vmem:[%s4278_s30 + $0x90] sm:$0xf] }
  0xa3   : > { %1096 = vrot.lane.b32.xlu1 %v1012_v23, %s4191_s5  ;;  %v1050_v23 = vrot.slane %v894_v16, 5  ;;  %v3674_v16 = vld [vmem:[%s4278_s30 + $0x30] sm:$0xf] }
  0xa4   : > { %1094 = vrot.lane.b32.xlu0 %v1009_v27, %s4191_s5  ;;  %v1044_v27 = vsel %vm4483_vm6, %v3665_v14, %v1043_v15  ;;  %v3669_v15 = vld [vmem:[%s4278_s30 + $0x10] sm:$0xf] }
  0xa5   : > { %v737_v37 = vpop.permute.xlu1 %736  ;;  %v1052_v33 = vrot.slane %v1050_v23, 4 }
  0xa6   : > { %826 = vst.msk [vmem:[#allocation2 + $0x1c] sm:$0xf] %vm818_vm8, %v737_v37  ;;  %v735_v40 = vpop.permute.xlu0 %734 }
  0xa7   : > { %825 = vst.msk [vmem:[#allocation2 + $0x18] sm:$0xf] %vm818_vm8, %v735_v40  ;;  %1092 = vrot.lane.b32.xlu2 %v1005_v43, %s4191_s5  ;;  %v897_v40 = vld [vmem:[%s4278_s30 + $0xb8] sm:$0xf]  ;;  %v248_v43 = vld [vmem:[%s4278_s30 + $0x9c] sm:$0xf] }
  0xa8   : > { %v1057_v48 = vrot.slane %v897_v40, 5  ;;  %281 = vst.msk [vmem:[#allocation2 + $0x68] sm:$0xf] %vm254_vm7, %v248_v43  ;;  %v3684_v43 = vld [vmem:[%s4278_s30 + $0x6c] sm:$0xf] }
  0xa9   : > { %v751_v55 = vpop.permute.xlu2 %750 }
  0xaa   : > { %833 = vst.msk [vmem:[#allocation2 + $0x38] sm:$0xf] %vm818_vm8, %v751_v55  ;;  %v1059_v55 = vrot.slane %v1057_v48, 4 }
  0xab   : > { %1102 = vrot.lane.b32.xlu1 %v1023_v44, %s4191_s5  ;;  %v1054_v44 = vsel %vm4483_vm6, %v1052_v33, %v1053_v34  ;;  %v3682_v33 = vld [vmem:[%s4278_s30 + $0x60] sm:$0xf] }
  0xac   : > { %1100 = vrot.lane.b32.xlu0 %v1019_v47, %s4191_s5  ;;  %v1051_v47 = vsel %vm4483_vm6, %v3666_v38, %v1050_v23  ;;  %v3681_v38 = vld [vmem:[%s4278_s30 + $0x58] sm:$0xf] }
  0xad   : > { %v743_v56 = vpop.permute.xlu1 %742 }
  0xae   : > { %829 = vst.msk [vmem:[#allocation2 + $0x28] sm:$0xf] %vm818_vm8, %v743_v56  ;;  %v741_v58 = vpop.permute.xlu0 %740  ;;  %v1060_v56 = vrot.slane %v898_v50, 5  ;;  %v3692_v50 = vld [vmem:[%s4278_s30 + $0x9c] sm:$0xf] }
  0xaf   : > { %828 = vst.msk [vmem:[#allocation2 + $0x24] sm:$0xf] %vm818_vm8, %v741_v58  ;;  %1098 = vrot.lane.b32.xlu2 %v1016_v63, %s4191_s5 }
  0xb0   : > { %v1061_v63 = vsel %vm4483_vm6, %v1059_v55, %v1060_v56 }
  0xb1   : > { %v757_v17 = vpop.permute.xlu2 %756 }
  0xb2   : > { %836 = vst.msk [vmem:[#allocation2 + $0x44] sm:$0xf] %vm818_vm8, %v757_v17  ;;  %v3673_v17 = vld [vmem:[%s4278_s30 + $0x28] sm:$0xf] }
  0xb3   : > { %1108 = vrot.lane.b32.xlu1 %v1033_v2, %s4191_s5  ;;  %v3667_v2 = vrot.slane %v896_v1, 9  ;;  %v3694_v1 = vld [vmem:[%s4278_s30 + $0xa8] sm:$0xf] }
  0xb4   : > { %1106 = vrot.lane.b32.xlu0 %v1030_v6, %s4191_s5 }
  0xb5   : > { %v749_v18 = vpop.permute.xlu1 %748  ;;  %v1058_v7 = vsel %vm4483_vm6, %v3667_v2, %v1057_v48 }
  0xb6   : > { %832 = vst.msk [vmem:[#allocation2 + $0x34] sm:$0xf] %vm818_vm8, %v749_v18  ;;  %v747_v21 = vpop.permute.xlu0 %746 }
  0xb7   : > { %831 = vst.msk [vmem:[#allocation2 + $0x30] sm:$0xf] %vm818_vm8, %v747_v21  ;;  %1104 = vrot.lane.b32.xlu2 %v1026_v24, %s4191_s5  ;;  %v3677_v21 = vld [vmem:[%s4278_s30 + $0x40] sm:$0xf] }
  0xb9   : > { %v763_v35 = vpop.permute.xlu2 %762 }
  0xba   : > { %839 = vst.msk [vmem:[#allocation2 + $0x50] sm:$0xf] %vm818_vm8, %v763_v35 }
  0xbb   : > { %1114 = vrot.lane.b32.xlu1 %v1044_v27, %s4191_s5  ;;  %v3675_v27 = vld [vmem:[%s4278_s30 + $0x34] sm:$0xf] }
  0xbc   : > { %1112 = vrot.lane.b32.xlu0 %v1040_v29, %s4191_s5 }
  0xbd   : > { %v755_v37 = vpop.permute.xlu1 %754 }
  0xbe   : > { %835 = vst.msk [vmem:[#allocation2 + $0x40] sm:$0xf] %vm818_vm8, %v755_v37  ;;  %v753_v36 = vpop.permute.xlu0 %752 }
  0xbf   : > { %834 = vst.msk [vmem:[#allocation2 + $0x3c] sm:$0xf] %vm818_vm8, %v753_v36  ;;  %1110 = vrot.lane.b32.xlu2 %v1037_v42, %s4191_s5  ;;  %v3685_v36 = vld [vmem:[%s4278_s30 + $0x70] sm:$0xf] }
  0xc1   : > { %v769_v53 = vpop.permute.xlu2 %768 }
  0xc2   : > { %842 = vst.msk [vmem:[#allocation2 + $0x5c] sm:$0xf] %vm818_vm8, %v769_v53 }
  0xc3   : > { %1120 = vrot.lane.b32.xlu1 %v1054_v44, %s4191_s5  ;;  %v3689_v44 = vld [vmem:[%s4278_s30 + $0x88] sm:$0xf] }
  0xc4   : > { %1118 = vrot.lane.b32.xlu0 %v1051_v47, %s4191_s5 }
  0xc5   : > { %v761_v54 = vpop.permute.xlu1 %760 }
  0xc6   : > { %838 = vst.msk [vmem:[#allocation2 + $0x4c] sm:$0xf] %vm818_vm8, %v761_v54  ;;  %v759_v58 = vpop.permute.xlu0 %758  ;;  %v3700_v54 = vld [vmem:[%s4278_s30 + $0xc] sm:$0xf] }
  0xc7   : > { %837 = vst.msk [vmem:[#allocation2 + $0x48] sm:$0xf] %vm818_vm8, %v759_v58  ;;  %1116 = vrot.lane.b32.xlu2 %v1047_v60, %s4191_s5  ;;  %v1450_v58 = vshrl.u32 %v3701_v52, 16  ;;  %v1437_v60 = vshrl.u32 %v3700_v54, 16  ;;  %v1440_v62 = vshll.u32 %v3700_v54, 16 }
  0xc9   : > { %v775_v3 = vpop.permute.xlu2 %774  ;;  %v1452_v2 = vrot.slane %v1450_v58, 4 }
  0xca   : > { %845 = vst.msk [vmem:[#allocation2 + $0x68] sm:$0xf] %vm818_vm8, %v775_v3  ;;  %v1439_v3 = vrot.slane %v1437_v60, 4 }
  0xcb   : > { %1259 = vrot.lane.b32.xlu1 %v3668_v0, %s4192_s6  ;;  %v3695_v0 = vld [vmem:[%s4278_s30 + $0xac] sm:$0xf] }
  0xcc   : > { %1124 = vrot.lane.b32.xlu0 %v1061_v63, %s4191_s5  ;;  %v4881_v63 = vrot.slane %v1446_v57, 5 }
  0xcd   : > { %v767_v4 = vpop.permute.xlu1 %766 }
  0xce   : > { %841 = vst.msk [vmem:[#allocation2 + $0x58] sm:$0xf] %vm818_vm8, %v767_v4  ;;  %v765_v6 = vpop.permute.xlu0 %764  ;;  %v1442_v4 = vrot.slane %v1440_v62, 5 }
  0xcf   : > { %840 = vst.msk [vmem:[#allocation2 + $0x54] sm:$0xf] %vm818_vm8, %v765_v6  ;;  %1122 = vrot.lane.b32.xlu2 %v1058_v7, %s4191_s5  ;;  %v3702_v6 = vld [vmem:[%s4278_s30 + $0x14] sm:$0x1]  ;;  %s3560_s5 = scalar_lea.hbm %s5882_s3, %s4041_s28 }
  0xd1   : > { %v781_v12 = vpop.permute.xlu2 %780 }
  0xd2   : > { %848 = vst.msk [vmem:[#allocation2 + $0x74] sm:$0xf] %vm818_vm8, %v781_v12 }
  0xd3   : > { %1265 = vrot.lane.b32.xlu1 %v3671_v8, %s4192_s6 }
  0xd4   : > { %1263 = vrot.lane.b32.xlu0 %v3670_v11, %s4192_s6  ;;  %v3706_v11 = vld [vmem:[%s4278_s30 + $0x24] sm:$0xf] }
  0xd5   : > { %v773_v13 = vpop.permute.xlu1 %772 }
  0xd6   : > { %844 = vst.msk [vmem:[#allocation2 + $0x64] sm:$0xf] %vm818_vm8, %v773_v13  ;;  %v771_v14 = vpop.permute.xlu0 %770  ;;  %v3704_v13 = vld [vmem:[%s4278_s30 + $0x1c] sm:$0xf] }
  0xd7   : > { %843 = vst.msk [vmem:[#allocation2 + $0x60] sm:$0xf] %vm818_vm8, %v771_v14  ;;  %1261 = vrot.lane.b32.xlu2 %v3669_v15, %s4192_s6  ;;  %v1453_v14 = vor.u32 %v1452_v2, %v4881_v63  ;;  %v1456_v15 = vshll.u32 %v3702_v6, 16 }
  0xd9   : > { %v1063_v18 = vpop.permute.xlu2 %1062 }
  0xda   : > { %1159 = vst.msk [vmem:[#allocation2] sm:$0xf] %vm1158_vm9, %v1063_v18  ;;  %v3698_v18 = vld [vmem:[%s4278_s30 + $0xc0] sm:$0xf] }
  0xdb   : > { %1271 = vrot.lane.b32.xlu1 %v3674_v16, %s4192_s6  ;;  %v1443_v16 = vor.u32 %v1442_v4, %v1439_v3 }
  0xdc   : > { %1269 = vrot.lane.b32.xlu0 %v3673_v17, %s4192_s6  ;;  %v3693_v17 = vld [vmem:[%s4278_s30 + $0xa0] sm:$0xf] }
  0xdd   : > { %v779_v19 = vpop.permute.xlu1 %778 }
  0xde   : > { %847 = vst.msk [vmem:[#allocation2 + $0x70] sm:$0xf] %vm818_vm8, %v779_v19  ;;  %v777_v5 = vpop.permute.xlu0 %776  ;;  %v1485_v19 = vshrl.u32 %v3706_v11, 16 }
  0xdf   : > { %846 = vst.msk [vmem:[#allocation2 + $0x6c] sm:$0xf] %vm818_vm8, %v777_v5  ;;  %1267 = vrot.lane.b32.xlu2 %v3672_v20, %s4192_s6  ;;  %v1488_v5 = vshll.u32 %v3706_v11, 16  ;;  %v3697_v20 = vld [vmem:[%s4278_s30 + $0xb8] sm:$0xf] }
  0xe0   : > { %v3699_v11 = vld [vmem:[%s4278_s30 + $0xc4] sm:$0xf] }
  0xe1   : > { %v1069_v23 = vpop.permute.xlu2 %1068 }
  0xe2   : > { %1162 = vst.msk [vmem:[#allocation2 + $0xc] sm:$0xf] %vm1158_vm9, %v1069_v23  ;;  %v1454_v23 = vrot.slane %v1453_v14, 4 }
  0xe3   : > { %1277 = vrot.lane.b32.xlu1 %v3677_v21, %s4192_s6  ;;  %v1470_v21 = vshll.u32 %v3704_v13, 16 }
  0xe4   : > { %1275 = vrot.lane.b32.xlu0 %v3676_v22, %s4192_s6  ;;  %v1474_v22 = vshrl.u32 %v3704_v13, 16 }
  0xe5   : > { %v785_v24 = vpop.permute.xlu1 %784 }
  0xe6   : > { %850 = vst.msk [vmem:[#allocation2 + $0x7c] sm:$0xf] %vm818_vm8, %v785_v24  ;;  %v783_v26 = vpop.permute.xlu0 %782  ;;  %v1458_v24 = vrot.slane %v1456_v15, 5 }
  0xe7   : > { %849 = vst.msk [vmem:[#allocation2 + $0x78] sm:$0xf] %vm818_vm8, %v783_v26  ;;  %1273 = vrot.lane.b32.xlu2 %v3675_v27, %s4192_s6  ;;  %v1444_v26 = vrot.slane %v1443_v16, 4  ;;  %v3710_v27 = vld [vmem:[%s4278_s30 + $0x34] sm:$0xf] }
  0xe9   : > { %v1075_v29 = vpop.permute.xlu2 %1074 }
  0xea   : > { %1165 = vst.msk [vmem:[#allocation2 + $0x18] sm:$0xf] %vm1158_vm9, %v1075_v29  ;;  %v1490_v29 = vrot.slane %v1488_v5, 5 }
  0xeb   : > { %1283 = vrot.lane.b32.xlu1 %v3680_v10, %s4192_s6  ;;  %v4899_v10 = vld [vmem:[%s4278_s30 + $0x28] sm:$0xf] }
  0xec   : > { %1281 = vrot.lane.b32.xlu0 %v3679_v28, %s4192_s6  ;;  %v1487_v28 = vrot.slane %v1485_v19, 4 }
  0xed   : > { %v1067_v9 = vpop.permute.xlu1 %1066 }
  0xee   : > { %1161 = vst.msk [vmem:[#allocation2 + $0x8] sm:$0xf] %vm1158_vm9, %v1067_v9  ;;  %v1065_v30 = vpop.permute.xlu0 %1064 }
  0xef   : > { %1160 = vst.msk [vmem:[#allocation2 + $0x4] sm:$0xf] %vm1158_vm9, %v1065_v30  ;;  %1279 = vrot.lane.b32.xlu2 %v3678_v31, %s4192_s6  ;;  %v3703_v30 = vld [vmem:[%s4278_s30 + $0x18] sm:$0xf] }
  0xf1   : > { %v1081_v34 = vpop.permute.xlu2 %1080 }
  0xf2   : > { %1168 = vst.msk [vmem:[#allocation2 + $0x24] sm:$0xf] %vm1158_vm9, %v1081_v34  ;;  %v1476_v34 = vrot.slane %v1474_v22, 4 }
  0xf3   : > { %1289 = vrot.lane.b32.xlu1 %v3683_v32, %s4192_s6  ;;  %v3705_v32 = vld [vmem:[%s4278_s30 + $0x20] sm:$0x1] }
  0xf4   : > { %1287 = vrot.lane.b32.xlu0 %v3682_v33, %s4192_s6  ;;  %v4903_v33 = vrot.slane %v1470_v21, 5  ;;  %v3719_v21 = vld [vmem:[%s4278_s30 + $0x58] sm:$0xf] }
  0xf5   : > { %v1073_v35 = vpop.permute.xlu1 %1072 }
  0xf6   : > { %1164 = vst.msk [vmem:[#allocation2 + $0x14] sm:$0xf] %vm1158_vm9, %v1073_v35  ;;  %v1071_v37 = vpop.permute.xlu0 %1070 }
  0xf7   : > { %1163 = vst.msk [vmem:[#allocation2 + $0x10] sm:$0xf] %vm1158_vm9, %v1071_v37  ;;  %1285 = vrot.lane.b32.xlu2 %v3681_v38, %s4192_s6  ;;  %v1518_v37 = vshll.u32 %v3710_v27, 16  ;;  %v1522_v38 = vshrl.u32 %v3710_v27, 16  ;;  %v4945_v27 = vld [vmem:[%s4278_s30 + $0x4c] sm:$0xf] }
  0xf9   : > { %v1087_v40 = vpop.permute.xlu2 %1086  ;;  %v1524_v52 = vrot.slane %v1522_v38, 4 }
  0xfa   : > { %1171 = vst.msk [vmem:[#allocation2 + $0x30] sm:$0xf] %vm1158_vm9, %v1087_v40  ;;  %v1461_v40 = vshrl.u32 %v3703_v30, 16 }
  0xfb   : > { %1295 = vrot.lane.b32.xlu1 %v3686_v39, %s4192_s6  ;;  %v3709_v39 = vld [vmem:[%s4278_s30 + $0x30] sm:$0xf] }
  0xfc   : > { %1293 = vrot.lane.b32.xlu0 %v3685_v36, %s4192_s6  ;;  %v3696_v36 = vld [vmem:[%s4278_s30 + $0xb4] sm:$0xf]  ;;  %v1463_v54 = vrot.slane %v1461_v40, 4 }
  0xfd   : > { %v1079_v41 = vpop.permute.xlu1 %1078 }
  0xfe   : > { %1167 = vst.msk [vmem:[#allocation2 + $0x20] sm:$0xf] %vm1158_vm9, %v1079_v41  ;;  %v1077_v42 = vpop.permute.xlu0 %1076  ;;  %v1464_v41 = vshll.u32 %v3703_v30, 16 }
  0xff   : > { %1166 = vst.msk [vmem:[#allocation2 + $0x1c] sm:$0xf] %vm1158_vm9, %v1077_v42  ;;  %1291 = vrot.lane.b32.xlu2 %v3684_v43, %s4192_s6  ;;  %v1459_v42 = vsel %vm4289_vm2, %v1454_v23, %v1458_v24  ;;  %v1491_v43 = vor.u32 %v1490_v29, %v1487_v28  ;;  %v3718_v23 = vld [vmem:[%s4278_s30 + $0x54] sm:$0xf]  ;;  %v3708_v29 = vld [vmem:[%s4278_s30 + $0x2c] sm:$0x1] }
 0x100   : > { %v1581_v38 = vshrl.u32 %v3718_v23, 16 }
 0x101   : > { %v1093_v46 = vpop.permute.xlu2 %1092 }
 0x102   : > { %1174 = vst.msk [vmem:[#allocation2 + $0x3c] sm:$0xf] %vm1158_vm9, %v1093_v46  ;;  %v1449_v46 = vsel %vm4289_vm2, %v1444_v26, %v4881_v63  ;;  %v3712_v26 = vld [vmem:[%s4278_s30 + $0x3c] sm:$0xf] }
 0x103   : > { %1301 = vrot.lane.b32.xlu1 %v3689_v44, %s4192_s6  ;;  %v1494_v44 = vshll.u32 %v4899_v10, 16 }
 0x104   : > { %1299 = vrot.lane.b32.xlu0 %v3688_v45, %s4192_s6  ;;  %v1480_v45 = vshll.u32 %v3705_v32, 16 }
 0x105   : > { %v1085_v47 = vpop.permute.xlu1 %1084  ;;  %v4924_v57 = vrot.slane %v1494_v44, 5 }
 0x106   : > { %1170 = vst.msk [vmem:[#allocation2 + $0x2c] sm:$0xf] %vm1158_vm9, %v1085_v47  ;;  %v1083_v48 = vpop.permute.xlu0 %1082  ;;  %v1477_v47 = vor.u32 %v1476_v34, %v4903_v33  ;;  %v1482_v58 = vrot.slane %v1480_v45, 5  ;;  %v1590_v34 = vshll.u32 %v3719_v21, 16 }
 0x107   : > { %1169 = vst.msk [vmem:[#allocation2 + $0x28] sm:$0xf] %vm1158_vm9, %v1083_v48  ;;  %1297 = vrot.lane.b32.xlu2 %v3687_v49, %s4192_s6  ;;  %v1509_v48 = vshrl.u32 %v3709_v39, 16  ;;  %v1512_v49 = vshll.u32 %v3709_v39, 16  ;;  %v1533_v39 = vshrl.u32 %v3712_v26, 16 }
 0x108   : > { %v1478_v62 = vrot.slane %v1477_v47, 4 }
 0x109   : > { %v1099_v53 = vpop.permute.xlu2 %1098  ;;  %v1514_v63 = vrot.slane %v1512_v49, 5 }
 0x10a   : > { %1177 = vst.msk [vmem:[#allocation2 + $0x48] sm:$0xf] %vm1158_vm9, %v1099_v53  ;;  %v3715_v53 = vld [vmem:[%s4278_s30 + $0x48] sm:$0xf]  ;;  %v1483_v14 = vsel %vm4289_vm2, %v1478_v62, %v1482_v58  ;;  %v3724_v62 = vld [vmem:[%s4278_s30 + $0x6c] sm:$0xf] }
 0x10b   : > { %1307 = vrot.lane.b32.xlu1 %v3692_v50, %s4192_s6  ;;  %v3711_v50 = vld [vmem:[%s4278_s30 + $0x38] sm:$0x1]  ;;  %v1557_v4 = vshrl.u32 %v3715_v53, 16  ;;  %v1560_v6 = vshll.u32 %v3715_v53, 16 }
 0x10c   : > { %1305 = vrot.lane.b32.xlu0 %v3691_v51, %s4192_s6  ;;  %v4919_v51 = vrot.slane %v1518_v37, 5  ;;  %v1594_v37 = vshrl.u32 %v3719_v21, 16 }
 0x10d   : > { %v1091_v55 = vpop.permute.xlu1 %1090  ;;  %v1559_v5 = vrot.slane %v1557_v4, 4 }
 0x10e   : > { %1173 = vst.msk [vmem:[#allocation2 + $0x38] sm:$0xf] %vm1158_vm9, %v1091_v55  ;;  %v1089_v56 = vpop.permute.xlu0 %1088  ;;  %v1466_v55 = vrot.slane %v1464_v41, 5  ;;  %v1525_v3 = vor.u32 %v1524_v52, %v4919_v51  ;;  %v1584_v41 = vshll.u32 %v3718_v23, 16  ;;  %v1535_v52 = vrot.slane %v1533_v39, 4 }
 0x10f   : > { %1172 = vst.msk [vmem:[#allocation2 + $0x34] sm:$0xf] %vm1158_vm9, %v1089_v56  ;;  %1303 = vrot.lane.b32.xlu2 %v3690_v59, %s4192_s6  ;;  %v1492_v56 = vrot.slane %v1491_v43, 4  ;;  %v1504_v43 = vshll.u32 %v3708_v29, 16  ;;  %v3721_v29 = vld [vmem:[%s4278_s30 + $0x60] sm:$0xf] }
 0x111   : > { %v1105_v7 = vpop.permute.xlu2 %1104  ;;  %v1497_v13 = vsel %vm4289_vm2, %v1492_v56, %v4924_v57  ;;  %v1586_v56 = vrot.slane %v1584_v41, 5 }
 0x112   : > { %1180 = vst.msk [vmem:[#allocation2 + $0x54] sm:$0xf] %vm1158_vm9, %v1105_v7  ;;  %v3713_v7 = vld [vmem:[%s4278_s30 + $0x40] sm:$0xf] }
 0x113   : > { %1313 = vrot.lane.b32.xlu1 %v3695_v0, %s4192_s6  ;;  %v1528_v0 = vshll.u32 %v3711_v50, 16  ;;  %v1542_v16 = vshll.u32 %v3713_v7, 16  ;;  %v1596_v50 = vrot.slane %v1594_v37, 4 }
 0x114   : > { %1311 = vrot.lane.b32.xlu0 %v3694_v1, %s4192_s6  ;;  %v1511_v1 = vrot.slane %v1509_v48, 4 }
 0x115   : > { %v1097_v8 = vpop.permute.xlu1 %1096  ;;  %v1530_v19 = vrot.slane %v1528_v0, 5 }
 0x116   : > { %1176 = vst.msk [vmem:[#allocation2 + $0x44] sm:$0xf] %vm1158_vm9, %v1097_v8  ;;  %v1095_v12 = vpop.permute.xlu0 %1094  ;;  %v1498_v8 = vshrl.u32 %v4899_v10, 16  ;;  %v1515_v15 = vor.u32 %v1514_v63, %v1511_v1  ;;  %v3714_v10 = vld [vmem:[%s4278_s30 + $0x44] sm:$0x1] }
 0x117   : > { %1175 = vst.msk [vmem:[#allocation2 + $0x40] sm:$0xf] %vm1158_vm9, %v1095_v12  ;;  %1309 = vrot.lane.b32.xlu2 %v3693_v17, %s4192_s6  ;;  %v1467_v12 = vor.u32 %v1466_v55, %v1463_v54  ;;  %v1546_v17 = vshrl.u32 %v3713_v7, 16  ;;  %v1552_v49 = vshll.u32 %v3714_v10, 16  ;;  %v3720_v54 = vld [vmem:[%s4278_s30 + $0x5c] sm:$0x1] }
 0x118   : > { %v1500_v24 = vrot.slane %v1498_v8, 4  ;;  %v1516_v30 = vrot.slane %v1515_v15, 4  ;;  %v1583_v55 = vrot.slane %v1581_v38, 4  ;;  %v3722_v7 = vld [vmem:[%s4278_s30 + $0x64] sm:$0xf] }
 0x119   : > { %v1111_v9 = vpop.permute.xlu2 %1110  ;;  %v1468_v22 = vrot.slane %v1467_v12, 4  ;;  %v1548_v32 = vrot.slane %v1546_v17, 4  ;;  %v1554_v63 = vrot.slane %v1552_v49, 5  ;;  %v1614_v17 = vshll.u32 %v3722_v7, 16 }
 0x11a   : > { %1183 = vst.msk [vmem:[#allocation2 + $0x60] sm:$0xf] %vm1158_vm9, %v1111_v9  ;;  %v1521_v47 = vsel %vm4289_vm2, %v1516_v30, %v4919_v51  ;;  %v1506_v51 = vrot.slane %v1504_v43, 5  ;;  %v3723_v30 = vld [vmem:[%s4278_s30 + $0x68] sm:$0x1]  ;;  %v1608_v43 = vshll.u32 %v3721_v29, 16 }
 0x11b   : > { %1319 = vrot.lane.b32.xlu1 %v3698_v18, %s4192_s6  ;;  %v1526_v18 = vrot.slane %v1525_v3, 4  ;;  %v1473_v40 = vsel %vm4289_vm2, %v1468_v22, %v4903_v33  ;;  %v4966_v33 = vrot.slane %v1590_v34, 5  ;;  %v1570_v3 = vshrl.u32 %v4945_v27, 16 }
 0x11c   : > { %1317 = vrot.lane.b32.xlu0 %v3697_v20, %s4192_s6  ;;  %v1562_v20 = vrot.slane %v1560_v6, 5  ;;  %v1600_v6 = vshll.u32 %v3720_v54, 16 }
 0x11d   : > { %v1103_v31 = vpop.permute.xlu1 %1102  ;;  %v1531_v44 = vsel %vm4289_vm2, %v1526_v18, %v1530_v19  ;;  %v1597_v4 = vor.u32 %v1596_v50, %v4966_v33  ;;  %v1618_v18 = vshrl.u32 %v3722_v7, 16 }
 0x11e   : > { %1179 = vst.msk [vmem:[#allocation2 + $0x50] sm:$0xf] %vm1158_vm9, %v1103_v31  ;;  %v1101_v35 = vpop.permute.xlu0 %1100  ;;  %v4949_v31 = vrot.slane %v1542_v16, 5  ;;  %v1563_v45 = vor.u32 %v1562_v20, %v1559_v5  ;;  %v1602_v5 = vrot.slane %v1600_v6, 5 }
 0x11f   : > { %1178 = vst.msk [vmem:[#allocation2 + $0x4c] sm:$0xf] %vm1158_vm9, %v1101_v35  ;;  %1315 = vrot.lane.b32.xlu2 %v3696_v36, %s4192_s6  ;;  %v1536_v36 = vshll.u32 %v3712_v26, 16  ;;  %v1598_v19 = vrot.slane %v1597_v4, 4  ;;  %v1572_v26 = vrot.slane %v1570_v3, 4  ;;  %v1620_v34 = vrot.slane %v1618_v18, 4 }
 0x120   : > { %v1549_v48 = vor.u32 %v1548_v32, %v4949_v31  ;;  %v1564_v58 = vrot.slane %v1563_v45, 4  ;;  %v4997_v32 = vrot.slane %v1614_v17, 5 }
 0x121   : > { %v1117_v59 = vpop.permute.xlu2 %1116  ;;  %v1538_v53 = vrot.slane %v1536_v36, 5  ;;  %v3727_v36 = vld [vmem:[%s4278_s30 + $0x78] sm:$0xf] }
 0x122   : > { %1186 = vst.msk [vmem:[#allocation2 + $0x6c] sm:$0xf] %vm1158_vm9, %v1117_v59  ;;  %v1550_v1 = vrot.slane %v1549_v48, 4  ;;  %v1621_v48 = vor.u32 %v1620_v34, %v4997_v32  ;;  %v1653_v49 = vshrl.u32 %v3727_v36, 16  ;;  %v1656_v50 = vshll.u32 %v3727_v36, 16 }
 0x123   : > { %1822 = vrot.lane.b32.xlu1 %v1459_v42, %s4193_s7  ;;  %v1501_v42 = vor.u32 %v1500_v24, %v4924_v57  ;;  %v1539_v8 = vor.u32 %v1538_v53, %v1535_v52  ;;  %v3728_v24 = vld [vmem:[%s4278_s30 + $0x7c] sm:$0xf]  ;;  %v3729_v52 = vld [vmem:[%s4278_s30 + $0x80] sm:$0x1] }
 0x124   : > { %1820 = vrot.lane.b32.xlu0 %v1449_v46, %s4193_s7  ;;  %v1566_v46 = vshll.u32 %v4945_v27, 16  ;;  %v1555_v16 = vsel %vm4289_vm2, %v1550_v1, %v1554_v63  ;;  %v4992_v27 = vld [vmem:[%s4278_s30 + $0x70] sm:$0xf]  ;;  %v1662_v38 = vshll.u32 %v3728_v24, 16  ;;  %v1666_v39 = vshrl.u32 %v3728_v24, 16 }
 0x125   : > { %v1109_v60 = vpop.permute.xlu1 %1108  ;;  %v1502_v57 = vrot.slane %v1501_v42, 4  ;;  %v1540_v20 = vrot.slane %v1539_v8, 4  ;;  %v1605_v42 = vshrl.u32 %v3721_v29, 16  ;;  %v1622_v1 = vrot.slane %v1621_v48, 4  ;;  %v3732_v29 = vld [vmem:[%s4278_s30 + $0x8c] sm:$0x1] }
 0x126   : > { %1182 = vst.msk [vmem:[#allocation2 + $0x5c] sm:$0xf] %vm1158_vm9, %v1109_v60  ;;  %v1107_v2 = vpop.permute.xlu0 %1106  ;;  %v4971_v59 = vrot.slane %v1566_v46, 5  ;;  %v1638_v46 = vshll.u32 %v4992_v27, 16  ;;  %v5016_v53 = vrot.slane %v1662_v38, 5  ;;  %v1668_v54 = vrot.slane %v1666_v39, 4 }
 0x127   : > { %1181 = vst.msk [vmem:[#allocation2 + $0x58] sm:$0xf] %vm1158_vm9, %v1107_v2  ;;  %1321 = vrot.lane.b32.xlu2 %v3699_v11, %s4192_s6  ;;  %v1587_v11 = vor.u32 %v1586_v56, %v1583_v55  ;;  %v1507_v12 = vsel %vm4289_vm2, %v1502_v57, %v1506_v51  ;;  %v1545_v37 = vsel %vm4289_vm2, %v1540_v20, %v4949_v31  ;;  %v3733_v57 = vld [vmem:[%s4278_s30 + $0x90] sm:$0xf]  ;;  %v1607_v51 = vrot.slane %v1605_v42, 4  ;;  %s3562_s6 = sshll.u32 %s177_s29, 4  ;;  %s3563_s6 = int_to_ptr.vmem [resolvable:$true] %s3562_s6 }
 0x128   : > { %v1569_v15 = vsel %vm4289_vm2, %v1564_v58, %v4971_v59  ;;  %v1610_v58 = vrot.slane %v1608_v43, 5  ;;  %v1672_v63 = vshll.u32 %v3729_v52, 16  ;;  %v1658_v3 = vrot.slane %v1656_v50, 5 }
 0x129   : > { %v1123_v28 = vpop.permute.xlu2 %1122  ;;  %v1588_v21 = vrot.slane %v1587_v11, 4  ;;  %v1669_v6 = vor.u32 %v1668_v54, %v5016_v53  ;;  %v1701_v7 = vshrl.u32 %v3733_v57, 16  ;;  %v1704_v8 = vshll.u32 %v3733_v57, 16  ;;  %v3731_v11 = vld [vmem:[%s4278_s30 + $0x88] sm:$0xf] }
 0x12a   : > { %1189 = vst.msk [vmem:[#allocation2 + $0x78] sm:$0xf] %vm1158_vm9, %v1123_v28  ;;  %v3717_v28 = vld [vmem:[%s4278_s30 + $0x50] sm:$0x1]  ;;  %v1686_v18 = vshll.u32 %v3731_v11, 16  ;;  %v1674_v20 = vrot.slane %v1672_v63, 5 }
 0x12b   : > { %1828 = vrot.lane.b32.xlu1 %v1497_v13, %s4193_s7  ;;  %v1629_v13 = vshrl.u32 %v3724_v62, 16  ;;  %v1576_v41 = vshll.u32 %v3717_v28, 16  ;;  %v1593_v31 = vsel %vm4289_vm2, %v1588_v21, %v4966_v33  ;;  %v1703_v21 = vrot.slane %v1701_v7, 4  ;;  %v5043_v28 = vld [vmem:[%s4278_s30 + $0x94] sm:$0xf] }
 0x12c   : > { %1826 = vrot.lane.b32.xlu0 %v1483_v14, %s4193_s7  ;;  %v1632_v14 = vshll.u32 %v3724_v62, 16  ;;  %v1696_v50 = vshll.u32 %v3732_v29, 16 }
 0x12d   : > { %v1115_v9 = vpop.permute.xlu1 %1114  ;;  %v1631_v22 = vrot.slane %v1629_v13, 4  ;;  %v1578_v56 = vrot.slane %v1576_v41, 5 }
 0x12e   : > { %1185 = vst.msk [vmem:[#allocation2 + $0x68] sm:$0xf] %vm1158_vm9, %v1115_v9  ;;  %v1113_v35 = vpop.permute.xlu0 %1112  ;;  %v1634_v23 = vrot.slane %v1632_v14, 5  ;;  %v1611_v14 = vor.u32 %v1610_v58, %v1607_v51 }
 0x12f   : > { %1184 = vst.msk [vmem:[#allocation2 + $0x64] sm:$0xf] %vm1158_vm9, %v1113_v35  ;;  %1824 = vrot.lane.b32.xlu2 %v1473_v40, %s4193_s7  ;;  %v1573_v40 = vor.u32 %v1572_v26, %v4971_v59  ;;  %v5021_v59 = vrot.slane %v1638_v46, 5  ;;  %v3736_v26 = vld [vmem:[%s4278_s30 + $0x9c] sm:$0xf] }
 0x130   : > { %v1635_v45 = vor.u32 %v1634_v23, %v1631_v22  ;;  %v1706_v22 = vrot.slane %v1704_v8, 5  ;;  %v3737_v23 = vld [vmem:[%s4278_s30 + $0xa0] sm:$0xf]  ;;  %v1612_v24 = vrot.slane %v1611_v14, 4  ;;  %v1725_v41 = vshrl.u32 %v3736_v26, 16 }
 0x131   : > { %v1262_v60 = vpop.permute.xlu2 %1261  ;;  %v1574_v55 = vrot.slane %v1573_v40, 4  ;;  %v1734_v39 = vshll.u32 %v3737_v23, 16  ;;  %v1738_v40 = vshrl.u32 %v3737_v23, 16  ;;  %v1714_v14 = vshrl.u32 %v5043_v28, 16 }
 0x132   : > { %1357 = vst.msk [vmem:[#allocation2 + $0x4] sm:$0xf] %vm1355_vm10, %v1262_v60  ;;  %v1636_v33 = vrot.slane %v1635_v45, 4  ;;  %v1728_v45 = vshll.u32 %v3736_v26, 16  ;;  %v1707_v48 = vor.u32 %v1706_v22, %v1703_v21  ;;  %v1727_v58 = vrot.slane %v1725_v41, 4 }
 0x133   : > { %1834 = vrot.lane.b32.xlu1 %v1531_v44, %s4193_s7  ;;  %v1603_v44 = vsel %vm4289_vm2, %v1598_v19, %v1602_v5  ;;  %v1579_v13 = vsel %vm4289_vm2, %v1574_v55, %v1578_v56  ;;  %v1690_v19 = vshrl.u32 %v3731_v11, 16  ;;  %v1670_v5 = vrot.slane %v1669_v6, 4  ;;  %v3740_v6 = vld [vmem:[%s4278_s30 + $0xac] sm:$0xf] }
 0x134   : > { %1832 = vrot.lane.b32.xlu0 %v1521_v47, %s4193_s7  ;;  %v1624_v47 = vshll.u32 %v3723_v30, 16  ;;  %v3726_v30 = vld [vmem:[%s4278_s30 + $0x74] sm:$0x1]  ;;  %v5065_v55 = vrot.slane %v1734_v39, 5  ;;  %v1740_v56 = vrot.slane %v1738_v40, 4 }
 0x135   : > { %v1121_v0 = vpop.permute.xlu1 %1120  ;;  %v1692_v38 = vrot.slane %v1690_v19, 4  ;;  %v1762_v19 = vshrl.u32 %v3740_v6, 16  ;;  %v3746_v39 = vld [vmem:[%s4278_s30 + $0xc4] sm:$0xf] }
 0x136   : > { %1188 = vst.msk [vmem:[#allocation2 + $0x74] sm:$0xf] %vm1158_vm9, %v1121_v0  ;;  %v1119_v2 = vpop.permute.xlu0 %1118  ;;  %v1626_v60 = vrot.slane %v1624_v47, 5  ;;  %v1648_v47 = vshll.u32 %v3726_v30, 16  ;;  %v1741_v8 = vor.u32 %v1740_v56, %v5065_v55  ;;  %v3735_v30 = vld [vmem:[%s4278_s30 + $0x98] sm:$0x1] }
 0x137   : > { %1187 = vst.msk [vmem:[#allocation2 + $0x70] sm:$0xf] %vm1158_vm9, %v1119_v2  ;;  %1830 = vrot.lane.b32.xlu2 %v1507_v12, %s4193_s7  ;;  %v1655_v2 = vrot.slane %v1653_v49, 4  ;;  %v1642_v12 = vshrl.u32 %v4992_v27, 16  ;;  %v1710_v49 = vshll.u32 %v5043_v28, 16  ;;  %v1764_v29 = vrot.slane %v1762_v19, 4 }
 0x138   : > { %v1742_v21 = vrot.slane %v1741_v8, 4 }
 0x139   : > { %v1268_v10 = vpop.permute.xlu2 %1267  ;;  %v1659_v17 = vor.u32 %v1658_v3, %v1655_v2  ;;  %v1644_v27 = vrot.slane %v1642_v12, 4 }
 0x13a   : > { %1360 = vst.msk [vmem:[#allocation2 + $0x10] sm:$0xf] %vm1355_vm10, %v1268_v10  ;;  %v3730_v10 = vld [vmem:[%s4278_s30 + $0x84] sm:$0xf] }
 0x13b   : > { %1840 = vrot.lane.b32.xlu1 %v1569_v15, %s4193_s7  ;;  %v1641_v15 = vsel %vm4289_vm2, %v1636_v33, %v5021_v59  ;;  %v1677_v42 = vshrl.u32 %v3730_v10, 16  ;;  %v1680_v43 = vshll.u32 %v3730_v10, 16  ;;  %v1645_v46 = vor.u32 %v1644_v27, %v5021_v59  ;;  %v5088_v27 = vld [vmem:[%s4278_s30 + $0xb8] sm:$0xf] }
 0x13c   : > { %1838 = vrot.lane.b32.xlu0 %v1555_v16, %s4193_s7  ;;  %v1627_v16 = vsel %vm4289_vm2, %v1622_v1, %v1626_v60  ;;  %v1730_v33 = vrot.slane %v1728_v45, 5  ;;  %v1650_v60 = vrot.slane %v1648_v47, 5  ;;  %v1698_v1 = vrot.slane %v1696_v50, 5 }
 0x13d   : > { %v1260_v9 = vpop.permute.xlu1 %1259  ;;  %v1679_v57 = vrot.slane %v1677_v42, 4  ;;  %v1682_v51 = vrot.slane %v1680_v43, 5  ;;  %v1646_v59 = vrot.slane %v1645_v46, 4  ;;  %v1716_v10 = vrot.slane %v1714_v14, 4 }
 0x13e   : > { %1356 = vst.msk [vmem:[#allocation2] sm:$0xf] %vm1355_vm10, %v1260_v9  ;;  %v1125_v35 = vpop.permute.xlu0 %1124  ;;  %v1782_v42 = vshll.u32 %v5088_v27, 16  ;;  %v1720_v46 = vshll.u32 %v3735_v30, 16  ;;  %v1806_v50 = vshll.u32 %v3746_v39, 16 }
 0x13f   : > { %1190 = vst.msk [vmem:[#allocation2 + $0x7c] sm:$0xf] %vm1158_vm9, %v1125_v35  ;;  %1836 = vrot.lane.b32.xlu2 %v1545_v37, %s4193_s7  ;;  %v1660_v35 = vrot.slane %v1659_v17, 4  ;;  %v5047_v37 = vrot.slane %v1686_v18, 5  ;;  %v1758_v18 = vshll.u32 %v3740_v6, 16  ;;  %v1786_v6 = vshrl.u32 %v5088_v27, 16 }
 0x140   : > { %v3751_v30 = vld [vmem:[%s4278_s30 + $0x18] sm:$0xe] }
 0x141   : > { %v1274_v62 = vpop.permute.xlu2 %1273  ;;  %v1665_v52 = vsel %vm4289_vm2, %v1660_v35, %v5016_v53  ;;  %v1693_v54 = vor.u32 %v1692_v38, %v5047_v37  ;;  %v1708_v53 = vrot.slane %v1707_v48, 4  ;;  %v5091_v28 = vrot.slane %v1758_v18, 5  ;;  %v3741_v38 = vld [vmem:[%s4278_s30 + $0xb0] sm:$0x1] }
 0x142   : > { %1363 = vst.msk [vmem:[#allocation2 + $0x1c] sm:$0xf] %vm1355_vm10, %v1274_v62  ;;  %v3742_v62 = vld [vmem:[%s4278_s30 + $0xb4] sm:$0xf] }
 0x143   : > { %1846 = vrot.lane.b32.xlu1 %v1603_v44, %s4193_s7  ;;  %v1617_v44 = vsel %vm4289_vm2, %v1612_v24, %v4997_v32  ;;  %v3738_v32 = vld [vmem:[%s4278_s30 + $0xa4] sm:$0x1]  ;;  %v1694_v3 = vrot.slane %v1693_v54, 4  ;;  %v1773_v11 = vshrl.u32 %v3742_v62, 16  ;;  %v1776_v12 = vshll.u32 %v3742_v62, 16 }
 0x144   : > { %1844 = vrot.lane.b32.xlu0 %v1593_v31, %s4193_s7  ;;  %v1675_v31 = vsel %vm4289_vm2, %v1670_v5, %v1674_v20  ;;  %v1765_v48 = vor.u32 %v1764_v29, %v5091_v28 }
 0x145   : > { %v1266_v0 = vpop.permute.xlu1 %1265  ;;  %v1699_v5 = vsel %vm4289_vm2, %v1694_v3, %v1698_v1  ;;  %v1775_v22 = vrot.slane %v1773_v11, 4  ;;  %v1778_v23 = vrot.slane %v1776_v12, 5 }
 0x146   : > { %1359 = vst.msk [vmem:[#allocation2 + $0xc] sm:$0xf] %vm1355_vm10, %v1266_v0  ;;  %v1264_v4 = vpop.permute.xlu0 %1263  ;;  %v5070_v0 = vrot.slane %v1710_v49, 5  ;;  %v1768_v49 = vshll.u32 %v3741_v38, 16  ;;  %v3750_v38 = vld [vmem:[%s4278_s30 + $0x14] sm:$0x1] }
 0x147   : > { %1358 = vst.msk [vmem:[#allocation2 + $0x8] sm:$0xf] %vm1355_vm10, %v1264_v4  ;;  %1842 = vrot.lane.b32.xlu2 %v1579_v13, %s4193_s7  ;;  %v1744_v4 = vshll.u32 %v3738_v32, 16  ;;  %v1683_v13 = vor.u32 %v1682_v51, %v1679_v57  ;;  %v1779_v41 = vor.u32 %v1778_v23, %v1775_v22  ;;  %v1784_v57 = vrot.slane %v1782_v42, 5 }
 0x148   : > { %v1713_v17 = vsel %vm4289_vm2, %v1708_v53, %v5070_v0  ;;  %v1717_v45 = vor.u32 %v1716_v10, %v5070_v0  ;;  %v1770_v62 = vrot.slane %v1768_v49, 5  ;;  %v1808_v53 = vrot.slane %v1806_v50, 5  ;;  %v3748_v49 = vld [vmem:[%s4278_s30 + $0xc] sm:$0xe] }
 0x149   : > { %v1280_v9 = vpop.permute.xlu2 %1279  ;;  %v1746_v20 = vrot.slane %v1744_v4, 5  ;;  %v1684_v24 = vrot.slane %v1683_v13, 4 }
 0x14a   : > { %1366 = vst.msk [vmem:[#allocation2 + $0x28] sm:$0xf] %vm1355_vm10, %v1280_v9  ;;  %v1718_v51 = vrot.slane %v1717_v45, 4  ;;  %v3755_v45 = vld [vmem:[%s4278_s30 + $0x28] sm:$0xf] }
 0x14b   : > { %1852 = vrot.lane.b32.xlu1 %v1641_v15, %s4193_s7  ;;  %v1731_v15 = vor.u32 %v1730_v33, %v1727_v58  ;;  %v1747_v40 = vsel %vm4289_vm2, %v1742_v21, %v1746_v20  ;;  %v1689_v43 = vsel %vm4289_vm2, %v1684_v24, %v5047_v37  ;;  %v1780_v37 = vrot.slane %v1779_v41, 4  ;;  %v3744_v20 = vld [vmem:[%s4278_s30 + $0xbc] sm:$0x1]  ;;  %v3749_v24 = vld [vmem:[%s4278_s30 + $0x10] sm:$0xf] }
 0x14c   : > { %1850 = vrot.lane.b32.xlu0 %v1627_v16, %s4193_s7  ;;  %v1651_v16 = vsel %vm4289_vm2, %v1646_v59, %v1650_v60  ;;  %v1722_v58 = vrot.slane %v1720_v46, 5  ;;  %v1766_v60 = vrot.slane %v1765_v48, 4  ;;  %v1792_v10 = vshll.u32 %v3744_v20, 16  ;;  %v3765_v20 = vld [vmem:[%s4278_s30 + $0x50] sm:$0x1] }
 0x14d   : > { %v1272_v34 = vpop.permute.xlu1 %1271  ;;  %v1732_v26 = vrot.slane %v1731_v15, 4  ;;  %v1785_v11 = vsel %vm4289_vm2, %v1780_v37, %v1784_v57  ;;  %v2061_v48 = vrot.slane %v3755_v45, 5 }
 0x14e   : > { %1362 = vst.msk [vmem:[#allocation2 + $0x18] sm:$0xf] %vm1355_vm10, %v1272_v34  ;;  %v1270_v36 = vpop.permute.xlu0 %1269  ;;  %v3739_v34 = vld [vmem:[%s4278_s30 + $0xa8] sm:$0xf]  ;;  %v1771_v14 = vsel %vm4289_vm2, %v1766_v60, %v1770_v62 }
 0x14f   : > { %1361 = vst.msk [vmem:[#allocation2 + $0x14] sm:$0xf] %vm1355_vm10, %v1270_v36  ;;  %1848 = vrot.lane.b32.xlu2 %v1617_v44, %s4193_s7  ;;  %v3745_v44 = vld [vmem:[%s4278_s30 + $0xc0] sm:$0xf]  ;;  %v1749_v47 = vshrl.u32 %v3739_v34, 16  ;;  %v1737_v54 = vsel %vm4289_vm2, %v1732_v26, %v5065_v55 }
 0x150   : > { %v1797_v32 = vshrl.u32 %v3745_v44, 16  ;;  %v1800_v56 = vshll.u32 %v3745_v44, 16  ;;  %v2050_v44 = vrot.slane %v3750_v38, 5 }
 0x151   : > { %v1286_v63 = vpop.permute.xlu2 %1285  ;;  %v1751_v33 = vrot.slane %v1749_v47, 4 }
 0x152   : > { %1369 = vst.msk [vmem:[#allocation2 + $0x34] sm:$0xf] %vm1355_vm10, %v1286_v63  ;;  %v3747_v63 = vld [vmem:[%s4278_s30 + $0xc8] sm:$0x1]  ;;  %v1802_v3 = vrot.slane %v1800_v56, 5  ;;  %v2063_v56 = vrot.slane %v2061_v48, 4 }
 0x153   : > { %1858 = vrot.lane.b32.xlu1 %v1675_v31, %s4193_s7  ;;  %v1752_v31 = vshll.u32 %v3739_v34, 16  ;;  %v1816_v13 = vshll.u32 %v3747_v63, 16  ;;  %v3752_v34 = vld [vmem:[%s4278_s30 + $0x1c] sm:$0xf] }
 0x154   : > { %1856 = vrot.lane.b32.xlu0 %v1665_v52, %s4193_s7  ;;  %v1810_v52 = vshrl.u32 %v3746_v39, 16 }
 0x155   : > { %v1278_v2 = vpop.permute.xlu1 %1277  ;;  %v1754_v59 = vrot.slane %v1752_v31, 5  ;;  %v1818_v19 = vrot.slane %v1816_v13, 5 }
 0x156   : > { %1365 = vst.msk [vmem:[#allocation2 + $0x24] sm:$0xf] %vm1355_vm10, %v1278_v2  ;;  %v1276_v7 = vpop.permute.xlu0 %1275  ;;  %v1812_v0 = vrot.slane %v1810_v52, 4  ;;  %v1799_v2 = vrot.slane %v1797_v32, 4  ;;  %v3756_v52 = vld [vmem:[%s4278_s30 + $0x2c] sm:$0x1] }
 0x157   : > { %1364 = vst.msk [vmem:[#allocation2 + $0x20] sm:$0xf] %vm1355_vm10, %v1276_v7  ;;  %1854 = vrot.lane.b32.xlu2 %v1651_v16, %s4193_s7  ;;  %v1723_v7 = vsel %vm4289_vm2, %v1718_v51, %v1722_v58  ;;  %v1755_v8 = vor.u32 %v1754_v59, %v1751_v33  ;;  %v3796_v32 = vrot.slane %v3748_v49, 9  ;;  %v2064_v37 = vrot.slane %v3756_v52, 5  ;;  %v3758_v59 = vld [vmem:[%s4278_s30 + $0x34] sm:$0xf] }
 0x158   : > { %v1813_v12 = vor.u32 %v1812_v0, %v1808_v53  ;;  %v1803_v15 = vor.u32 %v1802_v3, %v1799_v2  ;;  %v2068_v63 = vrot.slane %v3758_v59, 5  ;;  %v3759_v2 = vld [vmem:[%s4278_s30 + $0x38] sm:$0x1] }
 0x159   : > { %v1292_v9 = vpop.permute.xlu2 %1291  ;;  %v1756_v16 = vrot.slane %v1755_v8, 4  ;;  %v2065_v62 = vsel %vm4483_vm6, %v2063_v56, %v2064_v37  ;;  %v2071_v13 = vrot.slane %v3759_v2, 5  ;;  %v3774_v37 = vld [vmem:[%s4278_s30 + $0x74] sm:$0x1] }
 0x15a   : > { %1372 = vst.msk [vmem:[#allocation2 + $0x40] sm:$0xf] %vm1355_vm10, %v1292_v9  ;;  %v1814_v18 = vrot.slane %v1813_v12, 4  ;;  %v1804_v22 = vrot.slane %v1803_v15, 4  ;;  %v2070_v12 = vrot.slane %v2068_v63, 4 }
 0x15b   : > { %1864 = vrot.lane.b32.xlu1 %v1713_v17, %s4193_s7  ;;  %v1788_v17 = vrot.slane %v1786_v6, 4  ;;  %v1761_v26 = vsel %vm4289_vm2, %v1756_v16, %v5091_v28  ;;  %v3797_v28 = vrot.slane %v3751_v30, 9 }
 0x15c   : > { %1862 = vrot.lane.b32.xlu0 %v1699_v5, %s4193_s7  ;;  %v1819_v29 = vsel %vm4289_vm2, %v1814_v18, %v1818_v19  ;;  %v1809_v9 = vsel %vm4289_vm2, %v1804_v22, %v1808_v53  ;;  %v3753_v53 = vld [vmem:[%s4278_s30 + $0x20] sm:$0x1]  ;;  %v3757_v19 = vld [vmem:[%s4278_s30 + $0x30] sm:$0xe] }
 0x15d   : > { %v1284_v35 = vpop.permute.xlu1 %1283  ;;  %v1789_v27 = vor.u32 %v1788_v17, %v1784_v57  ;;  %v3799_v22 = vrot.slane %v3757_v19, 9 }
 0x15e   : > { %1368 = vst.msk [vmem:[#allocation2 + $0x30] sm:$0xf] %vm1355_vm10, %v1284_v35  ;;  %v1282_v36 = vpop.permute.xlu0 %1281  ;;  %v2047_v35 = vrot.slane %v3749_v24, 5  ;;  %v2085_v24 = vrot.slane %v3765_v20, 5 }
 0x15f   : > { %1367 = vst.msk [vmem:[#allocation2 + $0x2c] sm:$0xf] %vm1355_vm10, %v1282_v36  ;;  %1860 = vrot.lane.b32.xlu2 %v1689_v43, %s4193_s7  ;;  %v1790_v39 = vrot.slane %v1789_v27, 4  ;;  %v1794_v36 = vrot.slane %v1792_v10, 5  ;;  %v2069_v30 = vsel %vm4483_vm6, %v3799_v22, %v2068_v63  ;;  %v3771_v63 = vld [vmem:[%s4278_s30 + $0x68] sm:$0x1] }
 0x160   : > { %v2049_v43 = vrot.slane %v2047_v35, 4  ;;  %v2048_v60 = vsel %vm4483_vm6, %v3796_v32, %v2047_v35  ;;  %v3762_v35 = vld [vmem:[%s4278_s30 + $0x44] sm:$0x1]  ;;  %v3766_v32 = vld [vmem:[%s4278_s30 + $0x54] sm:$0xe] }
 0x161   : > { %v1298_v55 = vpop.permute.xlu2 %1297  ;;  %v1795_v47 = vsel %vm4289_vm2, %v1790_v39, %v1794_v36  ;;  %v3769_v39 = vld [vmem:[%s4278_s30 + $0x60] sm:$0xe]  ;;  %v3770_v36 = vld [vmem:[%s4278_s30 + $0x64] sm:$0xf]  ;;  %v3775_v22 = vld [vmem:[%s4278_s30 + $0x78] sm:$0xe] }
 0x162   : > { %1375 = vst.msk [vmem:[#allocation2 + $0x4c] sm:$0xf] %vm1355_vm10, %v1298_v55  ;;  %v2051_v50 = vsel %vm4483_vm6, %v2049_v43, %v2050_v44  ;;  %v3760_v55 = vld [vmem:[%s4278_s30 + $0x3c] sm:$0xe]  ;;  %v3803_v43 = vrot.slane %v3769_v39, 9  ;;  %v2096_v44 = vrot.slane %v3770_v36, 5 }
 0x163   : > { %1870 = vrot.lane.b32.xlu1 %v1747_v40, %s4193_s7  ;;  %v2054_v40 = vrot.slane %v3752_v34, 5  ;;  %v3800_v6 = vrot.slane %v3760_v55, 9 }
 0x164   : > { %1868 = vrot.lane.b32.xlu0 %v1737_v54, %s4193_s7  ;;  %v3754_v54 = vld [vmem:[%s4278_s30 + $0x24] sm:$0xe]  ;;  %v2097_v52 = vsel %vm4483_vm6, %v3803_v43, %v2096_v44 }
 0x165   : > { %v1290_v1 = vpop.permute.xlu1 %1289  ;;  %v2055_v31 = vsel %vm4483_vm6, %v3797_v28, %v2054_v40  ;;  %v3798_v58 = vrot.slane %v3754_v54, 9  ;;  %v2056_v3 = vrot.slane %v2054_v40, 4  ;;  %v3768_v40 = vld [vmem:[%s4278_s30 + $0x5c] sm:$0x1] }
 0x166   : > { %1371 = vst.msk [vmem:[#allocation2 + $0x3c] sm:$0xf] %vm1355_vm10, %v1290_v1  ;;  %v1288_v4 = vpop.permute.xlu0 %1287  ;;  %v3761_v1 = vld [vmem:[%s4278_s30 + $0x40] sm:$0xf] }
 0x167   : > { %1370 = vst.msk [vmem:[#allocation2 + $0x38] sm:$0xf] %vm1355_vm10, %v1288_v4  ;;  %1866 = vrot.lane.b32.xlu2 %v1723_v7, %s4193_s7  ;;  %v2062_v0 = vsel %vm4483_vm6, %v3798_v58, %v2061_v48  ;;  %v2057_v4 = vrot.slane %v3753_v53, 5  ;;  %v2075_v7 = vrot.slane %v3761_v1, 5  ;;  %v3773_v48 = vld [vmem:[%s4278_s30 + $0x70] sm:$0xf] }
 0x168   : > { %v2103_v54 = vrot.slane %v3773_v48, 5 }
 0x169   : > { %v1304_v5 = vpop.permute.xlu2 %1303  ;;  %v2058_v16 = vsel %vm4483_vm6, %v2056_v3, %v2057_v4  ;;  %v2076_v17 = vsel %vm4483_vm6, %v3800_v6, %v2075_v7  ;;  %v3778_v3 = vld [vmem:[%s4278_s30 + $0x84] sm:$0xe]  ;;  %v3779_v4 = vld [vmem:[%s4278_s30 + $0x88] sm:$0xf] }
 0x16a   : > { %1378 = vst.msk [vmem:[#allocation2 + $0x58] sm:$0xf] %vm1355_vm10, %v1304_v5  ;;  %v2072_v5 = vsel %vm4483_vm6, %v2070_v12, %v2071_v13  ;;  %v2105_v58 = vrot.slane %v2103_v54, 4  ;;  %v3806_v12 = vrot.slane %v3778_v3, 9  ;;  %v2117_v13 = vrot.slane %v3779_v4, 5 }
 0x16b   : > { %1876 = vrot.lane.b32.xlu1 %v1785_v11, %s4193_s7 }
 0x16c   : > { %1874 = vrot.lane.b32.xlu0 %v1771_v14, %s4193_s7  ;;  %v3764_v14 = vld [vmem:[%s4278_s30 + $0x4c] sm:$0xf]  ;;  %v2118_v20 = vsel %vm4483_vm6, %v3806_v12, %v2117_v13 }
 0x16d   : > { %v1296_v21 = vpop.permute.xlu1 %1295  ;;  %v2082_v18 = vrot.slane %v3764_v14, 5 }
 0x16e   : > { %1374 = vst.msk [vmem:[#allocation2 + $0x48] sm:$0xf] %vm1355_vm10, %v1296_v21  ;;  %v1294_v23 = vpop.permute.xlu0 %1293  ;;  %v3763_v21 = vld [vmem:[%s4278_s30 + $0x48] sm:$0xe] }
 0x16f   : > { %1373 = vst.msk [vmem:[#allocation2 + $0x44] sm:$0xf] %vm1355_vm10, %v1294_v23  ;;  %1872 = vrot.lane.b32.xlu2 %v1761_v26, %s4193_s7  ;;  %v2084_v23 = vrot.slane %v2082_v18, 4  ;;  %v3801_v10 = vrot.slane %v3763_v21, 9 }
 0x171   : > { %v1310_v41 = vpop.permute.xlu2 %1309  ;;  %v2086_v34 = vsel %vm4483_vm6, %v2084_v23, %v2085_v24  ;;  %v2083_v38 = vsel %vm4483_vm6, %v3801_v10, %v2082_v18  ;;  %v3782_v18 = vld [vmem:[%s4278_s30 + $0x94] sm:$0xf]  ;;  %v3783_v24 = vld [vmem:[%s4278_s30 + $0x98] sm:$0x1] }
 0x172   : > { %1381 = vst.msk [vmem:[#allocation2 + $0x64] sm:$0xf] %vm1355_vm10, %v1310_v41  ;;  %v2077_v41 = vrot.slane %v2075_v7, 4  ;;  %v3777_v7 = vld [vmem:[%s4278_s30 + $0x80] sm:$0x1]  ;;  %v2124_v21 = vrot.slane %v3782_v18, 5 }
 0x173   : > { %1882 = vrot.lane.b32.xlu1 %v1819_v29, %s4193_s7 }
 0x174   : > { %1880 = vrot.lane.b32.xlu0 %v1809_v9, %s4193_s7  ;;  %v3767_v9 = vld [vmem:[%s4278_s30 + $0x58] sm:$0xf]  ;;  %v2126_v10 = vrot.slane %v2124_v21, 4 }
 0x175   : > { %v1302_v42 = vpop.permute.xlu1 %1301  ;;  %v2089_v28 = vrot.slane %v3767_v9, 5 }
 0x176   : > { %1377 = vst.msk [vmem:[#allocation2 + $0x54] sm:$0xf] %vm1355_vm10, %v1302_v42  ;;  %v1300_v46 = vpop.permute.xlu0 %1299  ;;  %v2078_v42 = vrot.slane %v3762_v35, 5 }
 0x177   : > { %1376 = vst.msk [vmem:[#allocation2 + $0x50] sm:$0xf] %vm1355_vm10, %v1300_v46  ;;  %1878 = vrot.lane.b32.xlu2 %v1795_v47, %s4193_s7  ;;  %v2091_v47 = vrot.slane %v2089_v28, 4  ;;  %s3564_s7 = sshll.u32 %s3560_s5, 4  ;;  %s3565_s7 = int_to_ptr.hbm [resolvable:$true] %s3564_s7 }
 0x179   : > { %v1316_v57 = vpop.permute.xlu2 %1315 }
 0x17a   : > { %1384 = vst.msk [vmem:[#allocation2 + $0x70] sm:$0xf] %vm1355_vm10, %v1316_v57  ;;  %v3772_v57 = vld [vmem:[%s4278_s30 + $0x6c] sm:$0xe] }
 0x17b   : > { %2161 = vrot.lane.b32.xlu1 %v2055_v31, %s4194_s8  ;;  %v2092_v31 = vrot.slane %v3768_v40, 5 }
 0x17c   : > { %2159 = vrot.lane.b32.xlu0 %v2051_v50, %s4194_s8  ;;  %v2079_v50 = vsel %vm4483_vm6, %v2077_v41, %v2078_v42  ;;  %v3787_v41 = vld [vmem:[%s4278_s30 + $0xa8] sm:$0xe]  ;;  %v3788_v42 = vld [vmem:[%s4278_s30 + $0xac] sm:$0xf] }
 0x17d   : > { %v1308_v51 = vpop.permute.xlu1 %1307  ;;  %v2093_v56 = vsel %vm4483_vm6, %v2091_v47, %v2092_v31  ;;  %v3809_v47 = vrot.slane %v3787_v41, 9  ;;  %v2138_v31 = vrot.slane %v3788_v42, 5  ;;  %v3816_v41 = vld [vmem:[%s4278_s30 + $0x30] sm:$0xf]  ;;  %v3821_v42 = vld [vmem:[%s4278_s30 + $0x4c] sm:$0xf] }
 0x17e   : > { %1380 = vst.msk [vmem:[#allocation2 + $0x60] sm:$0xf] %vm1355_vm10, %v1308_v51  ;;  %v1306_v33 = vpop.permute.xlu0 %1305  ;;  %v3802_v51 = vrot.slane %v3766_v32, 9 }
 0x17f   : > { %1379 = vst.msk [vmem:[#allocation2 + $0x5c] sm:$0xf] %vm1355_vm10, %v1306_v33  ;;  %2157 = vrot.lane.b32.xlu2 %v2048_v60, %s4194_s8  ;;  %v2106_v33 = vrot.slane %v3774_v37, 5  ;;  %v2139_v37 = vsel %vm4483_vm6, %v3809_v47, %v2138_v31  ;;  %v2140_v12 = vrot.slane %v2138_v31, 4  ;;  %v3819_v31 = vld [vmem:[%s4278_s30 + $0x40] sm:$0xf] }
 0x180   : > { %v2090_v55 = vsel %vm4483_vm6, %v3802_v51, %v2089_v28  ;;  %v3780_v28 = vld [vmem:[%s4278_s30 + $0x8c] sm:$0x1]  ;;  %v3784_v51 = vld [vmem:[%s4278_s30 + $0x9c] sm:$0xe] }
 0x181   : > { %v1322_v8 = vpop.permute.xlu2 %1321  ;;  %v2107_v1 = vsel %vm4483_vm6, %v2105_v58, %v2106_v33  ;;  %v3792_v33 = vld [vmem:[%s4278_s30 + $0xbc] sm:$0x1] }
 0x182   : > { %1387 = vst.msk [vmem:[#allocation2 + $0x7c] sm:$0xf] %vm1355_vm10, %v1322_v8  ;;  %v2098_v8 = vrot.slane %v2096_v44, 4  ;;  %v3786_v44 = vld [vmem:[%s4278_s30 + $0xa4] sm:$0x1] }
 0x183   : > { %2167 = vrot.lane.b32.xlu1 %v2065_v62, %s4194_s8  ;;  %v3804_v62 = vrot.slane %v3772_v57, 9 }
 0x184   : > { %2165 = vrot.lane.b32.xlu0 %v2062_v0, %s4194_s8  ;;  %v3776_v0 = vld [vmem:[%s4278_s30 + $0x7c] sm:$0xf] }
 0x185   : > { %v1314_v11 = vpop.permute.xlu1 %1313  ;;  %v2104_v2 = vsel %vm4483_vm6, %v3804_v62, %v2103_v54  ;;  %v2110_v6 = vrot.slane %v3776_v0, 5  ;;  %v3791_v54 = vld [vmem:[%s4278_s30 + $0xb8] sm:$0xf] }
 0x186   : > { %1383 = vst.msk [vmem:[#allocation2 + $0x6c] sm:$0xf] %vm1355_vm10, %v1314_v11  ;;  %v1312_v15 = vpop.permute.xlu0 %1311  ;;  %v2099_v11 = vrot.slane %v3771_v63, 5  ;;  %v2145_v57 = vrot.slane %v3791_v54, 5 }
 0x187   : > { %1382 = vst.msk [vmem:[#allocation2 + $0x68] sm:$0xf] %vm1355_vm10, %v1312_v15  ;;  %2163 = vrot.lane.b32.xlu2 %v2058_v16, %s4194_s8  ;;  %v2112_v16 = vrot.slane %v2110_v6, 4 }
 0x188   : > { %v2147_v62 = vrot.slane %v2145_v57, 4 }
 0x189   : > { %v1825_v26 = vpop.permute.xlu2 %1824 }
 0x18a   : > { %1919 = vst.msk [vmem:[#allocation2 + $0x8] sm:$0xf] %vm1916_vm11, %v1825_v26  ;;  %v3781_v26 = vld [vmem:[%s4278_s30 + $0x90] sm:$0xe] }
 0x18b   : > { %2173 = vrot.lane.b32.xlu1 %v2076_v17, %s4194_s8  ;;  %v2113_v17 = vrot.slane %v3777_v7, 5 }
 0x18c   : > { %2171 = vrot.lane.b32.xlu0 %v2072_v5, %s4194_s8  ;;  %v2100_v5 = vsel %vm4483_vm6, %v2098_v8, %v2099_v11  ;;  %v3795_v11 = vld [vmem:[%s4278_s30 + $0xc8] sm:$0x1] }
 0x18d   : > { %v1320_v27 = vpop.permute.xlu1 %1319  ;;  %v2114_v23 = vsel %vm4483_vm6, %v2112_v16, %v2113_v17  ;;  %v2155_v17 = vrot.slane %v3795_v11, 5 }
 0x18e   : > { %1386 = vst.msk [vmem:[#allocation2 + $0x78] sm:$0xf] %vm1355_vm10, %v1320_v27  ;;  %v1318_v29 = vpop.permute.xlu0 %1317  ;;  %v3805_v27 = vrot.slane %v3775_v22, 9 }
 0x18f   : > { %1385 = vst.msk [vmem:[#allocation2 + $0x74] sm:$0xf] %vm1355_vm10, %v1318_v29  ;;  %2169 = vrot.lane.b32.xlu2 %v2069_v30, %s4194_s8  ;;  %v2127_v29 = vrot.slane %v3783_v24, 5 }
 0x190   : > { %v2111_v39 = vsel %vm4483_vm6, %v3805_v27, %v2110_v6  ;;  %v3789_v6 = vld [vmem:[%s4278_s30 + $0xb0] sm:$0x1] }
 0x191   : > { %v1831_v45 = vpop.permute.xlu2 %1830  ;;  %v2128_v36 = vsel %vm4483_vm6, %v2126_v10, %v2127_v29  ;;  %v3815_v10 = vld [vmem:[%s4278_s30 + $0x28] sm:$0xf]  ;;  %v3814_v29 = vld [vmem:[%s4278_s30 + $0x24] sm:$0xf] }
 0x192   : > { %1922 = vst.msk [vmem:[#allocation2 + $0x14] sm:$0xf] %vm1916_vm11, %v1831_v45  ;;  %v2119_v45 = vrot.slane %v2117_v13, 4  ;;  %v2141_v13 = vrot.slane %v3789_v6, 5 }
 0x193   : > { %2179 = vrot.lane.b32.xlu1 %v2086_v34, %s4194_s8  ;;  %v3807_v34 = vrot.slane %v3781_v26, 9 }
 0x194   : > { %2177 = vrot.lane.b32.xlu0 %v2083_v38, %s4194_s8  ;;  %v3785_v38 = vld [vmem:[%s4278_s30 + $0xa0] sm:$0xf] }
 0x195   : > { %v1823_v46 = vpop.permute.xlu1 %1822  ;;  %v2125_v40 = vsel %vm4483_vm6, %v3807_v34, %v2124_v21  ;;  %v2131_v43 = vrot.slane %v3785_v38, 5  ;;  %v3818_v38 = vld [vmem:[%s4278_s30 + $0x3c] sm:$0xf] }
 0x196   : > { %1918 = vst.msk [vmem:[#allocation2 + $0x4] sm:$0xf] %vm1916_vm11, %v1823_v46  ;;  %v1821_v49 = vpop.permute.xlu0 %1820  ;;  %v2120_v46 = vrot.slane %v3780_v28, 5 }
 0x197   : > { %1917 = vst.msk [vmem:[#allocation2] sm:$0xf] %vm1916_vm11, %v1821_v49  ;;  %2175 = vrot.lane.b32.xlu2 %v2079_v50, %s4194_s8  ;;  %v2133_v50 = vrot.slane %v2131_v43, 4 }
 0x199   : > { %v1837_v59 = vpop.permute.xlu2 %1836 }
 0x19a   : > { %1925 = vst.msk [vmem:[#allocation2 + $0x20] sm:$0xf] %vm1916_vm11, %v1837_v59  ;;  %v3790_v59 = vld [vmem:[%s4278_s30 + $0xb4] sm:$0xe] }
 0x19b   : > { %2185 = vrot.lane.b32.xlu1 %v2097_v52, %s4194_s8  ;;  %v2134_v52 = vrot.slane %v3786_v44, 5 }
 0x19c   : > { %2183 = vrot.lane.b32.xlu0 %v2093_v56, %s4194_s8  ;;  %v2121_v56 = vsel %vm4483_vm6, %v2119_v45, %v2120_v46  ;;  %v3865_v46 = vld [vmem:[%s4278_s30 + $0x6c] sm:$0xf] }
 0x19d   : > { %v1829_v60 = vpop.permute.xlu1 %1828  ;;  %v2135_v58 = vsel %vm4483_vm6, %v2133_v50, %v2134_v52  ;;  %v2703_v50 = vshll.u32 %v3865_v46, 16  ;;  %v3823_v52 = vld [vmem:[%s4278_s30 + $0x58] sm:$0xf] }
 0x19e   : > { %1921 = vst.msk [vmem:[#allocation2 + $0x10] sm:$0xf] %vm1916_vm11, %v1829_v60  ;;  %v1827_v53 = vpop.permute.xlu0 %1826  ;;  %v3808_v60 = vrot.slane %v3784_v51, 9  ;;  %v3890_v51 = vld [vmem:[%s4278_s30 + $0xd0] sm:$0xf] }
 0x19f   : > { %1920 = vst.msk [vmem:[#allocation2 + $0xc] sm:$0xf] %vm1916_vm11, %v1827_v53  ;;  %2181 = vrot.lane.b32.xlu2 %v2090_v55, %s4194_s8  ;;  %v2148_v53 = vrot.slane %v3792_v33, 5  ;;  %v3889_v33 = vld [vmem:[%s4278_s30 + $0xcc] sm:$0xf] }
 0x1a0   : > { %v2132_v3 = vsel %vm4483_vm6, %v3808_v60, %v2131_v43  ;;  %v3820_v43 = vld [vmem:[%s4278_s30 + $0x48] sm:$0xf]  ;;  %v3827_v60 = vld [vmem:[%s4278_s30 + $0x70] sm:$0xf] }
 0x1a1   : > { %v1843_v14 = vpop.permute.xlu2 %1842  ;;  %v2149_v4 = vsel %vm4483_vm6, %v2147_v62, %v2148_v53 }
 0x1a2   : > { %1928 = vst.msk [vmem:[#allocation2 + $0x2c] sm:$0xf] %vm1916_vm11, %v1843_v14 }
 0x1a3   : > { %2191 = vrot.lane.b32.xlu1 %v2107_v1, %s4194_s8  ;;  %v3810_v1 = vrot.slane %v3790_v59, 9  ;;  %v3822_v59 = vld [vmem:[%s4278_s30 + $0x54] sm:$0xf] }
 0x1a4   : > { %2189 = vrot.lane.b32.xlu0 %v2104_v2, %s4194_s8  ;;  %v3794_v2 = vld [vmem:[%s4278_s30 + $0xc4] sm:$0xf] }
 0x1a5   : > { %v1835_v15 = vpop.permute.xlu1 %1834  ;;  %v2146_v7 = vsel %vm4483_vm6, %v3810_v1, %v2145_v57  ;;  %v2152_v8 = vrot.slane %v3794_v2, 5  ;;  %v3866_v57 = vld [vmem:[%s4278_s30 + $0x70] sm:$0xf]  ;;  %v3826_v1 = vld [vmem:[%s4278_s30 + $0x6c] sm:$0xf]  ;;  %v2895_v2 = vshll.u32 %v3889_v33, 16 }
 0x1a6   : > { %1924 = vst.msk [vmem:[#allocation2 + $0x1c] sm:$0xf] %vm1916_vm11, %v1835_v15  ;;  %v1833_v19 = vpop.permute.xlu0 %1832  ;;  %v2709_v53 = vshll.u32 %v3866_v57, 16 }
 0x1a7   : > { %1923 = vst.msk [vmem:[#allocation2 + $0x18] sm:$0xf] %vm1916_vm11, %v1833_v19  ;;  %2187 = vrot.lane.b32.xlu2 %v2100_v5, %s4194_s8  ;;  %v2154_v16 = vrot.slane %v2152_v8, 4  ;;  %v2142_v19 = vsel %vm4483_vm6, %v2140_v12, %v2141_v13  ;;  %v3812_v5 = vld [vmem:[%s4278_s30 + $0x18] sm:$0xf] }
 0x1a8   : > { %v3891_v12 = vld [vmem:[%s4278_s30 + $0xd4] sm:$0x1] }
 0x1a9   : > { %v1849_v9 = vpop.permute.xlu2 %1848  ;;  %v2156_v21 = vsel %vm4483_vm6, %v2154_v16, %v2155_v17  ;;  %v2713_v16 = vshrl.u32 %v3866_v57, 16  ;;  %v3825_v17 = vld [vmem:[%s4278_s30 + $0x64] sm:$0xf] }
 0x1aa   : > { %1931 = vst.msk [vmem:[#allocation2 + $0x38] sm:$0xf] %vm1916_vm11, %v1849_v9 }
 0x1ab   : > { %2197 = vrot.lane.b32.xlu1 %v2118_v20, %s4194_s8  ;;  %v3793_v20 = vld [vmem:[%s4278_s30 + $0xc0] sm:$0xe] }
 0x1ac   : > { %2195 = vrot.lane.b32.xlu0 %v2114_v23, %s4194_s8  ;;  %v3811_v22 = vrot.slane %v3793_v20, 9  ;;  %v3843_v20 = vld [vmem:[%s4278_s30 + $0xd0] sm:$0xf] }
 0x1ad   : > { %v1841_v30 = vpop.permute.xlu1 %1840 }
 0x1ae   : > { %1927 = vst.msk [vmem:[#allocation2 + $0x28] sm:$0xf] %vm1916_vm11, %v1841_v30  ;;  %v1839_v35 = vpop.permute.xlu0 %1838  ;;  %v2153_v27 = vsel %vm4483_vm6, %v3811_v22, %v2152_v8  ;;  %v2715_v22 = vrot.slane %v2713_v16, 4  ;;  %v3840_v16 = vld [vmem:[%s4278_s30 + $0xc0] sm:$0xf] }
 0x1af   : > { %1926 = vst.msk [vmem:[#allocation2 + $0x24] sm:$0xf] %vm1916_vm11, %v1839_v35  ;;  %2193 = vrot.lane.b32.xlu2 %v2111_v39, %s4194_s8  ;;  %v3813_v35 = vld [vmem:[%s4278_s30 + $0x1c] sm:$0xf]  ;;  %v3817_v39 = vld [vmem:[%s4278_s30 + $0x34] sm:$0xf] }
 0x1b1   : > { %v1855_v48 = vpop.permute.xlu2 %1854 }
 0x1b2   : > { %1934 = vst.msk [vmem:[#allocation2 + $0x44] sm:$0xf] %vm1916_vm11, %v1855_v48  ;;  %v3824_v48 = vld [vmem:[%s4278_s30 + $0x60] sm:$0xf] }
 0x1b3   : > { %2203 = vrot.lane.b32.xlu1 %v2128_v36, %s4194_s8 }
 0x1b4   : > { %2201 = vrot.lane.b32.xlu0 %v2125_v40, %s4194_s8 }
 0x1b5   : > { %v1847_v49 = vpop.permute.xlu1 %1846 }
 0x1b6   : > { %1930 = vst.msk [vmem:[#allocation2 + $0x34] sm:$0xf] %vm1916_vm11, %v1847_v49  ;;  %v1845_v32 = vpop.permute.xlu0 %1844  ;;  %v2700_v49 = vshrl.u32 %v3865_v46, 16 }
 0x1b7   : > { %1929 = vst.msk [vmem:[#allocation2 + $0x30] sm:$0xf] %vm1916_vm11, %v1845_v32  ;;  %2199 = vrot.lane.b32.xlu2 %v2121_v56, %s4194_s8  ;;  %v2705_v32 = vrot.slane %v2703_v50, 5  ;;  %v3886_v50 = vld [vmem:[%s4278_s30 + $0xc0] sm:$0xf] }
 0x1b8   : > { %v2702_v54 = vrot.slane %v2700_v49, 4  ;;  %v2871_v57 = vshll.u32 %v3886_v50, 16 }
 0x1b9   : > { %v1861_v0 = vpop.permute.xlu2 %1860 }
 0x1ba   : > { %1937 = vst.msk [vmem:[#allocation2 + $0x50] sm:$0xf] %vm1916_vm11, %v1861_v0  ;;  %v2706_v62 = vor.u32 %v2705_v32, %v2702_v54  ;;  %v2901_v0 = vshll.u32 %v3890_v51, 16  ;;  %v3863_v54 = vld [vmem:[%s4278_s30 + $0x64] sm:$0xf] }
 0x1bb   : > { %2209 = vrot.lane.b32.xlu1 %v2139_v37, %s4194_s8 }
 0x1bc   : > { %2207 = vrot.lane.b32.xlu0 %v2135_v58, %s4194_s8  ;;  %v2903_v6 = vrot.slane %v2901_v0, 5 }
 0x1bd   : > { %v1853_v55 = vpop.permute.xlu1 %1852 }
 0x1be   : > { %1933 = vst.msk [vmem:[#allocation2 + $0x40] sm:$0xf] %vm1916_vm11, %v1853_v55  ;;  %v1851_v63 = vpop.permute.xlu0 %1850  ;;  %v2905_v55 = vshrl.u32 %v3890_v51, 16  ;;  %v3913_v51 = vld [vmem:[%s4278_s30 + $0x6c] sm:$0xe] }
 0x1bf   : > { %1932 = vst.msk [vmem:[#allocation2 + $0x3c] sm:$0xf] %vm1916_vm11, %v1851_v63  ;;  %2205 = vrot.lane.b32.xlu2 %v2132_v3, %s4194_s8  ;;  %v2892_v63 = vshrl.u32 %v3889_v33, 16  ;;  %v2707_v3 = vrot.slane %v2706_v62, 4  ;;  %v2685_v33 = vshll.u32 %v3863_v54, 16 }
 0x1c1   : > { %v1867_v14 = vpop.permute.xlu2 %1866  ;;  %v2894_v13 = vrot.slane %v2892_v63, 4  ;;  %v3887_v63 = vld [vmem:[%s4278_s30 + $0xc4] sm:$0xf] }
 0x1c2   : > { %1940 = vst.msk [vmem:[#allocation2 + $0x5c] sm:$0xf] %vm1916_vm11, %v1867_v14  ;;  %v2897_v14 = vrot.slane %v2895_v2, 5  ;;  %v5416_v2 = vrot.slane %v2685_v33, 5 }
 0x1c3   : > { %2215 = vrot.lane.b32.xlu1 %v2149_v4, %s4194_s8  ;;  %v2711_v4 = vrot.slane %v2709_v53, 5  ;;  %v2873_v53 = vrot.slane %v2871_v57, 5 }
 0x1c4   : > { %2213 = vrot.lane.b32.xlu0 %v2146_v7, %s4194_s8  ;;  %v2907_v7 = vrot.slane %v2905_v55, 4  ;;  %v3862_v55 = vld [vmem:[%s4278_s30 + $0x60] sm:$0xf] }
 0x1c5   : > { %v1859_v15 = vpop.permute.xlu1 %1858 }
 0x1c6   : > { %1936 = vst.msk [vmem:[#allocation2 + $0x4c] sm:$0xf] %vm1916_vm11, %v1859_v15  ;;  %v1857_v18 = vpop.permute.xlu0 %1856 }
 0x1c7   : > { %1935 = vst.msk [vmem:[#allocation2 + $0x48] sm:$0xf] %vm1916_vm11, %v1857_v18  ;;  %2211 = vrot.lane.b32.xlu2 %v2142_v19, %s4194_s8  ;;  %v2712_v18 = vsel %vm4289_vm2, %v2707_v3, %v2711_v4  ;;  %v2908_v19 = vor.u32 %v2907_v7, %v2903_v6 }
 0x1c9   : > { %v1873_v23 = vpop.permute.xlu2 %1872 }
 0x1ca   : > { %1943 = vst.msk [vmem:[#allocation2 + $0x68] sm:$0xf] %vm1916_vm11, %v1873_v23  ;;  %v2909_v23 = vrot.slane %v2908_v19, 4 }
 0x1cb   : > { %2354 = vrot.lane.b32.xlu1 %v3812_v5, %s4195_s9  ;;  %v2911_v5 = vshll.u32 %v3891_v12, 16  ;;  %v3841_v12 = vld [vmem:[%s4278_s30 + $0xc4] sm:$0xf] }
 0x1cc   : > { %2219 = vrot.lane.b32.xlu0 %v2156_v21, %s4194_s8  ;;  %v2898_v21 = vor.u32 %v2897_v14, %v2894_v13  ;;  %v2877_v14 = vshll.u32 %v3887_v63, 16 }
 0x1cd   : > { %v1865_v24 = vpop.permute.xlu1 %1864 }
 0x1ce   : > { %1939 = vst.msk [vmem:[#allocation2 + $0x58] sm:$0xf] %vm1916_vm11, %v1865_v24  ;;  %v1863_v26 = vpop.permute.xlu0 %1862  ;;  %v2913_v24 = vrot.slane %v2911_v5, 5 }
 0x1cf   : > { %1938 = vst.msk [vmem:[#allocation2 + $0x54] sm:$0xf] %vm1916_vm11, %v1863_v26  ;;  %2217 = vrot.lane.b32.xlu2 %v2153_v27, %s4194_s8  ;;  %v3867_v27 = vld [vmem:[%s4278_s30 + $0x74] sm:$0x1]  ;;  %s3547_s8 = scalar_lea.sflag [#allocation4], %s175_s26 }
 0x1d1   : > { %v1879_v9 = vpop.permute.xlu2 %1878 }
 0x1d2   : > { %1946 = vst.msk [vmem:[#allocation2 + $0x74] sm:$0xf] %vm1916_vm11, %v1879_v9 }
 0x1d3   : > { %2360 = vrot.lane.b32.xlu1 %v3815_v10, %s4195_s9 }
 0x1d4   : > { %2358 = vrot.lane.b32.xlu0 %v3814_v29, %s4195_s9  ;;  %v2899_v29 = vrot.slane %v2898_v21, 4 }
 0x1d5   : > { %v1871_v30 = vpop.permute.xlu1 %1870 }
 0x1d6   : > { %1942 = vst.msk [vmem:[#allocation2 + $0x64] sm:$0xf] %vm1916_vm11, %v1871_v30  ;;  %v1869_v34 = vpop.permute.xlu0 %1868  ;;  %v3914_v30 = vld [vmem:[%s4278_s30 + $0x70] sm:$0xf] }
 0x1d7   : > { %1941 = vst.msk [vmem:[#allocation2 + $0x60] sm:$0xf] %vm1916_vm11, %v1869_v34  ;;  %2356 = vrot.lane.b32.xlu2 %v3813_v35, %s4195_s9  ;;  %v3842_v34 = vld [vmem:[%s4278_s30 + $0xcc] sm:$0xf]  ;;  %v2716_v35 = vor.u32 %v2715_v22, %v2711_v4 }
 0x1d9   : > { %v2158_v36 = vpop.permute.xlu2 %2157 }
 0x1da   : > { %2254 = vst.msk [vmem:[#allocation2] sm:$0xf] %vm2253_vm12, %v2158_v36  ;;  %v2904_v36 = vsel %vm4289_vm2, %v2899_v29, %v2903_v6  ;;  %v3864_v6 = vld [vmem:[%s4278_s30 + $0x68] sm:$0x1]  ;;  %v3911_v29 = vld [vmem:[%s4278_s30 + $0x64] sm:$0xf] }
 0x1db   : > { %2366 = vrot.lane.b32.xlu1 %v3818_v38, %s4195_s9  ;;  %v2719_v38 = vshll.u32 %v3867_v27, 16 }
 0x1dc   : > { %2364 = vrot.lane.b32.xlu0 %v3817_v39, %s4195_s9  ;;  %v2914_v39 = vsel %vm4289_vm2, %v2909_v23, %v2913_v24  ;;  %v2879_v23 = vrot.slane %v2877_v14, 5  ;;  %v3838_v14 = vld [vmem:[%s4278_s30 + $0xb4] sm:$0xf] }
 0x1dd   : > { %v1877_v28 = vpop.permute.xlu1 %1876 }
 0x1de   : > { %1945 = vst.msk [vmem:[#allocation2 + $0x70] sm:$0xf] %vm1916_vm11, %v1877_v28  ;;  %v1875_v40 = vpop.permute.xlu0 %1874  ;;  %v3937_v28 = vld [vmem:[%s4278_s30 + $0xcc] sm:$0xe] }
 0x1df   : > { %1944 = vst.msk [vmem:[#allocation2 + $0x6c] sm:$0xf] %vm1916_vm11, %v1875_v40  ;;  %2362 = vrot.lane.b32.xlu2 %v3816_v41, %s4195_s9  ;;  %v3938_v40 = vld [vmem:[%s4278_s30 + $0xd0] sm:$0xf]  ;;  %v3191_v41 = vrot.slane %v3914_v30, 5  ;;  %v2881_v30 = vshrl.u32 %v3887_v63, 16 }
 0x1e0   : > { %v3247_v46 = vrot.slane %v3938_v40, 5  ;;  %v3910_v40 = vld [vmem:[%s4278_s30 + $0x60] sm:$0xe] }
 0x1e1   : > { %v2164_v44 = vpop.permute.xlu2 %2163 }
 0x1e2   : > { %2257 = vst.msk [vmem:[#allocation2 + $0xc] sm:$0xf] %vm2253_vm12, %v2164_v44  ;;  %v2721_v44 = vrot.slane %v2719_v38, 5  ;;  %v3249_v19 = vrot.slane %v3247_v46, 4 }
 0x1e3   : > { %2372 = vrot.lane.b32.xlu1 %v3821_v42, %s4195_s9  ;;  %v3915_v42 = vld [vmem:[%s4278_s30 + $0x74] sm:$0x1] }
 0x1e4   : > { %2370 = vrot.lane.b32.xlu0 %v3820_v43, %s4195_s9  ;;  %v2717_v43 = vrot.slane %v2716_v35, 4  ;;  %v3194_v49 = vrot.slane %v3915_v42, 5  ;;  %v2883_v42 = vrot.slane %v2881_v30, 4 }
 0x1e5   : > { %v1883_v45 = vpop.permute.xlu1 %1882 }
 0x1e6   : > { %1948 = vst.msk [vmem:[#allocation2 + $0x7c] sm:$0xf] %vm1916_vm11, %v1883_v45  ;;  %v1881_v47 = vpop.permute.xlu0 %1880  ;;  %v3955_v45 = vrot.slane %v3937_v28, 9  ;;  %v2722_v32 = vsel %vm4289_vm2, %v2717_v43, %v2721_v44  ;;  %v3912_v28 = vld [vmem:[%s4278_s30 + $0x68] sm:$0x1] }
 0x1e7   : > { %1947 = vst.msk [vmem:[#allocation2 + $0x78] sm:$0xf] %vm1916_vm11, %v1881_v47  ;;  %2368 = vrot.lane.b32.xlu2 %v3819_v31, %s4195_s9  ;;  %v3187_v44 = vrot.slane %v3912_v28, 5 }
 0x1e9   : > { %v2170_v56 = vpop.permute.xlu2 %2169 }
 0x1ea   : > { %2260 = vst.msk [vmem:[#allocation2 + $0x18] sm:$0xf] %vm2253_vm12, %v2170_v56  ;;  %v3248_v56 = vsel %vm4483_vm6, %v3955_v45, %v3247_v46  ;;  %v3946_v45 = vrot.slane %v3910_v40, 9  ;;  %v3907_v40 = vld [vmem:[%s4278_s30 + $0x54] sm:$0xe] }
 0x1eb   : > { %2378 = vrot.lane.b32.xlu1 %v3824_v48, %s4195_s9  ;;  %v3193_v48 = vrot.slane %v3191_v41, 4 }
 0x1ec   : > { %2376 = vrot.lane.b32.xlu0 %v3823_v52, %s4195_s9 }
 0x1ed   : > { %v2162_v37 = vpop.permute.xlu1 %2161 }
 0x1ee   : > { %2256 = vst.msk [vmem:[#allocation2 + $0x8] sm:$0xf] %vm2253_vm12, %v2162_v37  ;;  %v2160_v58 = vpop.permute.xlu0 %2159  ;;  %v2868_v37 = vshrl.u32 %v3886_v50, 16 }
 0x1ef   : > { %2255 = vst.msk [vmem:[#allocation2 + $0x4] sm:$0xf] %vm2253_vm12, %v2160_v58  ;;  %2374 = vrot.lane.b32.xlu2 %v3822_v59, %s4195_s9  ;;  %v3195_v58 = vsel %vm4483_vm6, %v3193_v48, %v3194_v49  ;;  %v2689_v59 = vshrl.u32 %v3863_v54, 16  ;;  %v5448_v48 = vld [vmem:[%s4278_s30 + $0xc4] sm:$0xf] }
 0x1f0   : > { %v2870_v62 = vrot.slane %v2868_v37, 4  ;;  %v3860_v49 = vld [vmem:[%s4278_s30 + $0x58] sm:$0xf]  ;;  %v3240_v57 = vrot.slane %v5448_v48, 5 }
 0x1f1   : > { %v2176_v8 = vpop.permute.xlu2 %2175  ;;  %v2691_v3 = vrot.slane %v2689_v59, 4  ;;  %v3936_v59 = vld [vmem:[%s4278_s30 + $0xc8] sm:$0x1] }
 0x1f2   : > { %2263 = vst.msk [vmem:[#allocation2 + $0x24] sm:$0xf] %vm2253_vm12, %v2176_v8  ;;  %v2676_v8 = vshrl.u32 %v3862_v55, 16  ;;  %v2874_v13 = vor.u32 %v2873_v53, %v2870_v62 }
 0x1f3   : > { %2384 = vrot.lane.b32.xlu1 %v3827_v60, %s4195_s9  ;;  %v3947_v60 = vrot.slane %v3913_v51, 9  ;;  %v2661_v51 = vshll.u32 %v3860_v49, 16 }
 0x1f4   : > { %2382 = vrot.lane.b32.xlu0 %v3826_v1, %s4195_s9  ;;  %v2875_v22 = vrot.slane %v2874_v13, 4 }
 0x1f5   : > { %v2168_v11 = vpop.permute.xlu1 %2167  ;;  %v3192_v7 = vsel %vm4483_vm6, %v3947_v60, %v3191_v41  ;;  %v2663_v63 = vrot.slane %v2661_v51, 5 }
 0x1f6   : > { %2259 = vst.msk [vmem:[#allocation2 + $0x14] sm:$0xf] %vm2253_vm12, %v2168_v11  ;;  %v2166_v15 = vpop.permute.xlu0 %2165  ;;  %v2679_v11 = vshll.u32 %v3862_v55, 16  ;;  %v2880_v38 = vsel %vm4289_vm2, %v2875_v22, %v2879_v23  ;;  %v3242_v55 = vrot.slane %v3240_v57, 4 }
 0x1f7   : > { %2258 = vst.msk [vmem:[#allocation2 + $0x10] sm:$0xf] %vm2253_vm12, %v2166_v15  ;;  %2380 = vrot.lane.b32.xlu2 %v3825_v17, %s4195_s9  ;;  %v3939_v15 = vld [vmem:[%s4278_s30 + $0xd4] sm:$0x1]  ;;  %v2692_v17 = vor.u32 %v2691_v3, %v5416_v2 }
 0x1f8   : > { %v3250_v5 = vrot.slane %v3939_v15, 5  ;;  %v2681_v21 = vrot.slane %v2679_v11, 5 }
 0x1f9   : > { %v2182_v26 = vpop.permute.xlu2 %2181  ;;  %v2693_v27 = vrot.slane %v2692_v17, 4  ;;  %v3934_v17 = vld [vmem:[%s4278_s30 + $0xc0] sm:$0xe] }
 0x1fa   : > { %2266 = vst.msk [vmem:[#allocation2 + $0x30] sm:$0xf] %vm2253_vm12, %v2182_v26 }
 0x1fb   : > { %2943 = vrot.lane.b32.xlu1 %v2712_v18, %s4196_s10  ;;  %v2695_v18 = vshll.u32 %v3864_v6, 16  ;;  %v3861_v6 = vld [vmem:[%s4278_s30 + $0x5c] sm:$0x1] }
 0x1fc   : > { %2416 = vrot.lane.b32.xlu0 %v3843_v20, %s4195_s9  ;;  %v2678_v20 = vrot.slane %v2676_v8, 4 }
 0x1fd   : > { %v2174_v10 = vpop.permute.xlu1 %2173 }
 0x1fe   : > { %2262 = vst.msk [vmem:[#allocation2 + $0x20] sm:$0xf] %vm2253_vm12, %v2174_v10  ;;  %v2172_v9 = vpop.permute.xlu0 %2171  ;;  %v2697_v10 = vrot.slane %v2695_v18, 5  ;;  %v2682_v35 = vor.u32 %v2681_v21, %v2678_v20  ;;  %v3954_v21 = vrot.slane %v3934_v17, 9 }
 0x1ff   : > { %2261 = vst.msk [vmem:[#allocation2 + $0x1c] sm:$0xf] %vm2253_vm12, %v2172_v9  ;;  %2414 = vrot.lane.b32.xlu2 %v3842_v34, %s4195_s9  ;;  %v3251_v34 = vsel %vm4483_vm6, %v3249_v19, %v3250_v5 }
 0x200   : > { %v2683_v41 = vrot.slane %v2682_v35, 4  ;;  %v3241_v35 = vsel %vm4483_vm6, %v3954_v21, %v3240_v57 }
 0x201   : > { %v2188_v47 = vpop.permute.xlu2 %2187 }
 0x202   : > { %2269 = vst.msk [vmem:[#allocation2 + $0x3c] sm:$0xf] %vm2253_vm12, %v2188_v47  ;;  %v3888_v47 = vld [vmem:[%s4278_s30 + $0xc8] sm:$0x1]  ;;  %v2688_v54 = vsel %vm4289_vm2, %v2683_v41, %v5416_v2  ;;  %v3908_v41 = vld [vmem:[%s4278_s30 + $0x58] sm:$0xf] }
 0x203   : > { %2977 = vrot.lane.b32.xlu1 %v2914_v39, %s4196_s10  ;;  %v3184_v39 = vrot.slane %v3911_v29, 5 }
 0x204   : > { %2975 = vrot.lane.b32.xlu0 %v2904_v36, %s4196_s10  ;;  %v2698_v36 = vsel %vm4289_vm2, %v2693_v27, %v2697_v10 }
 0x205   : > { %v2180_v31 = vpop.permute.xlu1 %2179  ;;  %v3186_v43 = vrot.slane %v3184_v39, 4  ;;  %v3185_v33 = vsel %vm4483_vm6, %v3946_v45, %v3184_v39 }
 0x206   : > { %2265 = vst.msk [vmem:[#allocation2 + $0x2c] sm:$0xf] %vm2253_vm12, %v2180_v31  ;;  %v2178_v52 = vpop.permute.xlu0 %2177 }
 0x207   : > { %2264 = vst.msk [vmem:[#allocation2 + $0x28] sm:$0xf] %vm2253_vm12, %v2178_v52  ;;  %2945 = vrot.lane.b32.xlu2 %v2722_v32, %s4196_s10  ;;  %v3859_v52 = vld [vmem:[%s4278_s30 + $0x54] sm:$0xf]  ;;  %v2884_v32 = vor.u32 %v2883_v42, %v2879_v23  ;;  %v3188_v37 = vsel %vm4483_vm6, %v3186_v43, %v3187_v44 }
 0x208   : > { %v2652_v60 = vshrl.u32 %v3859_v52, 16  ;;  %v2655_v62 = vshll.u32 %v3859_v52, 16 }
 0x209   : > { %v2194_v0 = vpop.permute.xlu2 %2193  ;;  %v2885_v53 = vrot.slane %v2884_v32, 4 }
 0x20a   : > { %2272 = vst.msk [vmem:[#allocation2 + $0x48] sm:$0xf] %vm2253_vm12, %v2194_v0  ;;  %v2657_v8 = vrot.slane %v2655_v62, 5  ;;  %v3931_v62 = vld [vmem:[%s4278_s30 + $0xb4] sm:$0xe] }
 0x20b   : > { %3312 = vrot.lane.b32.xlu1 %v3248_v56, %s4197_s11  ;;  %v2887_v56 = vshll.u32 %v3888_v47, 16  ;;  %v3177_v47 = vrot.slane %v3908_v41, 5  ;;  %v3837_v41 = vld [vmem:[%s4278_s30 + $0xac] sm:$0xf] }
 0x20c   : > { %3282 = vrot.lane.b32.xlu0 %v3195_v58, %s4197_s11  ;;  %v2665_v58 = vshrl.u32 %v3860_v49, 16 }
 0x20d   : > { %v2186_v1 = vpop.permute.xlu1 %2185  ;;  %v2889_v0 = vrot.slane %v2887_v56, 5  ;;  %v3179_v21 = vrot.slane %v3177_v47, 4 }
 0x20e   : > { %2268 = vst.msk [vmem:[#allocation2 + $0x38] sm:$0xf] %vm2253_vm12, %v2186_v1  ;;  %v2184_v4 = vpop.permute.xlu0 %2183  ;;  %v3243_v1 = vrot.slane %v3936_v59, 5  ;;  %v2667_v2 = vrot.slane %v2665_v58, 4  ;;  %v3933_v58 = vld [vmem:[%s4278_s30 + $0xbc] sm:$0x1] }
 0x20f   : > { %2267 = vst.msk [vmem:[#allocation2 + $0x34] sm:$0xf] %vm2253_vm12, %v2184_v4  ;;  %3280 = vrot.lane.b32.xlu2 %v3192_v7, %s4197_s11  ;;  %v2654_v7 = vrot.slane %v2652_v60, 4  ;;  %v2890_v13 = vsel %vm4289_vm2, %v2885_v53, %v2889_v0  ;;  %v3236_v0 = vrot.slane %v3933_v58, 5 }
 0x210   : > { %v2668_v15 = vor.u32 %v2667_v2, %v2663_v63  ;;  %v3244_v18 = vsel %vm4483_vm6, %v3242_v55, %v3243_v1  ;;  %v3953_v1 = vrot.slane %v3931_v62, 9 }
 0x211   : > { %v2200_v24 = vpop.permute.xlu2 %2199  ;;  %v2658_v19 = vor.u32 %v2657_v8, %v2654_v7  ;;  %v3881_v7 = vld [vmem:[%s4278_s30 + $0xac] sm:$0xf] }
 0x212   : > { %2275 = vst.msk [vmem:[#allocation2 + $0x54] sm:$0xf] %vm2253_vm12, %v2200_v24  ;;  %v2669_v22 = vrot.slane %v2668_v15, 4  ;;  %v2833_v17 = vshrl.u32 %v3881_v7, 16 }
 0x213   : > { %2412 = vrot.lane.b32.xlu1 %v3841_v12, %s4195_s9  ;;  %v3884_v12 = vld [vmem:[%s4278_s30 + $0xb8] sm:$0xf]  ;;  %v2659_v10 = vrot.slane %v2658_v19, 4 }
 0x214   : > { %2410 = vrot.lane.b32.xlu0 %v3840_v16, %s4195_s9  ;;  %v2671_v16 = vshll.u32 %v3861_v6, 16  ;;  %v2853_v5 = vshll.u32 %v3884_v12, 16  ;;  %v2857_v20 = vshrl.u32 %v3884_v12, 16  ;;  %v3857_v6 = vld [vmem:[%s4278_s30 + $0x4c] sm:$0xf] }
 0x215   : > { %v2192_v26 = vpop.permute.xlu1 %2191  ;;  %v2664_v28 = vsel %vm4289_vm2, %v2659_v10, %v2663_v63  ;;  %v2637_v15 = vshll.u32 %v3857_v6, 16 }
 0x216   : > { %2271 = vst.msk [vmem:[#allocation2 + $0x44] sm:$0xf] %vm2253_vm12, %v2192_v26  ;;  %v2190_v9 = vpop.permute.xlu0 %2189  ;;  %v2673_v23 = vrot.slane %v2671_v16, 5  ;;  %v3883_v26 = vld [vmem:[%s4278_s30 + $0xb4] sm:$0xf]  ;;  %v5482_v29 = vrot.slane %v2853_v5, 5 }
 0x217   : > { %2270 = vst.msk [vmem:[#allocation2 + $0x40] sm:$0xf] %vm2253_vm12, %v2190_v9  ;;  %3314 = vrot.lane.b32.xlu2 %v3251_v34, %s4197_s11  ;;  %v2859_v9 = vrot.slane %v2857_v20, 4  ;;  %v3885_v34 = vld [vmem:[%s4278_s30 + $0xbc] sm:$0x1]  ;;  %v2847_v39 = vshll.u32 %v3883_v26, 16 }
 0x218   : > { %v2863_v43 = vshll.u32 %v3885_v34, 16  ;;  %v2829_v16 = vshll.u32 %v3881_v7, 16 }
 0x219   : > { %v2206_v46 = vpop.permute.xlu2 %2205  ;;  %v2860_v42 = vor.u32 %v2859_v9, %v5482_v29  ;;  %v2849_v45 = vrot.slane %v2847_v39, 5  ;;  %v3882_v9 = vld [vmem:[%s4278_s30 + $0xb0] sm:$0x1] }
 0x21a   : > { %2278 = vst.msk [vmem:[#allocation2 + $0x60] sm:$0xf] %vm2253_vm12, %v2206_v46  ;;  %v3945_v46 = vrot.slane %v3907_v40, 9  ;;  %v2865_v52 = vrot.slane %v2863_v43, 5  ;;  %v2839_v40 = vshll.u32 %v3882_v9, 16 }
 0x21b   : > { %2971 = vrot.lane.b32.xlu1 %v2880_v38, %s4196_s10  ;;  %v2844_v38 = vshrl.u32 %v3883_v26, 16  ;;  %v2831_v26 = vrot.slane %v2829_v16, 5  ;;  %v3835_v9 = vld [vmem:[%s4278_s30 + $0xa0] sm:$0xf] }
 0x21c   : > { %2941 = vrot.lane.b32.xlu0 %v2698_v36, %s4196_s10  ;;  %v2674_v36 = vsel %vm4289_vm2, %v2669_v22, %v2673_v23  ;;  %v3178_v51 = vsel %vm4483_vm6, %v3945_v46, %v3177_v47  ;;  %v3858_v47 = vld [vmem:[%s4278_s30 + $0x50] sm:$0x1] }
 0x21d   : > { %v2198_v31 = vpop.permute.xlu1 %2197  ;;  %v2846_v44 = vrot.slane %v2844_v38, 4  ;;  %v2641_v38 = vshrl.u32 %v3857_v6, 16 }
 0x21e   : > { %2274 = vst.msk [vmem:[#allocation2 + $0x50] sm:$0xf] %vm2253_vm12, %v2198_v31  ;;  %v2196_v50 = vpop.permute.xlu0 %2195  ;;  %v3932_v31 = vld [vmem:[%s4278_s30 + $0xb8] sm:$0xf] }
 0x21f   : > { %2273 = vst.msk [vmem:[#allocation2 + $0x4c] sm:$0xf] %vm2253_vm12, %v2196_v50  ;;  %2939 = vrot.lane.b32.xlu2 %v2688_v54, %s4196_s10  ;;  %v2861_v50 = vrot.slane %v2860_v42, 4  ;;  %v3856_v54 = vld [vmem:[%s4278_s30 + $0x48] sm:$0xf]  ;;  %v3233_v56 = vrot.slane %v3932_v31, 5  ;;  %v2850_v57 = vor.u32 %v2849_v45, %v2846_v44 }
 0x220   : > { %v2631_v59 = vshll.u32 %v3856_v54, 16  ;;  %v2643_v43 = vrot.slane %v2641_v38, 4  ;;  %v2841_v45 = vrot.slane %v2839_v40, 5  ;;  %v3834_v38 = vld [vmem:[%s4278_s30 + $0x9c] sm:$0xf] }
 0x221   : > { %v2212_v3 = vpop.permute.xlu2 %2211  ;;  %v2866_v60 = vsel %vm4289_vm2, %v2861_v50, %v2865_v52  ;;  %v3235_v53 = vrot.slane %v3233_v56, 4  ;;  %v2851_v55 = vrot.slane %v2850_v57, 4  ;;  %v3234_v19 = vsel %vm4483_vm6, %v3953_v1, %v3233_v56  ;;  %v3905_v50 = vld [vmem:[%s4278_s30 + $0x4c] sm:$0xf]  ;;  %v3836_v52 = vld [vmem:[%s4278_s30 + $0xa8] sm:$0xf] }
 0x222   : > { %2281 = vst.msk [vmem:[#allocation2 + $0x6c] sm:$0xf] %vm2253_vm12, %v2212_v3  ;;  %v2633_v2 = vrot.slane %v2631_v59, 5  ;;  %v3928_v57 = vld [vmem:[%s4278_s30 + $0xa8] sm:$0xe]  ;;  %v3170_v58 = vrot.slane %v3905_v50, 5 }
 0x223   : > { %3278 = vrot.lane.b32.xlu1 %v3188_v37, %s4197_s11  ;;  %v3839_v37 = vld [vmem:[%s4278_s30 + $0xb8] sm:$0xf]  ;;  %v3237_v12 = vsel %vm4483_vm6, %v3235_v53, %v3236_v0  ;;  %v3952_v62 = vrot.slane %v3928_v57, 9  ;;  %v3903_v57 = vld [vmem:[%s4278_s30 + $0x44] sm:$0x1] }
 0x224   : > { %3276 = vrot.lane.b32.xlu0 %v3185_v33, %s4197_s11  ;;  %v2628_v33 = vshrl.u32 %v3856_v54, 16  ;;  %v3172_v1 = vrot.slane %v3170_v58, 4 }
 0x225   : > { %v2204_v4 = vpop.permute.xlu1 %2203 }
 0x226   : > { %2277 = vst.msk [vmem:[#allocation2 + $0x5c] sm:$0xf] %vm2253_vm12, %v2204_v4  ;;  %v2202_v11 = vpop.permute.xlu0 %2201  ;;  %v2630_v63 = vrot.slane %v2628_v33, 4  ;;  %v3906_v33 = vld [vmem:[%s4278_s30 + $0x50] sm:$0x1] }
 0x227   : > { %2276 = vst.msk [vmem:[#allocation2 + $0x58] sm:$0xf] %vm2253_vm12, %v2202_v11  ;;  %2973 = vrot.lane.b32.xlu2 %v2890_v13, %s4196_s10  ;;  %v3880_v11 = vld [vmem:[%s4278_s30 + $0xa8] sm:$0xf]  ;;  %v2856_v13 = vsel %vm4289_vm2, %v2851_v55, %v5482_v29 }
 0x228   : > { %v2820_v5 = vshrl.u32 %v3880_v11, 16  ;;  %v2823_v20 = vshll.u32 %v3880_v11, 16 }
 0x229   : > { %v2218_v24 = vpop.permute.xlu2 %2217 }
 0x22a   : > { %2284 = vst.msk [vmem:[#allocation2 + $0x78] sm:$0xf] %vm2253_vm12, %v2218_v24  ;;  %v2639_v24 = vrot.slane %v2637_v15, 5  ;;  %v2825_v34 = vrot.slane %v2823_v20, 5 }
 0x22b   : > { %2406 = vrot.lane.b32.xlu1 %v3838_v14, %s4195_s9  ;;  %v2634_v14 = vor.u32 %v2633_v2, %v2630_v63  ;;  %v3173_v63 = vrot.slane %v3906_v33, 5  ;;  %v3877_v2 = vld [vmem:[%s4278_s30 + $0x9c] sm:$0xf] }
 0x22c   : > { %3310 = vrot.lane.b32.xlu0 %v3244_v18, %s4197_s11  ;;  %v3909_v18 = vld [vmem:[%s4278_s30 + $0x5c] sm:$0x1]  ;;  %v2644_v54 = vor.u32 %v2643_v43, %v2639_v24  ;;  %v2799_v11 = vshll.u32 %v3877_v2, 16 }
 0x22d   : > { %v2210_v27 = vpop.permute.xlu1 %2209  ;;  %v3180_v22 = vrot.slane %v3909_v18, 5  ;;  %v2635_v23 = vrot.slane %v2634_v14, 4 }
 0x22e   : > { %2280 = vst.msk [vmem:[#allocation2 + $0x68] sm:$0xf] %vm2253_vm12, %v2210_v27  ;;  %v2208_v30 = vpop.permute.xlu0 %2207  ;;  %v2835_v27 = vrot.slane %v2833_v17, 4  ;;  %v2645_v59 = vrot.slane %v2644_v54, 4  ;;  %v2801_v18 = vrot.slane %v2799_v11, 5 }
 0x22f   : > { %2279 = vst.msk [vmem:[#allocation2 + $0x64] sm:$0xf] %vm2253_vm12, %v2208_v30  ;;  %3308 = vrot.lane.b32.xlu2 %v3241_v35, %s4197_s11  ;;  %v2822_v30 = vrot.slane %v2820_v5, 4  ;;  %v3181_v39 = vsel %vm4483_vm6, %v3179_v21, %v3180_v22  ;;  %v3853_v5 = vld [vmem:[%s4278_s30 + $0x3c] sm:$0xf] }
 0x230   : > { %v3878_v21 = vld [vmem:[%s4278_s30 + $0xa0] sm:$0xf] }
 0x231   : > { %v2357_v48 = vpop.permute.xlu2 %2356  ;;  %v2826_v42 = vor.u32 %v2825_v34, %v2822_v30  ;;  %v2805_v34 = vshll.u32 %v3878_v21, 16  ;;  %v2809_v50 = vshrl.u32 %v3878_v21, 16 }
 0x232   : > { %2452 = vst.msk [vmem:[#allocation2 + $0x4] sm:$0xf] %vm2450_vm13, %v2357_v48 }
 0x233   : > { %2937 = vrot.lane.b32.xlu1 %v2674_v36, %s4196_s10  ;;  %v2640_v36 = vsel %vm4289_vm2, %v2635_v23, %v2639_v24  ;;  %v2827_v48 = vrot.slane %v2826_v42, 4  ;;  %v2811_v33 = vrot.slane %v2809_v50, 4 }
 0x234   : > { %2935 = vrot.lane.b32.xlu0 %v2664_v28, %s4196_s10  ;;  %v2836_v28 = vor.u32 %v2835_v27, %v2831_v26 }
 0x235   : > { %v2216_v49 = vpop.permute.xlu1 %2215 }
 0x236   : > { %2283 = vst.msk [vmem:[#allocation2 + $0x74] sm:$0xf] %vm2253_vm12, %v2216_v49  ;;  %v2214_v32 = vpop.permute.xlu0 %2213  ;;  %v2837_v44 = vrot.slane %v2836_v28, 4 }
 0x237   : > { %2282 = vst.msk [vmem:[#allocation2 + $0x70] sm:$0xf] %vm2253_vm12, %v2214_v32  ;;  %2408 = vrot.lane.b32.xlu2 %v3839_v37, %s4195_s9  ;;  %v2647_v32 = vshll.u32 %v3858_v47, 16  ;;  %v2832_v37 = vsel %vm4289_vm2, %v2827_v48, %v2831_v26  ;;  %v3855_v26 = vld [vmem:[%s4278_s30 + $0x44] sm:$0x1] }
 0x238   : > { %v2842_v56 = vsel %vm4289_vm2, %v2837_v44, %v2841_v45  ;;  %v2807_v44 = vrot.slane %v2805_v34, 5  ;;  %v3902_v48 = vld [vmem:[%s4278_s30 + $0x40] sm:$0xf] }
 0x239   : > { %v2363_v3 = vpop.permute.xlu2 %2362 }
 0x23a   : > { %2455 = vst.msk [vmem:[#allocation2 + $0x10] sm:$0xf] %vm2450_vm13, %v2363_v3 }
 0x23b   : > { %3272 = vrot.lane.b32.xlu1 %v3178_v51, %s4197_s11  ;;  %v3929_v51 = vld [vmem:[%s4278_s30 + $0xac] sm:$0xf] }
 0x23c   : > { %2969 = vrot.lane.b32.xlu0 %v2866_v60, %s4196_s10  ;;  %v2649_v60 = vrot.slane %v2647_v32, 5  ;;  %v3226_v53 = vrot.slane %v3929_v51, 5  ;;  %v3901_v51 = vld [vmem:[%s4278_s30 + $0x3c] sm:$0xe] }
 0x23d   : > { %v2355_v4 = vpop.permute.xlu1 %2354 }
 0x23e   : > { %2451 = vst.msk [vmem:[#allocation2] sm:$0xf] %vm2450_vm13, %v2355_v4  ;;  %v2220_v8 = vpop.permute.xlu0 %2219  ;;  %v3854_v4 = vld [vmem:[%s4278_s30 + $0x40] sm:$0xf]  ;;  %v2650_v6 = vsel %vm4289_vm2, %v2645_v59, %v2649_v60  ;;  %v3227_v7 = vsel %vm4483_vm6, %v3952_v62, %v3226_v53  ;;  %v3228_v28 = vrot.slane %v3226_v53, 4  ;;  %v3166_v60 = vrot.slane %v3903_v57, 5 }
 0x23f   : > { %2285 = vst.msk [vmem:[#allocation2 + $0x7c] sm:$0xf] %vm2253_vm12, %v2220_v8  ;;  %2967 = vrot.lane.b32.xlu2 %v2856_v13, %s4196_s10  ;;  %v2796_v8 = vshrl.u32 %v3877_v2, 16  ;;  %v3174_v13 = vsel %vm4483_vm6, %v3172_v1, %v3173_v63  ;;  %v2613_v14 = vshll.u32 %v3854_v4, 16  ;;  %v2617_v15 = vshrl.u32 %v3854_v4, 16 }
 0x240   : > { %v3879_v53 = vld [vmem:[%s4278_s30 + $0xa4] sm:$0x1]  ;;  %v3851_v1 = vld [vmem:[%s4278_s30 + $0x34] sm:$0xf]  ;;  %v3926_v2 = vld [vmem:[%s4278_s30 + $0xa0] sm:$0xf] }
 0x241   : > { %v2369_v10 = vpop.permute.xlu2 %2368  ;;  %v2798_v17 = vrot.slane %v2796_v8, 4  ;;  %v5577_v22 = vrot.slane %v2613_v14, 5  ;;  %v2619_v23 = vrot.slane %v2617_v15, 4  ;;  %v2589_v11 = vshll.u32 %v3851_v1, 16 }
 0x242   : > { %2458 = vst.msk [vmem:[#allocation2 + $0x1c] sm:$0xf] %vm2450_vm13, %v2369_v10  ;;  %v2604_v10 = vshrl.u32 %v3853_v5, 16  ;;  %v3219_v14 = vrot.slane %v3926_v2, 5 }
 0x243   : > { %3306 = vrot.lane.b32.xlu1 %v3237_v12, %s4197_s11  ;;  %v3904_v12 = vld [vmem:[%s4278_s30 + $0x48] sm:$0xe]  ;;  %v2802_v30 = vor.u32 %v2801_v18, %v2798_v17  ;;  %v3927_v17 = vld [vmem:[%s4278_s30 + $0xa4] sm:$0x1] }
 0x244   : > { %3304 = vrot.lane.b32.xlu0 %v3234_v19, %s4197_s11  ;;  %v3944_v16 = vrot.slane %v3904_v12, 9  ;;  %v2593_v12 = vshrl.u32 %v3851_v1, 16 }
 0x245   : > { %v2361_v29 = vpop.permute.xlu1 %2360  ;;  %v2803_v43 = vrot.slane %v2802_v30, 4  ;;  %v3832_v30 = vld [vmem:[%s4278_s30 + $0x90] sm:$0xf] }
 0x246   : > { %2454 = vst.msk [vmem:[#allocation2 + $0xc] sm:$0xf] %vm2450_vm13, %v2361_v29  ;;  %v2359_v35 = vpop.permute.xlu0 %2358  ;;  %v3171_v27 = vsel %vm4483_vm6, %v3944_v16, %v3170_v58  ;;  %v2607_v29 = vshll.u32 %v3853_v5, 16  ;;  %v3852_v5 = vld [vmem:[%s4278_s30 + $0x38] sm:$0x1]  ;;  %v2595_v21 = vrot.slane %v2593_v12, 4 }
 0x247   : > { %2453 = vst.msk [vmem:[#allocation2 + $0x8] sm:$0xf] %vm2450_vm13, %v2359_v35  ;;  %3274 = vrot.lane.b32.xlu2 %v3181_v39, %s4197_s11  ;;  %v3930_v35 = vld [vmem:[%s4278_s30 + $0xb0] sm:$0x1]  ;;  %v2620_v39 = vor.u32 %v2619_v23, %v5577_v22  ;;  %v2808_v32 = vsel %vm4289_vm2, %v2803_v43, %v2807_v44  ;;  %v2599_v34 = vshll.u32 %v3852_v5, 16 }
 0x248   : > { %v3229_v40 = vrot.slane %v3930_v35, 5  ;;  %v2609_v42 = vrot.slane %v2607_v29, 5  ;;  %v3875_v29 = vld [vmem:[%s4278_s30 + $0x94] sm:$0xf] }
 0x249   : > { %v2375_v46 = vpop.permute.xlu2 %2374  ;;  %v2621_v47 = vrot.slane %v2620_v39, 4  ;;  %v2781_v39 = vshll.u32 %v3875_v29, 16 }
 0x24a   : > { %2461 = vst.msk [vmem:[#allocation2 + $0x28] sm:$0xf] %vm2450_vm13, %v2375_v46 }
 0x24b   : > { %2931 = vrot.lane.b32.xlu1 %v2640_v36, %s4196_s10  ;;  %v2623_v36 = vshll.u32 %v3855_v26, 16  ;;  %v3222_v26 = vrot.slane %v3927_v17, 5 }
 0x24c   : > { %2404 = vrot.lane.b32.xlu0 %v3837_v41, %s4195_s9  ;;  %v2606_v41 = vrot.slane %v2604_v10, 4 }
 0x24d   : > { %v2367_v31 = vpop.permute.xlu1 %2366 }
 0x24e   : > { %2457 = vst.msk [vmem:[#allocation2 + $0x18] sm:$0xf] %vm2450_vm13, %v2367_v31  ;;  %v2365_v49 = vpop.permute.xlu0 %2364  ;;  %v2625_v31 = vrot.slane %v2623_v36, 5  ;;  %v2610_v54 = vor.u32 %v2609_v42, %v2606_v41  ;;  %v2785_v36 = vshrl.u32 %v3875_v29, 16  ;;  %v3872_v29 = vld [vmem:[%s4278_s30 + $0x88] sm:$0xf] }
 0x24f   : > { %2456 = vst.msk [vmem:[#allocation2 + $0x14] sm:$0xf] %vm2450_vm13, %v2365_v49  ;;  %2402 = vrot.lane.b32.xlu2 %v3836_v52, %s4195_s9  ;;  %v3230_v52 = vsel %vm4483_vm6, %v3228_v28, %v3229_v40  ;;  %v3925_v28 = vld [vmem:[%s4278_s30 + $0x9c] sm:$0xe] }
 0x250   : > { %v2611_v58 = vrot.slane %v2610_v54, 4  ;;  %v3951_v42 = vrot.slane %v3925_v28, 9  ;;  %v2761_v28 = vshrl.u32 %v3872_v29, 16 }
 0x251   : > { %v2381_v0 = vpop.permute.xlu2 %2380 }
 0x252   : > { %2464 = vst.msk [vmem:[#allocation2 + $0x34] sm:$0xf] %vm2450_vm13, %v2381_v0  ;;  %v2616_v4 = vsel %vm4289_vm2, %v2611_v58, %v5577_v22  ;;  %v3220_v54 = vsel %vm4483_vm6, %v3951_v42, %v3219_v14  ;;  %v3898_v58 = vld [vmem:[%s4278_s30 + $0x30] sm:$0xe] }
 0x253   : > { %2965 = vrot.lane.b32.xlu1 %v2842_v56, %s4196_s10  ;;  %v3163_v56 = vrot.slane %v3902_v48, 5 }
 0x254   : > { %2963 = vrot.lane.b32.xlu0 %v2832_v37, %s4196_s10  ;;  %v2626_v37 = vsel %vm4289_vm2, %v2621_v47, %v2625_v31  ;;  %v3874_v31 = vld [vmem:[%s4278_s30 + $0x90] sm:$0xf] }
 0x255   : > { %v2373_v55 = vpop.permute.xlu1 %2372  ;;  %v3165_v59 = vrot.slane %v3163_v56, 4 }
 0x256   : > { %2460 = vst.msk [vmem:[#allocation2 + $0x24] sm:$0xf] %vm2450_vm13, %v2373_v55  ;;  %v2371_v3 = vpop.permute.xlu0 %2370  ;;  %v3943_v55 = vrot.slane %v3901_v51, 9 }
 0x257   : > { %2459 = vst.msk [vmem:[#allocation2 + $0x20] sm:$0xf] %vm2450_vm13, %v2371_v3  ;;  %2933 = vrot.lane.b32.xlu2 %v2650_v6, %s4196_s10  ;;  %v3850_v3 = vld [vmem:[%s4278_s30 + $0x30] sm:$0xf]  ;;  %v2812_v6 = vor.u32 %v2811_v33, %v2807_v44  ;;  %v3167_v8 = vsel %vm4483_vm6, %v3165_v59, %v3166_v60  ;;  %v2601_v44 = vrot.slane %v2599_v34, 5 }
 0x258   : > { %v2580_v15 = vshrl.u32 %v3850_v3, 16  ;;  %v2583_v16 = vshll.u32 %v3850_v3, 16  ;;  %v3899_v33 = vld [vmem:[%s4278_s30 + $0x34] sm:$0xf] }
 0x259   : > { %v2415_v19 = vpop.permute.xlu2 %2414  ;;  %v2813_v18 = vrot.slane %v2812_v6, 4  ;;  %v3847_v6 = vld [vmem:[%s4278_s30 + $0x24] sm:$0xf] }
 0x25a   : > { %2481 = vst.msk [vmem:[#allocation2 + $0x78] sm:$0xf] %vm2450_vm13, %v2415_v19  ;;  %v2585_v10 = vrot.slane %v2583_v16, 5  ;;  %v2559_v16 = vshll.u32 %v3847_v6, 16 }
 0x25b   : > { %3300 = vrot.lane.b32.xlu1 %v3227_v7, %s4197_s11  ;;  %v2815_v7 = vshll.u32 %v3879_v53, 16  ;;  %v3942_v53 = vrot.slane %v3898_v58, 9 }
 0x25c   : > { %3270 = vrot.lane.b32.xlu0 %v3174_v13, %s4197_s11  ;;  %v3164_v13 = vsel %vm4483_vm6, %v3943_v55, %v3163_v56  ;;  %v2775_v56 = vshll.u32 %v3874_v31, 16 }
 0x25d   : > { %v2379_v20 = vpop.permute.xlu1 %2378  ;;  %v2817_v19 = vrot.slane %v2815_v7, 5 }
 0x25e   : > { %2463 = vst.msk [vmem:[#allocation2 + $0x30] sm:$0xf] %vm2450_vm13, %v2379_v20  ;;  %v2377_v24 = vpop.permute.xlu0 %2376  ;;  %v2591_v20 = vrot.slane %v2589_v11, 5  ;;  %v3833_v11 = vld [vmem:[%s4278_s30 + $0x94] sm:$0xf] }
 0x25f   : > { %2462 = vst.msk [vmem:[#allocation2 + $0x2c] sm:$0xf] %vm2450_vm13, %v2377_v24  ;;  %3268 = vrot.lane.b32.xlu2 %v3171_v27, %s4197_s11  ;;  %v3221_v24 = vrot.slane %v3219_v14, 4  ;;  %v2582_v27 = vrot.slane %v2580_v15, 4  ;;  %v2818_v35 = vsel %vm4289_vm2, %v2813_v18, %v2817_v19  ;;  %v2556_v15 = vshrl.u32 %v3847_v6, 16 }
 0x260   : > { %v3924_v18 = vld [vmem:[%s4278_s30 + $0x98] sm:$0x1]  ;;  %v3922_v19 = vld [vmem:[%s4278_s30 + $0x90] sm:$0xe]  ;;  %v3896_v6 = vld [vmem:[%s4278_s30 + $0x28] sm:$0xf] }
 0x261   : > { %v2946_v45 = vpop.permute.xlu2 %2945  ;;  %v3223_v40 = vsel %vm4483_vm6, %v3221_v24, %v3222_v26  ;;  %v2586_v41 = vor.u32 %v2585_v10, %v2582_v27  ;;  %v2561_v24 = vrot.slane %v2559_v16, 5  ;;  %v3950_v10 = vrot.slane %v3922_v19, 9 }
 0x262   : > { %v3149_v16 = vrot.slane %v3896_v6, 5  ;;  %v3893_v6 = vld [vmem:[%s4278_s30 + $0x1c] sm:$0xf] }
 0x263   : > { %2400 = vrot.lane.b32.xlu1 %v3835_v9, %s4195_s9 }
 0x264   : > { %2398 = vrot.lane.b32.xlu0 %v3834_v38, %s4195_s9  ;;  %v2596_v38 = vor.u32 %v2595_v21, %v2591_v20  ;;  %v3215_v21 = vrot.slane %v3924_v18, 5 }
 0x265   : > { %v2385_v46 = vpop.permute.xlu1 %2384 }
 0x266   : > { %2466 = vst.msk [vmem:[#allocation2 + $0x3c] sm:$0xf] %vm2450_vm13, %v2385_v46  ;;  %v2383_v49 = vpop.permute.xlu0 %2382  ;;  %v2597_v43 = vrot.slane %v2596_v38, 4  ;;  %v2787_v46 = vrot.slane %v2785_v36, 4  ;;  %v2757_v36 = vshll.u32 %v3872_v29, 16 }
 0x267   : > { %2465 = vst.msk [vmem:[#allocation2 + $0x38] sm:$0xf] %vm2450_vm13, %v2383_v49  ;;  %3302 = vrot.lane.b32.xlu2 %v3230_v52, %s4197_s11  ;;  %v2587_v49 = vrot.slane %v2586_v41, 4  ;;  %v3876_v52 = vld [vmem:[%s4278_s30 + $0x98] sm:$0x1] }
 0x268   : > { %3027 = vst.msk [vmem:[#allocation2 + $0x3c] sm:$0xf] %vm3011_vm14, %v2946_v45  ;;  %v5639_v45 = vrot.slane %v2781_v39, 5  ;;  %v2791_v59 = vshll.u32 %v3876_v52, 16  ;;  %v3873_v52 = vld [vmem:[%s4278_s30 + $0x8c] sm:$0x1] }
 0x269   : > { %v3281_v62 = vpop.permute.xlu2 %3280  ;;  %v2592_v51 = vsel %vm4289_vm2, %v2587_v49, %v2591_v20  ;;  %v3845_v29 = vld [vmem:[%s4278_s30 + $0x1c] sm:$0xf] }
 0x26a   : > { %v2788_v57 = vor.u32 %v2787_v46, %v5639_v45  ;;  %v2793_v2 = vrot.slane %v2791_v59, 5  ;;  %v3831_v59 = vld [vmem:[%s4278_s30 + $0x88] sm:$0xf] }
 0x26b   : > { %2959 = vrot.lane.b32.xlu1 %v2808_v32, %s4196_s10  ;;  %v2772_v32 = vshrl.u32 %v3874_v31, 16  ;;  %v2759_v31 = vrot.slane %v2757_v36, 5  ;;  %v2541_v36 = vshll.u32 %v3845_v29, 16 }
 0x26c   : > { %2929 = vrot.lane.b32.xlu0 %v2626_v37, %s4196_s10  ;;  %v2602_v37 = vsel %vm4289_vm2, %v2597_v43, %v2601_v44  ;;  %v2789_v55 = vrot.slane %v2788_v57, 4 }
 0x26d   : > { %v2944_v0 = vpop.permute.xlu1 %2943  ;;  %v2774_v60 = vrot.slane %v2772_v32, 4 }
 0x26e   : > { %3026 = vst.msk [vmem:[#allocation2 + $0x38] sm:$0xf] %vm3011_vm14, %v2944_v0  ;;  %v2417_v63 = vpop.permute.xlu0 %2416  ;;  %v3156_v0 = vrot.slane %v3899_v33, 5  ;;  %v2794_v17 = vsel %vm4289_vm2, %v2789_v55, %v2793_v2  ;;  %v2767_v33 = vshll.u32 %v3873_v52, 16 }
 0x26f   : > { %2482 = vst.msk [vmem:[#allocation2 + $0x7c] sm:$0xf] %vm2450_vm13, %v2417_v63  ;;  %2927 = vrot.lane.b32.xlu2 %v2616_v4, %s4196_s10  ;;  %v3923_v4 = vld [vmem:[%s4278_s30 + $0x94] sm:$0xf] }
 0x270   : > { %3363 = vst.msk [vmem:[#allocation2 + $0x38] sm:$0xf] %vm3348_vm15, %v3281_v62  ;;  %v2777_v62 = vrot.slane %v2775_v56, 5  ;;  %v3212_v14 = vrot.slane %v3923_v4, 5  ;;  %v3158_v44 = vrot.slane %v3156_v0, 4 }
 0x271   : > { %v3315_v22 = vpop.permute.xlu2 %3314 }
 0x272   : > { %v2778_v12 = vor.u32 %v2777_v62, %v2774_v60  ;;  %v3214_v20 = vrot.slane %v3212_v14, 4  ;;  %v3213_v41 = vsel %vm4483_vm6, %v3950_v10, %v3212_v14  ;;  %v3919_v14 = vld [vmem:[%s4278_s30 + $0x84] sm:$0xe] }
 0x273   : > { %3266 = vrot.lane.b32.xlu1 %v3167_v8, %s4197_s11 }
 0x274   : > { %3264 = vrot.lane.b32.xlu0 %v3164_v13, %s4197_s11  ;;  %v3157_v13 = vsel %vm4483_vm6, %v3942_v53, %v3156_v0  ;;  %v2779_v5 = vrot.slane %v2778_v12, 4  ;;  %v3216_v38 = vsel %vm4483_vm6, %v3214_v20, %v3215_v21  ;;  %v2769_v0 = vrot.slane %v2767_v33, 5 }
 0x275   : > { %v2978_v23 = vpop.permute.xlu1 %2977 }
 0x276   : > { %3043 = vst.msk [vmem:[#allocation2 + $0x7c] sm:$0xf] %vm3011_vm14, %v2978_v23  ;;  %v2976_v9 = vpop.permute.xlu0 %2975  ;;  %v2558_v23 = vrot.slane %v2556_v15, 4  ;;  %v3920_v15 = vld [vmem:[%s4278_s30 + $0x88] sm:$0xf] }
 0x277   : > { %3042 = vst.msk [vmem:[#allocation2 + $0x78] sm:$0xf] %vm3011_vm14, %v2976_v9  ;;  %2961 = vrot.lane.b32.xlu2 %v2818_v35, %s4196_s10  ;;  %v2784_v35 = vsel %vm4289_vm2, %v2779_v5, %v5639_v45  ;;  %v3949_v5 = vrot.slane %v3919_v14, 9  ;;  %v3205_v20 = vrot.slane %v3920_v15, 5  ;;  %v3142_v14 = vrot.slane %v3893_v6, 5 }
 0x278   : > { %3380 = vst.msk [vmem:[#allocation2 + $0x7c] sm:$0xf] %vm3348_vm15, %v3315_v22  ;;  %v3848_v22 = vld [vmem:[%s4278_s30 + $0x28] sm:$0xf]  ;;  %v2562_v39 = vor.u32 %v2561_v24, %v2558_v23  ;;  %v3151_v23 = vrot.slane %v3149_v16, 4 }
 0x279   : > { %v2940_v47 = vpop.permute.xlu2 %2939  ;;  %v2565_v34 = vshll.u32 %v3848_v22, 16 }
 0x27a   : > { %3024 = vst.msk [vmem:[#allocation2 + $0x30] sm:$0xf] %vm3011_vm14, %v2940_v47  ;;  %v2563_v46 = vrot.slane %v2562_v39, 4 }
 0x27b   : > { %2394 = vrot.lane.b32.xlu1 %v3832_v30, %s4195_s9  ;;  %v3871_v30 = vld [vmem:[%s4278_s30 + $0x84] sm:$0xf]  ;;  %v2567_v47 = vrot.slane %v2565_v34, 5 }
 0x27c   : > { %3298 = vrot.lane.b32.xlu0 %v3223_v40, %s4197_s11  ;;  %v3900_v40 = vld [vmem:[%s4278_s30 + $0x38] sm:$0x1]  ;;  %v2748_v42 = vshrl.u32 %v3871_v30, 16  ;;  %v2751_v43 = vshll.u32 %v3871_v30, 16  ;;  %v3206_v30 = vsel %vm4483_vm6, %v3949_v5, %v3205_v20  ;;  %v3144_v5 = vrot.slane %v3142_v14, 4 }
 0x27d   : > { %v3313_v48 = vpop.permute.xlu1 %3312  ;;  %v3159_v45 = vrot.slane %v3900_v40, 5 }
 0x27e   : > { %3379 = vst.msk [vmem:[#allocation2 + $0x78] sm:$0xf] %vm3348_vm15, %v3313_v48  ;;  %v3283_v50 = vpop.permute.xlu0 %3282  ;;  %v2763_v48 = vrot.slane %v2761_v28, 4  ;;  %v2753_v32 = vrot.slane %v2751_v43, 5  ;;  %v2545_v28 = vshrl.u32 %v3845_v29, 16 }
 0x27f   : > { %3364 = vst.msk [vmem:[#allocation2 + $0x3c] sm:$0xf] %vm3348_vm15, %v3283_v50  ;;  %3296 = vrot.lane.b32.xlu2 %v3220_v54, %s4197_s11  ;;  %v2750_v54 = vrot.slane %v2748_v42, 4  ;;  %v3160_v57 = vsel %vm4483_vm6, %v3158_v44, %v3159_v45  ;;  %v3844_v45 = vld [vmem:[%s4278_s30 + $0x18] sm:$0xf] }
 0x280   : > { %v2764_v58 = vor.u32 %v2763_v48, %v2759_v31  ;;  %v2547_v48 = vrot.slane %v2545_v28, 4  ;;  %v2532_v52 = vshrl.u32 %v3844_v45, 16 }
 0x281   : > { %v2974_v1 = vpop.permute.xlu2 %2973  ;;  %v2754_v60 = vor.u32 %v2753_v32, %v2750_v54  ;;  %v2535_v54 = vshll.u32 %v3844_v45, 16  ;;  %v3829_v32 = vld [vmem:[%s4278_s30 + $0x7c] sm:$0xf] }
 0x282   : > { %v2765_v53 = vrot.slane %v2764_v58, 4  ;;  %v3828_v58 = vld [vmem:[%s4278_s30 + $0x78] sm:$0xf] }
 0x283   : > { %2925 = vrot.lane.b32.xlu1 %v2602_v37, %s4196_s10  ;;  %v2569_v37 = vshrl.u32 %v3848_v22, 16  ;;  %v2755_v2 = vrot.slane %v2754_v60, 4 }
 0x284   : > { %2923 = vrot.lane.b32.xlu0 %v2592_v51, %s4196_s10  ;;  %v2568_v51 = vsel %vm4289_vm2, %v2563_v46, %v2567_v47  ;;  %v2770_v12 = vsel %vm4289_vm2, %v2765_v53, %v2769_v0  ;;  %v2537_v53 = vrot.slane %v2535_v54, 5 }
 0x285   : > { %v2413_v63 = vpop.permute.xlu1 %2412  ;;  %v4040_v3 = vld [vmem:[#allocation2 + $0x78] sm:$0xff]  ;;  %v2571_v62 = vrot.slane %v2569_v37, 4 }
 0x286   : > { %2480 = vst.msk [vmem:[#allocation2 + $0x74] sm:$0xf] %vm2450_vm13, %v2413_v63  ;;  %v2411_v7 = vpop.permute.xlu0 %2410  ;;  %v4032_v8 = vld [vmem:[#allocation2 + $0x38] sm:$0xff]  ;;  %3529 = vmatpush.bf16.xpose.msra.mxu1 %v4040_v3 }
 0x287   : > { %2479 = vst.msk [vmem:[#allocation2 + $0x70] sm:$0xf] %vm2450_vm13, %v2411_v7  ;;  %3516 = vmatpush.bf16.xpose.msra.mxu0 %v4032_v8  ;;  %2396 = vrot.lane.b32.xlu2 %v3833_v11, %s4195_s9  ;;  %v3830_v7 = vld [vmem:[%s4278_s30 + $0x84] sm:$0xf]  ;;  %v2572_v8 = vor.u32 %v2571_v62, %v2567_v47  ;;  %v3846_v47 = vld [vmem:[%s4278_s30 + $0x20] sm:$0x1] }
 0x288   : > { %3041 = vst.msk [vmem:[#allocation2 + $0x74] sm:$0xf] %vm3011_vm14, %v2974_v1  ;;  %v3849_v1 = vld [vmem:[%s4278_s30 + $0x2c] sm:$0x1]  ;;  %v2534_v62 = vrot.slane %v2532_v52, 4 }
 0x289   : > { %v3309_v26 = vpop.permute.xlu2 %3308  ;;  %v2575_v11 = vshll.u32 %v3849_v1, 16  ;;  %v2573_v18 = vrot.slane %v2572_v8, 4 }
 0x28b   : > { %3260 = vrot.lane.b32.xlu1 %v3157_v13, %s4197_s11  ;;  %v2760_v13 = vsel %vm4289_vm2, %v2755_v2, %v2759_v31  ;;  %v2577_v19 = vrot.slane %v2575_v11, 5  ;;  %v5736_v31 = vrot.slane %v2541_v36, 5 }
 0x28c   : > { %2957 = vrot.lane.b32.xlu0 %v2794_v17, %s4196_s10  ;;  %v3897_v17 = vld [vmem:[%s4278_s30 + $0x2c] sm:$0x1] }
 0x28d   : > { %v2972_v27 = vpop.permute.xlu1 %2971  ;;  %v3152_v24 = vrot.slane %v3897_v17, 5  ;;  %v2548_v33 = vor.u32 %v2547_v48, %v5736_v31  ;;  %v3892_v17 = vld [vmem:[%s4278_s30 + $0x18] sm:$0xe] }
 0x28e   : > { %3040 = vst.msk [vmem:[#allocation2 + $0x70] sm:$0xf] %vm3011_vm14, %v2972_v27  ;;  %v2942_v9 = vpop.permute.xlu0 %2941 }
 0x28f   : > { %3025 = vst.msk [vmem:[#allocation2 + $0x34] sm:$0xf] %vm3011_vm14, %v2942_v9  ;;  %2955 = vrot.lane.b32.xlu2 %v2784_v35, %s4196_s10  ;;  %v2578_v9 = vsel %vm4289_vm2, %v2573_v18, %v2577_v19  ;;  %v3153_v39 = vsel %vm4483_vm6, %v3151_v23, %v3152_v24  ;;  %v3940_v24 = vrot.slane %v3892_v17, 9 }
 0x290   : > { %3377 = vst.msk [vmem:[#allocation2 + $0x70] sm:$0xf] %vm3348_vm15, %v3309_v26  ;;  %v3868_v26 = vld [vmem:[%s4278_s30 + $0x78] sm:$0xf] }
 0x291   : > { %v2409_v49 = vpop.permute.xlu2 %2408  ;;  %v2724_v34 = vshrl.u32 %v3868_v26, 16  ;;  %v2727_v35 = vshll.u32 %v3868_v26, 16 }
 0x292   : > { %2478 = vst.msk [vmem:[#allocation2 + $0x6c] sm:$0xf] %vm2450_vm13, %v2409_v49 }
 0x293   : > { %3294 = vrot.lane.b32.xlu1 %v3216_v38, %s4197_s11  ;;  %v3895_v38 = vld [vmem:[%s4278_s30 + $0x24] sm:$0xe]  ;;  %v2726_v42 = vrot.slane %v2724_v34, 4  ;;  %v2729_v43 = vrot.slane %v2727_v35, 5  ;;  %v3143_v35 = vsel %vm4483_vm6, %v3940_v24, %v3142_v14 }
 0x294   : > { %3292 = vrot.lane.b32.xlu0 %v3213_v41, %s4197_s11  ;;  %v3941_v40 = vrot.slane %v3895_v38, 9  ;;  %v3869_v41 = vld [vmem:[%s4278_s30 + $0x7c] sm:$0xf] }
 0x295   : > { %v3279_v50 = vpop.permute.xlu1 %3278  ;;  %v2733_v37 = vshll.u32 %v3869_v41, 16  ;;  %v2737_v8 = vshrl.u32 %v3869_v41, 16 }
 0x296   : > { %3362 = vst.msk [vmem:[#allocation2 + $0x34] sm:$0xf] %vm3348_vm15, %v3279_v50  ;;  %v3277_v56 = vpop.permute.xlu0 %3276  ;;  %v3150_v50 = vsel %vm4483_vm6, %v3941_v40, %v3149_v16  ;;  %v3894_v16 = vld [vmem:[%s4278_s30 + $0x20] sm:$0x1] }
 0x297   : > { %3361 = vst.msk [vmem:[#allocation2 + $0x30] sm:$0xf] %vm3348_vm15, %v3277_v56  ;;  %3262 = vrot.lane.b32.xlu2 %v3160_v57, %s4197_s11  ;;  %v2730_v56 = vor.u32 %v2729_v43, %v2726_v42  ;;  %v2551_v57 = vshll.u32 %v3846_v47, 16  ;;  %v2739_v19 = vrot.slane %v2737_v8, 4 }
 0x299   : > { %v2968_v55 = vpop.permute.xlu2 %2967  ;;  %v2731_v0 = vrot.slane %v2730_v56, 4  ;;  %v2553_v1 = vrot.slane %v2551_v57, 5 }
 0x29b   : > { %2919 = vrot.lane.b32.xlu1 %v2568_v51, %s4196_s10  ;;  %v3921_v51 = vld [vmem:[%s4278_s30 + $0x8c] sm:$0x1] }
 0x29c   : > { %2392 = vrot.lane.b32.xlu0 %v3831_v59, %s4195_s9  ;;  %v3207_v59 = vrot.slane %v3205_v20, 4  ;;  %v3208_v60 = vrot.slane %v3921_v51, 5  ;;  %v3145_v20 = vrot.slane %v3894_v16, 5 }
 0x29d   : > { %v2407_v63 = vpop.permute.xlu1 %2406 }
 0x29e   : > { %2477 = vst.msk [vmem:[#allocation2 + $0x68] sm:$0xf] %vm2450_vm13, %v2407_v63  ;;  %v3311_v3 = vpop.permute.xlu0 %3310  ;;  %v4031_v4 = vld [vmem:[#allocation2 + $0x30] sm:$0xff]  ;;  %v3209_v11 = vsel %vm4483_vm6, %v3207_v59, %v3208_v60  ;;  %v3146_v34 = vsel %vm4483_vm6, %v3144_v5, %v3145_v20 }
 0x29f   : > { %3378 = vst.msk [vmem:[#allocation2 + $0x74] sm:$0xf] %vm3348_vm15, %v3311_v3  ;;  %3517 = vmatpush.bf16.xpose.msra.mxu0 %v4031_v4  ;;  %2390 = vrot.lane.b32.xlu2 %v3830_v7, %s4195_s9  ;;  %v2549_v3 = vrot.slane %v2548_v33, 4 }
 0x2a0   : > { %3038 = vst.msk [vmem:[#allocation2 + $0x68] sm:$0xf] %vm3011_vm14, %v2968_v55  ;;  %v2735_v55 = vrot.slane %v2733_v37, 5 }
 0x2a1   : > { %v3275_v21 = vpop.permute.xlu2 %3274  ;;  %v2554_v15 = vsel %vm4289_vm2, %v2549_v3, %v2553_v1 }
 0x2a3   : > { %2953 = vrot.lane.b32.xlu1 %v2770_v12, %s4196_s10  ;;  %v2538_v12 = vor.u32 %v2537_v53, %v2534_v62 }
 0x2a4   : > { %2951 = vrot.lane.b32.xlu0 %v2760_v13, %s4196_s10  ;;  %v2736_v13 = vsel %vm4289_vm2, %v2731_v0, %v2735_v55 }
 0x2a5   : > { %v2938_v22 = vpop.permute.xlu1 %2937  ;;  %v2539_v18 = vrot.slane %v2538_v12, 4 }
 0x2a6   : > { %3023 = vst.msk [vmem:[#allocation2 + $0x2c] sm:$0xf] %vm3011_vm14, %v2938_v22  ;;  %v2936_v27 = vpop.permute.xlu0 %2935  ;;  %v4039_v10 = vld [vmem:[#allocation2 + $0x70] sm:$0xff]  ;;  %v3870_v22 = vld [vmem:[%s4278_s30 + $0x80] sm:$0x1] }
 0x2a7   : > { %3022 = vst.msk [vmem:[#allocation2 + $0x28] sm:$0xf] %vm3011_vm14, %v2936_v27  ;;  %3530 = vmatpush.bf16.xpose.msra.mxu1 %v4039_v10  ;;  %2921 = vrot.lane.b32.xlu2 %v2578_v9, %s4196_s10  ;;  %v3917_v10 = vld [vmem:[%s4278_s30 + $0x7c] sm:$0xf]  ;;  %v2544_v29 = vsel %vm4289_vm2, %v2539_v18, %v5736_v31  ;;  %v2740_v9 = vor.u32 %v2739_v19, %v2735_v55 }
 0x2a8   : > { %3360 = vst.msk [vmem:[#allocation2 + $0x2c] sm:$0xf] %vm3348_vm15, %v3275_v21  ;;  %v3198_v38 = vrot.slane %v3917_v10, 5 }
 0x2a9   : > { %v2403_v44 = vpop.permute.xlu2 %2402  ;;  %v2741_v36 = vrot.slane %v2740_v9, 4 }
 0x2aa   : > { %2475 = vst.msk [vmem:[#allocation2 + $0x60] sm:$0xf] %vm2450_vm13, %v2403_v44  ;;  %v3200_v42 = vrot.slane %v3198_v38, 4 }
 0x2ab   : > { %3288 = vrot.lane.b32.xlu1 %v3206_v30, %s4197_s11  ;;  %v2743_v30 = vshll.u32 %v3870_v22, 16 }
 0x2ac   : > { %3258 = vrot.lane.b32.xlu0 %v3153_v39, %s4197_s11  ;;  %v3918_v39 = vld [vmem:[%s4278_s30 + $0x80] sm:$0x1] }
 0x2ad   : > { %v3273_v46 = vpop.permute.xlu1 %3272  ;;  %v2745_v28 = vrot.slane %v2743_v30, 5  ;;  %v3201_v43 = vrot.slane %v3918_v39, 5  ;;  %v3414_v30 = vld [vmem:[%s5881_s2] sm:$0xff] }
 0x2ae   : > { %3359 = vst.msk [vmem:[#allocation2 + $0x28] sm:$0xf] %vm3348_vm15, %v3273_v46  ;;  %v2970_v49 = vpop.permute.xlu0 %2969  ;;  %v3916_v46 = vld [vmem:[%s4278_s30 + $0x78] sm:$0xe] }
 0x2af   : > { %3039 = vst.msk [vmem:[#allocation2 + $0x6c] sm:$0xf] %vm3011_vm14, %v2970_v49  ;;  %3256 = vrot.lane.b32.xlu2 %v3150_v50, %s4197_s11  ;;  %v2746_v45 = vsel %vm4289_vm2, %v2741_v36, %v2745_v28  ;;  %v3202_v47 = vsel %vm4483_vm6, %v3200_v42, %v3201_v43  ;;  %v3948_v31 = vrot.slane %v3916_v46, 9  ;;  %v3381_v36 = vld [vmem:[%s5880_s1] sm:$0xf] }
 0x2b1   : > { %v2934_v63 = vpop.permute.xlu2 %2933  ;;  %v3199_v25 = vsel %vm4483_vm6, %v3948_v31, %v3198_v38 }
 0x2b2   : > { %3021 = vst.msk [vmem:[#allocation2 + $0x24] sm:$0xf] %vm3011_vm14, %v2934_v63 }
 0x2b3   : > { %2388 = vrot.lane.b32.xlu1 %v3829_v32, %s4195_s9 }
 0x2b4   : > { %2386 = vrot.lane.b32.xlu0 %v3828_v58, %s4195_s9  ;;  %s4123_s9 = sshra.s32 %s3565_s7, 4  ;;  %s4124_s9 = int_to_ptr.hbm [resolvable:$true] %s4123_s9 }
 0x2b5   : > { %v3307_v2 = vpop.permute.xlu1 %3306  ;;  %v4030_v4 = vld [vmem:[#allocation2 + $0x28] sm:$0xff]  ;;  %s4125_s15 = scalar_lea.hbm %s4124_s9, 16  ;;  %p4130_p1 = scmp.lt.s32.totalorder %s4124_s9, %s5882_s3 }
 0x2b6   : > { %3376 = vst.msk [vmem:[#allocation2 + $0x6c] sm:$0xf] %vm3348_vm15, %v3307_v2  ;;  %v3305_v7 = vpop.permute.xlu0 %3304  ;;  %3518 = vmatpush.bf16.xpose.msra.mxu0 %v4030_v4  ;;  %p4126_p12 = scmp.ne.s32.totalorder %s4124_s9, %s4125_s15  ;;  %p4131_p2 = scmp.lt.s32.totalorder %s4129_s18, %s4125_s15 }
 0x2b7   : > { %3375 = vst.msk [vmem:[#allocation2 + $0x68] sm:$0xf] %vm3348_vm15, %v3305_v7  ;;  %3290 = vrot.lane.b32.xlu2 %v3209_v11, %s4197_s11 }
 0x2b8   : > { %p4127_p13 = pnand %p4126_p12, %p4258_p4  ;;  %p4132_p3 = por %p4131_p2, %p4130_p1 }
 0x2b9   : > { %v3269_v21 = vpop.permute.xlu2 %3268 }
 0x2ba   : > { %p4128_p0 = pneg %p4127_p13 }
 0x2bb   : > { %2947 = vrot.lane.b32.xlu1 %v2736_v13, %s4196_s10 }
 0x2bc   : > { %2917 = vrot.lane.b32.xlu0 %v2554_v15, %s4196_s10  ;;  %p4133_p5 = pnand %p4132_p3, %p4128_p0 }
 0x2bd   : > { %v2932_v23 = vpop.permute.xlu1 %2931 }
 0x2be   : > { %3020 = vst.msk [vmem:[#allocation2 + $0x20] sm:$0xf] %vm3011_vm14, %v2932_v23  ;;  %v2405_v26 = vpop.permute.xlu0 %2404  ;;  %v4038_v27 = vld [vmem:[#allocation2 + $0x68] sm:$0xff] }
 0x2bf   : > { %2476 = vst.msk [vmem:[#allocation2 + $0x64] sm:$0xf] %vm2450_vm13, %v2405_v26  ;;  %3531 = vmatpush.bf16.xpose.msra.mxu1 %v4038_v27  ;;  %2915 = vrot.lane.b32.xlu2 %v2544_v29, %s4196_s10 }
 0x2c0   : > { %3357 = vst.msk [vmem:[#allocation2 + $0x20] sm:$0xf] %vm3348_vm15, %v3269_v21 }
 0x2c1   : > { %v3303_v40 = vpop.permute.xlu2 %3302 }
 0x2c3   : > { %3254 = vrot.lane.b32.xlu1 %v3146_v34, %s4197_s11 }
 0x2c4   : > { %3252 = vrot.lane.b32.xlu0 %v3143_v35, %s4197_s11 }
 0x2c5   : > { %v2966_v41 = vpop.permute.xlu1 %2965 }
 0x2c6   : > { %3037 = vst.msk [vmem:[#allocation2 + $0x64] sm:$0xf] %vm3011_vm14, %v2966_v41  ;;  %v2964_v44 = vpop.permute.xlu0 %2963 }
 0x2c7   : > { %3036 = vst.msk [vmem:[#allocation2 + $0x60] sm:$0xf] %vm3011_vm14, %v2964_v44  ;;  %2949 = vrot.lane.b32.xlu2 %v2746_v45, %s4196_s10 }
 0x2c8   : > { %3374 = vst.msk [vmem:[#allocation2 + $0x64] sm:$0xf] %vm3348_vm15, %v3303_v40 }
 0x2c9   : > { %v2928_v48 = vpop.permute.xlu2 %2927 }
 0x2ca   : > { %3018 = vst.msk [vmem:[#allocation2 + $0x18] sm:$0xf] %vm3011_vm14, %v2928_v48 }
 0x2cb   : > { %3417 = vperm.xlu1 %4107, %v3414_v30  }
 0x2cc   : > { %3286 = vrot.lane.b32.xlu0 %v3202_v47, %s4197_s11 }
 0x2cd   : > { %v3301_v49 = vpop.permute.xlu1 %3300 }
 0x2ce   : > { %3373 = vst.msk [vmem:[#allocation2 + $0x60] sm:$0xf] %vm3348_vm15, %v3301_v49  ;;  %v3271_v50 = vpop.permute.xlu0 %3270 }
 0x2cf   : > { %3358 = vst.msk [vmem:[#allocation2 + $0x24] sm:$0xf] %vm3348_vm15, %v3271_v50  ;;  %3284 = vrot.lane.b32.xlu2 %v3199_v25, %s4197_s11 }
 0x2d1   : > { %v2962_v52 = vpop.permute.xlu2 %2961 }
 0x2d5   : > { %v2401_v54 = vpop.permute.xlu1 %2400  ;;  %v4037_v32 = vld [vmem:[#allocation2 + $0x60] sm:$0xff] }
 0x2d6   : > { %2474 = vst.msk [vmem:[#allocation2 + $0x5c] sm:$0xf] %vm2450_vm13, %v2401_v54  ;;  %v2399_v56 = vpop.permute.xlu0 %2398  ;;  %v4029_v37 = vld [vmem:[#allocation2 + $0x20] sm:$0xff]  ;;  %3532 = vmatpush.bf16.xpose.msra.mxu1 %v4037_v32 }
 0x2d7   : > { %2473 = vst.msk [vmem:[#allocation2 + $0x58] sm:$0xf] %vm2450_vm13, %v2399_v56  ;;  %3519 = vmatpush.bf16.xpose.msra.mxu0 %v4029_v37 }
 0x2d8   : > { %3035 = vst.msk [vmem:[#allocation2 + $0x5c] sm:$0xf] %vm3011_vm14, %v2962_v52 }
 0x2d9   : > { %v3297_v57 = vpop.permute.xlu2 %3296 }
 0x2dd   : > { %v2960_v51 = vpop.permute.xlu1 %2959 }
 0x2de   : > { %3034 = vst.msk [vmem:[#allocation2 + $0x58] sm:$0xf] %vm3011_vm14, %v2960_v51  ;;  %v2930_v61 = vpop.permute.xlu0 %2929 }
 0x2df   : > { %3019 = vst.msk [vmem:[#allocation2 + $0x1c] sm:$0xf] %vm3011_vm14, %v2930_v61 }
 0x2e0   : > { %3371 = vst.msk [vmem:[#allocation2 + $0x58] sm:$0xf] %vm3348_vm15, %v3297_v57 }
 0x2e1   : > { %v2397_v58 = vpop.permute.xlu2 %2396 }
 0x2e2   : > { %2472 = vst.msk [vmem:[#allocation2 + $0x54] sm:$0xf] %vm2450_vm13, %v2397_v58 }
 0x2e5   : > { %v3267_v33 = vpop.permute.xlu1 %3266 }
 0x2e6   : > { %3356 = vst.msk [vmem:[#allocation2 + $0x1c] sm:$0xf] %vm3348_vm15, %v3267_v33  ;;  %v3265_v59 = vpop.permute.xlu0 %3264 }
 0x2e7   : > { %3355 = vst.msk [vmem:[#allocation2 + $0x18] sm:$0xf] %vm3348_vm15, %v3265_v59 }
 0x2e9   : > { %v2956_v60 = vpop.permute.xlu2 %2955 }
 0x2ed   : > { %v2395_v62 = vpop.permute.xlu1 %2394 }
 0x2ee   : > { %2471 = vst.msk [vmem:[#allocation2 + $0x50] sm:$0xf] %vm2450_vm13, %v2395_v62  ;;  %v3299_v53 = vpop.permute.xlu0 %3298  ;;  %v4028_v0 = vld [vmem:[#allocation2 + $0x18] sm:$0xff] }
 0x2ef   : > { %3372 = vst.msk [vmem:[#allocation2 + $0x5c] sm:$0xf] %vm3348_vm15, %v3299_v53  ;;  %3520 = vmatpush.bf16.xpose.msra.mxu0 %v4028_v0 }
 0x2f0   : > { %3032 = vst.msk [vmem:[#allocation2 + $0x50] sm:$0xf] %vm3011_vm14, %v2956_v60 }
 0x2f1   : > { %v3263_v55 = vpop.permute.xlu2 %3262 }
 0x2f5   : > { %v2926_v1 = vpop.permute.xlu1 %2925 }
 0x2f6   : > { %3017 = vst.msk [vmem:[#allocation2 + $0x14] sm:$0xf] %vm3011_vm14, %v2926_v1  ;;  %v2924_v63 = vpop.permute.xlu0 %2923  ;;  %v4036_v2 = vld [vmem:[#allocation2 + $0x58] sm:$0xff] }
 0x2f7   : > { %3016 = vst.msk [vmem:[#allocation2 + $0x10] sm:$0xf] %vm3011_vm14, %v2924_v63  ;;  %3533 = vmatpush.bf16.xpose.msra.mxu1 %v4036_v2 }
 0x2f8   : > { %3354 = vst.msk [vmem:[#allocation2 + $0x14] sm:$0xf] %vm3348_vm15, %v3263_v55 }
 0x2f9   : > { %v2391_v3 = vpop.permute.xlu2 %2390 }
 0x2fa   : > { %2469 = vst.msk [vmem:[#allocation2 + $0x48] sm:$0xf] %vm2450_vm13, %v2391_v3 }
 0x2fd   : > { %v3261_v4 = vpop.permute.xlu1 %3260 }
 0x2fe   : > { %3353 = vst.msk [vmem:[#allocation2 + $0x10] sm:$0xf] %vm3348_vm15, %v3261_v4  ;;  %v2958_v6 = vpop.permute.xlu0 %2957 }
 0x2ff   : > { %3033 = vst.msk [vmem:[#allocation2 + $0x54] sm:$0xf] %vm3011_vm14, %v2958_v6 }
 0x301   : > { %v2922_v7 = vpop.permute.xlu2 %2921 }
 0x302   : > { %3015 = vst.msk [vmem:[#allocation2 + $0xc] sm:$0xf] %vm3011_vm14, %v2922_v7 }
 0x305   : > { %v3295_v8 = vpop.permute.xlu1 %3294  ;;  %v4027_v11 = vld [vmem:[#allocation2 + $0x10] sm:$0xff] }
 0x306   : > { %3370 = vst.msk [vmem:[#allocation2 + $0x54] sm:$0xf] %vm3348_vm15, %v3295_v8  ;;  %v3293_v12 = vpop.permute.xlu0 %3292  ;;  %3521 = vmatpush.bf16.xpose.msra.mxu0 %v4027_v11 }
 0x307   : > { %3369 = vst.msk [vmem:[#allocation2 + $0x50] sm:$0xf] %vm3348_vm15, %v3293_v12 }
 0x309   : > { %v3257_v13 = vpop.permute.xlu2 %3256 }
 0x30d   : > { %v2920_v14 = vpop.permute.xlu1 %2919 }
 0x30e   : > { %3014 = vst.msk [vmem:[#allocation2 + $0x8] sm:$0xf] %vm3011_vm14, %v2920_v14  ;;  %v2393_v15 = vpop.permute.xlu0 %2392  ;;  %v4035_v16 = vld [vmem:[#allocation2 + $0x50] sm:$0xff] }
 0x30f   : > { %2470 = vst.msk [vmem:[#allocation2 + $0x4c] sm:$0xf] %vm2450_vm13, %v2393_v15  ;;  %3534 = vmatpush.bf16.xpose.msra.mxu1 %v4035_v16 }
 0x310   : > { %3351 = vst.msk [vmem:[#allocation2 + $0x8] sm:$0xf] %vm3348_vm15, %v3257_v13 }
 0x311   : > { %v3291_v17 = vpop.permute.xlu2 %3290 }
 0x315   : > { %v2954_v18 = vpop.permute.xlu1 %2953 }
 0x316   : > { %3031 = vst.msk [vmem:[#allocation2 + $0x4c] sm:$0xf] %vm3011_vm14, %v2954_v18  ;;  %v2952_v19 = vpop.permute.xlu0 %2951 }
 0x317   : > { %3030 = vst.msk [vmem:[#allocation2 + $0x48] sm:$0xf] %vm3011_vm14, %v2952_v19 }
 0x318   : > { %3368 = vst.msk [vmem:[#allocation2 + $0x4c] sm:$0xf] %vm3348_vm15, %v3291_v17 }
 0x319   : > { %v2916_v5 = vpop.permute.xlu2 %2915 }
 0x31a   : > { %3012 = vst.msk [vmem:[#allocation2] sm:$0xf] %vm3011_vm14, %v2916_v5 }
 0x31d   : > { %v3289_v20 = vpop.permute.xlu1 %3288 }
 0x31e   : > { %3367 = vst.msk [vmem:[#allocation2 + $0x48] sm:$0xf] %vm3348_vm15, %v3289_v20  ;;  %v3259_v21 = vpop.permute.xlu0 %3258 }
 0x31f   : > { %3352 = vst.msk [vmem:[#allocation2 + $0xc] sm:$0xf] %vm3348_vm15, %v3259_v21 }
 0x321   : > { %v2950_v22 = vpop.permute.xlu2 %2949 }
 0x325   : > { %v2389_v23 = vpop.permute.xlu1 %2388  ;;  %v4034_v24 = vld [vmem:[#allocation2 + $0x48] sm:$0xff] }
 0x326   : > { %2468 = vst.msk [vmem:[#allocation2 + $0x44] sm:$0xf] %vm2450_vm13, %v2389_v23  ;;  %v2387_v26 = vpop.permute.xlu0 %2386  ;;  %v4026_v27 = vld [vmem:[#allocation2 + $0x8] sm:$0xff]  ;;  %3535 = vmatpush.bf16.xpose.msra.mxu1 %v4034_v24 }
 0x327   : > { %2467 = vst.msk [vmem:[#allocation2 + $0x40] sm:$0xf] %vm2450_vm13, %v2387_v26  ;;  %3522 = vmatpush.bf16.xpose.msra.mxu0 %v4026_v27 }
 0x328   : > { %3029 = vst.msk [vmem:[#allocation2 + $0x44] sm:$0xf] %vm3011_vm14, %v2950_v22 }
 0x329   : > { %v3285_v29 = vpop.permute.xlu2 %3284 }
 0x32d   : > { %v2948_v10 = vpop.permute.xlu1 %2947 }
 0x32e   : > { %3028 = vst.msk [vmem:[#allocation2 + $0x40] sm:$0xf] %vm3011_vm14, %v2948_v10  ;;  %v2918_v9 = vpop.permute.xlu0 %2917 }
 0x32f   : > { %3013 = vst.msk [vmem:[#allocation2 + $0x4] sm:$0xf] %vm3011_vm14, %v2918_v9 }
 0x330   : > { %3365 = vst.msk [vmem:[#allocation2 + $0x40] sm:$0xf] %vm3348_vm15, %v3285_v29 }
 0x335   : > { %v3255_v34 = vpop.permute.xlu1 %3254 }
 0x336   : > { %3350 = vst.msk [vmem:[#allocation2 + $0x4] sm:$0xf] %vm3348_vm15, %v3255_v34  ;;  %v3253_v35 = vpop.permute.xlu0 %3252 }
 0x337   : > { %3349 = vst.msk [vmem:[#allocation2] sm:$0xf] %vm3348_vm15, %v3253_v35 }
 0x33d   : > { %v3418_v40 = vpop.permute.xlu1 %3417 }
 0x33e   : > { %v3287_v38 = vpop.permute.xlu0 %3286  ;;  %v4025_v39 = vld [vmem:[#allocation2] sm:$0xff] }
 0x33f   : > { %3366 = vst.msk [vmem:[#allocation2 + $0x44] sm:$0xf] %vm3348_vm15, %v3287_v38  ;;  %3523 = vmatpush.bf16.xpose.msra.mxu0 %v4025_v39 }
 0x346   : > { %v4033_v28 = vld [vmem:[#allocation2 + $0x40] sm:$0xff]  ;;  %3524 = vmatmul.bf16.vlgmr.msra.gmra.mxu0 %v3381_v36 }
 0x347   : > { %3536 = vmatpush.bf16.xpose.msra.mxu1 %v4033_v28 }
 0x34e   : > { %3537 = vmatmul.bf16.vlgmr.msra.gmra.mxu1 %v3381_v36 }
 0x3c3   : > { %v3525_v41 = vpop.f32.mrf.mxu0 }
 0x3c4   : > { %v3526_v42 = vadd.f32 %v3525_v41, %v3418_v40 }
 0x3c6   : > { %v3542_v43 = vmax.f32 %v3526_v42, 0.0 }
 0x3c8   : > { %3544 = vst [vmem:[%s177_s29] sm:$0xff] %v3542_v43 }
 0x3cb   : > { %v3527_v44 = vpop.f32.mrf.mxu0  ;;  %v3538_v45 = vpop.f32.mrf.mxu1 }
 0x3cc   : > { %v3539_v46 = vadd.f32 %v3538_v45, %v3418_v40 }
 0x3ce   : > { %v3543_v47 = vmax.f32 %v3539_v46, 0.0 }
 0x3d0   : > { %3545 = vst [vmem:[%s177_s29 + $0x8] sm:$0xff] %v3543_v47 }
 0x3d1   : > { %4136 = shalt.err (!%p4133_p5)
}
 0x3d2   : > { %4043 = dma.vmem_to_hbm [thread:$0]  (%p4258_p4), %s3563_s6, 256, %s3565_s7, %s3547_s8  }
 0x3d3   : > { %v3540_v31 = vpop.f32.mrf.mxu1 }
 0x3d4 PF: > { %p4049_p6 = scmp.ge.s32.totalorder %s4187_s17, 2  ;;  %s3576_s23 = sand.u32 1, %s4167_s12  }
 0x3d5   : > { %s3577_s26 = scalar_lea.sflag [#allocation4], %s3576_s23 }
 0x3d6   : > { %p4046_p7 = pnand %p4049_p6, %p4265_p8 }
 0x3d8   : > { %p4047_p9 = pneg %p4046_p7 }
 0x3da   : > { %4162 = dma.done.wait (%p4047_p9), %s3577_s26, 256  }
 0x3db   : > { %4164 = vsyncadd (%p4047_p9), %s3577_s26, 4294967040  ;;  %s16_s17 = sadd.s32 1, %s4187_s17   ;;  %s5889_s12 = smov %s4171_s13 }
 0x3dc   : > { %p13_p10 = scmp.ge.s32.totalorder %s16_s17, 4   ;;  %s5890_s13 = smov %s4175_s14 }
 0x3dd   : > { %s5891_s14 = smov %s4271_s25  ;;  %s5892_s15 = smov %s4183_s16 }
 0x3de   : > { %s5893_s16 = smov %s5895_s20  ;;  %15 = sbr.rel (!%p13_p10) target bundleno = 4 (0x4), region = 70 }
 0x3e3   :  { %3583 = vsyncpa [#allocation4], 1 }
 0x3e4   :  { %3585 = vsyncpa [#allocation4 + $0x1], 1 }

</bundles_post_ra>
